<compile_context>
chip_gen: v7x
topology: tpu7x:2x2x1
jax: 0.10.0
libtpu: 0.0.40
codegen_flags: <defaults>
</compile_context>

<pallas_src>
import jax
import jax.numpy as jnp
from jax.experimental import pallas as pl
from jax.experimental.pallas import tpu as pltpu

LANE = 128
FC_VMEM_LIMIT = 40 * 1024 * 1024   # safe on v5e/v6e (128 MiB) and v7x (64 MiB)


def _split_tile(m, cap):
    """Largest 16-aligned (bf16 sublane packing) row tile that still yields a
    grid of >= 2 steps (engages both v7x TensorCores), capped to bound VMEM."""
    if m < 32:
        return m                                   # single full block
    half = (((m + 1) // 2) + 15) // 16 * 16        # ceil(m/2) rounded up to 16
    return max(16, min(cap, half))


# ---------------------------------------------------------------------------
# Pallas kernel 1: conv GEMM  Y = relu(X @ W + b), bf16 in, f32 acc, bf16 out
# ---------------------------------------------------------------------------
def _gemm_bias_relu_kernel(x_ref, w_ref, b_ref, o_ref):
    y = jnp.dot(x_ref[...], w_ref[...], preferred_element_type=jnp.float32)
    o_ref[...] = jnp.maximum(y + b_ref[...], 0.0).astype(o_ref.dtype)


def pallas_conv_gemm(xm, wm, b2d, *, tm_cap=1024):
    """xm [M, K] bf16 (K = real_cin*k*k), wm [K, 128] bf16, b2d [1, 128] f32.
    Returns relu(xm @ wm + b) as bf16 [M, 128]. Grid tiles M; W/b whole-block."""
    M, K = xm.shape
    K2, N = wm.shape
    assert K == K2, (K, K2)
    tm = _split_tile(M, tm_cap)
    grid_m = pl.cdiv(M, tm)
    flops = 2 * M * K * N
    bytes_accessed = (M * K + K * N + M * N) * 2 + N * 4
    return pl.pallas_call(
        _gemm_bias_relu_kernel,
        out_shape=jax.ShapeDtypeStruct((M, N), jnp.bfloat16),
        grid=(grid_m,),
        in_specs=[
            pl.BlockSpec((tm, K), lambda i: (i, 0)),
            pl.BlockSpec((K, N), lambda i: (0, 0)),
            pl.BlockSpec((1, N), lambda i: (0, 0)),
        ],
        out_specs=pl.BlockSpec((tm, N), lambda i: (i, 0)),
        compiler_params=pltpu.CompilerParams(
            dimension_semantics=("parallel",)),
        cost_estimate=pl.CostEstimate(flops=flops, transcendentals=0,
                                      bytes_accessed=bytes_accessed),
    )(xm, wm, b2d)


# ---------------------------------------------------------------------------
# Pallas kernel 2: fused FC head  q = (relu(relu(x@W1+b1)@W2+b2))@W3+b3
# All intermediates are lane-dense (512 / 128 / 128 wide) and never leave VMEM.
# ---------------------------------------------------------------------------
def _fc_head_kernel(x_ref, w1_ref, b1_ref, w2_ref, b2_ref, w3_ref, b3_ref,
                    o_ref):
    h = jnp.dot(x_ref[...], w1_ref[...], preferred_element_type=jnp.float32)
    h = jnp.maximum(h + b1_ref[...], 0.0).astype(jnp.bfloat16)
    h = jnp.dot(h, w2_ref[...], preferred_element_type=jnp.float32)
    h = jnp.maximum(h + b2_ref[...], 0.0).astype(jnp.bfloat16)
    q = jnp.dot(h, w3_ref[...], preferred_element_type=jnp.float32)
    o_ref[...] = q + b3_ref[...]


def pallas_fc_head(x, w1, b1, w2, b2, w3, b3, *, tb_cap=256):
    M, K1 = x.shape
    H1 = w1.shape[1]            # 512
    H2 = w2.shape[1]            # 128 (padded)
    N = w3.shape[1]             # 128 (padded); real Q-values in [:, :4]
    tb = _split_tile(M, tb_cap)
    grid_b = pl.cdiv(M, tb)
    flops = 2 * M * (K1 * H1 + H1 * H2 + H2 * N)
    bytes_accessed = ((M * K1 + K1 * H1 + H1 * H2 + H2 * N) * 2
                      + (H1 + H2 + N) * 4 + M * N * 4)
    return pl.pallas_call(
        _fc_head_kernel,
        out_shape=jax.ShapeDtypeStruct((M, N), jnp.float32),
        grid=(grid_b,),
        in_specs=[
            pl.BlockSpec((tb, K1), lambda i: (i, 0)),
            pl.BlockSpec(w1.shape, lambda i: (0, 0)),
            pl.BlockSpec(b1.shape, lambda i: (0, 0)),
            pl.BlockSpec(w2.shape, lambda i: (0, 0)),
            pl.BlockSpec(b2.shape, lambda i: (0, 0)),
            pl.BlockSpec(w3.shape, lambda i: (0, 0)),
            pl.BlockSpec(b3.shape, lambda i: (0, 0)),
        ],
        out_specs=pl.BlockSpec((tb, N), lambda i: (i, 0)),
        compiler_params=pltpu.CompilerParams(
            dimension_semantics=("parallel",),
            vmem_limit_bytes=FC_VMEM_LIMIT),
        cost_estimate=pl.CostEstimate(flops=flops, transcendentals=0,
                                      bytes_accessed=bytes_accessed),
    )(x, w1, b1, w2, b2, w3, b3)


# ---------------------------------------------------------------------------
# Conv block: slice to real channels, NHWC im2col (single XLA op), Pallas GEMM
# ---------------------------------------------------------------------------
def conv_block(h, wm, b2d, *, cin, k, s):
    """h [B, H, W, C>=cin] bf16; wm [cin*k*k, 128] bf16 (K ordered (C, kh, kw));
    b2d [1, 128] f32.  Returns [B, OH, OW, 128] bf16 (real channels first)."""
    B, H, W, C = h.shape
    if C != cin:
        h = h[..., :cin]          # drop zero-padded channels before im2col
    OH = (H - k) // s + 1
    OW = (W - k) // s + 1
    # Patch features are ordered (c, kh, kw) -> matches PyTorch OIHW flatten.
    patches = jax.lax.conv_general_dilated_patches(
        h, filter_shape=(k, k), window_strides=(s, s), padding="VALID",
        dimension_numbers=("NHWC", "HWIO", "NHWC"))      # [B, OH, OW, cin*k*k]
    xm = patches.reshape(B * OH * OW, cin * k * k)
    ym = pallas_conv_gemm(xm, wm, b2d)                   # [B*OH*OW, 128]
    return ym.reshape(B, OH, OW, wm.shape[1])


# ---------------------------------------------------------------------------
# Deterministic parameter init (PyTorch-like uniform fan-in scaling)
# ---------------------------------------------------------------------------
def init_params(key):
    def uni(k, shape, fan_in):
        bound = 1.0 / (fan_in ** 0.5)
        return jax.random.uniform(k, shape, jnp.float32, -bound, bound)

    ks = jax.random.split(key, 12)
    p = {}
    p["c1_w"] = uni(ks[0], (32, 1, 8, 8), 1 * 8 * 8)
    p["c1_b"] = uni(ks[1], (32,), 1 * 8 * 8)
    p["c2_w"] = uni(ks[2], (64, 32, 4, 4), 32 * 4 * 4)
    p["c2_b"] = uni(ks[3], (64,), 32 * 4 * 4)
    p["c3_w"] = uni(ks[4], (64, 64, 3, 3), 64 * 3 * 3)
    p["c3_b"] = uni(ks[5], (64,), 64 * 3 * 3)
    # Linear weights stored as [in_features, out_features]
    p["l1_w"] = uni(ks[6], (3136, 512), 3136)
    p["l1_b"] = uni(ks[7], (512,), 3136)
    p["l2_w"] = uni(ks[8], (512, 64), 512)
    p["l2_b"] = uni(ks[9], (64,), 512)
    p["l3_w"] = uni(ks[10], (64, 4), 64)
    p["l3_b"] = uni(ks[11], (4,), 64)
    return p


# ---------------------------------------------------------------------------
# One-time host-side weight preparation for the Pallas path
#   * conv weights -> [cin*k*k, 128] bf16 GEMM matrices (no input-channel pad,
#     output channels zero-padded to 128 lanes)
#   * l1 rows permuted from PyTorch (C,H,W) flatten to NHWC (H,W,C_pad=128)
#     flatten with zero rows at the 64 dead channels (lane-dense K = 6272)
#   * l2/l3 padded to 128-lane N/K so all FC intermediates are lane-dense
# ---------------------------------------------------------------------------
def prepare_params(p):
    def conv_wm(w):
        OC, IC, k, _ = w.shape
        wm = w.reshape(OC, IC * k * k).T               # K order = (IC, kh, kw)
        wm = jnp.pad(wm, ((0, 0), (0, LANE - OC)))     # lane-dense N = 128
        return wm.astype(jnp.bfloat16)

    def pad_bias(b, n=LANE):
        return jnp.pad(b, (0, n - b.shape[0])).astype(jnp.float32).reshape(1, n)

    q = {}
    q["c1_wm"] = conv_wm(p["c1_w"])          # K = 64
    q["c1_b"] = pad_bias(p["c1_b"])
    q["c2_wm"] = conv_wm(p["c2_w"])          # K = 512  (was 2048)
    q["c2_b"] = pad_bias(p["c2_b"])
    q["c3_wm"] = conv_wm(p["c3_w"])          # K = 576  (was 1152)
    q["c3_b"] = pad_bias(p["c3_b"])
    # fc1: rows from PyTorch (C,H,W) flatten -> NHWC (H,W,C_pad=128) flatten.
    l1 = p["l1_w"].reshape(64, 7, 7, 512).transpose(1, 2, 0, 3)    # [7,7,64,512]
    l1 = jnp.pad(l1, ((0, 0), (0, 0), (0, LANE - 64), (0, 0)))     # [7,7,128,512]
    q["l1_w"] = l1.reshape(7 * 7 * LANE, 512).astype(jnp.bfloat16)
    q["l1_b"] = p["l1_b"].astype(jnp.float32).reshape(1, -1)
    q["l2_w"] = jnp.pad(p["l2_w"], ((0, 0), (0, LANE - 64))).astype(jnp.bfloat16)
    q["l2_b"] = pad_bias(p["l2_b"])
    q["l3_w"] = jnp.pad(p["l3_w"], ((0, LANE - 64), (0, LANE - 4))).astype(jnp.bfloat16)
    q["l3_b"] = pad_bias(p["l3_b"])
    return q


# ---------------------------------------------------------------------------
# Full DQN forward (matches nn.Sequential in the PyTorch module)
# ---------------------------------------------------------------------------
@jax.jit
def dqn_forward(prep, x):
    # x: [B, 1, 84, 84] f32 (PyTorch NCHW convention; 84x84 -> Flatten == 3136)
    B = x.shape[0]
    h = jnp.transpose(x, (0, 2, 3, 1)).astype(jnp.bfloat16)           # NHWC
    h = conv_block(h, prep["c1_wm"], prep["c1_b"], cin=1, k=8, s=4)   # [B,20,20,128]
    h = conv_block(h, prep["c2_wm"], prep["c2_b"], cin=32, k=4, s=2)  # [B, 9, 9,128]
    h = conv_block(h, prep["c3_wm"], prep["c3_b"], cin=64, k=3, s=1)  # [B, 7, 7,128]
    h = h.reshape(B, 7 * 7 * LANE)            # lane-dense 6272-wide flatten
    q = pallas_fc_head(h, prep["l1_w"], prep["l1_b"],
                       prep["l2_w"], prep["l2_b"],
                       prep["l3_w"], prep["l3_b"])                    # [B,128] f32
    return q[:, :4]                            # real Q-values


# ---------------------------------------------------------------------------
# Pure-JAX (f32, NCHW) reference for a correctness sanity check
# ---------------------------------------------------------------------------
def dqn_reference(params, x):
    def conv(x, w, b, s):
        y = jax.lax.conv_general_dilated(
            x, w, window_strides=(s, s), padding="VALID",
            dimension_numbers=("NCHW", "OIHW", "NCHW"))
        return jnp.maximum(y + b[None, :, None, None], 0.0)

    h = conv(x, params["c1_w"], params["c1_b"], 4)
    h = conv(h, params["c2_w"], params["c2_b"], 2)
    h = conv(h, params["c3_w"], params["c3_b"], 1)
    h = h.reshape(h.shape[0], -1)
    h = jnp.maximum(h @ params["l1_w"] + params["l1_b"], 0.0)
    h = jnp.maximum(h @ params["l2_w"] + params["l2_b"], 0.0)
    return h @ params["l3_w"] + params["l3_b"]


if __name__ == "__main__":
    key = jax.random.PRNGKey(0)
    k_params, k_x = jax.random.split(key)
    params = init_params(k_params)
    prep = prepare_params(params)
    # batch=2; spatial must be 84 so Flatten -> 3136 matches Linear(3136, 512).
    x = jax.random.normal(k_x, (2, 1, 84, 84), jnp.float32)

    q = jax.block_until_ready(dqn_forward(prep, x))
    q_ref = jax.block_until_ready(dqn_reference(params, x))

    assert q.shape == (2, 4), q.shape
    err = float(jnp.max(jnp.abs(q - q_ref)))
    assert err < 5e-3, f"mismatch vs reference: max abs err {err}"
    print("KERNEL_OK")
</pallas_src>

<mosaic_0001>
module attributes {stable_mosaic.version = 11 : i64} {
  func.func @_gemm_bias_relu_kernel(%arg0: i32, %arg1: memref<400x64xbf16, #tpu.memory_space<vmem>>, %arg2: memref<64x128xbf16, #tpu.memory_space<vmem>>, %arg3: memref<1x128xf32, #tpu.memory_space<vmem>>, %arg4: memref<400x128xbf16, #tpu.memory_space<vmem>>) attributes {dimension_semantics = [#tpu.dimension_semantics<parallel>], iteration_bounds = array<i64: 2>, scalar_prefetch = 0 : i64, scratch_operands = 0 : i64, tpu.core_type = #tpu.core_type<tc>, window_params = [{transform_indices = @transform_0, window_bounds = array<i64: 400, 64>}, {pipeline_mode = #tpu.pipeline_mode<synchronous>, transform_indices = @transform_1, window_bounds = array<i64: 64, 128>}, {pipeline_mode = #tpu.pipeline_mode<synchronous>, transform_indices = @transform_2, window_bounds = array<i64: 1, 128>}, {transform_indices = @transform_3, window_bounds = array<i64: 400, 128>}]} {
    %c0 = arith.constant 0 : index
    %c0_0 = arith.constant 0 : index
    %0 = vector.load %arg1[%c0, %c0_0] : memref<400x64xbf16, #tpu.memory_space<vmem>>, vector<400x64xbf16>
    %c0_1 = arith.constant 0 : index
    %c0_2 = arith.constant 0 : index
    %1 = vector.load %arg2[%c0_1, %c0_2] : memref<64x128xbf16, #tpu.memory_space<vmem>>, vector<64x128xbf16>
    %cst = arith.constant dense<0.000000e+00> : vector<400x128xf32>
    %2 = tpu.matmul %0, %1, %cst {dimension_numbers = #tpu.dot_dimension_numbers<[1], [0], [0], [1], [0, 0, 1, 1], [], []>} : vector<400x64xbf16>, vector<64x128xbf16>, vector<400x128xf32> -> vector<400x128xf32>
    %c0_3 = arith.constant 0 : index
    %c0_4 = arith.constant 0 : index
    %3 = vector.load %arg3[%c0_3, %c0_4] : memref<1x128xf32, #tpu.memory_space<vmem>>, vector<1x128xf32>
    %4 = vector.broadcast %3 : vector<1x128xf32> to vector<400x128xf32>
    %5 = arith.addf %2, %4 : vector<400x128xf32>
    %cst_5 = arith.constant 0.000000e+00 : f32
    %6 = vector.broadcast %cst_5 : f32 to vector<400x128xf32>
    %7 = arith.maximumf %5, %6 : vector<400x128xf32>
    %8 = arith.truncf %7 : vector<400x128xf32> to vector<400x128xbf16>
    %c0_6 = arith.constant 0 : index
    %c0_7 = arith.constant 0 : index
    %9 = vector.load %arg4[%c0_6, %c0_7] : memref<400x128xbf16, #tpu.memory_space<vmem>>, vector<400x128xbf16>
    tpu.vector_store %arg4[%c0_6, %c0_7], %8 {strides = array<i32>} : memref<400x128xbf16, #tpu.memory_space<vmem>>, vector<400x128xbf16>,
    return
  }
  func.func @transform_0(%arg0: i32) -> (i32, i32) {
    %c0_i32 = arith.constant 0 : i32
    %c0_i32_0 = arith.constant 0 : i32
    return %arg0, %c0_i32 : i32, i32
  }
  func.func @transform_1(%arg0: i32) -> (i32, i32) {
    %c0_i32 = arith.constant 0 : i32
    %c0_i32_0 = arith.constant 0 : i32
    %c0_i32_1 = arith.constant 0 : i32
    return %c0_i32, %c0_i32_0 : i32, i32
  }
  func.func @transform_2(%arg0: i32) -> (i32, i32) {
    %c0_i32 = arith.constant 0 : i32
    %c0_i32_0 = arith.constant 0 : i32
    %c0_i32_1 = arith.constant 0 : i32
    return %c0_i32, %c0_i32_0 : i32, i32
  }
  func.func @transform_3(%arg0: i32) -> (i32, i32) {
    %c0_i32 = arith.constant 0 : i32
    %c0_i32_0 = arith.constant 0 : i32
    return %arg0, %c0_i32 : i32, i32
  }
}

module attributes {stable_mosaic.version = 11 : i64} {
  func.func @_gemm_bias_relu_kernel(%arg0: i32, %arg1: memref<96x512xbf16, #tpu.memory_space<vmem>>, %arg2: memref<512x128xbf16, #tpu.memory_space<vmem>>, %arg3: memref<1x128xf32, #tpu.memory_space<vmem>>, %arg4: memref<96x128xbf16, #tpu.memory_space<vmem>>) attributes {dimension_semantics = [#tpu.dimension_semantics<parallel>], iteration_bounds = array<i64: 2>, scalar_prefetch = 0 : i64, scratch_operands = 0 : i64, tpu.core_type = #tpu.core_type<tc>, window_params = [{transform_indices = @transform_0, window_bounds = array<i64: 96, 512>}, {pipeline_mode = #tpu.pipeline_mode<synchronous>, transform_indices = @transform_1, window_bounds = array<i64: 512, 128>}, {pipeline_mode = #tpu.pipeline_mode<synchronous>, transform_indices = @transform_2, window_bounds = array<i64: 1, 128>}, {transform_indices = @transform_3, window_bounds = array<i64: 96, 128>}]} {
    %c0 = arith.constant 0 : index
    %c0_0 = arith.constant 0 : index
    %0 = vector.load %arg1[%c0, %c0_0] : memref<96x512xbf16, #tpu.memory_space<vmem>>, vector<96x512xbf16>
    %c0_1 = arith.constant 0 : index
    %c0_2 = arith.constant 0 : index
    %1 = vector.load %arg2[%c0_1, %c0_2] : memref<512x128xbf16, #tpu.memory_space<vmem>>, vector<512x128xbf16>
    %cst = arith.constant dense<0.000000e+00> : vector<96x128xf32>
    %2 = tpu.matmul %0, %1, %cst {dimension_numbers = #tpu.dot_dimension_numbers<[1], [0], [0], [1], [0, 0, 1, 1], [], []>} : vector<96x512xbf16>, vector<512x128xbf16>, vector<96x128xf32> -> vector<96x128xf32>
    %c0_3 = arith.constant 0 : index
    %c0_4 = arith.constant 0 : index
    %3 = vector.load %arg3[%c0_3, %c0_4] : memref<1x128xf32, #tpu.memory_space<vmem>>, vector<1x128xf32>
    %4 = vector.broadcast %3 : vector<1x128xf32> to vector<96x128xf32>
    %5 = arith.addf %2, %4 : vector<96x128xf32>
    %cst_5 = arith.constant 0.000000e+00 : f32
    %6 = vector.broadcast %cst_5 : f32 to vector<96x128xf32>
    %7 = arith.maximumf %5, %6 : vector<96x128xf32>
    %8 = arith.truncf %7 : vector<96x128xf32> to vector<96x128xbf16>
    %c0_6 = arith.constant 0 : index
    %c0_7 = arith.constant 0 : index
    %9 = vector.load %arg4[%c0_6, %c0_7] : memref<96x128xbf16, #tpu.memory_space<vmem>>, vector<96x128xbf16>
    tpu.vector_store %arg4[%c0_6, %c0_7], %8 {strides = array<i32>} : memref<96x128xbf16, #tpu.memory_space<vmem>>, vector<96x128xbf16>,
    return
  }
  func.func @transform_0(%arg0: i32) -> (i32, i32) {
    %c0_i32 = arith.constant 0 : i32
    %c0_i32_0 = arith.constant 0 : i32
    return %arg0, %c0_i32 : i32, i32
  }
  func.func @transform_1(%arg0: i32) -> (i32, i32) {
    %c0_i32 = arith.constant 0 : i32
    %c0_i32_0 = arith.constant 0 : i32
    %c0_i32_1 = arith.constant 0 : i32
    return %c0_i32, %c0_i32_0 : i32, i32
  }
  func.func @transform_2(%arg0: i32) -> (i32, i32) {
    %c0_i32 = arith.constant 0 : i32
    %c0_i32_0 = arith.constant 0 : i32
    %c0_i32_1 = arith.constant 0 : i32
    return %c0_i32, %c0_i32_0 : i32, i32
  }
  func.func @transform_3(%arg0: i32) -> (i32, i32) {
    %c0_i32 = arith.constant 0 : i32
    %c0_i32_0 = arith.constant 0 : i32
    return %arg0, %c0_i32 : i32, i32
  }
}

module attributes {stable_mosaic.version = 11 : i64} {
  func.func @_gemm_bias_relu_kernel(%arg0: i32, %arg1: memref<64x576xbf16, #tpu.memory_space<vmem>>, %arg2: memref<576x128xbf16, #tpu.memory_space<vmem>>, %arg3: memref<1x128xf32, #tpu.memory_space<vmem>>, %arg4: memref<64x128xbf16, #tpu.memory_space<vmem>>) attributes {dimension_semantics = [#tpu.dimension_semantics<parallel>], iteration_bounds = array<i64: 2>, scalar_prefetch = 0 : i64, scratch_operands = 0 : i64, tpu.core_type = #tpu.core_type<tc>, window_params = [{transform_indices = @transform_0, window_bounds = array<i64: 64, 576>}, {pipeline_mode = #tpu.pipeline_mode<synchronous>, transform_indices = @transform_1, window_bounds = array<i64: 576, 128>}, {pipeline_mode = #tpu.pipeline_mode<synchronous>, transform_indices = @transform_2, window_bounds = array<i64: 1, 128>}, {transform_indices = @transform_3, window_bounds = array<i64: 64, 128>}]} {
    %c0 = arith.constant 0 : index
    %c0_0 = arith.constant 0 : index
    %0 = vector.load %arg1[%c0, %c0_0] : memref<64x576xbf16, #tpu.memory_space<vmem>>, vector<64x576xbf16>
    %c0_1 = arith.constant 0 : index
    %c0_2 = arith.constant 0 : index
    %1 = vector.load %arg2[%c0_1, %c0_2] : memref<576x128xbf16, #tpu.memory_space<vmem>>, vector<576x128xbf16>
    %cst = arith.constant dense<0.000000e+00> : vector<64x128xf32>
    %2 = tpu.matmul %0, %1, %cst {dimension_numbers = #tpu.dot_dimension_numbers<[1], [0], [0], [1], [0, 0, 1, 1], [], []>} : vector<64x576xbf16>, vector<576x128xbf16>, vector<64x128xf32> -> vector<64x128xf32>
    %c0_3 = arith.constant 0 : index
    %c0_4 = arith.constant 0 : index
    %3 = vector.load %arg3[%c0_3, %c0_4] : memref<1x128xf32, #tpu.memory_space<vmem>>, vector<1x128xf32>
    %4 = vector.broadcast %3 : vector<1x128xf32> to vector<64x128xf32>
    %5 = arith.addf %2, %4 : vector<64x128xf32>
    %cst_5 = arith.constant 0.000000e+00 : f32
    %6 = vector.broadcast %cst_5 : f32 to vector<64x128xf32>
    %7 = arith.maximumf %5, %6 : vector<64x128xf32>
    %8 = arith.truncf %7 : vector<64x128xf32> to vector<64x128xbf16>
    %c0_6 = arith.constant 0 : index
    %c0_7 = arith.constant 0 : index
    %9 = vector.load %arg4[%c0_6, %c0_7] : memref<64x128xbf16, #tpu.memory_space<vmem>>, vector<64x128xbf16>
    tpu.vector_store %arg4[%c0_6, %c0_7], %8 {strides = array<i32>} : memref<64x128xbf16, #tpu.memory_space<vmem>>, vector<64x128xbf16>,
    return
  }
  func.func @transform_0(%arg0: i32) -> (i32, i32) {
    %c0_i32 = arith.constant 0 : i32
    %c0_i32_0 = arith.constant 0 : i32
    return %arg0, %c0_i32 : i32, i32
  }
  func.func @transform_1(%arg0: i32) -> (i32, i32) {
    %c0_i32 = arith.constant 0 : i32
    %c0_i32_0 = arith.constant 0 : i32
    %c0_i32_1 = arith.constant 0 : i32
    return %c0_i32, %c0_i32_0 : i32, i32
  }
  func.func @transform_2(%arg0: i32) -> (i32, i32) {
    %c0_i32 = arith.constant 0 : i32
    %c0_i32_0 = arith.constant 0 : i32
    %c0_i32_1 = arith.constant 0 : i32
    return %c0_i32, %c0_i32_0 : i32, i32
  }
  func.func @transform_3(%arg0: i32) -> (i32, i32) {
    %c0_i32 = arith.constant 0 : i32
    %c0_i32_0 = arith.constant 0 : i32
    return %arg0, %c0_i32 : i32, i32
  }
}

module attributes {stable_mosaic.version = 11 : i64} {
  func.func @_fc_head_kernel(%arg0: i32, %arg1: memref<2x6272xbf16, #tpu.memory_space<vmem>>, %arg2: memref<6272x512xbf16, #tpu.memory_space<vmem>>, %arg3: memref<1x512xf32, #tpu.memory_space<vmem>>, %arg4: memref<512x128xbf16, #tpu.memory_space<vmem>>, %arg5: memref<1x128xf32, #tpu.memory_space<vmem>>, %arg6: memref<128x128xbf16, #tpu.memory_space<vmem>>, %arg7: memref<1x128xf32, #tpu.memory_space<vmem>>, %arg8: memref<2x128xf32, #tpu.memory_space<vmem>>) attributes {dimension_semantics = [#tpu.dimension_semantics<parallel>], iteration_bounds = array<i64: 1>, scalar_prefetch = 0 : i64, scratch_operands = 0 : i64, tpu.core_type = #tpu.core_type<tc>, window_params = [{transform_indices = @transform_0, window_bounds = array<i64: 2, 6272>}, {pipeline_mode = #tpu.pipeline_mode<synchronous>, transform_indices = @transform_1, window_bounds = array<i64: 6272, 512>}, {pipeline_mode = #tpu.pipeline_mode<synchronous>, transform_indices = @transform_2, window_bounds = array<i64: 1, 512>}, {pipeline_mode = #tpu.pipeline_mode<synchronous>, transform_indices = @transform_3, window_bounds = array<i64: 512, 128>}, {pipeline_mode = #tpu.pipeline_mode<synchronous>, transform_indices = @transform_4, window_bounds = array<i64: 1, 128>}, {pipeline_mode = #tpu.pipeline_mode<synchronous>, transform_indices = @transform_5, window_bounds = array<i64: 128, 128>}, {pipeline_mode = #tpu.pipeline_mode<synchronous>, transform_indices = @transform_6, window_bounds = array<i64: 1, 128>}, {transform_indices = @transform_7, window_bounds = array<i64: 2, 128>}]} {
    %c0 = arith.constant 0 : index
    %c0_0 = arith.constant 0 : index
    %0 = vector.load %arg1[%c0, %c0_0] : memref<2x6272xbf16, #tpu.memory_space<vmem>>, vector<2x6272xbf16>
    %c0_1 = arith.constant 0 : index
    %c0_2 = arith.constant 0 : index
    %1 = vector.load %arg2[%c0_1, %c0_2] : memref<6272x512xbf16, #tpu.memory_space<vmem>>, vector<6272x512xbf16>
    %cst = arith.constant dense<0.000000e+00> : vector<2x512xf32>
    %2 = tpu.matmul %0, %1, %cst {dimension_numbers = #tpu.dot_dimension_numbers<[1], [0], [0], [1], [0, 0, 1, 1], [], []>} : vector<2x6272xbf16>, vector<6272x512xbf16>, vector<2x512xf32> -> vector<2x512xf32>
    %c0_3 = arith.constant 0 : index
    %c0_4 = arith.constant 0 : index
    %3 = vector.load %arg3[%c0_3, %c0_4] : memref<1x512xf32, #tpu.memory_space<vmem>>, vector<1x512xf32>
    %4 = vector.broadcast %3 : vector<1x512xf32> to vector<2x512xf32>
    %5 = arith.addf %2, %4 : vector<2x512xf32>
    %cst_5 = arith.constant 0.000000e+00 : f32
    %6 = vector.broadcast %cst_5 : f32 to vector<2x512xf32>
    %7 = arith.maximumf %5, %6 : vector<2x512xf32>
    %8 = arith.truncf %7 : vector<2x512xf32> to vector<2x512xbf16>
    %c0_6 = arith.constant 0 : index
    %c0_7 = arith.constant 0 : index
    %9 = vector.load %arg4[%c0_6, %c0_7] : memref<512x128xbf16, #tpu.memory_space<vmem>>, vector<512x128xbf16>
    %cst_8 = arith.constant dense<0.000000e+00> : vector<2x128xf32>
    %10 = tpu.matmul %8, %9, %cst_8 {dimension_numbers = #tpu.dot_dimension_numbers<[1], [0], [0], [1], [0, 0, 1, 1], [], []>} : vector<2x512xbf16>, vector<512x128xbf16>, vector<2x128xf32> -> vector<2x128xf32>
    %c0_9 = arith.constant 0 : index
    %c0_10 = arith.constant 0 : index
    %11 = vector.load %arg5[%c0_9, %c0_10] : memref<1x128xf32, #tpu.memory_space<vmem>>, vector<1x128xf32>
    %12 = vector.broadcast %11 : vector<1x128xf32> to vector<2x128xf32>
    %13 = arith.addf %10, %12 : vector<2x128xf32>
    %cst_11 = arith.constant 0.000000e+00 : f32
    %14 = vector.broadcast %cst_11 : f32 to vector<2x128xf32>
    %15 = arith.maximumf %13, %14 : vector<2x128xf32>
    %16 = arith.truncf %15 : vector<2x128xf32> to vector<2x128xbf16>
    %c0_12 = arith.constant 0 : index
    %c0_13 = arith.constant 0 : index
    %17 = vector.load %arg6[%c0_12, %c0_13] : memref<128x128xbf16, #tpu.memory_space<vmem>>, vector<128x128xbf16>
    %cst_14 = arith.constant dense<0.000000e+00> : vector<2x128xf32>
    %18 = tpu.matmul %16, %17, %cst_14 {dimension_numbers = #tpu.dot_dimension_numbers<[1], [0], [0], [1], [0, 0, 1, 1], [], []>} : vector<2x128xbf16>, vector<128x128xbf16>, vector<2x128xf32> -> vector<2x128xf32>
    %c0_15 = arith.constant 0 : index
    %c0_16 = arith.constant 0 : index
    %19 = vector.load %arg7[%c0_15, %c0_16] : memref<1x128xf32, #tpu.memory_space<vmem>>, vector<1x128xf32>
    %20 = vector.broadcast %19 : vector<1x128xf32> to vector<2x128xf32>
    %21 = arith.addf %18, %20 : vector<2x128xf32>
    %c0_17 = arith.constant 0 : index
    %c0_18 = arith.constant 0 : index
    %22 = vector.load %arg8[%c0_17, %c0_18] : memref<2x128xf32, #tpu.memory_space<vmem>>, vector<2x128xf32>
    tpu.vector_store %arg8[%c0_17, %c0_18], %21 {strides = array<i32>} : memref<2x128xf32, #tpu.memory_space<vmem>>, vector<2x128xf32>,
    return
  }
  func.func @transform_0(%arg0: i32) -> (i32, i32) {
    %c0_i32 = arith.constant 0 : i32
    %c0_i32_0 = arith.constant 0 : i32
    return %arg0, %c0_i32 : i32, i32
  }
  func.func @transform_1(%arg0: i32) -> (i32, i32) {
    %c0_i32 = arith.constant 0 : i32
    %c0_i32_0 = arith.constant 0 : i32
    %c0_i32_1 = arith.constant 0 : i32
    return %c0_i32, %c0_i32_0 : i32, i32
  }
  func.func @transform_2(%arg0: i32) -> (i32, i32) {
    %c0_i32 = arith.constant 0 : i32
    %c0_i32_0 = arith.constant 0 : i32
    %c0_i32_1 = arith.constant 0 : i32
    return %c0_i32, %c0_i32_0 : i32, i32
  }
  func.func @transform_3(%arg0: i32) -> (i32, i32) {
    %c0_i32 = arith.constant 0 : i32
    %c0_i32_0 = arith.constant 0 : i32
    %c0_i32_1 = arith.constant 0 : i32
    return %c0_i32, %c0_i32_0 : i32, i32
  }
  func.func @transform_4(%arg0: i32) -> (i32, i32) {
    %c0_i32 = arith.constant 0 : i32
    %c0_i32_0 = arith.constant 0 : i32
    %c0_i32_1 = arith.constant 0 : i32
    return %c0_i32, %c0_i32_0 : i32, i32
  }
  func.func @transform_5(%arg0: i32) -> (i32, i32) {
    %c0_i32 = arith.constant 0 : i32
    %c0_i32_0 = arith.constant 0 : i32
    %c0_i32_1 = arith.constant 0 : i32
    return %c0_i32, %c0_i32_0 : i32, i32
  }
  func.func @transform_6(%arg0: i32) -> (i32, i32) {
    %c0_i32 = arith.constant 0 : i32
    %c0_i32_0 = arith.constant 0 : i32
    %c0_i32_1 = arith.constant 0 : i32
    return %c0_i32, %c0_i32_0 : i32, i32
  }
  func.func @transform_7(%arg0: i32) -> (i32, i32) {
    %c0_i32 = arith.constant 0 : i32
    %c0_i32_0 = arith.constant 0 : i32
    return %arg0, %c0_i32 : i32, i32
  }
}

</mosaic_0001>

<bundles_post_ra>
// kernel: dqn_forward.4
= control target key start
LH: loop header
LB: loop body
LE: loop exit
PB: predicated region body
PF: predicated region fallthrough
CT: control target
= control target key end

     0   :  { %s1581_s12 = smov 0   ;;  %s1809_s0 = inlined_call_operand.vmem [shape: bf16[800,64], index: 0, kind: input, shape index: {}]   ;;  %s1810_s1 = inlined_call_operand.vmem [shape: bf16[64,128], index: 1, kind: input, shape index: {}]   ;;  %s1811_s2 = inlined_call_operand.vmem [shape: f32[1,128], index: 2, kind: input, shape index: {}]   ;;  %s1812_s3 = inlined_call_operand.vmem [shape: bf16[800,128], index: 3, kind: output, shape index: {}]  }
   0x1 LB: > { %s1054_s13 = sadd.s32 4294967295, %s1557_s12   ;;  %p1058_p0 = scmp.ge.s32.totalorder %s1557_s12, 1  ;;  %s1557_s12 = sphi %s1581_s12, %s13_s12  }
   0x2   : > { %p138_p1 = scmp.lt.s32.totalorder %s1557_s12, 3 }
   0x4   : > { %p139_p2 = pnand %p1058_p0, %p138_p1 }
   0x5   : > { %v1522_v0 = vld [vmem:[%s1810_s1] sm:$0xff] (!%p139_p2)   ;;  %v1559_v1 = vmov (!%p139_p2), 0.0   ;;  %v1523_v2 = vld [vmem:[%s1810_s1 + $0x8] sm:$0xff] (!%p139_p2)   ;;  %s162_s18 = smul.u32 (!%p139_p2), 50, %s1054_s13  ;;  %vm1560_vm0 = vmmov (!%p139_p2), 0   ;;  %v1524_v3 = vld [vmem:[%s1810_s1 + $0x10] sm:$0xff] (!%p139_p2)  }
   0x6   : > { %142 = sbr.rel (%p139_p2) target bundleno = 339 (0x153), region = 32  ;;  %1396 = vmatprep.subr.bf16.mxu0 (!%p139_p2), %v1559_v1  ;;  %1504 = vmatprep.subr.bf16.mxu1 (!%p139_p2), %v1559_v1  ;;  %v1525_v4 = vld [vmem:[%s1810_s1 + $0x18] sm:$0xff] (!%p139_p2)   ;;  %vm389_vm1 = vcmask (!%p139_p2), 523264   ;;  %v1722_v30 = vld [vmem:[%s1811_s2] ss:$0 sm:$0xff] (!%p139_p2) }
   0x7   : > { %1397 = vmatpush3.bf16.msra.mxu0 (!%p139_p2), %v1522_v0  ;;  %1508 = vmatpush3.bf16.msra.mxu1 (!%p139_p2), %v1522_v0  ;;  %p163_p3 = scmp.lt.s32.totalorder (!%p139_p2), %s162_s18, 99 }
   0x8   : > { %1398 = vmatprep.subr.bf16.mxu0 (!%p139_p2), %v1559_v1  ;;  %1505 = vmatprep.subr.bf16.mxu1 (!%p139_p2), %v1559_v1 }
   0x9   : > { %1404 = vmatprep.mubr.msk.bf16.mxu0 (!%p139_p2), %vm1560_vm0, %v1559_v1  ;;  %1456 = vmatprep.mubr.msk.bf16.mxu1 (!%p139_p2), %vm1560_vm0, %v1559_v1 }
   0xb   : > { %1399 = vmatpush3.bf16.msra.mxu0 (!%p139_p2), %v1523_v2  ;;  %1509 = vmatpush3.bf16.msra.mxu1 (!%p139_p2), %v1523_v2 }
   0xc   : > { %1400 = vmatprep.subr.bf16.mxu0 (!%p139_p2), %v1559_v1  ;;  %1506 = vmatprep.subr.bf16.mxu1 (!%p139_p2), %v1559_v1 }
   0xd   : > { %s1814_s18 = smov (!%p163_p3, %s162_s18), 99 }
   0xe   : > { %s1059_s21 = sshll.u32 %s1814_s18, 2 }
   0xf   : > { %s1616_s24 = scalar_lea.vmem %s1809_s0, %s1059_s21  ;;  %1401 = vmatpush3.bf16.msra.mxu0 %v1524_v3  ;;  %1510 = vmatpush3.bf16.msra.mxu1 %v1524_v3  ;;  %s1733_s4 = scalar_lea.vmem %s1812_s3, %s1059_s21 }
  0x10   : > { %1402 = vmatprep.subr.bf16.mxu0 %v1559_v1  ;;  %1507 = vmatprep.subr.bf16.mxu1 %v1559_v1  ;;  %v1526_v5 = vld [vmem:[%s1616_s24] sm:$0xff]   ;;  %v1527_v6 = vld [vmem:[%s1616_s24 + $0x68] sm:$0xff]   ;;  %v1529_v8 = vld [vmem:[%s1616_s24 + $0x70] sm:$0xff]  }
  0x11   : > { %v1528_v7 = vld [vmem:[%s1616_s24 + $0x8] sm:$0xff]   ;;  %v1530_v9 = vld [vmem:[%s1616_s24 + $0x10] sm:$0xff]   ;;  %v1531_v10 = vld [vmem:[%s1616_s24 + $0x78] sm:$0xff]  }
  0x12   : > { %v1532_v11 = vld [vmem:[%s1616_s24 + $0x18] sm:$0xff]   ;;  %v1533_v12 = vld [vmem:[%s1616_s24 + $0x80] sm:$0xff]   ;;  %v1535_v14 = vld [vmem:[%s1616_s24 + $0x88] sm:$0xff]  }
  0x13   : > { %1403 = vmatpush3.bf16.msra.mxu0 %v1525_v4  ;;  %1511 = vmatpush3.bf16.msra.mxu1 %v1525_v4  ;;  %v1534_v13 = vld [vmem:[%s1616_s24 + $0x20] sm:$0xff]   ;;  %v1536_v15 = vld [vmem:[%s1616_s24 + $0x28] sm:$0xff]   ;;  %v1537_v16 = vld [vmem:[%s1616_s24 + $0x90] sm:$0xff]  }
  0x14   : > { %v1538_v17 = vld [vmem:[%s1616_s24 + $0x30] sm:$0xff]   ;;  %v1539_v18 = vld [vmem:[%s1616_s24 + $0x98] sm:$0xff]   ;;  %v1541_v20 = vld [vmem:[%s1616_s24 + $0xa0] sm:$0xff]  }
  0x15   : > { %v1540_v19 = vld [vmem:[%s1616_s24 + $0x38] sm:$0xff]   ;;  %v1542_v21 = vld [vmem:[%s1616_s24 + $0x40] sm:$0xff]   ;;  %v1543_v22 = vld [vmem:[%s1616_s24 + $0xa8] sm:$0xff]  }
  0x16   : > { %1405 = vmatmul.mubr.msk.bf16.vlgmr.msra.gmra.mrb[0].mxu0 %vm389_vm1, %v1526_v5  ;;  %1457 = vmatmul.mubr.msk.bf16.vlgmr.msra.gmra.mrb[0].mxu1 %vm389_vm1, %v1527_v6  ;;  %v1544_v23 = vld [vmem:[%s1616_s24 + $0x48] sm:$0xff]   ;;  %v1545_v24 = vld [vmem:[%s1616_s24 + $0xb0] sm:$0xff]   ;;  %v1547_v26 = vld [vmem:[%s1616_s24 + $0xb8] sm:$0xff]  }
  0x17   : > { %1408 = vmatprep.mubr.msk.bf16.mxu0 %vm1560_vm0, %v1559_v1  ;;  %1460 = vmatprep.mubr.msk.bf16.mxu1 %vm1560_vm0, %v1559_v1  ;;  %v1546_v25 = vld [vmem:[%s1616_s24 + $0x50] sm:$0xff]   ;;  %v1548_v27 = vld [vmem:[%s1616_s24 + $0x58] sm:$0xff]   ;;  %v1549_v28 = vld [vmem:[%s1616_s24 + $0xc0] sm:$0xff]  }
  0x18   : > { %v1550_v29 = vld [vmem:[%s1616_s24 + $0x60] sm:$0xff]  }
  0x1e   : > { %1409 = vmatmul.mubr.msk.bf16.gmra.mrb[4].mxu0 %vm389_vm1, %v1528_v7  ;;  %1461 = vmatmul.mubr.msk.bf16.gmra.mrb[4].mxu1 %vm389_vm1, %v1529_v8 }
  0x1f   : > { %1412 = vmatprep.mubr.msk.bf16.mxu0 %vm1560_vm0, %v1559_v1  ;;  %1464 = vmatprep.mubr.msk.bf16.mxu1 %vm1560_vm0, %v1559_v1 }
  0x26   : > { %1413 = vmatmul.mubr.msk.bf16.gmra.mrb[8].mxu0 %vm389_vm1, %v1530_v9  ;;  %1465 = vmatmul.mubr.msk.bf16.gmra.mrb[8].mxu1 %vm389_vm1, %v1531_v10 }
  0x27   : > { %1416 = vmatprep.mubr.msk.bf16.mxu0 %vm1560_vm0, %v1559_v1  ;;  %1468 = vmatprep.mubr.msk.bf16.mxu1 %vm1560_vm0, %v1559_v1 }
  0x2e   : > { %1417 = vmatmul.mubr.msk.bf16.gmra.mrb[12].mxu0 %vm389_vm1, %v1532_v11  ;;  %1469 = vmatmul.mubr.msk.bf16.gmra.mrb[12].mxu1 %vm389_vm1, %v1533_v12 }
  0x2f   : > { %1420 = vmatprep.mubr.msk.bf16.mxu0 %vm1560_vm0, %v1559_v1  ;;  %1472 = vmatprep.mubr.msk.bf16.mxu1 %vm1560_vm0, %v1559_v1 }
  0x36   : > { %1421 = vmatmul.mubr.msk.bf16.gmra.mrb[16].mxu0 %vm389_vm1, %v1534_v13  ;;  %1473 = vmatmul.mubr.msk.bf16.gmra.mrb[16].mxu1 %vm389_vm1, %v1535_v14 }
  0x37   : > { %1424 = vmatprep.mubr.msk.bf16.mxu0 %vm1560_vm0, %v1559_v1  ;;  %1476 = vmatprep.mubr.msk.bf16.mxu1 %vm1560_vm0, %v1559_v1 }
  0x3e   : > { %1425 = vmatmul.mubr.msk.bf16.gmra.mrb[20].mxu0 %vm389_vm1, %v1536_v15  ;;  %1477 = vmatmul.mubr.msk.bf16.gmra.mrb[20].mxu1 %vm389_vm1, %v1537_v16 }
  0x3f   : > { %1428 = vmatprep.mubr.msk.bf16.mxu0 %vm1560_vm0, %v1559_v1  ;;  %1480 = vmatprep.mubr.msk.bf16.mxu1 %vm1560_vm0, %v1559_v1 }
  0x46   : > { %1429 = vmatmul.mubr.msk.bf16.gmra.mrb[24].mxu0 %vm389_vm1, %v1538_v17  ;;  %1481 = vmatmul.mubr.msk.bf16.gmra.mrb[24].mxu1 %vm389_vm1, %v1539_v18 }
  0x47   : > { %1432 = vmatprep.mubr.msk.bf16.mxu0 %vm1560_vm0, %v1559_v1  ;;  %1484 = vmatprep.mubr.msk.bf16.mxu1 %vm1560_vm0, %v1559_v1 }
  0x4e   : > { %1433 = vmatmul.mubr.msk.bf16.gmra.mrb[28].mxu0 %vm389_vm1, %v1540_v19  ;;  %1485 = vmatmul.mubr.msk.bf16.gmra.mrb[28].mxu1 %vm389_vm1, %v1541_v20 }
  0x4f   : > { %1436 = vmatprep.mubr.msk.bf16.mxu0 %vm1560_vm0, %v1559_v1  ;;  %1488 = vmatprep.mubr.msk.bf16.mxu1 %vm1560_vm0, %v1559_v1 }
  0x56   : > { %1437 = vmatmul.mubr.msk.bf16.gmra.mrb[32].mxu0 %vm389_vm1, %v1542_v21  ;;  %1489 = vmatmul.mubr.msk.bf16.gmra.mrb[32].mxu1 %vm389_vm1, %v1543_v22 }
  0x57   : > { %1440 = vmatprep.mubr.msk.bf16.mxu0 %vm1560_vm0, %v1559_v1  ;;  %1492 = vmatprep.mubr.msk.bf16.mxu1 %vm1560_vm0, %v1559_v1 }
  0x5e   : > { %1441 = vmatmul.mubr.msk.bf16.gmra.mrb[36].mxu0 %vm389_vm1, %v1544_v23  ;;  %1493 = vmatmul.mubr.msk.bf16.gmra.mrb[36].mxu1 %vm389_vm1, %v1545_v24 }
  0x5f   : > { %1444 = vmatprep.mubr.msk.bf16.mxu0 %vm1560_vm0, %v1559_v1  ;;  %1496 = vmatprep.mubr.msk.bf16.mxu1 %vm1560_vm0, %v1559_v1 }
  0x66   : > { %1445 = vmatmul.mubr.msk.bf16.gmra.mrb[40].mxu0 %vm389_vm1, %v1546_v25  ;;  %1497 = vmatmul.mubr.msk.bf16.gmra.mrb[40].mxu1 %vm389_vm1, %v1547_v26 }
  0x67   : > { %1448 = vmatprep.mubr.msk.bf16.mxu0 %vm1560_vm0, %v1559_v1  ;;  %1500 = vmatprep.mubr.msk.bf16.mxu1 %vm1560_vm0, %v1559_v1 }
  0x6e   : > { %1449 = vmatmul.mubr.msk.bf16.gmra.mrb[44].mxu0 %vm389_vm1, %v1548_v27  ;;  %1501 = vmatmul.mubr.msk.bf16.gmra.mrb[44].mxu1 %vm389_vm1, %v1549_v28 }
  0x6f   : > { %1452 = vmatprep.mubr.msk.bf16.mxu0 %vm1560_vm0, %v1559_v1 }
  0x76   : > { %1453 = vmatmul.mubr.msk.bf16.gmra.mrb[48].mxu0 %vm389_vm1, %v1550_v29 }
  0xe9   : > { %v499_v31 = vpop.f32.mrb[0].mxu0  ;;  %v603_v32 = vpop.f32.mrb[0].mxu1 }
  0xea   : > { %v500_v33 = vadd.f32 %v1722_v30, %v499_v31  ;;  %v1406_v34 = vpop.f32.mrb[1].mxu0  ;;  %v604_v35 = vadd.f32 %v1722_v30, %v603_v32  ;;  %v1458_v36 = vpop.f32.mrb[1].mxu1 }
  0xeb   : > { %v502_v37 = vpop.f32.mrb[2].mxu0  ;;  %v606_v38 = vpop.f32.mrb[2].mxu1 }
  0xec   : > { %v503_v39 = vadd.f32 %v1722_v30, %v502_v37  ;;  %v1407_v40 = vpop.f32.mrb[3].mxu0  ;;  %v724_v41 = vmax.f32 %v604_v35, 0.0  ;;  %v607_v42 = vadd.f32 %v1722_v30, %v606_v38  ;;  %v1459_v43 = vpop.f32.mrb[3].mxu1  ;;  %v698_v44 = vmax.f32 %v500_v33, 0.0 }
  0xee   : > { %v699_v45 = vmax.f32 %v503_v39, 0.0  ;;  %v725_v46 = vmax.f32 %v607_v42, 0.0 }
  0xf0   : > { %v1221_v47 = vpack.c.bf16 %v699_v45, %v698_v44  ;;  %v1286_v48 = vpack.c.bf16 %v725_v46, %v724_v41 }
  0xf1   : > { %v507_v49 = vpop.f32.mrb[4].mxu0  ;;  %v611_v50 = vpop.f32.mrb[4].mxu1 }
  0xf2   : > { %1222 = vst [vmem:[%s1733_s4] sm:$0xff] %v1221_v47   ;;  %1355 = vst [vmem:[%s1733_s4 + $0x68] sm:$0xff] %v1286_v48   ;;  %v508_v51 = vadd.f32 %v1722_v30, %v507_v49  ;;  %v1410_v52 = vpop.f32.mrb[5].mxu0  ;;  %v612_v53 = vadd.f32 %v1722_v30, %v611_v50  ;;  %v1462_v54 = vpop.f32.mrb[5].mxu1 }
  0xf3   : > { %v510_v55 = vpop.f32.mrb[6].mxu0  ;;  %v614_v56 = vpop.f32.mrb[6].mxu1 }
  0xf4   : > { %v511_v57 = vadd.f32 %v1722_v30, %v510_v55  ;;  %v1411_v58 = vpop.f32.mrb[7].mxu0  ;;  %v726_v59 = vmax.f32 %v612_v53, 0.0  ;;  %v615_v60 = vadd.f32 %v1722_v30, %v614_v56  ;;  %v1463_v61 = vpop.f32.mrb[7].mxu1  ;;  %v700_v62 = vmax.f32 %v508_v51, 0.0 }
  0xf6   : > { %v701_v63 = vmax.f32 %v511_v57, 0.0  ;;  %v727_v0 = vmax.f32 %v615_v60, 0.0 }
  0xf8   : > { %v1226_v1 = vpack.c.bf16 %v701_v63, %v700_v62  ;;  %v1291_v2 = vpack.c.bf16 %v727_v0, %v726_v59 }
  0xf9   : > { %v515_v3 = vpop.f32.mrb[8].mxu0  ;;  %v619_v4 = vpop.f32.mrb[8].mxu1 }
  0xfa   : > { %1343 = vst [vmem:[%s1733_s4 + $0x8] sm:$0xff] %v1226_v1   ;;  %1356 = vst [vmem:[%s1733_s4 + $0x70] sm:$0xff] %v1291_v2   ;;  %v516_v5 = vadd.f32 %v1722_v30, %v515_v3  ;;  %v1414_v6 = vpop.f32.mrb[9].mxu0  ;;  %v620_v7 = vadd.f32 %v1722_v30, %v619_v4  ;;  %v1466_v8 = vpop.f32.mrb[9].mxu1 }
  0xfb   : > { %v518_v9 = vpop.f32.mrb[10].mxu0  ;;  %v622_v10 = vpop.f32.mrb[10].mxu1 }
  0xfc   : > { %v519_v11 = vadd.f32 %v1722_v30, %v518_v9  ;;  %v1415_v12 = vpop.f32.mrb[11].mxu0  ;;  %v728_v13 = vmax.f32 %v620_v7, 0.0  ;;  %v623_v14 = vadd.f32 %v1722_v30, %v622_v10  ;;  %v1467_v15 = vpop.f32.mrb[11].mxu1  ;;  %v702_v16 = vmax.f32 %v516_v5, 0.0 }
  0xfe   : > { %v703_v17 = vmax.f32 %v519_v11, 0.0  ;;  %v729_v18 = vmax.f32 %v623_v14, 0.0 }
 0x100   : > { %v1231_v19 = vpack.c.bf16 %v703_v17, %v702_v16  ;;  %v1296_v20 = vpack.c.bf16 %v729_v18, %v728_v13 }
 0x101   : > { %v523_v21 = vpop.f32.mrb[12].mxu0  ;;  %v627_v22 = vpop.f32.mrb[12].mxu1 }
 0x102   : > { %1344 = vst [vmem:[%s1733_s4 + $0x10] sm:$0xff] %v1231_v19   ;;  %1357 = vst [vmem:[%s1733_s4 + $0x78] sm:$0xff] %v1296_v20   ;;  %v524_v23 = vadd.f32 %v1722_v30, %v523_v21  ;;  %v1418_v24 = vpop.f32.mrb[13].mxu0  ;;  %v628_v25 = vadd.f32 %v1722_v30, %v627_v22  ;;  %v1470_v26 = vpop.f32.mrb[13].mxu1 }
 0x103   : > { %v526_v27 = vpop.f32.mrb[14].mxu0  ;;  %v630_v28 = vpop.f32.mrb[14].mxu1 }
 0x104   : > { %v527_v29 = vadd.f32 %v1722_v30, %v526_v27  ;;  %v1419_v31 = vpop.f32.mrb[15].mxu0  ;;  %v730_v32 = vmax.f32 %v628_v25, 0.0  ;;  %v631_v33 = vadd.f32 %v1722_v30, %v630_v28  ;;  %v1471_v34 = vpop.f32.mrb[15].mxu1  ;;  %v704_v35 = vmax.f32 %v524_v23, 0.0 }
 0x106   : > { %v705_v36 = vmax.f32 %v527_v29, 0.0  ;;  %v731_v37 = vmax.f32 %v631_v33, 0.0 }
 0x108   : > { %v1236_v38 = vpack.c.bf16 %v705_v36, %v704_v35  ;;  %v1301_v39 = vpack.c.bf16 %v731_v37, %v730_v32 }
 0x109   : > { %v531_v40 = vpop.f32.mrb[16].mxu0  ;;  %v635_v41 = vpop.f32.mrb[16].mxu1 }
 0x10a   : > { %1345 = vst [vmem:[%s1733_s4 + $0x18] sm:$0xff] %v1236_v38   ;;  %1358 = vst [vmem:[%s1733_s4 + $0x80] sm:$0xff] %v1301_v39   ;;  %v532_v42 = vadd.f32 %v1722_v30, %v531_v40  ;;  %v1422_v43 = vpop.f32.mrb[17].mxu0  ;;  %v636_v44 = vadd.f32 %v1722_v30, %v635_v41  ;;  %v1474_v45 = vpop.f32.mrb[17].mxu1 }
 0x10b   : > { %v534_v46 = vpop.f32.mrb[18].mxu0  ;;  %v638_v47 = vpop.f32.mrb[18].mxu1 }
 0x10c   : > { %v535_v48 = vadd.f32 %v1722_v30, %v534_v46  ;;  %v1423_v49 = vpop.f32.mrb[19].mxu0  ;;  %v732_v50 = vmax.f32 %v636_v44, 0.0  ;;  %v639_v51 = vadd.f32 %v1722_v30, %v638_v47  ;;  %v1475_v52 = vpop.f32.mrb[19].mxu1  ;;  %v706_v53 = vmax.f32 %v532_v42, 0.0 }
 0x10e   : > { %v707_v54 = vmax.f32 %v535_v48, 0.0  ;;  %v733_v55 = vmax.f32 %v639_v51, 0.0 }
 0x110   : > { %v1241_v56 = vpack.c.bf16 %v707_v54, %v706_v53  ;;  %v1306_v57 = vpack.c.bf16 %v733_v55, %v732_v50 }
 0x111   : > { %v539_v58 = vpop.f32.mrb[20].mxu0  ;;  %v643_v59 = vpop.f32.mrb[20].mxu1 }
 0x112   : > { %1346 = vst [vmem:[%s1733_s4 + $0x20] sm:$0xff] %v1241_v56   ;;  %1359 = vst [vmem:[%s1733_s4 + $0x88] sm:$0xff] %v1306_v57   ;;  %v540_v60 = vadd.f32 %v1722_v30, %v539_v58  ;;  %v1426_v61 = vpop.f32.mrb[21].mxu0  ;;  %v644_v62 = vadd.f32 %v1722_v30, %v643_v59  ;;  %v1478_v63 = vpop.f32.mrb[21].mxu1 }
 0x113   : > { %v542_v0 = vpop.f32.mrb[22].mxu0  ;;  %v646_v1 = vpop.f32.mrb[22].mxu1 }
 0x114   : > { %v543_v2 = vadd.f32 %v1722_v30, %v542_v0  ;;  %v1427_v3 = vpop.f32.mrb[23].mxu0  ;;  %v734_v4 = vmax.f32 %v644_v62, 0.0  ;;  %v647_v5 = vadd.f32 %v1722_v30, %v646_v1  ;;  %v1479_v6 = vpop.f32.mrb[23].mxu1  ;;  %v708_v7 = vmax.f32 %v540_v60, 0.0 }
 0x116   : > { %v709_v8 = vmax.f32 %v543_v2, 0.0  ;;  %v735_v9 = vmax.f32 %v647_v5, 0.0 }
 0x118   : > { %v1246_v10 = vpack.c.bf16 %v709_v8, %v708_v7  ;;  %v1311_v11 = vpack.c.bf16 %v735_v9, %v734_v4 }
 0x119   : > { %v547_v12 = vpop.f32.mrb[24].mxu0  ;;  %v651_v13 = vpop.f32.mrb[24].mxu1 }
 0x11a   : > { %1347 = vst [vmem:[%s1733_s4 + $0x28] sm:$0xff] %v1246_v10   ;;  %1360 = vst [vmem:[%s1733_s4 + $0x90] sm:$0xff] %v1311_v11   ;;  %v548_v14 = vadd.f32 %v1722_v30, %v547_v12  ;;  %v1430_v15 = vpop.f32.mrb[25].mxu0  ;;  %v652_v16 = vadd.f32 %v1722_v30, %v651_v13  ;;  %v1482_v17 = vpop.f32.mrb[25].mxu1 }
 0x11b   : > { %v550_v18 = vpop.f32.mrb[26].mxu0  ;;  %v654_v19 = vpop.f32.mrb[26].mxu1 }
 0x11c   : > { %v551_v20 = vadd.f32 %v1722_v30, %v550_v18  ;;  %v1431_v21 = vpop.f32.mrb[27].mxu0  ;;  %v736_v22 = vmax.f32 %v652_v16, 0.0  ;;  %v655_v23 = vadd.f32 %v1722_v30, %v654_v19  ;;  %v1483_v24 = vpop.f32.mrb[27].mxu1  ;;  %v710_v25 = vmax.f32 %v548_v14, 0.0 }
 0x11e   : > { %v711_v26 = vmax.f32 %v551_v20, 0.0  ;;  %v737_v27 = vmax.f32 %v655_v23, 0.0 }
 0x120   : > { %v1251_v28 = vpack.c.bf16 %v711_v26, %v710_v25  ;;  %v1316_v29 = vpack.c.bf16 %v737_v27, %v736_v22 }
 0x121   : > { %v555_v31 = vpop.f32.mrb[28].mxu0  ;;  %v659_v32 = vpop.f32.mrb[28].mxu1 }
 0x122   : > { %1348 = vst [vmem:[%s1733_s4 + $0x30] sm:$0xff] %v1251_v28   ;;  %1361 = vst [vmem:[%s1733_s4 + $0x98] sm:$0xff] %v1316_v29   ;;  %v556_v33 = vadd.f32 %v1722_v30, %v555_v31  ;;  %v1434_v34 = vpop.f32.mrb[29].mxu0  ;;  %v660_v35 = vadd.f32 %v1722_v30, %v659_v32  ;;  %v1486_v36 = vpop.f32.mrb[29].mxu1 }
 0x123   : > { %v558_v37 = vpop.f32.mrb[30].mxu0  ;;  %v662_v38 = vpop.f32.mrb[30].mxu1 }
 0x124   : > { %v559_v39 = vadd.f32 %v1722_v30, %v558_v37  ;;  %v1435_v40 = vpop.f32.mrb[31].mxu0  ;;  %v738_v41 = vmax.f32 %v660_v35, 0.0  ;;  %v663_v42 = vadd.f32 %v1722_v30, %v662_v38  ;;  %v1487_v43 = vpop.f32.mrb[31].mxu1  ;;  %v712_v44 = vmax.f32 %v556_v33, 0.0 }
 0x126   : > { %v713_v45 = vmax.f32 %v559_v39, 0.0  ;;  %v739_v46 = vmax.f32 %v663_v42, 0.0 }
 0x128   : > { %v1256_v47 = vpack.c.bf16 %v713_v45, %v712_v44  ;;  %v1321_v48 = vpack.c.bf16 %v739_v46, %v738_v41 }
 0x129   : > { %v563_v49 = vpop.f32.mrb[32].mxu0  ;;  %v667_v50 = vpop.f32.mrb[32].mxu1 }
 0x12a   : > { %1349 = vst [vmem:[%s1733_s4 + $0x38] sm:$0xff] %v1256_v47   ;;  %1362 = vst [vmem:[%s1733_s4 + $0xa0] sm:$0xff] %v1321_v48   ;;  %v564_v51 = vadd.f32 %v1722_v30, %v563_v49  ;;  %v1438_v52 = vpop.f32.mrb[33].mxu0  ;;  %v668_v53 = vadd.f32 %v1722_v30, %v667_v50  ;;  %v1490_v54 = vpop.f32.mrb[33].mxu1 }
 0x12b   : > { %v566_v55 = vpop.f32.mrb[34].mxu0  ;;  %v670_v56 = vpop.f32.mrb[34].mxu1 }
 0x12c   : > { %v567_v57 = vadd.f32 %v1722_v30, %v566_v55  ;;  %v1439_v58 = vpop.f32.mrb[35].mxu0  ;;  %v740_v59 = vmax.f32 %v668_v53, 0.0  ;;  %v671_v60 = vadd.f32 %v1722_v30, %v670_v56  ;;  %v1491_v61 = vpop.f32.mrb[35].mxu1  ;;  %v714_v62 = vmax.f32 %v564_v51, 0.0 }
 0x12e   : > { %v715_v63 = vmax.f32 %v567_v57, 0.0  ;;  %v741_v0 = vmax.f32 %v671_v60, 0.0 }
 0x130   : > { %v1261_v1 = vpack.c.bf16 %v715_v63, %v714_v62  ;;  %v1326_v2 = vpack.c.bf16 %v741_v0, %v740_v59 }
 0x131   : > { %v571_v3 = vpop.f32.mrb[36].mxu0  ;;  %v675_v4 = vpop.f32.mrb[36].mxu1 }
 0x132   : > { %1350 = vst [vmem:[%s1733_s4 + $0x40] sm:$0xff] %v1261_v1   ;;  %1363 = vst [vmem:[%s1733_s4 + $0xa8] sm:$0xff] %v1326_v2   ;;  %v572_v5 = vadd.f32 %v1722_v30, %v571_v3  ;;  %v1442_v6 = vpop.f32.mrb[37].mxu0  ;;  %v676_v7 = vadd.f32 %v1722_v30, %v675_v4  ;;  %v1494_v8 = vpop.f32.mrb[37].mxu1 }
 0x133   : > { %v574_v9 = vpop.f32.mrb[38].mxu0  ;;  %v678_v10 = vpop.f32.mrb[38].mxu1 }
 0x134   : > { %v575_v11 = vadd.f32 %v1722_v30, %v574_v9  ;;  %v1443_v12 = vpop.f32.mrb[39].mxu0  ;;  %v742_v13 = vmax.f32 %v676_v7, 0.0  ;;  %v679_v14 = vadd.f32 %v1722_v30, %v678_v10  ;;  %v1495_v15 = vpop.f32.mrb[39].mxu1  ;;  %v716_v16 = vmax.f32 %v572_v5, 0.0 }
 0x136   : > { %v717_v17 = vmax.f32 %v575_v11, 0.0  ;;  %v743_v18 = vmax.f32 %v679_v14, 0.0 }
 0x138   : > { %v1266_v19 = vpack.c.bf16 %v717_v17, %v716_v16  ;;  %v1331_v20 = vpack.c.bf16 %v743_v18, %v742_v13 }
 0x139   : > { %v579_v21 = vpop.f32.mrb[40].mxu0  ;;  %v683_v22 = vpop.f32.mrb[40].mxu1 }
 0x13a   : > { %1351 = vst [vmem:[%s1733_s4 + $0x48] sm:$0xff] %v1266_v19   ;;  %1364 = vst [vmem:[%s1733_s4 + $0xb0] sm:$0xff] %v1331_v20   ;;  %v580_v23 = vadd.f32 %v1722_v30, %v579_v21  ;;  %v1446_v24 = vpop.f32.mrb[41].mxu0  ;;  %v684_v25 = vadd.f32 %v1722_v30, %v683_v22  ;;  %v1498_v26 = vpop.f32.mrb[41].mxu1 }
 0x13b   : > { %v582_v27 = vpop.f32.mrb[42].mxu0  ;;  %v686_v28 = vpop.f32.mrb[42].mxu1 }
 0x13c   : > { %v583_v29 = vadd.f32 %v1722_v30, %v582_v27  ;;  %v1447_v31 = vpop.f32.mrb[43].mxu0  ;;  %v744_v32 = vmax.f32 %v684_v25, 0.0  ;;  %v687_v33 = vadd.f32 %v1722_v30, %v686_v28  ;;  %v1499_v34 = vpop.f32.mrb[43].mxu1  ;;  %v718_v35 = vmax.f32 %v580_v23, 0.0 }
 0x13e   : > { %v719_v36 = vmax.f32 %v583_v29, 0.0  ;;  %v745_v37 = vmax.f32 %v687_v33, 0.0 }
 0x140   : > { %v1271_v38 = vpack.c.bf16 %v719_v36, %v718_v35  ;;  %v1336_v39 = vpack.c.bf16 %v745_v37, %v744_v32 }
 0x141   : > { %v587_v40 = vpop.f32.mrb[44].mxu0  ;;  %v691_v41 = vpop.f32.mrb[44].mxu1 }
 0x142   : > { %1352 = vst [vmem:[%s1733_s4 + $0x50] sm:$0xff] %v1271_v38   ;;  %1365 = vst [vmem:[%s1733_s4 + $0xb8] sm:$0xff] %v1336_v39   ;;  %v588_v42 = vadd.f32 %v1722_v30, %v587_v40  ;;  %v1450_v43 = vpop.f32.mrb[45].mxu0  ;;  %v692_v44 = vadd.f32 %v1722_v30, %v691_v41  ;;  %v1502_v45 = vpop.f32.mrb[45].mxu1 }
 0x143   : > { %v590_v46 = vpop.f32.mrb[46].mxu0  ;;  %v694_v47 = vpop.f32.mrb[46].mxu1 }
 0x144   : > { %v591_v48 = vadd.f32 %v1722_v30, %v590_v46  ;;  %v1451_v49 = vpop.f32.mrb[47].mxu0  ;;  %v746_v50 = vmax.f32 %v692_v44, 0.0  ;;  %v695_v51 = vadd.f32 %v1722_v30, %v694_v47  ;;  %v1503_v52 = vpop.f32.mrb[47].mxu1  ;;  %v720_v53 = vmax.f32 %v588_v42, 0.0 }
 0x146   : > { %v721_v54 = vmax.f32 %v591_v48, 0.0  ;;  %v747_v55 = vmax.f32 %v695_v51, 0.0 }
 0x148   : > { %v1276_v56 = vpack.c.bf16 %v721_v54, %v720_v53  ;;  %v1341_v57 = vpack.c.bf16 %v747_v55, %v746_v50 }
 0x149   : > { %v595_v58 = vpop.f32.mrb[48].mxu0 }
 0x14a   : > { %1353 = vst [vmem:[%s1733_s4 + $0x58] sm:$0xff] %v1276_v56   ;;  %1366 = vst [vmem:[%s1733_s4 + $0xc0] sm:$0xff] %v1341_v57   ;;  %v596_v59 = vadd.f32 %v1722_v30, %v595_v58  ;;  %v1454_v60 = vpop.f32.mrb[49].mxu0 }
 0x14b   : > { %v598_v61 = vpop.f32.mrb[50].mxu0 }
 0x14c   : > { %v599_v62 = vadd.f32 %v1722_v30, %v598_v61  ;;  %v1455_v63 = vpop.f32.mrb[51].mxu0  ;;  %v722_v0 = vmax.f32 %v596_v59, 0.0 }
 0x14e   : > { %v723_v1 = vmax.f32 %v599_v62, 0.0 }
 0x150   : > { %v1281_v2 = vpack.c.bf16 %v723_v1, %v722_v0 }
 0x152   : > { %1354 = vst [vmem:[%s1733_s4 + $0x60] sm:$0xff] %v1281_v2  }
 0x153 PF: > { %s13_s12 = sadd.s32 1, %s1557_s12  }
 0x154   : > { %p10_p4 = scmp.ge.s32.totalorder %s13_s12, 4  }
 0x156   :  { %12 = sbr.rel (!%p10_p4) target bundleno = 1 (0x1), region = 62 }

// kernel: dqn_forward.5
= control target key start
LH: loop header
LB: loop body
LE: loop exit
PB: predicated region body
PF: predicated region fallthrough
CT: control target
= control target key end

     0   :  { %s1612_s12 = smov 0   ;;  %s1614_s13 = smov 0   ;;  %s1856_s0 = inlined_call_operand.vmem [shape: bf16[162,512], index: 0, kind: input, shape index: {}]   ;;  %s1857_s1 = inlined_call_operand.vmem [shape: bf16[512,128], index: 1, kind: input, shape index: {}]   ;;  %s1858_s2 = inlined_call_operand.vmem [shape: f32[1,128], index: 2, kind: input, shape index: {}]   ;;  %s1859_s3 = inlined_call_operand.vmem [shape: bf16[162,128], index: 3, kind: output, shape index: {}]  }
   0x1   :  { %s1616_s14 = smov 0  }
   0x2 LB: > { %s1625_s15 = sadd.s32 4294967295, %s1558_s14   ;;  %s1627_s16 = sadd.s32 1, %s1558_s14   ;;  %s1558_s14 = sphi %s1616_s14, %s1866_s14   ;;  %s1554_s13 = sphi %s1614_s13, %s1865_s13   ;;  %s1550_s12 = sphi %s1612_s12, %s1864_s12  }
   0x3   : > { %s85_s17 = ssub.s32 %s1558_s14, %s1627_s16  ;;  %s88_s18 = sadd.s32 1, %s1554_s13 }
   0x4   : > { %p86_p0 = scmp.eq.s32.totalorder %s85_s17, 0  ;;  %p98_p1 = scmp.ne.s32.totalorder %s1554_s13, %s1550_s12 }
   0x5   : > { %p99_p2 = scmp.eq.s32.totalorder %s1625_s15, 1  ;;  %p1105_p3 = scmp.ge.s32.totalorder %s1558_s14, 1 }
   0x6   : > { %s1635_s19 = scalar_select %p86_p0, %s1554_s13, %s88_s18  }
   0x7   : > { %p1637_p4 = por %p99_p2, %p98_p1  ;;  %p149_p5 = scmp.lt.s32.totalorder %s1558_s14, 3 }
   0x9   : > { %p150_p6 = pnand %p1105_p3, %p149_p5 }
   0xa   : > { %v1432_v0 = vld [vmem:[%s1857_s1 + $0x40] sm:$0xff] (!%p150_p6)   ;;  %v1436_v4 = vld [vmem:[%s1857_s1 + $0x48] sm:$0xff] (!%p150_p6)   ;;  %v1440_v8 = vld [vmem:[%s1857_s1 + $0x50] sm:$0xff] (!%p150_p6)   ;;  %s1687_s30 = smul.u32 (!%p150_p6), 12, %s1625_s15  ;;  %s175_s5 = sand.u32 (!%p150_p6), 1, %s1550_s12  }
   0xb   : > { %153 = sbr.rel (%p150_p6) target bundleno = 379 (0x17b), region = 32  ;;  %v1433_v1 = vld [vmem:[%s1857_s1 + $0xc0] sm:$0xff] (!%p150_p6)   ;;  %1238 = vmatprep.subr.bf16.mxu0 (!%p150_p6), %v1432_v0  ;;  %v1437_v5 = vld [vmem:[%s1857_s1 + $0xc8] sm:$0xff] (!%p150_p6)   ;;  %v1441_v9 = vld [vmem:[%s1857_s1 + $0xd0] sm:$0xff] (!%p150_p6)  }
   0xc   : > { %v1434_v2 = vld [vmem:[%s1857_s1] sm:$0xff] (!%p150_p6)   ;;  %1290 = vmatprep.subr.bf16.mxu1 (!%p150_p6), %v1433_v1  ;;  %v1438_v6 = vld [vmem:[%s1857_s1 + $0x8] sm:$0xff] (!%p150_p6)   ;;  %v1442_v10 = vld [vmem:[%s1857_s1 + $0x10] sm:$0xff] (!%p150_p6)   ;;  %p184_p7 = scmp.lt.s32.totalorder (!%p150_p6), %s1687_s30, 20  ;;  %s1342_s6 = smul.u32 (!%p150_p6), 48, %s175_s5 }
   0xd   : > { %v1435_v3 = vld [vmem:[%s1857_s1 + $0x80] sm:$0xff] (!%p150_p6)   ;;  %1239 = vmatpush3.bf16.msra.mxu0 (!%p150_p6), %v1434_v2  ;;  %v1439_v7 = vld [vmem:[%s1857_s1 + $0x88] sm:$0xff] (!%p150_p6)   ;;  %v1443_v11 = vld [vmem:[%s1857_s1 + $0x90] sm:$0xff] (!%p150_p6)  }
   0xe   : > { %1291 = vmatpush3.bf16.msra.mxu1 (!%p150_p6), %v1435_v3  ;;  %1240 = vmatprep.subr.bf16.mxu0 (!%p150_p6), %v1436_v4  ;;  %v1444_v12 = vld [vmem:[%s1857_s1 + $0x58] sm:$0xff] (!%p150_p6)   ;;  %v1448_v16 = vld [vmem:[%s1857_s1 + $0x60] sm:$0xff] (!%p150_p6)   ;;  %v1452_v20 = vld [vmem:[%s1857_s1 + $0x68] sm:$0xff] (!%p150_p6)   ;;  %s1780_s12 = scalar_lea.vmem (!%p150_p6), [#allocation2], %s1342_s6  }
   0xf   : > { %1292 = vmatprep.subr.bf16.mxu1 (!%p150_p6), %v1437_v5  ;;  %v1445_v13 = vld [vmem:[%s1857_s1 + $0xd8] sm:$0xff] (!%p150_p6)   ;;  %v1449_v17 = vld [vmem:[%s1857_s1 + $0xe0] sm:$0xff] (!%p150_p6)   ;;  %v1453_v21 = vld [vmem:[%s1857_s1 + $0xe8] sm:$0xff] (!%p150_p6)  }
  0x10   : > { %v1446_v14 = vld [vmem:[%s1857_s1 + $0x18] sm:$0xff] (!%p150_p6)   ;;  %v1450_v18 = vld [vmem:[%s1857_s1 + $0x20] sm:$0xff] (!%p150_p6)   ;;  %v1454_v22 = vld [vmem:[%s1857_s1 + $0x28] sm:$0xff] (!%p150_p6)  }
  0x11   : > { %1241 = vmatpush3.bf16.msra.mxu0 (!%p150_p6), %v1438_v6  ;;  %v1447_v15 = vld [vmem:[%s1857_s1 + $0x98] sm:$0xff] (!%p150_p6)   ;;  %v1451_v19 = vld [vmem:[%s1857_s1 + $0xa0] sm:$0xff] (!%p150_p6)   ;;  %v1455_v23 = vld [vmem:[%s1857_s1 + $0xa8] sm:$0xff] (!%p150_p6)  }
  0x12   : > { %1293 = vmatpush3.bf16.msra.mxu1 %v1439_v7  ;;  %1242 = vmatprep.subr.bf16.mxu0 %v1440_v8  ;;  %s185_s26 = scalar_select %p184_p7, %s1687_s30, 20  ;;  %v1456_v24 = vld [vmem:[%s1857_s1 + $0x70] sm:$0xff]   ;;  %v1460_v28 = vld [vmem:[%s1857_s1 + $0x78] sm:$0xff]   ;;  %v1774_v58 = vld [vmem:[%s1858_s2] ss:$0 sm:$0xff] }
  0x13   : > { %1294 = vmatprep.subr.bf16.mxu1 %v1441_v9  ;;  %v1457_v25 = vld [vmem:[%s1857_s1 + $0xf0] sm:$0xff]   ;;  %v1461_v29 = vld [vmem:[%s1857_s1 + $0xf8] sm:$0xff]   ;;  %s850_s7 = ssub.s32 (%p1637_p4), 21, %s1687_s30  ;;  %s1202_s8 = smul.u32 (%p1637_p4), 48, %s1625_s15 }
  0x14   : > { %v1458_v26 = vld [vmem:[%s1857_s1 + $0x30] sm:$0xff]   ;;  %s1189_s9 = sshll.u32 %s185_s26, 4  ;;  %v1462_v30 = vld [vmem:[%s1857_s1 + $0x38] sm:$0xff]   ;;  %p851_p8 = scmp.lt.s32.totalorder (%p1637_p4), %s850_s7, 12 }
  0x15   : > { %1243 = vmatpush3.bf16.msra.mxu0 %v1442_v10  ;;  %v1459_v27 = vld [vmem:[%s1857_s1 + $0xb0] sm:$0xff]   ;;  %s1739_s24 = scalar_lea.vmem %s1856_s0, %s1189_s9  ;;  %v1463_v31 = vld [vmem:[%s1857_s1 + $0xb8] sm:$0xff]   ;;  %s1804_s11 = scalar_lea.vmem (%p1637_p4), %s1859_s3, %s1202_s8  }
  0x16   : > { %1295 = vmatpush3.bf16.msra.mxu1 %v1443_v11  ;;  %1244 = vmatprep.subr.bf16.mxu0 %v1444_v12  ;;  %v1464_v32 = vld [vmem:[%s1739_s24] ss:$16 sps:$4 sm:$0xff]   ;;  %v1466_v33 = vld [vmem:[%s1739_s24 + $0x4] ss:$16 sps:$4 sm:$0xff]   ;;  %v1467_v34 = vld [vmem:[%s1739_s24 + $0x8] ss:$16 sps:$4 sm:$0xff]  }
  0x17   : > { %1296 = vmatprep.subr.bf16.mxu1 %v1445_v13  ;;  %v1469_v35 = vld [vmem:[%s1739_s24 + $0xc] ss:$16 sps:$4 sm:$0xff]   ;;  %640 = vmatprep.mubr.bf16.mxu0 %v1466_v33  ;;  %v1470_v36 = vld [vmem:[%s1739_s24 + $0x24] ss:$16 sps:$4 sm:$0xff]   ;;  %v1474_v38 = vld [vmem:[%s1739_s24 + $0x20] ss:$16 sps:$4 sm:$0xff]  }
  0x18   : > { %721 = vmatprep.mubr.bf16.mxu1 %v1469_v35  ;;  %v1472_v37 = vld [vmem:[%s1739_s24 + $0x2c] ss:$16 sps:$4 sm:$0xff]   ;;  %v1475_v39 = vld [vmem:[%s1739_s24 + $0x28] ss:$16 sps:$4 sm:$0xff]   ;;  %v1476_v40 = vld [vmem:[%s1739_s24 + $0x44] ss:$16 sps:$4 sm:$0xff]  }
  0x19   : > { %1245 = vmatpush3.bf16.msra.mxu0 %v1446_v14  ;;  %v1478_v41 = vld [vmem:[%s1739_s24 + $0x4c] ss:$16 sps:$4 sm:$0xff]   ;;  %v1480_v42 = vld [vmem:[%s1739_s24 + $0x40] ss:$16 sps:$4 sm:$0xff]   ;;  %v1481_v43 = vld [vmem:[%s1739_s24 + $0x48] ss:$16 sps:$4 sm:$0xff]  }
  0x1a   : > { %1297 = vmatpush3.bf16.msra.mxu1 %v1447_v15  ;;  %1246 = vmatprep.subr.bf16.mxu0 %v1448_v16  ;;  %v1482_v44 = vld [vmem:[%s1739_s24 + $0x64] ss:$16 sps:$4 sm:$0xff]   ;;  %v1484_v45 = vld [vmem:[%s1739_s24 + $0x6c] ss:$16 sps:$4 sm:$0xff]   ;;  %v1486_v46 = vld [vmem:[%s1739_s24 + $0x60] ss:$16 sps:$4 sm:$0xff]  }
  0x1b   : > { %1298 = vmatprep.subr.bf16.mxu1 %v1449_v17  ;;  %v1487_v47 = vld [vmem:[%s1739_s24 + $0x68] ss:$16 sps:$4 sm:$0xff]   ;;  %v1488_v48 = vld [vmem:[%s1739_s24 + $0x84] ss:$16 sps:$4 sm:$0xff]   ;;  %v1490_v49 = vld [vmem:[%s1739_s24 + $0x8c] ss:$16 sps:$4 sm:$0xff]  }
  0x1c   : > { %v1492_v50 = vld [vmem:[%s1739_s24 + $0x80] ss:$16 sps:$4 sm:$0xff]   ;;  %v1493_v51 = vld [vmem:[%s1739_s24 + $0x88] ss:$16 sps:$4 sm:$0xff]   ;;  %v1494_v52 = vld [vmem:[%s1739_s24 + $0xa4] ss:$16 sps:$4 sm:$0xff]  }
  0x1d   : > { %1247 = vmatpush3.bf16.msra.mxu0 %v1450_v18  ;;  %v1496_v53 = vld [vmem:[%s1739_s24 + $0xac] ss:$16 sps:$4 sm:$0xff]   ;;  %v1498_v54 = vld [vmem:[%s1739_s24 + $0xa0] ss:$16 sps:$4 sm:$0xff]   ;;  %v1499_v55 = vld [vmem:[%s1739_s24 + $0xa8] ss:$16 sps:$4 sm:$0xff]  }
  0x1e   : > { %1299 = vmatpush3.bf16.msra.mxu1 %v1451_v19  ;;  %1248 = vmatprep.subr.bf16.mxu0 %v1452_v20 }
  0x1f   : > { %1300 = vmatprep.subr.bf16.mxu1 %v1453_v21 }
  0x21   : > { %1249 = vmatpush3.bf16.msra.mxu0 %v1454_v22 }
  0x22   : > { %1301 = vmatpush3.bf16.msra.mxu1 %v1455_v23  ;;  %1250 = vmatprep.subr.bf16.mxu0 %v1456_v24 }
  0x23   : > { %1302 = vmatprep.subr.bf16.mxu1 %v1457_v25 }
  0x25   : > { %1251 = vmatpush3.bf16.msra.mxu0 %v1458_v26 }
  0x26   : > { %1303 = vmatpush3.bf16.msra.mxu1 %v1459_v27  ;;  %1252 = vmatprep.subr.bf16.mxu0 %v1460_v28 }
  0x27   : > { %1304 = vmatprep.subr.bf16.mxu1 %v1461_v29 }
  0x29   : > { %1253 = vmatpush3.bf16.msra.mxu0 %v1462_v30 }
  0x2a   : > { %1305 = vmatpush3.bf16.msra.mxu1 %v1463_v31 }
  0x2c   : > { %641 = vmatmul.mubr.bf16.vlgmr.msra.gmra.mrb[0].mxu0 %v1464_v32 }
  0x2d   : > { %722 = vmatmul.mubr.bf16.vlgmr.msra.gmra.mrb[0].mxu1 %v1467_v34  ;;  %648 = vmatprep.mubr.bf16.mxu0 %v1470_v36 }
  0x2e   : > { %729 = vmatprep.mubr.bf16.mxu1 %v1472_v37 }
  0x34   : > { %649 = vmatmul.mubr.bf16.gmra.mrb[4].mxu0 %v1474_v38 }
  0x35   : > { %730 = vmatmul.mubr.bf16.gmra.mrb[4].mxu1 %v1475_v39  ;;  %656 = vmatprep.mubr.bf16.mxu0 %v1476_v40 }
  0x36   : > { %737 = vmatprep.mubr.bf16.mxu1 %v1478_v41 }
  0x3c   : > { %657 = vmatmul.mubr.bf16.gmra.mrb[8].mxu0 %v1480_v42 }
  0x3d   : > { %738 = vmatmul.mubr.bf16.gmra.mrb[8].mxu1 %v1481_v43  ;;  %664 = vmatprep.mubr.bf16.mxu0 %v1482_v44 }
  0x3e   : > { %745 = vmatprep.mubr.bf16.mxu1 %v1484_v45 }
  0x44   : > { %665 = vmatmul.mubr.bf16.gmra.mrb[12].mxu0 %v1486_v46 }
  0x45   : > { %746 = vmatmul.mubr.bf16.gmra.mrb[12].mxu1 %v1487_v47  ;;  %672 = vmatprep.mubr.bf16.mxu0 %v1488_v48 }
  0x46   : > { %753 = vmatprep.mubr.bf16.mxu1 %v1490_v49 }
  0x4c   : > { %673 = vmatmul.mubr.bf16.gmra.mrb[16].mxu0 %v1492_v50 }
  0x4d   : > { %754 = vmatmul.mubr.bf16.gmra.mrb[16].mxu1 %v1493_v51  ;;  %680 = vmatprep.mubr.bf16.mxu0 %v1494_v52 }
  0x4e   : > { %761 = vmatprep.mubr.bf16.mxu1 %v1496_v53 }
  0x54   : > { %681 = vmatmul.mubr.bf16.gmra.mrb[20].mxu0 %v1498_v54 }
  0x55   : > { %762 = vmatmul.mubr.bf16.gmra.mrb[20].mxu1 %v1499_v55 }
  0xff   : > { %v1254_v56 = vpop.f32.mrb[0].mxu0 }
 0x100   : > { %v1306_v57 = vpop.f32.mrb[0].mxu1  ;;  %v1255_v59 = vpop.f32.mrb[1].mxu0 }
 0x101   : > { %v1256_v60 = vadd.f32 %v1255_v59, %v1254_v56  ;;  %v1307_v61 = vpop.f32.mrb[1].mxu1  ;;  %v1257_v62 = vpop.f32.mrb[2].mxu0 }
 0x102   : > { %v1308_v63 = vadd.f32 %v1307_v61, %v1306_v57  ;;  %v1309_v0 = vpop.f32.mrb[2].mxu1  ;;  %v1258_v1 = vpop.f32.mrb[3].mxu0 }
 0x103   : > { %v643_v2 = vadd.f32 %v1256_v60, %v1774_v58  ;;  %v1259_v3 = vadd.f32 %v1258_v1, %v1257_v62  ;;  %v1310_v4 = vpop.f32.mrb[3].mxu1 }
 0x104   : > { %v1311_v5 = vadd.f32 %v1310_v4, %v1309_v0 }
 0x105   : > { %v724_v6 = vadd.f32 %v1308_v63, %v643_v2  ;;  %v646_v7 = vadd.f32 %v1259_v3, %v1774_v58 }
 0x107   : > { %v727_v8 = vadd.f32 %v1311_v5, %v646_v7  ;;  %v1260_v9 = vpop.f32.mrb[4].mxu0  ;;  %v770_v12 = vmax.f32 %v724_v6, 0.0 }
 0x108   : > { %v1312_v10 = vpop.f32.mrb[4].mxu1  ;;  %v1261_v11 = vpop.f32.mrb[5].mxu0 }
 0x109   : > { %v771_v13 = vmax.f32 %v727_v8, 0.0  ;;  %v1262_v14 = vadd.f32 %v1261_v11, %v1260_v9  ;;  %v1313_v15 = vpop.f32.mrb[5].mxu1  ;;  %v1263_v16 = vpop.f32.mrb[6].mxu0 }
 0x10a   : > { %v1314_v17 = vadd.f32 %v1313_v15, %v1312_v10  ;;  %v1315_v18 = vpop.f32.mrb[6].mxu1  ;;  %v1264_v19 = vpop.f32.mrb[7].mxu0 }
 0x10b   : > { %v1206_v20 = vpack.c.bf16 %v771_v13, %v770_v12  ;;  %v651_v21 = vadd.f32 %v1262_v14, %v1774_v58  ;;  %v1265_v22 = vadd.f32 %v1264_v19, %v1263_v16  ;;  %v1316_v23 = vpop.f32.mrb[7].mxu1 }
 0x10c   : > { %v1317_v24 = vadd.f32 %v1316_v23, %v1315_v18 }
 0x10d   : > { %1207 = vst [vmem:[%s1780_s12] sm:$0xff] %v1206_v20   ;;  %v732_v25 = vadd.f32 %v1314_v17, %v651_v21  ;;  %v654_v26 = vadd.f32 %v1265_v22, %v1774_v58 }
 0x10f   : > { %v735_v27 = vadd.f32 %v1317_v24, %v654_v26  ;;  %v1266_v28 = vpop.f32.mrb[8].mxu0  ;;  %v772_v31 = vmax.f32 %v732_v25, 0.0 }
 0x110   : > { %v1318_v29 = vpop.f32.mrb[8].mxu1  ;;  %v1267_v30 = vpop.f32.mrb[9].mxu0 }
 0x111   : > { %v773_v32 = vmax.f32 %v735_v27, 0.0  ;;  %v1268_v33 = vadd.f32 %v1267_v30, %v1266_v28  ;;  %v1319_v34 = vpop.f32.mrb[9].mxu1  ;;  %v1269_v35 = vpop.f32.mrb[10].mxu0 }
 0x112   : > { %v1320_v36 = vadd.f32 %v1319_v34, %v1318_v29  ;;  %v1321_v37 = vpop.f32.mrb[10].mxu1  ;;  %v1270_v38 = vpop.f32.mrb[11].mxu0 }
 0x113   : > { %v1211_v39 = vpack.c.bf16 %v773_v32, %v772_v31  ;;  %v659_v40 = vadd.f32 %v1268_v33, %v1774_v58  ;;  %v1271_v41 = vadd.f32 %v1270_v38, %v1269_v35  ;;  %v1322_v42 = vpop.f32.mrb[11].mxu1 }
 0x114   : > { %v1323_v43 = vadd.f32 %v1322_v42, %v1321_v37 }
 0x115   : > { %1233 = vst [vmem:[%s1780_s12 + $0x8] sm:$0xff] %v1211_v39   ;;  %v740_v44 = vadd.f32 %v1320_v36, %v659_v40  ;;  %v662_v45 = vadd.f32 %v1271_v41, %v1774_v58 }
 0x117   : > { %v743_v46 = vadd.f32 %v1323_v43, %v662_v45  ;;  %v1272_v47 = vpop.f32.mrb[12].mxu0  ;;  %v774_v50 = vmax.f32 %v740_v44, 0.0 }
 0x118   : > { %v1324_v48 = vpop.f32.mrb[12].mxu1  ;;  %v1273_v49 = vpop.f32.mrb[13].mxu0 }
 0x119   : > { %v775_v51 = vmax.f32 %v743_v46, 0.0  ;;  %v1274_v52 = vadd.f32 %v1273_v49, %v1272_v47  ;;  %v1325_v53 = vpop.f32.mrb[13].mxu1  ;;  %v1275_v54 = vpop.f32.mrb[14].mxu0 }
 0x11a   : > { %v1326_v55 = vadd.f32 %v1325_v53, %v1324_v48  ;;  %v1327_v56 = vpop.f32.mrb[14].mxu1  ;;  %v1276_v57 = vpop.f32.mrb[15].mxu0 }
 0x11b   : > { %v1216_v59 = vpack.c.bf16 %v775_v51, %v774_v50  ;;  %v667_v60 = vadd.f32 %v1274_v52, %v1774_v58  ;;  %v1277_v61 = vadd.f32 %v1276_v57, %v1275_v54  ;;  %v1328_v62 = vpop.f32.mrb[15].mxu1 }
 0x11c   : > { %v1329_v63 = vadd.f32 %v1328_v62, %v1327_v56 }
 0x11d   : > { %1234 = vst [vmem:[%s1780_s12 + $0x10] sm:$0xff] %v1216_v59   ;;  %v748_v0 = vadd.f32 %v1326_v55, %v667_v60  ;;  %v670_v1 = vadd.f32 %v1277_v61, %v1774_v58 }
 0x11f   : > { %v751_v2 = vadd.f32 %v1329_v63, %v670_v1  ;;  %v1278_v3 = vpop.f32.mrb[16].mxu0  ;;  %v776_v6 = vmax.f32 %v748_v0, 0.0 }
 0x120   : > { %v1330_v4 = vpop.f32.mrb[16].mxu1  ;;  %v1279_v5 = vpop.f32.mrb[17].mxu0 }
 0x121   : > { %v777_v7 = vmax.f32 %v751_v2, 0.0  ;;  %v1280_v8 = vadd.f32 %v1279_v5, %v1278_v3  ;;  %v1331_v9 = vpop.f32.mrb[17].mxu1  ;;  %v1281_v10 = vpop.f32.mrb[18].mxu0 }
 0x122   : > { %v1332_v11 = vadd.f32 %v1331_v9, %v1330_v4  ;;  %v1333_v12 = vpop.f32.mrb[18].mxu1  ;;  %v1282_v13 = vpop.f32.mrb[19].mxu0 }
 0x123   : > { %v1221_v14 = vpack.c.bf16 %v777_v7, %v776_v6  ;;  %v675_v15 = vadd.f32 %v1280_v8, %v1774_v58  ;;  %v1283_v16 = vadd.f32 %v1282_v13, %v1281_v10  ;;  %v1334_v17 = vpop.f32.mrb[19].mxu1 }
 0x124   : > { %v1335_v18 = vadd.f32 %v1334_v17, %v1333_v12 }
 0x125   : > { %1235 = vst [vmem:[%s1780_s12 + $0x18] sm:$0xff] %v1221_v14   ;;  %v756_v19 = vadd.f32 %v1332_v11, %v675_v15  ;;  %v678_v20 = vadd.f32 %v1283_v16, %v1774_v58 }
 0x127   : > { %v759_v21 = vadd.f32 %v1335_v18, %v678_v20  ;;  %v1284_v22 = vpop.f32.mrb[20].mxu0  ;;  %v778_v25 = vmax.f32 %v756_v19, 0.0 }
 0x128   : > { %v1336_v23 = vpop.f32.mrb[20].mxu1  ;;  %v1285_v24 = vpop.f32.mrb[21].mxu0 }
 0x129   : > { %v779_v26 = vmax.f32 %v759_v21, 0.0  ;;  %v1286_v27 = vadd.f32 %v1285_v24, %v1284_v22  ;;  %v1337_v28 = vpop.f32.mrb[21].mxu1  ;;  %v1287_v29 = vpop.f32.mrb[22].mxu0 }
 0x12a   : > { %v1338_v30 = vadd.f32 %v1337_v28, %v1336_v23  ;;  %v1339_v31 = vpop.f32.mrb[22].mxu1  ;;  %v1288_v32 = vpop.f32.mrb[23].mxu0 }
 0x12b   : > { %v1226_v33 = vpack.c.bf16 %v779_v26, %v778_v25  ;;  %v683_v34 = vadd.f32 %v1286_v27, %v1774_v58  ;;  %v1289_v35 = vadd.f32 %v1288_v32, %v1287_v29  ;;  %v1340_v36 = vpop.f32.mrb[23].mxu1 }
 0x12c   : > { %v1341_v37 = vadd.f32 %v1340_v36, %v1339_v31 }
 0x12d   : > { %1236 = vst [vmem:[%s1780_s12 + $0x20] sm:$0xff] %v1226_v33   ;;  %v764_v38 = vadd.f32 %v1338_v30, %v683_v34  ;;  %v686_v39 = vadd.f32 %v1289_v35, %v1774_v58 }
 0x12f   : > { %v767_v40 = vadd.f32 %v1341_v37, %v686_v39  ;;  %v780_v41 = vmax.f32 %v764_v38, 0.0  ;;  %848 = sbr.rel (!%p1637_p4) target bundleno = 379 (0x17b), region = 36 }
 0x131   : > { %v781_v42 = vmax.f32 %v767_v40, 0.0 }
 0x133   : > { %v1231_v43 = vpack.c.bf16 %v781_v42, %v780_v41 }
 0x135   : > { %1237 = vst [vmem:[%s1780_s12 + $0x28] sm:$0xff] %v1231_v43  }
 0x136   : > { %s1868_s7 = smov (!%p851_p8, %s850_s7), 12 }
 0x137   : > { %s1177_s14 = sshll.u32 %s1868_s7, 6 }
 0x138   : > { %p1180_p9 = scmp.eq.s32.totalorder %s1177_s14, 0 }
 0x139   : > { %1500 = sdivrem.u32 (!%p1180_p9), %s1868_s7, 12 }
 0x13a   : > { %859 = sbr.rel (%p1180_p9) target bundleno = 379 (0x17b), region = 40 }
 0x142   : > { %s1810_s20 = spop.drf %1500 }
 0x143   : > { %p1181_p10 = scmp.le.s32.totalorder %s1810_s20, 0 }
 0x144   : > { %s1861_s15 = smov (!%p1181_p10), %s1804_s11  ;;  %s1862_s30 = smov (!%p1181_p10), %s1780_s12 }
 0x145   : > { %1058 = sbr.rel (%p1181_p10) target bundleno = 350 (0x15e), region = 112  ;;  %s1819_s17 = smov (!%p1181_p10), 0  }
 0x146   : > { %s1821_s18 = smov (!%p1181_p10), 0  }
 0x14c LB: >> { %v876_v58 = vld [vmem:[%s1566_s30] sm:$0xf]  ;;  %v878_v44 = vld [vmem:[%s1566_s30 + $0x4] sm:$0xf]  ;;  %v880_v45 = vld [vmem:[%s1566_s30 + $0x8] sm:$0xf]  ;;  %s1574_s18 = sphi %s1821_s18, %s870_s18   ;;  %s1570_s17 = sphi %s1819_s17, %s1863_s17   ;;  %s1566_s30 = sphi %s1862_s30, %s905_s30   ;;  %s1562_s15 = sphi %s1861_s15, %s906_s15  }
 0x14d   : >> { %877 = vst [vmem:[%s1562_s15] sm:$0xf] %v876_v58  ;;  %879 = vst [vmem:[%s1562_s15 + $0x4] sm:$0xf] %v878_v44  ;;  %v882_v46 = vld [vmem:[%s1566_s30 + $0xc] sm:$0xf]  ;;  %s900_s21 = sadd.s32 1, %s1570_s17 }
 0x14e   : >> { %881 = vst [vmem:[%s1562_s15 + $0x8] sm:$0xf] %v880_v45  ;;  %v884_v47 = vld [vmem:[%s1566_s30 + $0x10] sm:$0xf]  ;;  %v886_v48 = vld [vmem:[%s1566_s30 + $0x14] sm:$0xf]  ;;  %p901_p11 = scmp.ge.s32.totalorder %s900_s21, %s1810_s20 }
 0x14f   : >> { %883 = vst [vmem:[%s1562_s15 + $0xc] sm:$0xf] %v882_v46  ;;  %885 = vst [vmem:[%s1562_s15 + $0x10] sm:$0xf] %v884_v47  ;;  %v888_v49 = vld [vmem:[%s1566_s30 + $0x18] sm:$0xf] }
 0x150   : >> { %887 = vst [vmem:[%s1562_s15 + $0x14] sm:$0xf] %v886_v48  ;;  %v890_v50 = vld [vmem:[%s1566_s30 + $0x1c] sm:$0xf]  ;;  %v892_v51 = vld [vmem:[%s1566_s30 + $0x20] sm:$0xf] }
 0x151   : >> { %889 = vst [vmem:[%s1562_s15 + $0x18] sm:$0xf] %v888_v49  ;;  %891 = vst [vmem:[%s1562_s15 + $0x1c] sm:$0xf] %v890_v50  ;;  %v894_v52 = vld [vmem:[%s1566_s30 + $0x24] sm:$0xf] }
 0x152   : >> { %893 = vst [vmem:[%s1562_s15 + $0x20] sm:$0xf] %v892_v51  ;;  %v896_v53 = vld [vmem:[%s1566_s30 + $0x28] sm:$0xf]  ;;  %v898_v54 = vld [vmem:[%s1566_s30 + $0x2c] sm:$0xf] }
 0x153   : >> { %895 = vst [vmem:[%s1562_s15 + $0x24] sm:$0xf] %v894_v52  ;;  %897 = vst [vmem:[%s1562_s15 + $0x28] sm:$0xf] %v896_v53  ;;  %s1870_s21 = smov (%p901_p11, %s900_s21), 0  ;;  %s870_s18 = sadd.s32 1, %s1574_s18  }
 0x154   : >> { %899 = vst [vmem:[%s1562_s15 + $0x2c] sm:$0xf] %v898_v54  ;;  %s903_s22 = smul.u32 48, %s1870_s21  ;;  %p869_p12 = scmp.ge.s32.totalorder %s870_s18, %s1810_s20 }
 0x155   : >> { %s1863_s17 = smov %s1870_s21 }
 0x156   : >> { %s905_s30 = scalar_lea.vmem %s1780_s12, %s903_s22 [#allocation2]   ;;  %s906_s15 = scalar_lea.vmem %s1804_s11, %s903_s22  }
 0x157   : > { %872 = sbr.rel (!%p869_p12) target bundleno = 332 (0x14c), region = 118 }
 0x15e PF: > { %1502 = sdivrem.u32 %s1868_s7, 12 }
 0x15f   : > { %s1182_s23 = smul.u32 48, %s1810_s20 }
 0x161   : > { %s911_s24 = scalar_lea.vmem %s1780_s12, %s1182_s23 [#allocation2]   ;;  %s913_s25 = scalar_lea.vmem %s1804_s11, %s1182_s23  }
 0x167   : > { %s1503_s26 = spop.drf %1502 }
 0x168   : > { %p1184_p13 = scmp.le.s32.totalorder %s1503_s26, 0 }
 0x169   : > { %s1576_s27 = smov (!%p1184_p13), %s913_s25   ;;  %s1580_s28 = smov (!%p1184_p13), %s911_s24  }
 0x16a   : > { %1072 = sbr.rel (%p1184_p13) target bundleno = 379 (0x17b), region = 123  ;;  %s1584_s29 = smov (!%p1184_p13), 0  }
 0x16b   : > { %s1588_s4 = smov (!%p1184_p13), 0  }
 0x171 LB: >> { %v923_v55 = vld [vmem:[%s1582_s28] sm:$0xf]  ;;  %s925_s5 = sadd.s32 1, %s1586_s29  ;;  %s917_s4 = sadd.s32 1, %s1590_s4   ;;  %s1590_s4 = sphi %s1588_s4, %s917_s4   ;;  %s1586_s29 = sphi %s1584_s29, %s1585_s29   ;;  %s1582_s28 = sphi %s1580_s28, %s930_s28   ;;  %s1578_s27 = sphi %s1576_s27, %s931_s27  }
 0x172   : >> { %924 = vst [vmem:[%s1578_s27] sm:$0xf] %v923_v55  ;;  %p926_p0 = scmp.ge.s32.totalorder %s925_s5, %s1503_s26  ;;  %p916_p1 = scmp.ge.s32.totalorder %s917_s4, %s1503_s26 }
 0x174   : >> { %s1872_s5 = smov (%p926_p0, %s925_s5), 0  ;;  %919 = sbr.rel (!%p916_p1) target bundleno = 369 (0x171), region = 129 }
 0x175   : >> { %s1185_s6 = sshll.u32 %s1872_s5, 2  ;;  %s1585_s29 = smov %s1872_s5  }
 0x176   : >> { %s930_s28 = scalar_lea.vmem %s911_s24, %s1185_s6 [#allocation2]   ;;  %s931_s27 = scalar_lea.vmem %s913_s25, %s1185_s6  }
 0x17b PF: > { %p10_p2 = scmp.ge.s32.totalorder %s1627_s16, 4   ;;  %s1864_s12 = smov %s1554_s13 }
 0x17c   : > { %s1865_s13 = smov %s1635_s19  ;;  %s1866_s14 = smov %s1627_s16 }
 0x17d   :  { %12 = sbr.rel (!%p10_p2) target bundleno = 2 (0x2), region = 140 }

// kernel: dqn_forward.6
= control target key start
LH: loop header
LB: loop body
LE: loop exit
PB: predicated region body
PF: predicated region fallthrough
CT: control target
= control target key end

     0   :  { %s1618_s12 = smov 0   ;;  %s1620_s13 = smov 0   ;;  %s1859_s0 = inlined_call_operand.vmem [shape: bf16[98,576], index: 0, kind: input, shape index: {}]   ;;  %s1860_s1 = inlined_call_operand.vmem [shape: bf16[576,128], index: 1, kind: input, shape index: {}]   ;;  %s1861_s2 = inlined_call_operand.vmem [shape: f32[1,128], index: 2, kind: input, shape index: {}]   ;;  %s1862_s3 = inlined_call_operand.vmem [shape: bf16[98,128], index: 3, kind: output, shape index: {}]  }
   0x1   :  { %s1622_s14 = smov 0  }
   0x2 LB: > { %s1631_s15 = sadd.s32 4294967295, %s1564_s14   ;;  %s1633_s16 = sadd.s32 1, %s1564_s14   ;;  %s1564_s14 = sphi %s1622_s14, %s1869_s14   ;;  %s1560_s13 = sphi %s1620_s13, %s1868_s13   ;;  %s1556_s12 = sphi %s1618_s12, %s1867_s12  }
   0x3   : > { %s85_s17 = ssub.s32 %s1564_s14, %s1633_s16  ;;  %s88_s18 = sadd.s32 1, %s1560_s13 }
   0x4   : > { %p86_p0 = scmp.eq.s32.totalorder %s85_s17, 0  ;;  %p98_p1 = scmp.ne.s32.totalorder %s1560_s13, %s1556_s12 }
   0x5   : > { %p99_p2 = scmp.eq.s32.totalorder %s1631_s15, 1  ;;  %p1121_p3 = scmp.ge.s32.totalorder %s1564_s14, 1 }
   0x6   : > { %s1641_s19 = scalar_select %p86_p0, %s1560_s13, %s88_s18  }
   0x7   : > { %p1643_p4 = por %p99_p2, %p98_p1  ;;  %p149_p5 = scmp.lt.s32.totalorder %s1564_s14, 3 }
   0x9   : > { %p150_p6 = pnand %p1121_p3, %p149_p5 }
   0xa   : > { %v1446_v0 = vld [vmem:[%s1860_s1 + $0x40] sm:$0xff] (!%p150_p6)   ;;  %v1450_v4 = vld [vmem:[%s1860_s1 + $0x48] sm:$0xff] (!%p150_p6)   ;;  %v1454_v8 = vld [vmem:[%s1860_s1 + $0x50] sm:$0xff] (!%p150_p6)   ;;  %s1693_s30 = sshll.u32 (!%p150_p6), %s1631_s15, 3  ;;  %vm620_vm0 = vcmask (!%p150_p6), 523264   ;;  %s175_s17 = sand.u32 (!%p150_p6), 1, %s1556_s12  }
   0xb   : > { %153 = sbr.rel (%p150_p6) target bundleno = 353 (0x161), region = 32  ;;  %v1447_v1 = vld [vmem:[%s1860_s1 + $0xc0] sm:$0xff] (!%p150_p6)   ;;  %1245 = vmatprep.subr.bf16.mxu0 (!%p150_p6), %v1446_v0  ;;  %v1451_v5 = vld [vmem:[%s1860_s1 + $0xc8] sm:$0xff] (!%p150_p6)   ;;  %v1455_v9 = vld [vmem:[%s1860_s1 + $0xd0] sm:$0xff] (!%p150_p6)   ;;  %p184_p7 = scmp.lt.s32.totalorder (!%p150_p6), %s1693_s30, 12 }
   0xc   : > { %v1448_v2 = vld [vmem:[%s1860_s1] sm:$0xff] (!%p150_p6)   ;;  %1285 = vmatprep.subr.bf16.mxu1 (!%p150_p6), %v1447_v1  ;;  %v1452_v6 = vld [vmem:[%s1860_s1 + $0x8] sm:$0xff] (!%p150_p6)   ;;  %v1456_v10 = vld [vmem:[%s1860_s1 + $0x10] sm:$0xff] (!%p150_p6)   ;;  %s1122_s18 = sshll.u32 (!%p150_p6), %s175_s17, 5 }
   0xd   : > { %v1449_v3 = vld [vmem:[%s1860_s1 + $0x80] sm:$0xff] (!%p150_p6)   ;;  %1246 = vmatpush3.bf16.msra.mxu0 (!%p150_p6), %v1448_v2  ;;  %v1453_v7 = vld [vmem:[%s1860_s1 + $0x88] sm:$0xff] (!%p150_p6)   ;;  %v1457_v11 = vld [vmem:[%s1860_s1 + $0x90] sm:$0xff] (!%p150_p6)   ;;  %s1792_s12 = scalar_lea.vmem (!%p150_p6), [#allocation2], %s1122_s18  }
   0xe   : > { %1286 = vmatpush3.bf16.msra.mxu1 (!%p150_p6), %v1449_v3  ;;  %1247 = vmatprep.subr.bf16.mxu0 (!%p150_p6), %v1450_v4  ;;  %v1458_v12 = vld [vmem:[%s1860_s1 + $0x58] sm:$0xff] (!%p150_p6)   ;;  %v1462_v16 = vld [vmem:[%s1860_s1 + $0x60] sm:$0xff] (!%p150_p6)   ;;  %v1466_v20 = vld [vmem:[%s1860_s1 + $0x68] sm:$0xff] (!%p150_p6)  }
   0xf   : > { %1287 = vmatprep.subr.bf16.mxu1 (!%p150_p6), %v1451_v5  ;;  %v1459_v13 = vld [vmem:[%s1860_s1 + $0xd8] sm:$0xff] (!%p150_p6)   ;;  %v1463_v17 = vld [vmem:[%s1860_s1 + $0xe0] sm:$0xff] (!%p150_p6)   ;;  %v1467_v21 = vld [vmem:[%s1860_s1 + $0xe8] sm:$0xff] (!%p150_p6)  }
  0x10   : > { %v1460_v14 = vld [vmem:[%s1860_s1 + $0x18] sm:$0xff] (!%p150_p6)   ;;  %v1464_v18 = vld [vmem:[%s1860_s1 + $0x20] sm:$0xff] (!%p150_p6)   ;;  %v1468_v22 = vld [vmem:[%s1860_s1 + $0x28] sm:$0xff] (!%p150_p6)  }
  0x11   : > { %1248 = vmatpush3.bf16.msra.mxu0 (!%p150_p6), %v1452_v6  ;;  %v1461_v15 = vld [vmem:[%s1860_s1 + $0x98] sm:$0xff] (!%p150_p6)   ;;  %v1465_v19 = vld [vmem:[%s1860_s1 + $0xa0] sm:$0xff] (!%p150_p6)   ;;  %v1469_v23 = vld [vmem:[%s1860_s1 + $0xa8] sm:$0xff] (!%p150_p6)  }
  0x12   : > { %1288 = vmatpush3.bf16.msra.mxu1 %v1453_v7  ;;  %1249 = vmatprep.subr.bf16.mxu0 %v1454_v8  ;;  %s185_s24 = scalar_select %p184_p7, %s1693_s30, 12  ;;  %v1470_v24 = vld [vmem:[%s1860_s1 + $0x70] sm:$0xff]   ;;  %v1474_v28 = vld [vmem:[%s1860_s1 + $0x78] sm:$0xff]   ;;  %v1484_v36 = vld [vmem:[%s1860_s1 + $0x100] sm:$0xff]  }
  0x13   : > { %1289 = vmatprep.subr.bf16.mxu1 %v1455_v9  ;;  %v1471_v25 = vld [vmem:[%s1860_s1 + $0xf0] sm:$0xff]   ;;  %v1475_v29 = vld [vmem:[%s1860_s1 + $0xf8] sm:$0xff]   ;;  %v1491_v39 = vld [vmem:[%s1860_s1 + $0x108] sm:$0xff]   ;;  %s884_s21 = ssub.s32 (%p1643_p4), 13, %s1693_s30  ;;  %s1219_s22 = sshll.u32 (%p1643_p4), %s1631_s15, 5 }
  0x14   : > { %s1357_s7 = smul.u32 20, %s185_s24  ;;  %v1472_v26 = vld [vmem:[%s1860_s1 + $0x30] sm:$0xff]   ;;  %v1476_v30 = vld [vmem:[%s1860_s1 + $0x38] sm:$0xff]   ;;  %v1125_v58 = vld [vmem:[%s1861_s2] ss:$0 sm:$0xff]  ;;  %p885_p8 = scmp.lt.s32.totalorder (%p1643_p4), %s884_s21, 8 }
  0x15   : > { %1250 = vmatpush3.bf16.msra.mxu0 %v1456_v10  ;;  %v1473_v27 = vld [vmem:[%s1860_s1 + $0xb0] sm:$0xff]   ;;  %v1477_v31 = vld [vmem:[%s1860_s1 + $0xb8] sm:$0xff]   ;;  %s1805_s25 = scalar_lea.vmem (%p1643_p4), %s1862_s3, %s1219_s22  }
  0x16   : > { %1290 = vmatpush3.bf16.msra.mxu1 %v1457_v11  ;;  %1251 = vmatprep.subr.bf16.mxu0 %v1458_v12  ;;  %s1745_s24 = scalar_lea.vmem %s1859_s0, %s1357_s7  ;;  %v1498_v44 = vld [vmem:[%s1860_s1 + $0x110] sm:$0xff]   ;;  %v1505_v45 = vld [vmem:[%s1860_s1 + $0x118] sm:$0xff]  }
  0x17   : > { %1291 = vmatprep.subr.bf16.mxu1 %v1459_v13  ;;  %v1478_v32 = vld [vmem:[%s1745_s24] ss:$20 sps:$4 sm:$0xff]   ;;  %v1480_v33 = vld [vmem:[%s1745_s24 + $0x4] ss:$20 sps:$4 sm:$0xff]   ;;  %v1481_v34 = vld [vmem:[%s1745_s24 + $0x8] ss:$20 sps:$4 sm:$0xff]  }
  0x18   : > { %v1483_v35 = vld [vmem:[%s1745_s24 + $0xc] ss:$20 sps:$4 sm:$0xff]   ;;  %665 = vmatprep.mubr.bf16.mxu0 %v1480_v33  ;;  %v1487_v38 = vld [vmem:[%s1745_s24 + $0x34] ss:$20 sps:$4 sm:$0xff]   ;;  %v1490_v41 = vld [vmem:[%s1745_s24 + $0x30] ss:$20 sps:$4 sm:$0xff]  }
  0x19   : > { %1252 = vmatpush3.bf16.msra.mxu0 %v1460_v14  ;;  %730 = vmatprep.mubr.bf16.mxu1 %v1483_v35  ;;  %v1485_v37 = vld [vmem:[%s1745_s24 + $0x2c] ss:$20 sps:$4 sm:$0xff]   ;;  %v1489_v40 = vld [vmem:[%s1745_s24 + $0x28] ss:$20 sps:$4 sm:$0xff]   ;;  %v1496_v46 = vld [vmem:[%s1745_s24 + $0x50] ss:$20 sps:$4 sm:$0xff]  }
  0x1a   : > { %1292 = vmatpush3.bf16.msra.mxu1 %v1461_v15  ;;  %1253 = vmatprep.subr.bf16.mxu0 %v1462_v16  ;;  %v1492_v42 = vld [vmem:[%s1745_s24 + $0x54] ss:$20 sps:$4 sm:$0xff]   ;;  %v1494_v43 = vld [vmem:[%s1745_s24 + $0x5c] ss:$20 sps:$4 sm:$0xff]   ;;  %v1497_v47 = vld [vmem:[%s1745_s24 + $0x58] ss:$20 sps:$4 sm:$0xff]  }
  0x1b   : > { %1293 = vmatprep.subr.bf16.mxu1 %v1463_v17  ;;  %v1499_v48 = vld [vmem:[%s1745_s24 + $0x7c] ss:$20 sps:$4 sm:$0xff]   ;;  %v1501_v49 = vld [vmem:[%s1745_s24 + $0x84] ss:$20 sps:$4 sm:$0xff]   ;;  %v1504_v51 = vld [vmem:[%s1745_s24 + $0x80] ss:$20 sps:$4 sm:$0xff]  }
  0x1c   : > { %v1503_v50 = vld [vmem:[%s1745_s24 + $0x78] ss:$20 sps:$4 sm:$0xff]   ;;  %v1506_v52 = vld [vmem:[%s1745_s24 + $0x10] ss:$20 sps:$4 sm:$0xff]   ;;  %v1507_v53 = vld [vmem:[%s1745_s24 + $0x60] ss:$20 sps:$4 sm:$0xff]  }
  0x1d   : > { %1254 = vmatpush3.bf16.msra.mxu0 %v1464_v18  ;;  %v1508_v54 = vld [vmem:[%s1745_s24 + $0x38] ss:$20 sps:$4 sm:$0xff]   ;;  %v1509_v55 = vld [vmem:[%s1745_s24 + $0x88] ss:$20 sps:$4 sm:$0xff]  }
  0x1e   : > { %1294 = vmatpush3.bf16.msra.mxu1 %v1465_v19  ;;  %1255 = vmatprep.subr.bf16.mxu0 %v1466_v20 }
  0x1f   : > { %1295 = vmatprep.subr.bf16.mxu1 %v1467_v21 }
  0x21   : > { %1256 = vmatpush3.bf16.msra.mxu0 %v1468_v22 }
  0x22   : > { %1296 = vmatpush3.bf16.msra.mxu1 %v1469_v23  ;;  %1257 = vmatprep.subr.bf16.mxu0 %v1470_v24 }
  0x23   : > { %1297 = vmatprep.subr.bf16.mxu1 %v1471_v25 }
  0x25   : > { %1258 = vmatpush3.bf16.msra.mxu0 %v1472_v26 }
  0x26   : > { %1298 = vmatpush3.bf16.msra.mxu1 %v1473_v27  ;;  %1259 = vmatprep.subr.bf16.mxu0 %v1474_v28 }
  0x27   : > { %1299 = vmatprep.subr.bf16.mxu1 %v1475_v29 }
  0x29   : > { %1260 = vmatpush3.bf16.msra.mxu0 %v1476_v30 }
  0x2a   : > { %1300 = vmatpush3.bf16.msra.mxu1 %v1477_v31  ;;  %1333 = vmatprep.subr.bf16.mxu0 %v1484_v36 }
  0x2b   : > { %1349 = vmatprep.subr.bf16.mxu1 %v1484_v36 }
  0x2c   : > { %666 = vmatmul.mubr.bf16.vlgmr.msra.gmra.mrb[0].mxu0 %v1478_v32 }
  0x2d   : > { %731 = vmatmul.mubr.bf16.vlgmr.msra.gmra.mrb[0].mxu1 %v1481_v34  ;;  %1334 = vmatpush3.bf16.msra.mxu0 %v1484_v36 }
  0x2e   : > { %1353 = vmatpush3.bf16.msra.mxu1 %v1484_v36  ;;  %673 = vmatprep.mubr.bf16.mxu0 %v1485_v37 }
  0x2f   : > { %738 = vmatprep.mubr.bf16.mxu1 %v1487_v38  ;;  %1335 = vmatprep.subr.bf16.mxu0 %v1491_v39 }
  0x30   : > { %1350 = vmatprep.subr.bf16.mxu1 %v1491_v39 }
  0x31   : > { %1336 = vmatpush3.bf16.msra.mxu0 %v1491_v39 }
  0x32   : > { %1354 = vmatpush3.bf16.msra.mxu1 %v1491_v39  ;;  %1337 = vmatprep.subr.bf16.mxu0 %v1498_v44 }
  0x33   : > { %1351 = vmatprep.subr.bf16.mxu1 %v1498_v44 }
  0x34   : > { %674 = vmatmul.mubr.bf16.gmra.mrb[4].mxu0 %v1489_v40 }
  0x35   : > { %739 = vmatmul.mubr.bf16.gmra.mrb[4].mxu1 %v1490_v41  ;;  %681 = vmatprep.mubr.bf16.mxu0 %v1492_v42 }
  0x36   : > { %746 = vmatprep.mubr.bf16.mxu1 %v1494_v43  ;;  %1338 = vmatpush3.bf16.msra.mxu0 %v1498_v44 }
  0x37   : > { %1355 = vmatpush3.bf16.msra.mxu1 %v1498_v44  ;;  %1339 = vmatprep.subr.bf16.mxu0 %v1505_v45 }
  0x38   : > { %1352 = vmatprep.subr.bf16.mxu1 %v1505_v45 }
  0x3a   : > { %1340 = vmatpush3.bf16.msra.mxu0 %v1505_v45 }
  0x3b   : > { %1356 = vmatpush3.bf16.msra.mxu1 %v1505_v45 }
  0x3c   : > { %682 = vmatmul.mubr.bf16.gmra.mrb[8].mxu0 %v1496_v46 }
  0x3d   : > { %747 = vmatmul.mubr.bf16.gmra.mrb[8].mxu1 %v1497_v47  ;;  %689 = vmatprep.mubr.bf16.mxu0 %v1499_v48 }
  0x3e   : > { %754 = vmatprep.mubr.bf16.mxu1 %v1501_v49 }
  0x44   : > { %690 = vmatmul.mubr.bf16.gmra.mrb[12].mxu0 %v1503_v50 }
  0x45   : > { %755 = vmatmul.mubr.bf16.gmra.mrb[12].mxu1 %v1504_v51  ;;  %1341 = vmatprep.mubr.msk.bf16.mxu0 %vm620_vm0, %v1506_v52 }
  0x46   : > { %1345 = vmatprep.mubr.msk.bf16.mxu1 %vm620_vm0, %v1507_v53 }
  0x4c   : > { %1342 = vmatmul.mubr.msk.bf16.vlgmr.msra.gmra.mrb[16].mxu0 %vm620_vm0, %v1508_v54 }
  0x4d   : > { %1346 = vmatmul.mubr.msk.bf16.vlgmr.msra.gmra.mrb[16].mxu1 %vm620_vm0, %v1509_v55 }
  0xff   : > { %v1261_v56 = vpop.f32.mrb[0].mxu0 }
 0x100   : > { %v1301_v57 = vpop.f32.mrb[0].mxu1  ;;  %v1262_v59 = vpop.f32.mrb[1].mxu0 }
 0x101   : > { %v1263_v60 = vadd.f32 %v1262_v59, %v1261_v56  ;;  %v1302_v61 = vpop.f32.mrb[1].mxu1  ;;  %v1264_v62 = vpop.f32.mrb[2].mxu0 }
 0x102   : > { %v1303_v63 = vadd.f32 %v1302_v61, %v1301_v57  ;;  %v1304_v0 = vpop.f32.mrb[2].mxu1  ;;  %v1265_v1 = vpop.f32.mrb[3].mxu0 }
 0x103   : > { %v668_v2 = vadd.f32 %v1263_v60, %v1125_v58  ;;  %v1266_v3 = vadd.f32 %v1265_v1, %v1264_v62  ;;  %v1305_v4 = vpop.f32.mrb[3].mxu1 }
 0x104   : > { %v1306_v5 = vadd.f32 %v1305_v4, %v1304_v0 }
 0x105   : > { %v671_v6 = vadd.f32 %v1266_v3, %v1125_v58  ;;  %v733_v7 = vadd.f32 %v1303_v63, %v668_v2 }
 0x107   : > { %v1267_v8 = vpop.f32.mrb[4].mxu0  ;;  %v1788_v9 = vadd.f32 %v1306_v5, %v671_v6 }
 0x108   : > { %v1307_v10 = vpop.f32.mrb[4].mxu1  ;;  %v1268_v11 = vpop.f32.mrb[5].mxu0 }
 0x109   : > { %v1269_v12 = vadd.f32 %v1268_v11, %v1267_v8  ;;  %v1308_v13 = vpop.f32.mrb[5].mxu1  ;;  %v1270_v14 = vpop.f32.mrb[6].mxu0 }
 0x10a   : > { %v1309_v15 = vadd.f32 %v1308_v13, %v1307_v10  ;;  %v1310_v16 = vpop.f32.mrb[6].mxu1  ;;  %v1271_v17 = vpop.f32.mrb[7].mxu0 }
 0x10b   : > { %v676_v18 = vadd.f32 %v1269_v12, %v1125_v58  ;;  %v1272_v19 = vadd.f32 %v1271_v17, %v1270_v14  ;;  %v1311_v20 = vpop.f32.mrb[7].mxu1 }
 0x10c   : > { %v1312_v21 = vadd.f32 %v1311_v20, %v1310_v16 }
 0x10d   : > { %v679_v22 = vadd.f32 %v1272_v19, %v1125_v58  ;;  %v741_v23 = vadd.f32 %v1309_v15, %v676_v18 }
 0x10f   : > { %v1273_v24 = vpop.f32.mrb[8].mxu0  ;;  %v744_v25 = vadd.f32 %v1312_v21, %v679_v22 }
 0x110   : > { %v1313_v26 = vpop.f32.mrb[8].mxu1  ;;  %v1274_v27 = vpop.f32.mrb[9].mxu0 }
 0x111   : > { %v1275_v28 = vadd.f32 %v1274_v27, %v1273_v24  ;;  %v1314_v29 = vpop.f32.mrb[9].mxu1  ;;  %v1276_v30 = vpop.f32.mrb[10].mxu0 }
 0x112   : > { %v1315_v31 = vadd.f32 %v1314_v29, %v1313_v26  ;;  %v1316_v32 = vpop.f32.mrb[10].mxu1  ;;  %v1277_v33 = vpop.f32.mrb[11].mxu0 }
 0x113   : > { %v684_v34 = vadd.f32 %v1275_v28, %v1125_v58  ;;  %v1278_v35 = vadd.f32 %v1277_v33, %v1276_v30  ;;  %v1317_v36 = vpop.f32.mrb[11].mxu1 }
 0x114   : > { %v1318_v37 = vadd.f32 %v1317_v36, %v1316_v32 }
 0x115   : > { %v687_v38 = vadd.f32 %v1278_v35, %v1125_v58  ;;  %v749_v39 = vadd.f32 %v1315_v31, %v684_v34 }
 0x117   : > { %v1279_v40 = vpop.f32.mrb[12].mxu0  ;;  %v752_v41 = vadd.f32 %v1318_v37, %v687_v38 }
 0x118   : > { %v1319_v42 = vpop.f32.mrb[12].mxu1  ;;  %v1280_v43 = vpop.f32.mrb[13].mxu0 }
 0x119   : > { %v1281_v44 = vadd.f32 %v1280_v43, %v1279_v40  ;;  %v1320_v45 = vpop.f32.mrb[13].mxu1  ;;  %v1282_v46 = vpop.f32.mrb[14].mxu0 }
 0x11a   : > { %v1321_v47 = vadd.f32 %v1320_v45, %v1319_v42  ;;  %v1322_v48 = vpop.f32.mrb[14].mxu1  ;;  %v1283_v49 = vpop.f32.mrb[15].mxu0 }
 0x11b   : > { %v692_v50 = vadd.f32 %v1281_v44, %v1125_v58  ;;  %v1284_v51 = vadd.f32 %v1283_v49, %v1282_v46  ;;  %v1323_v52 = vpop.f32.mrb[15].mxu1 }
 0x11c   : > { %v1324_v53 = vadd.f32 %v1323_v52, %v1322_v48 }
 0x11d   : > { %v695_v54 = vadd.f32 %v1284_v51, %v1125_v58  ;;  %v757_v55 = vadd.f32 %v1321_v47, %v692_v50 }
 0x11f   : > { %v1343_v56 = vpop.f32.mrb[16].mxu0  ;;  %v760_v57 = vadd.f32 %v1324_v53, %v695_v54 }
 0x120   : > { %v806_v59 = vadd.f32 %v1343_v56, %v741_v23  ;;  %v1347_v60 = vpop.f32.mrb[16].mxu1  ;;  %v797_v61 = vpop.f32.mrb[17].mxu0 }
 0x121   : > { %v822_v62 = vadd.f32 %v1347_v60, %v757_v55  ;;  %v798_v63 = vadd.f32 %v797_v61, %v733_v7  ;;  %v813_v0 = vpop.f32.mrb[17].mxu1  ;;  %v1344_v1 = vpop.f32.mrb[18].mxu0 }
 0x122   : > { %v814_v2 = vadd.f32 %v813_v0, %v749_v39  ;;  %v809_v3 = vadd.f32 %v1344_v1, %v744_v25  ;;  %v1348_v4 = vpop.f32.mrb[18].mxu1  ;;  %v800_v5 = vpop.f32.mrb[19].mxu0  ;;  %v830_v10 = vmax.f32 %v806_v59, 0.0 }
 0x123   : > { %v825_v6 = vadd.f32 %v1348_v4, %v760_v57  ;;  %v801_v8 = vadd.f32 %v800_v5, %v1788_v9  ;;  %v816_v58 = vpop.f32.mrb[19].mxu1  ;;  %v834_v13 = vmax.f32 %v822_v62, 0.0  ;;  %v828_v14 = vmax.f32 %v798_v63, 0.0 }
 0x124   : > { %v831_v11 = vmax.f32 %v809_v3, 0.0  ;;  %v817_v12 = vadd.f32 %v816_v58, %v752_v41  ;;  %v832_v17 = vmax.f32 %v814_v2, 0.0  ;;  %882 = sbr.rel (!%p1643_p4) target bundleno = 353 (0x161), region = 36 }
 0x125   : > { %v835_v15 = vmax.f32 %v825_v6, 0.0  ;;  %v829_v16 = vmax.f32 %v801_v8, 0.0 }
 0x126   : > { %v1230_v7 = vpack.c.bf16 %v831_v11, %v830_v10  ;;  %v833_v18 = vmax.f32 %v817_v12, 0.0 }
 0x127   : > { %v1240_v19 = vpack.c.bf16 %v835_v15, %v834_v13  ;;  %v1225_v20 = vpack.c.bf16 %v829_v16, %v828_v14 }
 0x128   : > { %1242 = vst [vmem:[%s1792_s12 + $0x8] sm:$0xff] %v1230_v7   ;;  %v1235_v9 = vpack.c.bf16 %v833_v18, %v832_v17 }
 0x129   : > { %1244 = vst [vmem:[%s1792_s12 + $0x18] sm:$0xff] %v1240_v19   ;;  %1226 = vst [vmem:[%s1792_s12] sm:$0xff] %v1225_v20  }
 0x12a   : > { %1243 = vst [vmem:[%s1792_s12 + $0x10] sm:$0xff] %v1235_v9  }
 0x12b   : > { %s1871_s21 = smov (!%p885_p8, %s884_s21), 8 }
 0x12c   : > { %s1196_s26 = sshll.u32 %s1871_s21, 6 }
 0x12d   : > { %p1199_p9 = scmp.eq.s32.totalorder %s1196_s26, 0 }
 0x12e   : > { %s1811_s27 = sshrl.u32 (!%p1199_p9), %s1871_s21, 3 }
 0x12f   : > { %893 = sbr.rel (%p1199_p9) target bundleno = 353 (0x161), region = 40  ;;  %p1200_p10 = scmp.le.s32.totalorder (!%p1199_p9), %s1811_s27, 0 }
 0x136   : > { %1074 = sbr.rel (%p1200_p10) target bundleno = 332 (0x14c), region = 112  ;;  %s1864_s15 = smov (!%p1200_p10), %s1805_s25 }
 0x137   : > { %s1865_s20 = smov (!%p1200_p10), %s1792_s12  ;;  %s1820_s30 = smov (!%p1200_p10), 0  }
 0x138   : > { %s1822_s28 = smov (!%p1200_p10), 0  }
 0x13d LB: >> { %v909_v21 = vld [vmem:[%s1572_s20] sm:$0xf]  ;;  %v911_v22 = vld [vmem:[%s1572_s20 + $0x4] sm:$0xf]  ;;  %v913_v23 = vld [vmem:[%s1572_s20 + $0x8] sm:$0xf]  ;;  %s1580_s28 = sphi %s1822_s28, %s903_s28   ;;  %s1576_s30 = sphi %s1820_s30, %s1866_s30   ;;  %s1572_s20 = sphi %s1865_s20, %s930_s20   ;;  %s1568_s15 = sphi %s1864_s15, %s931_s15  }
 0x13e   : >> { %910 = vst [vmem:[%s1568_s15] sm:$0xf] %v909_v21  ;;  %912 = vst [vmem:[%s1568_s15 + $0x4] sm:$0xf] %v911_v22  ;;  %v915_v24 = vld [vmem:[%s1572_s20 + $0xc] sm:$0xf]  ;;  %s925_s29 = sadd.s32 1, %s1576_s30 }
 0x13f   : >> { %914 = vst [vmem:[%s1568_s15 + $0x8] sm:$0xf] %v913_v23  ;;  %v917_v25 = vld [vmem:[%s1572_s20 + $0x10] sm:$0xf]  ;;  %v919_v26 = vld [vmem:[%s1572_s20 + $0x14] sm:$0xf]  ;;  %p926_p11 = scmp.ge.s32.totalorder %s925_s29, %s1811_s27 }
 0x140   : >> { %916 = vst [vmem:[%s1568_s15 + $0xc] sm:$0xf] %v915_v24  ;;  %918 = vst [vmem:[%s1568_s15 + $0x10] sm:$0xf] %v917_v25  ;;  %v921_v27 = vld [vmem:[%s1572_s20 + $0x18] sm:$0xf] }
 0x141   : >> { %920 = vst [vmem:[%s1568_s15 + $0x14] sm:$0xf] %v919_v26  ;;  %v923_v28 = vld [vmem:[%s1572_s20 + $0x1c] sm:$0xf]  ;;  %922 = vst [vmem:[%s1568_s15 + $0x18] sm:$0xf] %v921_v27 }
 0x142   : >> { %924 = vst [vmem:[%s1568_s15 + $0x1c] sm:$0xf] %v923_v28  ;;  %s1873_s29 = smov (%p926_p11, %s925_s29), 0  ;;  %s903_s28 = sadd.s32 1, %s1580_s28  }
 0x143   : >> { %s1201_s4 = sshll.u32 %s1873_s29, 5  ;;  %p902_p12 = scmp.ge.s32.totalorder %s903_s28, %s1811_s27 }
 0x144   : >> { %s930_s20 = scalar_lea.vmem %s1792_s12, %s1201_s4 [#allocation2]   ;;  %s931_s15 = scalar_lea.vmem %s1805_s25, %s1201_s4  }
 0x145   : >> { %s1866_s30 = smov %s1873_s29  ;;  %905 = sbr.rel (!%p902_p12) target bundleno = 317 (0x13d), region = 118 }
 0x14c PF: > { %s1841_s5 = sand.u32 7, %s1871_s21   ;;  %s1220_s6 = sshll.u32 %s1811_s27, 5 }
 0x14d   : > { %s936_s7 = scalar_lea.vmem %s1792_s12, %s1220_s6 [#allocation2]   ;;  %s938_s8 = scalar_lea.vmem %s1805_s25, %s1220_s6  }
 0x14e   : > { %p1206_p13 = scmp.le.s32.totalorder %s1841_s5, 0 }
 0x14f   : > { %s1582_s9 = smov (!%p1206_p13), %s938_s8   ;;  %s1586_s10 = smov (!%p1206_p13), %s936_s7  }
 0x150   : > { %1088 = sbr.rel (%p1206_p13) target bundleno = 353 (0x161), region = 123  ;;  %s1590_s11 = smov (!%p1206_p13), 0  }
 0x151   : > { %s1594_s14 = smov (!%p1206_p13), 0  }
 0x157 LB: >> { %v948_v29 = vld [vmem:[%s1588_s10] sm:$0xf]  ;;  %s950_s17 = sadd.s32 1, %s1592_s11  ;;  %s942_s14 = sadd.s32 1, %s1596_s14   ;;  %s1596_s14 = sphi %s1594_s14, %s942_s14   ;;  %s1592_s11 = sphi %s1590_s11, %s1591_s11   ;;  %s1588_s10 = sphi %s1586_s10, %s955_s10   ;;  %s1584_s9 = sphi %s1582_s9, %s956_s9  }
 0x158   : >> { %949 = vst [vmem:[%s1584_s9] sm:$0xf] %v948_v29  ;;  %p951_p0 = scmp.ge.s32.totalorder %s950_s17, %s1841_s5  ;;  %p941_p1 = scmp.ge.s32.totalorder %s942_s14, %s1841_s5 }
 0x15a   : >> { %s1875_s17 = smov (%p951_p0, %s950_s17), 0  ;;  %944 = sbr.rel (!%p941_p1) target bundleno = 343 (0x157), region = 129 }
 0x15b   : >> { %s1207_s18 = sshll.u32 %s1875_s17, 2  ;;  %s1591_s11 = smov %s1875_s17  }
 0x15c   : >> { %s955_s10 = scalar_lea.vmem %s936_s7, %s1207_s18 [#allocation2]   ;;  %s956_s9 = scalar_lea.vmem %s938_s8, %s1207_s18  }
 0x161 PF: > { %p10_p2 = scmp.ge.s32.totalorder %s1633_s16, 4   ;;  %s1867_s12 = smov %s1560_s13 }
 0x162   : > { %s1868_s13 = smov %s1641_s19  ;;  %s1869_s14 = smov %s1633_s16 }
 0x163   :  { %12 = sbr.rel (!%p10_p2) target bundleno = 2 (0x2), region = 140 }

// kernel: dqn_forward.7
= control target key start
LH: loop header
LB: loop body
LE: loop exit
PB: predicated region body
PF: predicated region fallthrough
CT: control target
= control target key end

     0   :  { %v1605_v36 = vlaneseq  ;;  %v16671_v37 = vmov 1966171168   ;;  %s21842_s0 = inlined_call_operand.vmem [shape: bf16[2,6272], index: 0, kind: input, shape index: {}]   ;;  %s21843_s1 = inlined_call_operand.vmem [shape: bf16[6272,512], index: 1, kind: input, shape index: {}]   ;;  %s21844_s2 = inlined_call_operand.vmem [shape: f32[1,512], index: 2, kind: input, shape index: {}]   ;;  %s21845_s3 = inlined_call_operand.vmem [shape: bf16[512,128], index: 3, kind: input, shape index: {}]   ;;  %s21846_s4 = inlined_call_operand.vmem [shape: f32[1,128], index: 4, kind: input, shape index: {}]   ;;  %s21847_s5 = inlined_call_operand.vmem [shape: bf16[128,128], index: 5, kind: input, shape index: {}]   ;;  %s21848_s6 = inlined_call_operand.vmem [shape: f32[1,128], index: 6, kind: input, shape index: {}]   ;;  %s21849_s7 = inlined_call_operand.hbm [shape: f32[2,128], index: 7, kind: output, shape index: {}]  }
   0x1   :  { %v14243_v0 = vld [vmem:[%s21843_s1 + $0x4] ss:$16 sps:$4 sm:$0xff]   ;;  %v14245_v1 = vld [vmem:[%s21843_s1 + $0xc] ss:$16 sps:$4 sm:$0xff]   ;;  %v14247_v2 = vld [vmem:[%s21843_s1] ss:$16 sps:$4 sm:$0xff]   ;;  %v1634_v38 = vunpack.c.l.s4 %v16671_v37 }
   0x2   :  { %9829 = vmatprep.subr.bf16.mxu0 %v14243_v0  ;;  %v14248_v3 = vld [vmem:[%s21843_s1 + $0x8] ss:$16 sps:$4 sm:$0xff]   ;;  %10854 = vmatprep.subr.bf16.mxu1 %v14245_v1  ;;  %v14249_v4 = vld [vmem:[%s21843_s1 + $0x24] ss:$16 sps:$4 sm:$0xff]   ;;  %v14251_v5 = vld [vmem:[%s21843_s1 + $0x2c] ss:$16 sps:$4 sm:$0xff]  }
   0x3   :  { %9830 = vmatpush1.bf16.msra.mxu0 %v14247_v2  ;;  %10855 = vmatpush1.bf16.msra.mxu1 %v14248_v3  ;;  %v14253_v6 = vld [vmem:[%s21843_s1 + $0x20] ss:$16 sps:$4 sm:$0xff]   ;;  %v14254_v7 = vld [vmem:[%s21843_s1 + $0x28] ss:$16 sps:$4 sm:$0xff]   ;;  %v14255_v8 = vld [vmem:[%s21843_s1 + $0x44] ss:$16 sps:$4 sm:$0xff]   ;;  %v1635_v43 = vunpack.c.0.s8 %v1634_v38 }
   0x4   :  { %9831 = vmatprep.subr.bf16.mxu0 %v14249_v4  ;;  %10856 = vmatprep.subr.bf16.mxu1 %v14251_v5  ;;  %v14257_v9 = vld [vmem:[%s21843_s1 + $0x4c] ss:$16 sps:$4 sm:$0xff]   ;;  %v14259_v10 = vld [vmem:[%s21843_s1 + $0x40] ss:$16 sps:$4 sm:$0xff]   ;;  %v14260_v11 = vld [vmem:[%s21843_s1 + $0x48] ss:$16 sps:$4 sm:$0xff]  }
   0x5   :  { %v14261_v12 = vld [vmem:[%s21843_s1 + $0x64] ss:$16 sps:$4 sm:$0xff]   ;;  %v14263_v13 = vld [vmem:[%s21843_s1 + $0x6c] ss:$16 sps:$4 sm:$0xff]   ;;  %v14265_v14 = vld [vmem:[%s21843_s1 + $0x60] ss:$16 sps:$4 sm:$0xff]  }
   0x6   :  { %v14266_v15 = vld [vmem:[%s21843_s1 + $0x68] ss:$16 sps:$4 sm:$0xff]   ;;  %v14267_v16 = vld [vmem:[%s21843_s1 + $0x84] ss:$16 sps:$4 sm:$0xff]   ;;  %v14269_v17 = vld [vmem:[%s21843_s1 + $0x8c] ss:$16 sps:$4 sm:$0xff]  }
   0x7   :  { %9832 = vmatpush1.bf16.msra.mxu0 %v14253_v6  ;;  %10857 = vmatpush1.bf16.msra.mxu1 %v14254_v7  ;;  %v14271_v18 = vld [vmem:[%s21843_s1 + $0x80] ss:$16 sps:$4 sm:$0xff]   ;;  %v14272_v19 = vld [vmem:[%s21843_s1 + $0x88] ss:$16 sps:$4 sm:$0xff]   ;;  %v14273_v20 = vld [vmem:[%s21843_s1 + $0xa4] ss:$16 sps:$4 sm:$0xff]  }
   0x8   :  { %9833 = vmatprep.subr.bf16.mxu0 %v14255_v8  ;;  %10858 = vmatprep.subr.bf16.mxu1 %v14257_v9  ;;  %v14275_v21 = vld [vmem:[%s21843_s1 + $0xac] ss:$16 sps:$4 sm:$0xff]   ;;  %v14277_v22 = vld [vmem:[%s21843_s1 + $0xa0] ss:$16 sps:$4 sm:$0xff]   ;;  %v14278_v23 = vld [vmem:[%s21843_s1 + $0xa8] ss:$16 sps:$4 sm:$0xff]  }
   0x9   :  { %v14279_v24 = vld [vmem:[%s21843_s1 + $0xc4] ss:$16 sps:$4 sm:$0xff]   ;;  %v14281_v25 = vld [vmem:[%s21843_s1 + $0xcc] ss:$16 sps:$4 sm:$0xff]   ;;  %v14283_v26 = vld [vmem:[%s21843_s1 + $0xc0] ss:$16 sps:$4 sm:$0xff]  }
   0xa   :  { %v14284_v27 = vld [vmem:[%s21843_s1 + $0xc8] ss:$16 sps:$4 sm:$0xff]   ;;  %v14285_v28 = vld [vmem:[%s21843_s1 + $0xe4] ss:$16 sps:$4 sm:$0xff]   ;;  %v14287_v29 = vld [vmem:[%s21843_s1 + $0xec] ss:$16 sps:$4 sm:$0xff]  }
   0xb   :  { %9834 = vmatpush1.bf16.msra.mxu0 %v14259_v10  ;;  %10859 = vmatpush1.bf16.msra.mxu1 %v14260_v11  ;;  %v14289_v30 = vld [vmem:[%s21843_s1 + $0xe0] ss:$16 sps:$4 sm:$0xff]   ;;  %v14290_v31 = vld [vmem:[%s21843_s1 + $0xe8] ss:$16 sps:$4 sm:$0xff]   ;;  %v14291_v32 = vld [vmem:[%s21843_s1 + $0x104] ss:$16 sps:$4 sm:$0xff]  }
   0xc   :  { %9835 = vmatprep.subr.bf16.mxu0 %v14261_v12  ;;  %10860 = vmatprep.subr.bf16.mxu1 %v14263_v13  ;;  %v14293_v33 = vld [vmem:[%s21843_s1 + $0x10c] ss:$16 sps:$4 sm:$0xff]   ;;  %v14295_v34 = vld [vmem:[%s21843_s1 + $0x100] ss:$16 sps:$4 sm:$0xff]   ;;  %v14296_v35 = vld [vmem:[%s21843_s1 + $0x108] ss:$16 sps:$4 sm:$0xff]  }
   0xd   :  { %v14297_v39 = vld [vmem:[%s21843_s1 + $0x124] ss:$16 sps:$4 sm:$0xff]   ;;  %v14299_v40 = vld [vmem:[%s21843_s1 + $0x12c] ss:$16 sps:$4 sm:$0xff]   ;;  %v14301_v41 = vld [vmem:[%s21843_s1 + $0x120] ss:$16 sps:$4 sm:$0xff]  }
   0xe   :  { %v16833_v42 = vshrl.u32 %v1605_v36, 7  ;;  %v14302_v44 = vld [vmem:[%s21843_s1 + $0x128] ss:$16 sps:$4 sm:$0xff]   ;;  %v14303_v45 = vld [vmem:[%s21843_s1 + $0x144] ss:$16 sps:$4 sm:$0xff]  }
   0xf   :  { %9836 = vmatpush1.bf16.msra.mxu0 %v14265_v14  ;;  %10861 = vmatpush1.bf16.msra.mxu1 %v14266_v15  ;;  %v14305_v46 = vld [vmem:[%s21843_s1 + $0x14c] ss:$16 sps:$4 sm:$0xff]   ;;  %v14307_v47 = vld [vmem:[%s21843_s1 + $0x140] ss:$16 sps:$4 sm:$0xff]   ;;  %v14308_v48 = vld [vmem:[%s21843_s1 + $0x148] ss:$16 sps:$4 sm:$0xff]  }
  0x10   :  { %9837 = vmatprep.subr.bf16.mxu0 %v14267_v16  ;;  %10862 = vmatprep.subr.bf16.mxu1 %v14269_v17  ;;  %v16851_v49 = vsub.s32 %v1635_v43, %v16833_v42  ;;  %v14309_v50 = vld [vmem:[%s21843_s1 + $0x164] ss:$16 sps:$4 sm:$0xff]   ;;  %v14311_v51 = vld [vmem:[%s21843_s1 + $0x16c] ss:$16 sps:$4 sm:$0xff]   ;;  %v14313_v53 = vld [vmem:[%s21843_s1 + $0x160] ss:$16 sps:$4 sm:$0xff]  }
  0x11   :  { %v16862_v52 = vld [vmem:[%s21842_s0] sm:$0xff]  ;;  %v14314_v55 = vld [vmem:[%s21843_s1 + $0x168] ss:$16 sps:$4 sm:$0xff]   ;;  %v14317_v57 = vld [vmem:[%s21843_s1 + $0x18c] ss:$16 sps:$4 sm:$0xff]  }
  0x12   :  { %v1639_v54 = vrot.slane %v16862_v52, %v16851_v49  ;;  %v14315_v56 = vld [vmem:[%s21843_s1 + $0x184] ss:$16 sps:$4 sm:$0xff]   ;;  %v14319_v59 = vld [vmem:[%s21843_s1 + $0x180] ss:$16 sps:$4 sm:$0xff]   ;;  %v14320_v61 = vld [vmem:[%s21843_s1 + $0x188] ss:$16 sps:$4 sm:$0xff]  }
  0x13   :  { %9838 = vmatpush1.bf16.msra.mxu0 %v14271_v18  ;;  %10863 = vmatpush1.bf16.msra.mxu1 %v14272_v19  ;;  %v14321_v62 = vld [vmem:[%s21843_s1 + $0x1a4] ss:$16 sps:$4 sm:$0xff]   ;;  %v14323_v63 = vld [vmem:[%s21843_s1 + $0x1ac] ss:$16 sps:$4 sm:$0xff]   ;;  %v14325_v0 = vld [vmem:[%s21843_s1 + $0x1a0] ss:$16 sps:$4 sm:$0xff]  }
  0x14   :  { %9839 = vmatprep.subr.bf16.mxu0 %v14273_v20  ;;  %10864 = vmatprep.subr.bf16.mxu1 %v14275_v21  ;;  %v1647_v58 = vcombine.high %v1639_v54, %v1639_v54  ;;  %v14326_v1 = vld [vmem:[%s21843_s1 + $0x1a8] ss:$16 sps:$4 sm:$0xff]   ;;  %v14327_v2 = vld [vmem:[%s21843_s1 + $0x1c4] ss:$16 sps:$4 sm:$0xff]   ;;  %v14329_v3 = vld [vmem:[%s21843_s1 + $0x1cc] ss:$16 sps:$4 sm:$0xff]   ;;  %v16931_v13 = vrot.slane %v1639_v54, %v16851_v49 }
  0x15   :  { %v14331_v4 = vld [vmem:[%s21843_s1 + $0x1c0] ss:$16 sps:$4 sm:$0xff]   ;;  %v14332_v5 = vld [vmem:[%s21843_s1 + $0x1c8] ss:$16 sps:$4 sm:$0xff]   ;;  %v14333_v6 = vld [vmem:[%s21843_s1 + $0x1e4] ss:$16 sps:$4 sm:$0xff]  }
  0x16   :  { %v1669_v60 = vrot.slane %v1647_v58, %v16851_v49  ;;  %v14335_v7 = vld [vmem:[%s21843_s1 + $0x1ec] ss:$16 sps:$4 sm:$0xff]   ;;  %v14337_v8 = vld [vmem:[%s21843_s1 + $0x1e0] ss:$16 sps:$4 sm:$0xff]   ;;  %v14338_v9 = vld [vmem:[%s21843_s1 + $0x1e8] ss:$16 sps:$4 sm:$0xff]  }
  0x17   :  { %9840 = vmatpush1.bf16.msra.mxu0 %v14277_v22  ;;  %10865 = vmatpush1.bf16.msra.mxu1 %v14278_v23  ;;  %v14341_v10 = vld [vmem:[%s21843_s1 + $0x204] ss:$16 sps:$4 sm:$0xff]   ;;  %v14344_v11 = vld [vmem:[%s21843_s1 + $0x20c] ss:$16 sps:$4 sm:$0xff]   ;;  %v14339_v12 = vld [vmem:[%s21843_s1 + $0x200] ss:$16 sps:$4 sm:$0xff]  }
  0x18   :  { %9841 = vmatprep.subr.bf16.mxu0 %v14279_v24  ;;  %10866 = vmatprep.subr.bf16.mxu1 %v14281_v25  ;;  %v14342_v14 = vld [vmem:[%s21843_s1 + $0x208] ss:$16 sps:$4 sm:$0xff]   ;;  %v14347_v15 = vld [vmem:[%s21843_s1 + $0x224] ss:$16 sps:$4 sm:$0xff]   ;;  %v14350_v16 = vld [vmem:[%s21843_s1 + $0x22c] ss:$16 sps:$4 sm:$0xff]   ;;  %v1679_v17 = vcombine.high %v1669_v60, %v1669_v60 }
  0x19   :  { %9861 = vmatprep.mubr.bf16.mxu0 %v1669_v60  ;;  %10886 = vmatprep.mubr.bf16.mxu1 %v1669_v60  ;;  %v14345_v18 = vld [vmem:[%s21843_s1 + $0x220] ss:$16 sps:$4 sm:$0xff]   ;;  %v14348_v19 = vld [vmem:[%s21843_s1 + $0x228] ss:$16 sps:$4 sm:$0xff]   ;;  %v14353_v20 = vld [vmem:[%s21843_s1 + $0x244] ss:$16 sps:$4 sm:$0xff]  }
  0x1a   :  { %v14356_v21 = vld [vmem:[%s21843_s1 + $0x24c] ss:$16 sps:$4 sm:$0xff]   ;;  %v14351_v22 = vld [vmem:[%s21843_s1 + $0x240] ss:$16 sps:$4 sm:$0xff]   ;;  %v14354_v23 = vld [vmem:[%s21843_s1 + $0x248] ss:$16 sps:$4 sm:$0xff]  }
  0x1b   :  { %9842 = vmatpush1.bf16.msra.mxu0 %v14283_v26  ;;  %10867 = vmatpush1.bf16.msra.mxu1 %v14284_v27  ;;  %v14359_v24 = vld [vmem:[%s21843_s1 + $0x264] ss:$16 sps:$4 sm:$0xff]   ;;  %v14362_v25 = vld [vmem:[%s21843_s1 + $0x26c] ss:$16 sps:$4 sm:$0xff]   ;;  %v14357_v26 = vld [vmem:[%s21843_s1 + $0x260] ss:$16 sps:$4 sm:$0xff]  }
  0x1c   :  { %9843 = vmatprep.subr.bf16.mxu0 %v14285_v28  ;;  %10868 = vmatprep.subr.bf16.mxu1 %v14287_v29  ;;  %v14360_v27 = vld [vmem:[%s21843_s1 + $0x268] ss:$16 sps:$4 sm:$0xff]   ;;  %v14365_v28 = vld [vmem:[%s21843_s1 + $0x284] ss:$16 sps:$4 sm:$0xff]   ;;  %v14368_v29 = vld [vmem:[%s21843_s1 + $0x28c] ss:$16 sps:$4 sm:$0xff]  }
  0x1d   :  { %v14377_v36 = vld [vmem:[%s21843_s1 + $0x2c4] ss:$16 sps:$4 sm:$0xff]   ;;  %v14380_v37 = vld [vmem:[%s21843_s1 + $0x2cc] ss:$16 sps:$4 sm:$0xff]   ;;  %v14375_v38 = vld [vmem:[%s21843_s1 + $0x2c0] ss:$16 sps:$4 sm:$0xff]  }
  0x1e   :  { %v14381_v43 = vld [vmem:[%s21843_s1 + $0x2e0] ss:$16 sps:$4 sm:$0xff]   ;;  %v14396_v54 = vld [vmem:[%s21843_s1 + $0x328] ss:$16 sps:$4 sm:$0xff]   ;;  %v14410_v60 = vld [vmem:[%s21843_s1 + $0x36c] ss:$16 sps:$4 sm:$0xff]  }
  0x1f   :  { %9844 = vmatpush1.bf16.msra.mxu0 %v14289_v30  ;;  %10869 = vmatpush1.bf16.msra.mxu1 %v14290_v31  ;;  %v14363_v30 = vld [vmem:[%s21843_s1 + $0x280] ss:$16 sps:$4 sm:$0xff]   ;;  %v14366_v31 = vld [vmem:[%s21843_s1 + $0x288] ss:$16 sps:$4 sm:$0xff]  }
  0x20   :  { %9845 = vmatprep.subr.bf16.mxu0 %v14291_v32  ;;  %10870 = vmatprep.subr.bf16.mxu1 %v14293_v33  ;;  %v14371_v32 = vld [vmem:[%s21843_s1 + $0x2a4] ss:$16 sps:$4 sm:$0xff]   ;;  %v14374_v33 = vld [vmem:[%s21843_s1 + $0x2ac] ss:$16 sps:$4 sm:$0xff]   ;;  %v14402_v58 = vld [vmem:[%s21843_s1 + $0x348] ss:$16 sps:$4 sm:$0xff]  }
  0x23   :  { %9846 = vmatpush1.bf16.msra.mxu0 %v14295_v34  ;;  %10871 = vmatpush1.bf16.msra.mxu1 %v14296_v35  ;;  %v14369_v34 = vld [vmem:[%s21843_s1 + $0x2a0] ss:$16 sps:$4 sm:$0xff]   ;;  %v14372_v35 = vld [vmem:[%s21843_s1 + $0x2a8] ss:$16 sps:$4 sm:$0xff]  }
  0x24   :  { %9847 = vmatprep.subr.bf16.mxu0 %v14297_v39  ;;  %10872 = vmatprep.subr.bf16.mxu1 %v14299_v40  ;;  %v14378_v39 = vld [vmem:[%s21843_s1 + $0x2c8] ss:$16 sps:$4 sm:$0xff]   ;;  %v14383_v40 = vld [vmem:[%s21843_s1 + $0x2e4] ss:$16 sps:$4 sm:$0xff]  }
  0x27   :  { %9848 = vmatpush1.bf16.msra.mxu0 %v14301_v41  ;;  %10873 = vmatpush1.bf16.msra.mxu1 %v14302_v44  ;;  %v14386_v41 = vld [vmem:[%s21843_s1 + $0x2ec] ss:$16 sps:$4 sm:$0xff]   ;;  %v14384_v44 = vld [vmem:[%s21843_s1 + $0x2e8] ss:$16 sps:$4 sm:$0xff]  }
  0x28   :  { %9849 = vmatprep.subr.bf16.mxu0 %v14303_v45  ;;  %10874 = vmatprep.subr.bf16.mxu1 %v14305_v46  ;;  %v14389_v45 = vld [vmem:[%s21843_s1 + $0x304] ss:$16 sps:$4 sm:$0xff]   ;;  %v14392_v46 = vld [vmem:[%s21843_s1 + $0x30c] ss:$16 sps:$4 sm:$0xff]  }
  0x2b   :  { %9850 = vmatpush1.bf16.msra.mxu0 %v14307_v47  ;;  %10875 = vmatpush1.bf16.msra.mxu1 %v14308_v48  ;;  %v14387_v47 = vld [vmem:[%s21843_s1 + $0x300] ss:$16 sps:$4 sm:$0xff]   ;;  %v14390_v48 = vld [vmem:[%s21843_s1 + $0x308] ss:$16 sps:$4 sm:$0xff]  }
  0x2c   :  { %9851 = vmatprep.subr.bf16.mxu0 %v14309_v50  ;;  %10876 = vmatprep.subr.bf16.mxu1 %v14311_v51  ;;  %v14395_v50 = vld [vmem:[%s21843_s1 + $0x324] ss:$16 sps:$4 sm:$0xff]   ;;  %v14398_v51 = vld [vmem:[%s21843_s1 + $0x32c] ss:$16 sps:$4 sm:$0xff]  }
  0x2f   :  { %9852 = vmatpush1.bf16.msra.mxu0 %v14313_v53  ;;  %10877 = vmatpush1.bf16.msra.mxu1 %v14314_v55  ;;  %v14393_v53 = vld [vmem:[%s21843_s1 + $0x320] ss:$16 sps:$4 sm:$0xff]   ;;  %v14401_v55 = vld [vmem:[%s21843_s1 + $0x344] ss:$16 sps:$4 sm:$0xff]  }
  0x30   :  { %9853 = vmatprep.subr.bf16.mxu0 %v14315_v56  ;;  %10878 = vmatprep.subr.bf16.mxu1 %v14317_v57  ;;  %v14404_v56 = vld [vmem:[%s21843_s1 + $0x34c] ss:$16 sps:$4 sm:$0xff]   ;;  %v14399_v57 = vld [vmem:[%s21843_s1 + $0x340] ss:$16 sps:$4 sm:$0xff]  }
  0x33   :  { %9854 = vmatpush1.bf16.msra.mxu0 %v14319_v59  ;;  %10879 = vmatpush1.bf16.msra.mxu1 %v14320_v61  ;;  %v14407_v59 = vld [vmem:[%s21843_s1 + $0x364] ss:$16 sps:$4 sm:$0xff]   ;;  %v14405_v61 = vld [vmem:[%s21843_s1 + $0x360] ss:$16 sps:$4 sm:$0xff]  }
  0x34   :  { %9855 = vmatprep.subr.bf16.mxu0 %v14321_v62  ;;  %10880 = vmatprep.subr.bf16.mxu1 %v14323_v63  ;;  %v14408_v62 = vld [vmem:[%s21843_s1 + $0x368] ss:$16 sps:$4 sm:$0xff]   ;;  %v14413_v63 = vld [vmem:[%s21843_s1 + $0x384] ss:$16 sps:$4 sm:$0xff]  }
  0x37   :  { %9856 = vmatpush1.bf16.msra.mxu0 %v14325_v0  ;;  %10881 = vmatpush1.bf16.msra.mxu1 %v14326_v1  ;;  %v14416_v0 = vld [vmem:[%s21843_s1 + $0x38c] ss:$16 sps:$4 sm:$0xff]   ;;  %v14411_v1 = vld [vmem:[%s21843_s1 + $0x380] ss:$16 sps:$4 sm:$0xff]  }
  0x38   :  { %9857 = vmatprep.subr.bf16.mxu0 %v14327_v2  ;;  %10882 = vmatprep.subr.bf16.mxu1 %v14329_v3  ;;  %v14414_v2 = vld [vmem:[%s21843_s1 + $0x388] ss:$16 sps:$4 sm:$0xff]   ;;  %v14419_v3 = vld [vmem:[%s21843_s1 + $0x3a4] ss:$16 sps:$4 sm:$0xff]  }
  0x3b   :  { %9858 = vmatpush1.bf16.msra.mxu0 %v14331_v4  ;;  %10883 = vmatpush1.bf16.msra.mxu1 %v14332_v5  ;;  %v14422_v4 = vld [vmem:[%s21843_s1 + $0x3ac] ss:$16 sps:$4 sm:$0xff]   ;;  %v14417_v5 = vld [vmem:[%s21843_s1 + $0x3a0] ss:$16 sps:$4 sm:$0xff]  }
  0x3c   :  { %9859 = vmatprep.subr.bf16.mxu0 %v14333_v6  ;;  %10884 = vmatprep.subr.bf16.mxu1 %v14335_v7  ;;  %v14420_v6 = vld [vmem:[%s21843_s1 + $0x3a8] ss:$16 sps:$4 sm:$0xff]   ;;  %v14425_v7 = vld [vmem:[%s21843_s1 + $0x3c4] ss:$16 sps:$4 sm:$0xff]  }
  0x3f   :  { %9860 = vmatpush1.bf16.msra.mxu0 %v14337_v8  ;;  %10885 = vmatpush1.bf16.msra.mxu1 %v14338_v9  ;;  %v14428_v8 = vld [vmem:[%s21843_s1 + $0x3cc] ss:$16 sps:$4 sm:$0xff]   ;;  %v1632_v9 = vcombine.high %v16862_v52, %v16862_v52 }
  0x40   :  { %9870 = vmatprep.subr.bf16.mxu0 %v14341_v10  ;;  %10895 = vmatprep.subr.bf16.mxu1 %v14344_v11  ;;  %v14423_v10 = vld [vmem:[%s21843_s1 + $0x3c0] ss:$16 sps:$4 sm:$0xff]   ;;  %v14426_v11 = vld [vmem:[%s21843_s1 + $0x3c8] ss:$16 sps:$4 sm:$0xff]   ;;  %v14434_v52 = vld [vmem:[%s21843_s1 + $0x3ec] ss:$16 sps:$4 sm:$0xff]  }
  0x42   :  { %9862 = vmatmul.mubr.bf16.vlgmr.msra.gmra.mrb[0].mxu0 %v16931_v13  ;;  %10887 = vmatmul.mubr.bf16.vlgmr.msra.gmra.mrb[0].mxu1 %v16931_v13 }
  0x43   :  { %9871 = vmatpush1.bf16.msra.mxu0 %v14339_v12  ;;  %10896 = vmatpush1.bf16.msra.mxu1 %v14342_v14  ;;  %v14431_v12 = vld [vmem:[%s21843_s1 + $0x3e4] ss:$16 sps:$4 sm:$0xff]   ;;  %v17115_v14 = vrot.slane %v1632_v9, %v16851_v49  ;;  %v14510_v9 = vld [vmem:[%s21843_s1 + $0x588] ss:$16 sps:$4 sm:$0xff]  }
  0x44   :  { %9872 = vmatprep.subr.bf16.mxu0 %v14347_v15  ;;  %10897 = vmatprep.subr.bf16.mxu1 %v14350_v16  ;;  %v14429_v15 = vld [vmem:[%s21843_s1 + $0x3e0] ss:$16 sps:$4 sm:$0xff]   ;;  %v14432_v16 = vld [vmem:[%s21843_s1 + $0x3e8] ss:$16 sps:$4 sm:$0xff]  }
  0x45   :  { %9902 = vmatprep.mubr.bf16.mxu0 %v1679_v17  ;;  %10927 = vmatprep.mubr.bf16.mxu1 %v1679_v17  ;;  %v14437_v17 = vld [vmem:[%s21843_s1 + $0x404] ss:$16 sps:$4 sm:$0xff]  }
  0x47   :  { %9873 = vmatpush1.bf16.msra.mxu0 %v14345_v18  ;;  %10898 = vmatpush1.bf16.msra.mxu1 %v14348_v19  ;;  %v14440_v18 = vld [vmem:[%s21843_s1 + $0x40c] ss:$16 sps:$4 sm:$0xff]   ;;  %v1648_v19 = vcombine.high %v17115_v14, %v17115_v14 }
  0x48   :  { %9874 = vmatprep.subr.bf16.mxu0 %v14353_v20  ;;  %10899 = vmatprep.subr.bf16.mxu1 %v14356_v21  ;;  %v14435_v20 = vld [vmem:[%s21843_s1 + $0x400] ss:$16 sps:$4 sm:$0xff]   ;;  %v1677_v21 = vcombine.high %v16931_v13, %v16931_v13 }
  0x49   :  { %v14441_v13 = vld [vmem:[%s21843_s1 + $0x420] ss:$16 sps:$4 sm:$0xff]  }
  0x4b   :  { %9875 = vmatpush1.bf16.msra.mxu0 %v14351_v22  ;;  %10900 = vmatpush1.bf16.msra.mxu1 %v14354_v23  ;;  %v14438_v22 = vld [vmem:[%s21843_s1 + $0x408] ss:$16 sps:$4 sm:$0xff]   ;;  %v14443_v23 = vld [vmem:[%s21843_s1 + $0x424] ss:$16 sps:$4 sm:$0xff]  }
  0x4c   :  { %9876 = vmatprep.subr.bf16.mxu0 %v14359_v24  ;;  %10901 = vmatprep.subr.bf16.mxu1 %v14362_v25  ;;  %v14446_v24 = vld [vmem:[%s21843_s1 + $0x42c] ss:$16 sps:$4 sm:$0xff]   ;;  %v17146_v25 = vrot.slane %v1648_v19, %v16851_v49  ;;  %v14527_v19 = vld [vmem:[%s21843_s1 + $0x5e4] ss:$16 sps:$4 sm:$0xff]  }
  0x4f   :  { %9877 = vmatpush1.bf16.msra.mxu0 %v14357_v26  ;;  %10902 = vmatpush1.bf16.msra.mxu1 %v14360_v27  ;;  %v14444_v26 = vld [vmem:[%s21843_s1 + $0x428] ss:$16 sps:$4 sm:$0xff]   ;;  %v14449_v27 = vld [vmem:[%s21843_s1 + $0x444] ss:$16 sps:$4 sm:$0xff]  }
  0x50   :  { %9878 = vmatprep.subr.bf16.mxu0 %v14365_v28  ;;  %10903 = vmatprep.subr.bf16.mxu1 %v14368_v29  ;;  %v14452_v28 = vld [vmem:[%s21843_s1 + $0x44c] ss:$16 sps:$4 sm:$0xff]   ;;  %v14447_v29 = vld [vmem:[%s21843_s1 + $0x440] ss:$16 sps:$4 sm:$0xff]  }
  0x53   :  { %9879 = vmatpush1.bf16.msra.mxu0 %v14363_v30  ;;  %10904 = vmatpush1.bf16.msra.mxu1 %v14366_v31  ;;  %v14450_v30 = vld [vmem:[%s21843_s1 + $0x448] ss:$16 sps:$4 sm:$0xff]   ;;  %v14455_v31 = vld [vmem:[%s21843_s1 + $0x464] ss:$16 sps:$4 sm:$0xff]  }
  0x54   :  { %9880 = vmatprep.subr.bf16.mxu0 %v14371_v32  ;;  %10905 = vmatprep.subr.bf16.mxu1 %v14374_v33  ;;  %v14458_v32 = vld [vmem:[%s21843_s1 + $0x46c] ss:$16 sps:$4 sm:$0xff]   ;;  %v14453_v33 = vld [vmem:[%s21843_s1 + $0x460] ss:$16 sps:$4 sm:$0xff]  }
  0x57   :  { %9881 = vmatpush1.bf16.msra.mxu0 %v14369_v34  ;;  %10906 = vmatpush1.bf16.msra.mxu1 %v14372_v35  ;;  %v14456_v34 = vld [vmem:[%s21843_s1 + $0x468] ss:$16 sps:$4 sm:$0xff]   ;;  %v14461_v35 = vld [vmem:[%s21843_s1 + $0x484] ss:$16 sps:$4 sm:$0xff]  }
  0x58   :  { %9882 = vmatprep.subr.bf16.mxu0 %v14377_v36  ;;  %10907 = vmatprep.subr.bf16.mxu1 %v14380_v37  ;;  %v14464_v36 = vld [vmem:[%s21843_s1 + $0x48c] ss:$16 sps:$4 sm:$0xff]   ;;  %v14459_v37 = vld [vmem:[%s21843_s1 + $0x480] ss:$16 sps:$4 sm:$0xff]  }
  0x5b   :  { %9883 = vmatpush1.bf16.msra.mxu0 %v14375_v38  ;;  %10908 = vmatpush1.bf16.msra.mxu1 %v14378_v39  ;;  %v14462_v38 = vld [vmem:[%s21843_s1 + $0x488] ss:$16 sps:$4 sm:$0xff]   ;;  %v14467_v39 = vld [vmem:[%s21843_s1 + $0x4a4] ss:$16 sps:$4 sm:$0xff]  }
  0x5c   :  { %9884 = vmatprep.subr.bf16.mxu0 %v14383_v40  ;;  %10909 = vmatprep.subr.bf16.mxu1 %v14386_v41  ;;  %v14470_v40 = vld [vmem:[%s21843_s1 + $0x4ac] ss:$16 sps:$4 sm:$0xff]   ;;  %v14465_v41 = vld [vmem:[%s21843_s1 + $0x4a0] ss:$16 sps:$4 sm:$0xff]  }
  0x5f   :  { %9885 = vmatpush1.bf16.msra.mxu0 %v14381_v43  ;;  %10910 = vmatpush1.bf16.msra.mxu1 %v14384_v44  ;;  %v14468_v43 = vld [vmem:[%s21843_s1 + $0x4a8] ss:$16 sps:$4 sm:$0xff]   ;;  %v14473_v44 = vld [vmem:[%s21843_s1 + $0x4c4] ss:$16 sps:$4 sm:$0xff]  }
  0x60   :  { %9886 = vmatprep.subr.bf16.mxu0 %v14389_v45  ;;  %10911 = vmatprep.subr.bf16.mxu1 %v14392_v46  ;;  %v14476_v45 = vld [vmem:[%s21843_s1 + $0x4cc] ss:$16 sps:$4 sm:$0xff]   ;;  %v14471_v46 = vld [vmem:[%s21843_s1 + $0x4c0] ss:$16 sps:$4 sm:$0xff]  }
  0x63   :  { %9887 = vmatpush1.bf16.msra.mxu0 %v14387_v47  ;;  %10912 = vmatpush1.bf16.msra.mxu1 %v14390_v48  ;;  %v14474_v47 = vld [vmem:[%s21843_s1 + $0x4c8] ss:$16 sps:$4 sm:$0xff]   ;;  %v14479_v48 = vld [vmem:[%s21843_s1 + $0x4e4] ss:$16 sps:$4 sm:$0xff]  }
  0x64   :  { %9888 = vmatprep.subr.bf16.mxu0 %v14395_v50  ;;  %10913 = vmatprep.subr.bf16.mxu1 %v14398_v51  ;;  %v14482_v50 = vld [vmem:[%s21843_s1 + $0x4ec] ss:$16 sps:$4 sm:$0xff]   ;;  %v14477_v51 = vld [vmem:[%s21843_s1 + $0x4e0] ss:$16 sps:$4 sm:$0xff]  }
  0x67   :  { %9889 = vmatpush1.bf16.msra.mxu0 %v14393_v53  ;;  %10914 = vmatpush1.bf16.msra.mxu1 %v14396_v54  ;;  %v14480_v53 = vld [vmem:[%s21843_s1 + $0x4e8] ss:$16 sps:$4 sm:$0xff]   ;;  %v14485_v54 = vld [vmem:[%s21843_s1 + $0x504] ss:$16 sps:$4 sm:$0xff]  }
  0x68   :  { %9890 = vmatprep.subr.bf16.mxu0 %v14401_v55  ;;  %10915 = vmatprep.subr.bf16.mxu1 %v14404_v56  ;;  %v14488_v55 = vld [vmem:[%s21843_s1 + $0x50c] ss:$16 sps:$4 sm:$0xff]   ;;  %v14483_v56 = vld [vmem:[%s21843_s1 + $0x500] ss:$16 sps:$4 sm:$0xff]  }
  0x6b   :  { %9891 = vmatpush1.bf16.msra.mxu0 %v14399_v57  ;;  %10916 = vmatpush1.bf16.msra.mxu1 %v14402_v58  ;;  %v14486_v57 = vld [vmem:[%s21843_s1 + $0x508] ss:$16 sps:$4 sm:$0xff]   ;;  %v14491_v58 = vld [vmem:[%s21843_s1 + $0x524] ss:$16 sps:$4 sm:$0xff]  }
  0x6c   :  { %9892 = vmatprep.subr.bf16.mxu0 %v14407_v59  ;;  %10917 = vmatprep.subr.bf16.mxu1 %v14410_v60  ;;  %v14494_v59 = vld [vmem:[%s21843_s1 + $0x52c] ss:$16 sps:$4 sm:$0xff]   ;;  %v14489_v60 = vld [vmem:[%s21843_s1 + $0x520] ss:$16 sps:$4 sm:$0xff]  }
  0x6f   :  { %9893 = vmatpush1.bf16.msra.mxu0 %v14405_v61  ;;  %10918 = vmatpush1.bf16.msra.mxu1 %v14408_v62  ;;  %v14492_v61 = vld [vmem:[%s21843_s1 + $0x528] ss:$16 sps:$4 sm:$0xff]   ;;  %v14497_v62 = vld [vmem:[%s21843_s1 + $0x544] ss:$16 sps:$4 sm:$0xff]  }
  0x70   :  { %9894 = vmatprep.subr.bf16.mxu0 %v14413_v63  ;;  %10919 = vmatprep.subr.bf16.mxu1 %v14416_v0  ;;  %v14500_v63 = vld [vmem:[%s21843_s1 + $0x54c] ss:$16 sps:$4 sm:$0xff]   ;;  %v14495_v0 = vld [vmem:[%s21843_s1 + $0x540] ss:$16 sps:$4 sm:$0xff]  }
  0x73   :  { %9895 = vmatpush1.bf16.msra.mxu0 %v14411_v1  ;;  %10920 = vmatpush1.bf16.msra.mxu1 %v14414_v2  ;;  %v14498_v1 = vld [vmem:[%s21843_s1 + $0x548] ss:$16 sps:$4 sm:$0xff]   ;;  %v14503_v2 = vld [vmem:[%s21843_s1 + $0x564] ss:$16 sps:$4 sm:$0xff]  }
  0x74   :  { %9896 = vmatprep.subr.bf16.mxu0 %v14419_v3  ;;  %10921 = vmatprep.subr.bf16.mxu1 %v14422_v4  ;;  %v14506_v3 = vld [vmem:[%s21843_s1 + $0x56c] ss:$16 sps:$4 sm:$0xff]   ;;  %v14501_v4 = vld [vmem:[%s21843_s1 + $0x560] ss:$16 sps:$4 sm:$0xff]  }
  0x77   :  { %9897 = vmatpush1.bf16.msra.mxu0 %v14417_v5  ;;  %10922 = vmatpush1.bf16.msra.mxu1 %v14420_v6  ;;  %v14504_v5 = vld [vmem:[%s21843_s1 + $0x568] ss:$16 sps:$4 sm:$0xff]   ;;  %v14509_v6 = vld [vmem:[%s21843_s1 + $0x584] ss:$16 sps:$4 sm:$0xff]  }
  0x78   :  { %9898 = vmatprep.subr.bf16.mxu0 %v14425_v7  ;;  %10923 = vmatprep.subr.bf16.mxu1 %v14428_v8  ;;  %v14512_v7 = vld [vmem:[%s21843_s1 + $0x58c] ss:$16 sps:$4 sm:$0xff]   ;;  %v14507_v8 = vld [vmem:[%s21843_s1 + $0x580] ss:$16 sps:$4 sm:$0xff]  }
  0x7b   :  { %9899 = vmatpush1.bf16.msra.mxu0 %v14423_v10  ;;  %10924 = vmatpush1.bf16.msra.mxu1 %v14426_v11  ;;  %v14515_v10 = vld [vmem:[%s21843_s1 + $0x5a4] ss:$16 sps:$4 sm:$0xff]   ;;  %v14518_v11 = vld [vmem:[%s21843_s1 + $0x5ac] ss:$16 sps:$4 sm:$0xff]  }
  0x7c   :  { %9900 = vmatprep.subr.bf16.mxu0 %v14431_v12  ;;  %10925 = vmatprep.subr.bf16.mxu1 %v14434_v52  ;;  %v14513_v12 = vld [vmem:[%s21843_s1 + $0x5a0] ss:$16 sps:$4 sm:$0xff]   ;;  %v14516_v52 = vld [vmem:[%s21843_s1 + $0x5a8] ss:$16 sps:$4 sm:$0xff]  }
  0x7f   :  { %9901 = vmatpush1.bf16.msra.mxu0 %v14429_v15  ;;  %10926 = vmatpush1.bf16.msra.mxu1 %v14432_v16  ;;  %v14521_v15 = vld [vmem:[%s21843_s1 + $0x5c4] ss:$16 sps:$4 sm:$0xff]   ;;  %v14524_v16 = vld [vmem:[%s21843_s1 + $0x5cc] ss:$16 sps:$4 sm:$0xff]  }
  0x80   :  { %9911 = vmatprep.subr.bf16.mxu0 %v14437_v17  ;;  %10936 = vmatprep.subr.bf16.mxu1 %v14440_v18  ;;  %v14519_v17 = vld [vmem:[%s21843_s1 + $0x5c0] ss:$16 sps:$4 sm:$0xff]   ;;  %v14522_v18 = vld [vmem:[%s21843_s1 + $0x5c8] ss:$16 sps:$4 sm:$0xff]  }
  0x82   :  { %9903 = vmatmul.mubr.bf16.vlgmr.msra.gmra.mrb[0].mxu0 %v1677_v21  ;;  %10928 = vmatmul.mubr.bf16.vlgmr.msra.gmra.mrb[0].mxu1 %v1677_v21  ;;  %v14525_v21 = vld [vmem:[%s21843_s1 + $0x5e0] ss:$16 sps:$4 sm:$0xff]  }
  0x83   :  { %9912 = vmatpush1.bf16.msra.mxu0 %v14435_v20  ;;  %10937 = vmatpush1.bf16.msra.mxu1 %v14438_v22  ;;  %v14530_v20 = vld [vmem:[%s21843_s1 + $0x5ec] ss:$16 sps:$4 sm:$0xff]   ;;  %v14528_v22 = vld [vmem:[%s21843_s1 + $0x5e8] ss:$16 sps:$4 sm:$0xff]  }
  0x84   :  { %9913 = vmatprep.subr.bf16.mxu0 %v14443_v23  ;;  %10938 = vmatprep.subr.bf16.mxu1 %v14446_v24  ;;  %v14534_v23 = vld [vmem:[%s21843_s1 + $0x604] ss:$16 sps:$4 sm:$0xff]   ;;  %v14537_v24 = vld [vmem:[%s21843_s1 + $0x60c] ss:$16 sps:$4 sm:$0xff]  }
  0x85   :  { %9943 = vmatprep.mubr.bf16.mxu0 %v17146_v25  ;;  %10968 = vmatprep.mubr.bf16.mxu1 %v17146_v25 }
  0x87   :  { %9914 = vmatpush1.bf16.msra.mxu0 %v14441_v13  ;;  %10939 = vmatpush1.bf16.msra.mxu1 %v14444_v26  ;;  %v14532_v13 = vld [vmem:[%s21843_s1 + $0x600] ss:$16 sps:$4 sm:$0xff]   ;;  %v17335_v26 = vrot.slane %v17115_v14, %v16851_v49  ;;  %v1680_v14 = vcombine.high %v17146_v25, %v17146_v25  ;;  %v14546_v25 = vld [vmem:[%s21843_s1 + $0x644] ss:$16 sps:$4 sm:$0xff]  }
  0x88   :  { %9915 = vmatprep.subr.bf16.mxu0 %v14449_v27  ;;  %10940 = vmatprep.subr.bf16.mxu1 %v14452_v28  ;;  %v14535_v27 = vld [vmem:[%s21843_s1 + $0x608] ss:$16 sps:$4 sm:$0xff]   ;;  %v14540_v28 = vld [vmem:[%s21843_s1 + $0x624] ss:$16 sps:$4 sm:$0xff]  }
  0x8b   :  { %9916 = vmatpush1.bf16.msra.mxu0 %v14447_v29  ;;  %10941 = vmatpush1.bf16.msra.mxu1 %v14450_v30  ;;  %v14543_v29 = vld [vmem:[%s21843_s1 + $0x62c] ss:$16 sps:$4 sm:$0xff]   ;;  %v14538_v30 = vld [vmem:[%s21843_s1 + $0x620] ss:$16 sps:$4 sm:$0xff]  }
  0x8c   :  { %9917 = vmatprep.subr.bf16.mxu0 %v14455_v31  ;;  %10942 = vmatprep.subr.bf16.mxu1 %v14458_v32  ;;  %v14541_v31 = vld [vmem:[%s21843_s1 + $0x628] ss:$16 sps:$4 sm:$0xff]   ;;  %v14549_v32 = vld [vmem:[%s21843_s1 + $0x64c] ss:$16 sps:$4 sm:$0xff]  }
  0x8f   :  { %9918 = vmatpush1.bf16.msra.mxu0 %v14453_v33  ;;  %10943 = vmatpush1.bf16.msra.mxu1 %v14456_v34  ;;  %v14544_v33 = vld [vmem:[%s21843_s1 + $0x640] ss:$16 sps:$4 sm:$0xff]   ;;  %v14547_v34 = vld [vmem:[%s21843_s1 + $0x648] ss:$16 sps:$4 sm:$0xff]  }
  0x90   :  { %9919 = vmatprep.subr.bf16.mxu0 %v14461_v35  ;;  %10944 = vmatprep.subr.bf16.mxu1 %v14464_v36  ;;  %v14552_v35 = vld [vmem:[%s21843_s1 + $0x664] ss:$16 sps:$4 sm:$0xff]   ;;  %v14555_v36 = vld [vmem:[%s21843_s1 + $0x66c] ss:$16 sps:$4 sm:$0xff]  }
  0x93   :  { %9920 = vmatpush1.bf16.msra.mxu0 %v14459_v37  ;;  %10945 = vmatpush1.bf16.msra.mxu1 %v14462_v38  ;;  %v14550_v37 = vld [vmem:[%s21843_s1 + $0x660] ss:$16 sps:$4 sm:$0xff]   ;;  %v14553_v38 = vld [vmem:[%s21843_s1 + $0x668] ss:$16 sps:$4 sm:$0xff]  }
  0x94   :  { %9921 = vmatprep.subr.bf16.mxu0 %v14467_v39  ;;  %10946 = vmatprep.subr.bf16.mxu1 %v14470_v40  ;;  %v14558_v39 = vld [vmem:[%s21843_s1 + $0x684] ss:$16 sps:$4 sm:$0xff]   ;;  %v14561_v40 = vld [vmem:[%s21843_s1 + $0x68c] ss:$16 sps:$4 sm:$0xff]  }
  0x97   :  { %9922 = vmatpush1.bf16.msra.mxu0 %v14465_v41  ;;  %10947 = vmatpush1.bf16.msra.mxu1 %v14468_v43  ;;  %v14556_v41 = vld [vmem:[%s21843_s1 + $0x680] ss:$16 sps:$4 sm:$0xff]   ;;  %v14559_v43 = vld [vmem:[%s21843_s1 + $0x688] ss:$16 sps:$4 sm:$0xff]  }
  0x98   :  { %9923 = vmatprep.subr.bf16.mxu0 %v14473_v44  ;;  %10948 = vmatprep.subr.bf16.mxu1 %v14476_v45  ;;  %v14564_v44 = vld [vmem:[%s21843_s1 + $0x6a4] ss:$16 sps:$4 sm:$0xff]   ;;  %v14567_v45 = vld [vmem:[%s21843_s1 + $0x6ac] ss:$16 sps:$4 sm:$0xff]  }
  0x9b   :  { %9924 = vmatpush1.bf16.msra.mxu0 %v14471_v46  ;;  %10949 = vmatpush1.bf16.msra.mxu1 %v14474_v47  ;;  %v14562_v46 = vld [vmem:[%s21843_s1 + $0x6a0] ss:$16 sps:$4 sm:$0xff]   ;;  %v14565_v47 = vld [vmem:[%s21843_s1 + $0x6a8] ss:$16 sps:$4 sm:$0xff]  }
  0x9c   :  { %9925 = vmatprep.subr.bf16.mxu0 %v14479_v48  ;;  %10950 = vmatprep.subr.bf16.mxu1 %v14482_v50  ;;  %v14570_v48 = vld [vmem:[%s21843_s1 + $0x6c4] ss:$16 sps:$4 sm:$0xff]   ;;  %v14573_v50 = vld [vmem:[%s21843_s1 + $0x6cc] ss:$16 sps:$4 sm:$0xff]  }
  0x9f   :  { %9926 = vmatpush1.bf16.msra.mxu0 %v14477_v51  ;;  %10951 = vmatpush1.bf16.msra.mxu1 %v14480_v53  ;;  %v14568_v51 = vld [vmem:[%s21843_s1 + $0x6c0] ss:$16 sps:$4 sm:$0xff]   ;;  %v14571_v53 = vld [vmem:[%s21843_s1 + $0x6c8] ss:$16 sps:$4 sm:$0xff]  }
  0xa0   :  { %9927 = vmatprep.subr.bf16.mxu0 %v14485_v54  ;;  %10952 = vmatprep.subr.bf16.mxu1 %v14488_v55  ;;  %v14576_v54 = vld [vmem:[%s21843_s1 + $0x6e4] ss:$16 sps:$4 sm:$0xff]   ;;  %v14579_v55 = vld [vmem:[%s21843_s1 + $0x6ec] ss:$16 sps:$4 sm:$0xff]  }
  0xa3   :  { %9928 = vmatpush1.bf16.msra.mxu0 %v14483_v56  ;;  %10953 = vmatpush1.bf16.msra.mxu1 %v14486_v57  ;;  %v14574_v56 = vld [vmem:[%s21843_s1 + $0x6e0] ss:$16 sps:$4 sm:$0xff]   ;;  %v14577_v57 = vld [vmem:[%s21843_s1 + $0x6e8] ss:$16 sps:$4 sm:$0xff]  }
  0xa4   :  { %9929 = vmatprep.subr.bf16.mxu0 %v14491_v58  ;;  %10954 = vmatprep.subr.bf16.mxu1 %v14494_v59  ;;  %v14582_v58 = vld [vmem:[%s21843_s1 + $0x704] ss:$16 sps:$4 sm:$0xff]   ;;  %v14585_v59 = vld [vmem:[%s21843_s1 + $0x70c] ss:$16 sps:$4 sm:$0xff]  }
  0xa7   :  { %9930 = vmatpush1.bf16.msra.mxu0 %v14489_v60  ;;  %10955 = vmatpush1.bf16.msra.mxu1 %v14492_v61  ;;  %v14580_v60 = vld [vmem:[%s21843_s1 + $0x700] ss:$16 sps:$4 sm:$0xff]   ;;  %v14583_v61 = vld [vmem:[%s21843_s1 + $0x708] ss:$16 sps:$4 sm:$0xff]  }
  0xa8   :  { %9931 = vmatprep.subr.bf16.mxu0 %v14497_v62  ;;  %10956 = vmatprep.subr.bf16.mxu1 %v14500_v63  ;;  %v14588_v62 = vld [vmem:[%s21843_s1 + $0x724] ss:$16 sps:$4 sm:$0xff]   ;;  %v14591_v63 = vld [vmem:[%s21843_s1 + $0x72c] ss:$16 sps:$4 sm:$0xff]  }
  0xab   :  { %9932 = vmatpush1.bf16.msra.mxu0 %v14495_v0  ;;  %10957 = vmatpush1.bf16.msra.mxu1 %v14498_v1  ;;  %v14586_v0 = vld [vmem:[%s21843_s1 + $0x720] ss:$16 sps:$4 sm:$0xff]   ;;  %v14589_v1 = vld [vmem:[%s21843_s1 + $0x728] ss:$16 sps:$4 sm:$0xff]  }
  0xac   :  { %9933 = vmatprep.subr.bf16.mxu0 %v14503_v2  ;;  %10958 = vmatprep.subr.bf16.mxu1 %v14506_v3  ;;  %v14594_v2 = vld [vmem:[%s21843_s1 + $0x744] ss:$16 sps:$4 sm:$0xff]   ;;  %v14597_v3 = vld [vmem:[%s21843_s1 + $0x74c] ss:$16 sps:$4 sm:$0xff]  }
  0xaf   :  { %9934 = vmatpush1.bf16.msra.mxu0 %v14501_v4  ;;  %10959 = vmatpush1.bf16.msra.mxu1 %v14504_v5  ;;  %v14592_v4 = vld [vmem:[%s21843_s1 + $0x740] ss:$16 sps:$4 sm:$0xff]   ;;  %v14595_v5 = vld [vmem:[%s21843_s1 + $0x748] ss:$16 sps:$4 sm:$0xff]  }
  0xb0   :  { %9935 = vmatprep.subr.bf16.mxu0 %v14509_v6  ;;  %10960 = vmatprep.subr.bf16.mxu1 %v14512_v7  ;;  %v14600_v6 = vld [vmem:[%s21843_s1 + $0x764] ss:$16 sps:$4 sm:$0xff]   ;;  %v14603_v7 = vld [vmem:[%s21843_s1 + $0x76c] ss:$16 sps:$4 sm:$0xff]  }
  0xb3   :  { %9936 = vmatpush1.bf16.msra.mxu0 %v14507_v8  ;;  %10961 = vmatpush1.bf16.msra.mxu1 %v14510_v9  ;;  %v14598_v8 = vld [vmem:[%s21843_s1 + $0x760] ss:$16 sps:$4 sm:$0xff]   ;;  %v14601_v9 = vld [vmem:[%s21843_s1 + $0x768] ss:$16 sps:$4 sm:$0xff]  }
  0xb4   :  { %9937 = vmatprep.subr.bf16.mxu0 %v14515_v10  ;;  %10962 = vmatprep.subr.bf16.mxu1 %v14518_v11  ;;  %v14606_v10 = vld [vmem:[%s21843_s1 + $0x784] ss:$16 sps:$4 sm:$0xff]   ;;  %v14609_v11 = vld [vmem:[%s21843_s1 + $0x78c] ss:$16 sps:$4 sm:$0xff]  }
  0xb7   :  { %9938 = vmatpush1.bf16.msra.mxu0 %v14513_v12  ;;  %10963 = vmatpush1.bf16.msra.mxu1 %v14516_v52  ;;  %v14604_v12 = vld [vmem:[%s21843_s1 + $0x780] ss:$16 sps:$4 sm:$0xff]   ;;  %v14607_v52 = vld [vmem:[%s21843_s1 + $0x788] ss:$16 sps:$4 sm:$0xff]  }
  0xb8   :  { %9939 = vmatprep.subr.bf16.mxu0 %v14521_v15  ;;  %10964 = vmatprep.subr.bf16.mxu1 %v14524_v16  ;;  %v14612_v15 = vld [vmem:[%s21843_s1 + $0x7a4] ss:$16 sps:$4 sm:$0xff]   ;;  %v14615_v16 = vld [vmem:[%s21843_s1 + $0x7ac] ss:$16 sps:$4 sm:$0xff]  }
  0xbb   :  { %9940 = vmatpush1.bf16.msra.mxu0 %v14519_v17  ;;  %10965 = vmatpush1.bf16.msra.mxu1 %v14522_v18  ;;  %v14610_v17 = vld [vmem:[%s21843_s1 + $0x7a0] ss:$16 sps:$4 sm:$0xff]   ;;  %v14613_v18 = vld [vmem:[%s21843_s1 + $0x7a8] ss:$16 sps:$4 sm:$0xff]  }
  0xbc   :  { %9941 = vmatprep.subr.bf16.mxu0 %v14527_v19  ;;  %10966 = vmatprep.subr.bf16.mxu1 %v14530_v20  ;;  %v14618_v19 = vld [vmem:[%s21843_s1 + $0x7c4] ss:$16 sps:$4 sm:$0xff]   ;;  %v14621_v20 = vld [vmem:[%s21843_s1 + $0x7cc] ss:$16 sps:$4 sm:$0xff]  }
  0xbf   :  { %9942 = vmatpush1.bf16.msra.mxu0 %v14525_v21  ;;  %10967 = vmatpush1.bf16.msra.mxu1 %v14528_v22  ;;  %v17509_v21 = vld.sshfl [vmem:[%s21842_s0 + $0x8] sm:$0xff pattern:$0x75316420]  ;;  %v14616_v22 = vld [vmem:[%s21843_s1 + $0x7c0] ss:$16 sps:$4 sm:$0xff]  }
  0xc0   :  { %9952 = vmatprep.subr.bf16.mxu0 %v14534_v23  ;;  %10977 = vmatprep.subr.bf16.mxu1 %v14537_v24  ;;  %v14619_v23 = vld [vmem:[%s21843_s1 + $0x7c8] ss:$16 sps:$4 sm:$0xff]   ;;  %v14624_v24 = vld [vmem:[%s21843_s1 + $0x7e4] ss:$16 sps:$4 sm:$0xff]  }
  0xc2   :  { %9944 = vmatmul.mubr.bf16.vlgmr.msra.gmra.mrb[0].mxu0 %v17335_v26  ;;  %10969 = vmatmul.mubr.bf16.vlgmr.msra.gmra.mrb[0].mxu1 %v17335_v26 }
  0xc3   :  { %9953 = vmatpush1.bf16.msra.mxu0 %v14532_v13  ;;  %10978 = vmatpush1.bf16.msra.mxu1 %v14535_v27  ;;  %v14627_v13 = vld [vmem:[%s21843_s1 + $0x7ec] ss:$16 sps:$4 sm:$0xff]   ;;  %v14622_v27 = vld [vmem:[%s21843_s1 + $0x7e0] ss:$16 sps:$4 sm:$0xff]  }
  0xc4   :  { %9954 = vmatprep.subr.bf16.mxu0 %v14540_v28  ;;  %10979 = vmatprep.subr.bf16.mxu1 %v14543_v29  ;;  %v14625_v28 = vld [vmem:[%s21843_s1 + $0x7e8] ss:$16 sps:$4 sm:$0xff]   ;;  %v14630_v29 = vld [vmem:[%s21843_s1 + $0x804] ss:$16 sps:$4 sm:$0xff]  }
  0xc5   :  { %9984 = vmatprep.mubr.bf16.mxu0 %v1680_v14  ;;  %11009 = vmatprep.mubr.bf16.mxu1 %v1680_v14  ;;  %v14633_v14 = vld [vmem:[%s21843_s1 + $0x80c] ss:$16 sps:$4 sm:$0xff]  }
  0xc7   :  { %9955 = vmatpush1.bf16.msra.mxu0 %v14538_v30  ;;  %10980 = vmatpush1.bf16.msra.mxu1 %v14541_v31  ;;  %v1696_v30 = vcombine.high %v17509_v21, %v17509_v21  ;;  %v1678_v31 = vcombine.high %v17335_v26, %v17335_v26  ;;  %v14639_v26 = vld [vmem:[%s21843_s1 + $0x82c] ss:$16 sps:$4 sm:$0xff]  }
  0xc8   :  { %9956 = vmatprep.subr.bf16.mxu0 %v14546_v25  ;;  %10981 = vmatprep.subr.bf16.mxu1 %v14549_v32  ;;  %v14628_v25 = vld [vmem:[%s21843_s1 + $0x800] ss:$16 sps:$4 sm:$0xff]   ;;  %v14631_v32 = vld [vmem:[%s21843_s1 + $0x808] ss:$16 sps:$4 sm:$0xff]  }
  0xcb   :  { %9957 = vmatpush1.bf16.msra.mxu0 %v14544_v33  ;;  %10982 = vmatpush1.bf16.msra.mxu1 %v14547_v34  ;;  %v14636_v33 = vld [vmem:[%s21843_s1 + $0x824] ss:$16 sps:$4 sm:$0xff]   ;;  %v17552_v34 = vrot.slane %v1696_v30, %v16851_v49 }
  0xcc   :  { %9958 = vmatprep.subr.bf16.mxu0 %v14552_v35  ;;  %10983 = vmatprep.subr.bf16.mxu1 %v14555_v36  ;;  %v14634_v35 = vld [vmem:[%s21843_s1 + $0x820] ss:$16 sps:$4 sm:$0xff]   ;;  %v14637_v36 = vld [vmem:[%s21843_s1 + $0x828] ss:$16 sps:$4 sm:$0xff]   ;;  %v14720_v30 = vld [vmem:[%s21843_s1 + $0x9e4] ss:$16 sps:$4 sm:$0xff]  }
  0xcf   :  { %9959 = vmatpush1.bf16.msra.mxu0 %v14550_v37  ;;  %10984 = vmatpush1.bf16.msra.mxu1 %v14553_v38  ;;  %v14642_v37 = vld [vmem:[%s21843_s1 + $0x844] ss:$16 sps:$4 sm:$0xff]   ;;  %v14645_v38 = vld [vmem:[%s21843_s1 + $0x84c] ss:$16 sps:$4 sm:$0xff]  }
  0xd0   :  { %9960 = vmatprep.subr.bf16.mxu0 %v14558_v39  ;;  %10985 = vmatprep.subr.bf16.mxu1 %v14561_v40  ;;  %v14640_v39 = vld [vmem:[%s21843_s1 + $0x840] ss:$16 sps:$4 sm:$0xff]   ;;  %v14643_v40 = vld [vmem:[%s21843_s1 + $0x848] ss:$16 sps:$4 sm:$0xff]  }
  0xd3   :  { %9961 = vmatpush1.bf16.msra.mxu0 %v14556_v41  ;;  %10986 = vmatpush1.bf16.msra.mxu1 %v14559_v43  ;;  %v14648_v41 = vld [vmem:[%s21843_s1 + $0x864] ss:$16 sps:$4 sm:$0xff]   ;;  %v14651_v43 = vld [vmem:[%s21843_s1 + $0x86c] ss:$16 sps:$4 sm:$0xff]  }
  0xd4   :  { %9962 = vmatprep.subr.bf16.mxu0 %v14564_v44  ;;  %10987 = vmatprep.subr.bf16.mxu1 %v14567_v45  ;;  %v14646_v44 = vld [vmem:[%s21843_s1 + $0x860] ss:$16 sps:$4 sm:$0xff]   ;;  %v14649_v45 = vld [vmem:[%s21843_s1 + $0x868] ss:$16 sps:$4 sm:$0xff]  }
  0xd7   :  { %9963 = vmatpush1.bf16.msra.mxu0 %v14562_v46  ;;  %10988 = vmatpush1.bf16.msra.mxu1 %v14565_v47  ;;  %v14654_v46 = vld [vmem:[%s21843_s1 + $0x884] ss:$16 sps:$4 sm:$0xff]   ;;  %v14657_v47 = vld [vmem:[%s21843_s1 + $0x88c] ss:$16 sps:$4 sm:$0xff]  }
  0xd8   :  { %9964 = vmatprep.subr.bf16.mxu0 %v14570_v48  ;;  %10989 = vmatprep.subr.bf16.mxu1 %v14573_v50  ;;  %v14652_v48 = vld [vmem:[%s21843_s1 + $0x880] ss:$16 sps:$4 sm:$0xff]   ;;  %v14655_v50 = vld [vmem:[%s21843_s1 + $0x888] ss:$16 sps:$4 sm:$0xff]  }
  0xdb   :  { %9965 = vmatpush1.bf16.msra.mxu0 %v14568_v51  ;;  %10990 = vmatpush1.bf16.msra.mxu1 %v14571_v53  ;;  %v14660_v51 = vld [vmem:[%s21843_s1 + $0x8a4] ss:$16 sps:$4 sm:$0xff]   ;;  %v14663_v53 = vld [vmem:[%s21843_s1 + $0x8ac] ss:$16 sps:$4 sm:$0xff]  }
  0xdc   :  { %9966 = vmatprep.subr.bf16.mxu0 %v14576_v54  ;;  %10991 = vmatprep.subr.bf16.mxu1 %v14579_v55  ;;  %v14658_v54 = vld [vmem:[%s21843_s1 + $0x8a0] ss:$16 sps:$4 sm:$0xff]   ;;  %v14661_v55 = vld [vmem:[%s21843_s1 + $0x8a8] ss:$16 sps:$4 sm:$0xff]  }
  0xdf   :  { %9967 = vmatpush1.bf16.msra.mxu0 %v14574_v56  ;;  %10992 = vmatpush1.bf16.msra.mxu1 %v14577_v57  ;;  %v14666_v56 = vld [vmem:[%s21843_s1 + $0x8c4] ss:$16 sps:$4 sm:$0xff]   ;;  %v14669_v57 = vld [vmem:[%s21843_s1 + $0x8cc] ss:$16 sps:$4 sm:$0xff]  }
  0xe0   :  { %9968 = vmatprep.subr.bf16.mxu0 %v14582_v58  ;;  %10993 = vmatprep.subr.bf16.mxu1 %v14585_v59  ;;  %v14664_v58 = vld [vmem:[%s21843_s1 + $0x8c0] ss:$16 sps:$4 sm:$0xff]   ;;  %v14667_v59 = vld [vmem:[%s21843_s1 + $0x8c8] ss:$16 sps:$4 sm:$0xff]  }
  0xe3   :  { %9969 = vmatpush1.bf16.msra.mxu0 %v14580_v60  ;;  %10994 = vmatpush1.bf16.msra.mxu1 %v14583_v61  ;;  %v14672_v60 = vld [vmem:[%s21843_s1 + $0x8e4] ss:$16 sps:$4 sm:$0xff]   ;;  %v14675_v61 = vld [vmem:[%s21843_s1 + $0x8ec] ss:$16 sps:$4 sm:$0xff]  }
  0xe4   :  { %9970 = vmatprep.subr.bf16.mxu0 %v14588_v62  ;;  %10995 = vmatprep.subr.bf16.mxu1 %v14591_v63  ;;  %v14670_v62 = vld [vmem:[%s21843_s1 + $0x8e0] ss:$16 sps:$4 sm:$0xff]   ;;  %v14673_v63 = vld [vmem:[%s21843_s1 + $0x8e8] ss:$16 sps:$4 sm:$0xff]  }
  0xe7   :  { %9971 = vmatpush1.bf16.msra.mxu0 %v14586_v0  ;;  %10996 = vmatpush1.bf16.msra.mxu1 %v14589_v1  ;;  %v14678_v0 = vld [vmem:[%s21843_s1 + $0x904] ss:$16 sps:$4 sm:$0xff]   ;;  %v14681_v1 = vld [vmem:[%s21843_s1 + $0x90c] ss:$16 sps:$4 sm:$0xff]  }
  0xe8   :  { %9972 = vmatprep.subr.bf16.mxu0 %v14594_v2  ;;  %10997 = vmatprep.subr.bf16.mxu1 %v14597_v3  ;;  %v14676_v2 = vld [vmem:[%s21843_s1 + $0x900] ss:$16 sps:$4 sm:$0xff]   ;;  %v14679_v3 = vld [vmem:[%s21843_s1 + $0x908] ss:$16 sps:$4 sm:$0xff]  }
  0xeb   :  { %9973 = vmatpush1.bf16.msra.mxu0 %v14592_v4  ;;  %10998 = vmatpush1.bf16.msra.mxu1 %v14595_v5  ;;  %v14684_v4 = vld [vmem:[%s21843_s1 + $0x924] ss:$16 sps:$4 sm:$0xff]   ;;  %v14687_v5 = vld [vmem:[%s21843_s1 + $0x92c] ss:$16 sps:$4 sm:$0xff]  }
  0xec   :  { %9974 = vmatprep.subr.bf16.mxu0 %v14600_v6  ;;  %10999 = vmatprep.subr.bf16.mxu1 %v14603_v7  ;;  %v14682_v6 = vld [vmem:[%s21843_s1 + $0x920] ss:$16 sps:$4 sm:$0xff]   ;;  %v14685_v7 = vld [vmem:[%s21843_s1 + $0x928] ss:$16 sps:$4 sm:$0xff]  }
  0xef   :  { %9975 = vmatpush1.bf16.msra.mxu0 %v14598_v8  ;;  %11000 = vmatpush1.bf16.msra.mxu1 %v14601_v9  ;;  %v14690_v8 = vld [vmem:[%s21843_s1 + $0x944] ss:$16 sps:$4 sm:$0xff]   ;;  %v14693_v9 = vld [vmem:[%s21843_s1 + $0x94c] ss:$16 sps:$4 sm:$0xff]  }
  0xf0   :  { %9976 = vmatprep.subr.bf16.mxu0 %v14606_v10  ;;  %11001 = vmatprep.subr.bf16.mxu1 %v14609_v11  ;;  %v14688_v10 = vld [vmem:[%s21843_s1 + $0x940] ss:$16 sps:$4 sm:$0xff]   ;;  %v14691_v11 = vld [vmem:[%s21843_s1 + $0x948] ss:$16 sps:$4 sm:$0xff]  }
  0xf3   :  { %9977 = vmatpush1.bf16.msra.mxu0 %v14604_v12  ;;  %11002 = vmatpush1.bf16.msra.mxu1 %v14607_v52  ;;  %v14696_v12 = vld [vmem:[%s21843_s1 + $0x964] ss:$16 sps:$4 sm:$0xff]   ;;  %v14699_v52 = vld [vmem:[%s21843_s1 + $0x96c] ss:$16 sps:$4 sm:$0xff]  }
  0xf4   :  { %9978 = vmatprep.subr.bf16.mxu0 %v14612_v15  ;;  %11003 = vmatprep.subr.bf16.mxu1 %v14615_v16  ;;  %v14694_v15 = vld [vmem:[%s21843_s1 + $0x960] ss:$16 sps:$4 sm:$0xff]   ;;  %v14697_v16 = vld [vmem:[%s21843_s1 + $0x968] ss:$16 sps:$4 sm:$0xff]  }
  0xf7   :  { %9979 = vmatpush1.bf16.msra.mxu0 %v14610_v17  ;;  %11004 = vmatpush1.bf16.msra.mxu1 %v14613_v18  ;;  %v14702_v17 = vld [vmem:[%s21843_s1 + $0x984] ss:$16 sps:$4 sm:$0xff]   ;;  %v14705_v18 = vld [vmem:[%s21843_s1 + $0x98c] ss:$16 sps:$4 sm:$0xff]  }
  0xf8   :  { %9980 = vmatprep.subr.bf16.mxu0 %v14618_v19  ;;  %11005 = vmatprep.subr.bf16.mxu1 %v14621_v20  ;;  %v14700_v19 = vld [vmem:[%s21843_s1 + $0x980] ss:$16 sps:$4 sm:$0xff]   ;;  %v14703_v20 = vld [vmem:[%s21843_s1 + $0x988] ss:$16 sps:$4 sm:$0xff]  }
  0xfb   :  { %9981 = vmatpush1.bf16.msra.mxu0 %v14616_v22  ;;  %11006 = vmatpush1.bf16.msra.mxu1 %v14619_v23  ;;  %v14708_v22 = vld [vmem:[%s21843_s1 + $0x9a4] ss:$16 sps:$4 sm:$0xff]   ;;  %v14711_v23 = vld [vmem:[%s21843_s1 + $0x9ac] ss:$16 sps:$4 sm:$0xff]  }
  0xfc   :  { %9982 = vmatprep.subr.bf16.mxu0 %v14624_v24  ;;  %11007 = vmatprep.subr.bf16.mxu1 %v14627_v13  ;;  %v14706_v24 = vld [vmem:[%s21843_s1 + $0x9a0] ss:$16 sps:$4 sm:$0xff]   ;;  %v14709_v13 = vld [vmem:[%s21843_s1 + $0x9a8] ss:$16 sps:$4 sm:$0xff]  }
  0xff   :  { %9983 = vmatpush1.bf16.msra.mxu0 %v14622_v27  ;;  %11008 = vmatpush1.bf16.msra.mxu1 %v14625_v28  ;;  %v14714_v27 = vld [vmem:[%s21843_s1 + $0x9c4] ss:$16 sps:$4 sm:$0xff]   ;;  %v14717_v28 = vld [vmem:[%s21843_s1 + $0x9cc] ss:$16 sps:$4 sm:$0xff]  }
 0x100   :  { %9993 = vmatprep.subr.bf16.mxu0 %v14630_v29  ;;  %11018 = vmatprep.subr.bf16.mxu1 %v14633_v14  ;;  %v14712_v29 = vld [vmem:[%s21843_s1 + $0x9c0] ss:$16 sps:$4 sm:$0xff]   ;;  %v14715_v14 = vld [vmem:[%s21843_s1 + $0x9c8] ss:$16 sps:$4 sm:$0xff]  }
 0x102   :  { %9985 = vmatmul.mubr.bf16.vlgmr.msra.gmra.mrb[0].mxu0 %v1678_v31  ;;  %11010 = vmatmul.mubr.bf16.vlgmr.msra.gmra.mrb[0].mxu1 %v1678_v31  ;;  %v14723_v31 = vld [vmem:[%s21843_s1 + $0x9ec] ss:$16 sps:$4 sm:$0xff]  }
 0x103   :  { %9994 = vmatpush1.bf16.msra.mxu0 %v14628_v25  ;;  %11019 = vmatpush1.bf16.msra.mxu1 %v14631_v32  ;;  %v14718_v25 = vld [vmem:[%s21843_s1 + $0x9e0] ss:$16 sps:$4 sm:$0xff]   ;;  %v14721_v32 = vld [vmem:[%s21843_s1 + $0x9e8] ss:$16 sps:$4 sm:$0xff]  }
 0x104   :  { %9995 = vmatprep.subr.bf16.mxu0 %v14636_v33  ;;  %11020 = vmatprep.subr.bf16.mxu1 %v14639_v26  ;;  %v14726_v33 = vld [vmem:[%s21843_s1 + $0xa04] ss:$16 sps:$4 sm:$0xff]   ;;  %v14729_v26 = vld [vmem:[%s21843_s1 + $0xa0c] ss:$16 sps:$4 sm:$0xff]  }
 0x105   :  { %10025 = vmatprep.mubr.bf16.mxu0 %v17552_v34  ;;  %11050 = vmatprep.mubr.bf16.mxu1 %v17552_v34 }
 0x107   :  { %9996 = vmatpush1.bf16.msra.mxu0 %v14634_v35  ;;  %11021 = vmatpush1.bf16.msra.mxu1 %v14637_v36  ;;  %v17738_v35 = vrot.slane %v17509_v21, %v16851_v49  ;;  %v14724_v36 = vld [vmem:[%s21843_s1 + $0xa00] ss:$16 sps:$4 sm:$0xff]   ;;  %v14735_v21 = vld [vmem:[%s21843_s1 + $0xa2c] ss:$16 sps:$4 sm:$0xff]  }
 0x108   :  { %9997 = vmatprep.subr.bf16.mxu0 %v14642_v37  ;;  %11022 = vmatprep.subr.bf16.mxu1 %v14645_v38  ;;  %v14727_v37 = vld [vmem:[%s21843_s1 + $0xa08] ss:$16 sps:$4 sm:$0xff]   ;;  %v14732_v38 = vld [vmem:[%s21843_s1 + $0xa24] ss:$16 sps:$4 sm:$0xff]  }
 0x10b   :  { %9998 = vmatpush1.bf16.msra.mxu0 %v14640_v39  ;;  %11023 = vmatpush1.bf16.msra.mxu1 %v14643_v40  ;;  %v1728_v39 = vcombine.high %v17552_v34, %v17552_v34  ;;  %v14730_v40 = vld [vmem:[%s21843_s1 + $0xa20] ss:$16 sps:$4 sm:$0xff]   ;;  %v14738_v34 = vld [vmem:[%s21843_s1 + $0xa44] ss:$16 sps:$4 sm:$0xff]  }
 0x10c   :  { %9999 = vmatprep.subr.bf16.mxu0 %v14648_v41  ;;  %11024 = vmatprep.subr.bf16.mxu1 %v14651_v43  ;;  %v14733_v41 = vld [vmem:[%s21843_s1 + $0xa28] ss:$16 sps:$4 sm:$0xff]   ;;  %v14741_v43 = vld [vmem:[%s21843_s1 + $0xa4c] ss:$16 sps:$4 sm:$0xff]  }
 0x10f   :  { %10000 = vmatpush1.bf16.msra.mxu0 %v14646_v44  ;;  %11025 = vmatpush1.bf16.msra.mxu1 %v14649_v45  ;;  %v14736_v44 = vld [vmem:[%s21843_s1 + $0xa40] ss:$16 sps:$4 sm:$0xff]   ;;  %v14739_v45 = vld [vmem:[%s21843_s1 + $0xa48] ss:$16 sps:$4 sm:$0xff]  }
 0x110   :  { %10001 = vmatprep.subr.bf16.mxu0 %v14654_v46  ;;  %11026 = vmatprep.subr.bf16.mxu1 %v14657_v47  ;;  %v14744_v46 = vld [vmem:[%s21843_s1 + $0xa64] ss:$16 sps:$4 sm:$0xff]   ;;  %v14747_v47 = vld [vmem:[%s21843_s1 + $0xa6c] ss:$16 sps:$4 sm:$0xff]  }
 0x113   :  { %10002 = vmatpush1.bf16.msra.mxu0 %v14652_v48  ;;  %11027 = vmatpush1.bf16.msra.mxu1 %v14655_v50  ;;  %v14742_v48 = vld [vmem:[%s21843_s1 + $0xa60] ss:$16 sps:$4 sm:$0xff]   ;;  %v14745_v50 = vld [vmem:[%s21843_s1 + $0xa68] ss:$16 sps:$4 sm:$0xff]  }
 0x114   :  { %10003 = vmatprep.subr.bf16.mxu0 %v14660_v51  ;;  %11028 = vmatprep.subr.bf16.mxu1 %v14663_v53  ;;  %v14750_v51 = vld [vmem:[%s21843_s1 + $0xa84] ss:$16 sps:$4 sm:$0xff]   ;;  %v14753_v53 = vld [vmem:[%s21843_s1 + $0xa8c] ss:$16 sps:$4 sm:$0xff]  }
 0x117   :  { %10004 = vmatpush1.bf16.msra.mxu0 %v14658_v54  ;;  %11029 = vmatpush1.bf16.msra.mxu1 %v14661_v55  ;;  %v14748_v54 = vld [vmem:[%s21843_s1 + $0xa80] ss:$16 sps:$4 sm:$0xff]   ;;  %v14751_v55 = vld [vmem:[%s21843_s1 + $0xa88] ss:$16 sps:$4 sm:$0xff]  }
 0x118   :  { %10005 = vmatprep.subr.bf16.mxu0 %v14666_v56  ;;  %11030 = vmatprep.subr.bf16.mxu1 %v14669_v57  ;;  %v14756_v56 = vld [vmem:[%s21843_s1 + $0xaa4] ss:$16 sps:$4 sm:$0xff]   ;;  %v14759_v57 = vld [vmem:[%s21843_s1 + $0xaac] ss:$16 sps:$4 sm:$0xff]  }
 0x11b   :  { %10006 = vmatpush1.bf16.msra.mxu0 %v14664_v58  ;;  %11031 = vmatpush1.bf16.msra.mxu1 %v14667_v59  ;;  %v14754_v58 = vld [vmem:[%s21843_s1 + $0xaa0] ss:$16 sps:$4 sm:$0xff]   ;;  %v14757_v59 = vld [vmem:[%s21843_s1 + $0xaa8] ss:$16 sps:$4 sm:$0xff]  }
 0x11c   :  { %10007 = vmatprep.subr.bf16.mxu0 %v14672_v60  ;;  %11032 = vmatprep.subr.bf16.mxu1 %v14675_v61  ;;  %v14762_v60 = vld [vmem:[%s21843_s1 + $0xac4] ss:$16 sps:$4 sm:$0xff]   ;;  %v14765_v61 = vld [vmem:[%s21843_s1 + $0xacc] ss:$16 sps:$4 sm:$0xff]  }
 0x11f   :  { %10008 = vmatpush1.bf16.msra.mxu0 %v14670_v62  ;;  %11033 = vmatpush1.bf16.msra.mxu1 %v14673_v63  ;;  %v14760_v62 = vld [vmem:[%s21843_s1 + $0xac0] ss:$16 sps:$4 sm:$0xff]   ;;  %v14763_v63 = vld [vmem:[%s21843_s1 + $0xac8] ss:$16 sps:$4 sm:$0xff]  }
 0x120   :  { %10009 = vmatprep.subr.bf16.mxu0 %v14678_v0  ;;  %11034 = vmatprep.subr.bf16.mxu1 %v14681_v1  ;;  %v14768_v0 = vld [vmem:[%s21843_s1 + $0xae4] ss:$16 sps:$4 sm:$0xff]   ;;  %v14771_v1 = vld [vmem:[%s21843_s1 + $0xaec] ss:$16 sps:$4 sm:$0xff]  }
 0x123   :  { %10010 = vmatpush1.bf16.msra.mxu0 %v14676_v2  ;;  %11035 = vmatpush1.bf16.msra.mxu1 %v14679_v3  ;;  %v14766_v2 = vld [vmem:[%s21843_s1 + $0xae0] ss:$16 sps:$4 sm:$0xff]   ;;  %v14769_v3 = vld [vmem:[%s21843_s1 + $0xae8] ss:$16 sps:$4 sm:$0xff]  }
 0x124   :  { %10011 = vmatprep.subr.bf16.mxu0 %v14684_v4  ;;  %11036 = vmatprep.subr.bf16.mxu1 %v14687_v5  ;;  %v14774_v4 = vld [vmem:[%s21843_s1 + $0xb04] ss:$16 sps:$4 sm:$0xff]   ;;  %v14777_v5 = vld [vmem:[%s21843_s1 + $0xb0c] ss:$16 sps:$4 sm:$0xff]  }
 0x127   :  { %10012 = vmatpush1.bf16.msra.mxu0 %v14682_v6  ;;  %11037 = vmatpush1.bf16.msra.mxu1 %v14685_v7  ;;  %v14772_v6 = vld [vmem:[%s21843_s1 + $0xb00] ss:$16 sps:$4 sm:$0xff]   ;;  %v14775_v7 = vld [vmem:[%s21843_s1 + $0xb08] ss:$16 sps:$4 sm:$0xff]  }
 0x128   :  { %10013 = vmatprep.subr.bf16.mxu0 %v14690_v8  ;;  %11038 = vmatprep.subr.bf16.mxu1 %v14693_v9  ;;  %v14780_v8 = vld [vmem:[%s21843_s1 + $0xb24] ss:$16 sps:$4 sm:$0xff]   ;;  %v14783_v9 = vld [vmem:[%s21843_s1 + $0xb2c] ss:$16 sps:$4 sm:$0xff]  }
 0x12b   :  { %10014 = vmatpush1.bf16.msra.mxu0 %v14688_v10  ;;  %11039 = vmatpush1.bf16.msra.mxu1 %v14691_v11  ;;  %v14778_v10 = vld [vmem:[%s21843_s1 + $0xb20] ss:$16 sps:$4 sm:$0xff]   ;;  %v14781_v11 = vld [vmem:[%s21843_s1 + $0xb28] ss:$16 sps:$4 sm:$0xff]  }
 0x12c   :  { %10015 = vmatprep.subr.bf16.mxu0 %v14696_v12  ;;  %11040 = vmatprep.subr.bf16.mxu1 %v14699_v52  ;;  %v14786_v12 = vld [vmem:[%s21843_s1 + $0xb44] ss:$16 sps:$4 sm:$0xff]   ;;  %v14789_v52 = vld [vmem:[%s21843_s1 + $0xb4c] ss:$16 sps:$4 sm:$0xff]  }
 0x12f   :  { %10016 = vmatpush1.bf16.msra.mxu0 %v14694_v15  ;;  %11041 = vmatpush1.bf16.msra.mxu1 %v14697_v16  ;;  %v14784_v15 = vld [vmem:[%s21843_s1 + $0xb40] ss:$16 sps:$4 sm:$0xff]   ;;  %v14787_v16 = vld [vmem:[%s21843_s1 + $0xb48] ss:$16 sps:$4 sm:$0xff]  }
 0x130   :  { %10017 = vmatprep.subr.bf16.mxu0 %v14702_v17  ;;  %11042 = vmatprep.subr.bf16.mxu1 %v14705_v18  ;;  %v14792_v17 = vld [vmem:[%s21843_s1 + $0xb64] ss:$16 sps:$4 sm:$0xff]   ;;  %v14795_v18 = vld [vmem:[%s21843_s1 + $0xb6c] ss:$16 sps:$4 sm:$0xff]  }
 0x133   :  { %10018 = vmatpush1.bf16.msra.mxu0 %v14700_v19  ;;  %11043 = vmatpush1.bf16.msra.mxu1 %v14703_v20  ;;  %v14790_v19 = vld [vmem:[%s21843_s1 + $0xb60] ss:$16 sps:$4 sm:$0xff]   ;;  %v14793_v20 = vld [vmem:[%s21843_s1 + $0xb68] ss:$16 sps:$4 sm:$0xff]  }
 0x134   :  { %10019 = vmatprep.subr.bf16.mxu0 %v14708_v22  ;;  %11044 = vmatprep.subr.bf16.mxu1 %v14711_v23  ;;  %v14798_v22 = vld [vmem:[%s21843_s1 + $0xb84] ss:$16 sps:$4 sm:$0xff]   ;;  %v14801_v23 = vld [vmem:[%s21843_s1 + $0xb8c] ss:$16 sps:$4 sm:$0xff]  }
 0x137   :  { %10020 = vmatpush1.bf16.msra.mxu0 %v14706_v24  ;;  %11045 = vmatpush1.bf16.msra.mxu1 %v14709_v13  ;;  %v14796_v24 = vld [vmem:[%s21843_s1 + $0xb80] ss:$16 sps:$4 sm:$0xff]   ;;  %v14799_v13 = vld [vmem:[%s21843_s1 + $0xb88] ss:$16 sps:$4 sm:$0xff]  }
 0x138   :  { %10021 = vmatprep.subr.bf16.mxu0 %v14714_v27  ;;  %11046 = vmatprep.subr.bf16.mxu1 %v14717_v28  ;;  %v14804_v27 = vld [vmem:[%s21843_s1 + $0xba4] ss:$16 sps:$4 sm:$0xff]   ;;  %v14807_v28 = vld [vmem:[%s21843_s1 + $0xbac] ss:$16 sps:$4 sm:$0xff]  }
 0x13b   :  { %10022 = vmatpush1.bf16.msra.mxu0 %v14712_v29  ;;  %11047 = vmatpush1.bf16.msra.mxu1 %v14715_v14  ;;  %v14802_v29 = vld [vmem:[%s21843_s1 + $0xba0] ss:$16 sps:$4 sm:$0xff]   ;;  %v14805_v14 = vld [vmem:[%s21843_s1 + $0xba8] ss:$16 sps:$4 sm:$0xff]  }
 0x13c   :  { %10023 = vmatprep.subr.bf16.mxu0 %v14720_v30  ;;  %11048 = vmatprep.subr.bf16.mxu1 %v14723_v31  ;;  %v14810_v30 = vld [vmem:[%s21843_s1 + $0xbc4] ss:$16 sps:$4 sm:$0xff]   ;;  %v14813_v31 = vld [vmem:[%s21843_s1 + $0xbcc] ss:$16 sps:$4 sm:$0xff]  }
 0x13f   :  { %10024 = vmatpush1.bf16.msra.mxu0 %v14718_v25  ;;  %11049 = vmatpush1.bf16.msra.mxu1 %v14721_v32  ;;  %v16641_v25 = vld [vmem:[%s21842_s0 + $0x8] sm:$0xff] }
 0x140   :  { %10034 = vmatprep.subr.bf16.mxu0 %v14726_v33  ;;  %11059 = vmatprep.subr.bf16.mxu1 %v14729_v26  ;;  %v1681_v32 = vcombine.high %v16641_v25, %v16641_v25  ;;  %v14808_v33 = vld [vmem:[%s21843_s1 + $0xbc0] ss:$16 sps:$4 sm:$0xff]   ;;  %v14811_v26 = vld [vmem:[%s21843_s1 + $0xbc8] ss:$16 sps:$4 sm:$0xff]  }
 0x141   :  { %v14892_v25 = vld [vmem:[%s21843_s1 + $0xd80] ss:$16 sps:$4 sm:$0xff]  }
 0x142   :  { %10026 = vmatmul.mubr.bf16.vlgmr.msra.gmra.mrb[0].mxu0 %v17738_v35  ;;  %11051 = vmatmul.mubr.bf16.vlgmr.msra.gmra.mrb[0].mxu1 %v17738_v35 }
 0x143   :  { %10035 = vmatpush1.bf16.msra.mxu0 %v14724_v36  ;;  %11060 = vmatpush1.bf16.msra.mxu1 %v14727_v37  ;;  %v14816_v36 = vld [vmem:[%s21843_s1 + $0xbe4] ss:$16 sps:$4 sm:$0xff]   ;;  %v14819_v37 = vld [vmem:[%s21843_s1 + $0xbec] ss:$16 sps:$4 sm:$0xff]  }
 0x144   :  { %10036 = vmatprep.subr.bf16.mxu0 %v14732_v38  ;;  %11061 = vmatprep.subr.bf16.mxu1 %v14735_v21  ;;  %v17928_v38 = vrot.slane %v1681_v32, %v16851_v49  ;;  %v14814_v21 = vld [vmem:[%s21843_s1 + $0xbe0] ss:$16 sps:$4 sm:$0xff]   ;;  %v14895_v32 = vld [vmem:[%s21843_s1 + $0xd88] ss:$16 sps:$4 sm:$0xff]  }
 0x145   :  { %10066 = vmatprep.mubr.bf16.mxu0 %v1728_v39  ;;  %11091 = vmatprep.mubr.bf16.mxu1 %v1728_v39  ;;  %v14817_v39 = vld [vmem:[%s21843_s1 + $0xbe8] ss:$16 sps:$4 sm:$0xff]  }
 0x147   :  { %10037 = vmatpush1.bf16.msra.mxu0 %v14730_v40  ;;  %11062 = vmatpush1.bf16.msra.mxu1 %v14733_v41  ;;  %v14822_v40 = vld [vmem:[%s21843_s1 + $0xc04] ss:$16 sps:$4 sm:$0xff]   ;;  %v14825_v41 = vld [vmem:[%s21843_s1 + $0xc0c] ss:$16 sps:$4 sm:$0xff]  }
 0x148   :  { %10038 = vmatprep.subr.bf16.mxu0 %v14738_v34  ;;  %11063 = vmatprep.subr.bf16.mxu1 %v14741_v43  ;;  %v1697_v34 = vcombine.high %v17928_v38, %v17928_v38  ;;  %v1726_v43 = vcombine.high %v17738_v35, %v17738_v35  ;;  %v14831_v35 = vld [vmem:[%s21843_s1 + $0xc2c] ss:$16 sps:$4 sm:$0xff]  }
 0x14b   :  { %10039 = vmatpush1.bf16.msra.mxu0 %v14736_v44  ;;  %11064 = vmatpush1.bf16.msra.mxu1 %v14739_v45  ;;  %v14820_v44 = vld [vmem:[%s21843_s1 + $0xc00] ss:$16 sps:$4 sm:$0xff]   ;;  %v14823_v45 = vld [vmem:[%s21843_s1 + $0xc08] ss:$16 sps:$4 sm:$0xff]  }
 0x14c   :  { %10040 = vmatprep.subr.bf16.mxu0 %v14744_v46  ;;  %11065 = vmatprep.subr.bf16.mxu1 %v14747_v47  ;;  %v14828_v46 = vld [vmem:[%s21843_s1 + $0xc24] ss:$16 sps:$4 sm:$0xff]   ;;  %v17959_v47 = vrot.slane %v1697_v34, %v16851_v49 }
 0x14d   :  { %v14912_v34 = vld [vmem:[%s21843_s1 + $0xde4] ss:$16 sps:$4 sm:$0xff]  }
 0x14f   :  { %10041 = vmatpush1.bf16.msra.mxu0 %v14742_v48  ;;  %11066 = vmatpush1.bf16.msra.mxu1 %v14745_v50  ;;  %v14826_v48 = vld [vmem:[%s21843_s1 + $0xc20] ss:$16 sps:$4 sm:$0xff]   ;;  %v14829_v50 = vld [vmem:[%s21843_s1 + $0xc28] ss:$16 sps:$4 sm:$0xff]  }
 0x150   :  { %10042 = vmatprep.subr.bf16.mxu0 %v14750_v51  ;;  %11067 = vmatprep.subr.bf16.mxu1 %v14753_v53  ;;  %v14834_v51 = vld [vmem:[%s21843_s1 + $0xc44] ss:$16 sps:$4 sm:$0xff]   ;;  %v14837_v53 = vld [vmem:[%s21843_s1 + $0xc4c] ss:$16 sps:$4 sm:$0xff]  }
 0x153   :  { %10043 = vmatpush1.bf16.msra.mxu0 %v14748_v54  ;;  %11068 = vmatpush1.bf16.msra.mxu1 %v14751_v55  ;;  %v14832_v54 = vld [vmem:[%s21843_s1 + $0xc40] ss:$16 sps:$4 sm:$0xff]   ;;  %v14835_v55 = vld [vmem:[%s21843_s1 + $0xc48] ss:$16 sps:$4 sm:$0xff]  }
 0x154   :  { %10044 = vmatprep.subr.bf16.mxu0 %v14756_v56  ;;  %11069 = vmatprep.subr.bf16.mxu1 %v14759_v57  ;;  %v14840_v56 = vld [vmem:[%s21843_s1 + $0xc64] ss:$16 sps:$4 sm:$0xff]   ;;  %v14843_v57 = vld [vmem:[%s21843_s1 + $0xc6c] ss:$16 sps:$4 sm:$0xff]  }
 0x157   :  { %10045 = vmatpush1.bf16.msra.mxu0 %v14754_v58  ;;  %11070 = vmatpush1.bf16.msra.mxu1 %v14757_v59  ;;  %v14838_v58 = vld [vmem:[%s21843_s1 + $0xc60] ss:$16 sps:$4 sm:$0xff]   ;;  %v14841_v59 = vld [vmem:[%s21843_s1 + $0xc68] ss:$16 sps:$4 sm:$0xff]  }
 0x158   :  { %10046 = vmatprep.subr.bf16.mxu0 %v14762_v60  ;;  %11071 = vmatprep.subr.bf16.mxu1 %v14765_v61  ;;  %v14846_v60 = vld [vmem:[%s21843_s1 + $0xc84] ss:$16 sps:$4 sm:$0xff]   ;;  %v14849_v61 = vld [vmem:[%s21843_s1 + $0xc8c] ss:$16 sps:$4 sm:$0xff]  }
 0x15b   :  { %10047 = vmatpush1.bf16.msra.mxu0 %v14760_v62  ;;  %11072 = vmatpush1.bf16.msra.mxu1 %v14763_v63  ;;  %v14844_v62 = vld [vmem:[%s21843_s1 + $0xc80] ss:$16 sps:$4 sm:$0xff]   ;;  %v14847_v63 = vld [vmem:[%s21843_s1 + $0xc88] ss:$16 sps:$4 sm:$0xff]  }
 0x15c   :  { %10048 = vmatprep.subr.bf16.mxu0 %v14768_v0  ;;  %11073 = vmatprep.subr.bf16.mxu1 %v14771_v1  ;;  %v14852_v0 = vld [vmem:[%s21843_s1 + $0xca4] ss:$16 sps:$4 sm:$0xff]   ;;  %v14855_v1 = vld [vmem:[%s21843_s1 + $0xcac] ss:$16 sps:$4 sm:$0xff]  }
 0x15f   :  { %10049 = vmatpush1.bf16.msra.mxu0 %v14766_v2  ;;  %11074 = vmatpush1.bf16.msra.mxu1 %v14769_v3  ;;  %v14850_v2 = vld [vmem:[%s21843_s1 + $0xca0] ss:$16 sps:$4 sm:$0xff]   ;;  %v14853_v3 = vld [vmem:[%s21843_s1 + $0xca8] ss:$16 sps:$4 sm:$0xff]  }
 0x160   :  { %10050 = vmatprep.subr.bf16.mxu0 %v14774_v4  ;;  %11075 = vmatprep.subr.bf16.mxu1 %v14777_v5  ;;  %v14858_v4 = vld [vmem:[%s21843_s1 + $0xcc4] ss:$16 sps:$4 sm:$0xff]   ;;  %v14861_v5 = vld [vmem:[%s21843_s1 + $0xccc] ss:$16 sps:$4 sm:$0xff]  }
 0x163   :  { %10051 = vmatpush1.bf16.msra.mxu0 %v14772_v6  ;;  %11076 = vmatpush1.bf16.msra.mxu1 %v14775_v7  ;;  %v14856_v6 = vld [vmem:[%s21843_s1 + $0xcc0] ss:$16 sps:$4 sm:$0xff]   ;;  %v14859_v7 = vld [vmem:[%s21843_s1 + $0xcc8] ss:$16 sps:$4 sm:$0xff]  }
 0x164   :  { %10052 = vmatprep.subr.bf16.mxu0 %v14780_v8  ;;  %11077 = vmatprep.subr.bf16.mxu1 %v14783_v9  ;;  %v14864_v8 = vld [vmem:[%s21843_s1 + $0xce4] ss:$16 sps:$4 sm:$0xff]   ;;  %v14867_v9 = vld [vmem:[%s21843_s1 + $0xcec] ss:$16 sps:$4 sm:$0xff]  }
 0x167   :  { %10053 = vmatpush1.bf16.msra.mxu0 %v14778_v10  ;;  %11078 = vmatpush1.bf16.msra.mxu1 %v14781_v11  ;;  %v14862_v10 = vld [vmem:[%s21843_s1 + $0xce0] ss:$16 sps:$4 sm:$0xff]   ;;  %v14865_v11 = vld [vmem:[%s21843_s1 + $0xce8] ss:$16 sps:$4 sm:$0xff]  }
 0x168   :  { %10054 = vmatprep.subr.bf16.mxu0 %v14786_v12  ;;  %11079 = vmatprep.subr.bf16.mxu1 %v14789_v52  ;;  %v14870_v12 = vld [vmem:[%s21843_s1 + $0xd04] ss:$16 sps:$4 sm:$0xff]   ;;  %v14873_v52 = vld [vmem:[%s21843_s1 + $0xd0c] ss:$16 sps:$4 sm:$0xff]  }
 0x16b   :  { %10055 = vmatpush1.bf16.msra.mxu0 %v14784_v15  ;;  %11080 = vmatpush1.bf16.msra.mxu1 %v14787_v16  ;;  %v14868_v15 = vld [vmem:[%s21843_s1 + $0xd00] ss:$16 sps:$4 sm:$0xff]   ;;  %v14871_v16 = vld [vmem:[%s21843_s1 + $0xd08] ss:$16 sps:$4 sm:$0xff]  }
 0x16c   :  { %10056 = vmatprep.subr.bf16.mxu0 %v14792_v17  ;;  %11081 = vmatprep.subr.bf16.mxu1 %v14795_v18  ;;  %v14876_v17 = vld [vmem:[%s21843_s1 + $0xd24] ss:$16 sps:$4 sm:$0xff]   ;;  %v14879_v18 = vld [vmem:[%s21843_s1 + $0xd2c] ss:$16 sps:$4 sm:$0xff]  }
 0x16f   :  { %10057 = vmatpush1.bf16.msra.mxu0 %v14790_v19  ;;  %11082 = vmatpush1.bf16.msra.mxu1 %v14793_v20  ;;  %v14874_v19 = vld [vmem:[%s21843_s1 + $0xd20] ss:$16 sps:$4 sm:$0xff]   ;;  %v14877_v20 = vld [vmem:[%s21843_s1 + $0xd28] ss:$16 sps:$4 sm:$0xff]  }
 0x170   :  { %10058 = vmatprep.subr.bf16.mxu0 %v14798_v22  ;;  %11083 = vmatprep.subr.bf16.mxu1 %v14801_v23  ;;  %v14882_v22 = vld [vmem:[%s21843_s1 + $0xd44] ss:$16 sps:$4 sm:$0xff]   ;;  %v14885_v23 = vld [vmem:[%s21843_s1 + $0xd4c] ss:$16 sps:$4 sm:$0xff]  }
 0x173   :  { %10059 = vmatpush1.bf16.msra.mxu0 %v14796_v24  ;;  %11084 = vmatpush1.bf16.msra.mxu1 %v14799_v13  ;;  %v14880_v24 = vld [vmem:[%s21843_s1 + $0xd40] ss:$16 sps:$4 sm:$0xff]   ;;  %v14883_v13 = vld [vmem:[%s21843_s1 + $0xd48] ss:$16 sps:$4 sm:$0xff]  }
 0x174   :  { %10060 = vmatprep.subr.bf16.mxu0 %v14804_v27  ;;  %11085 = vmatprep.subr.bf16.mxu1 %v14807_v28  ;;  %v14888_v27 = vld [vmem:[%s21843_s1 + $0xd64] ss:$16 sps:$4 sm:$0xff]   ;;  %v14891_v28 = vld [vmem:[%s21843_s1 + $0xd6c] ss:$16 sps:$4 sm:$0xff]  }
 0x177   :  { %10061 = vmatpush1.bf16.msra.mxu0 %v14802_v29  ;;  %11086 = vmatpush1.bf16.msra.mxu1 %v14805_v14  ;;  %v14886_v29 = vld [vmem:[%s21843_s1 + $0xd60] ss:$16 sps:$4 sm:$0xff]   ;;  %v14889_v14 = vld [vmem:[%s21843_s1 + $0xd68] ss:$16 sps:$4 sm:$0xff]  }
 0x178   :  { %10062 = vmatprep.subr.bf16.mxu0 %v14810_v30  ;;  %11087 = vmatprep.subr.bf16.mxu1 %v14813_v31  ;;  %v14894_v30 = vld [vmem:[%s21843_s1 + $0xd84] ss:$16 sps:$4 sm:$0xff]   ;;  %v14897_v31 = vld [vmem:[%s21843_s1 + $0xd8c] ss:$16 sps:$4 sm:$0xff]  }
 0x17b   :  { %10063 = vmatpush1.bf16.msra.mxu0 %v14808_v33  ;;  %11088 = vmatpush1.bf16.msra.mxu1 %v14811_v26  ;;  %v14900_v33 = vld [vmem:[%s21843_s1 + $0xda4] ss:$16 sps:$4 sm:$0xff]   ;;  %v14903_v26 = vld [vmem:[%s21843_s1 + $0xdac] ss:$16 sps:$4 sm:$0xff]  }
 0x17c   :  { %10064 = vmatprep.subr.bf16.mxu0 %v14816_v36  ;;  %11089 = vmatprep.subr.bf16.mxu1 %v14819_v37  ;;  %v14898_v36 = vld [vmem:[%s21843_s1 + $0xda0] ss:$16 sps:$4 sm:$0xff]   ;;  %v14901_v37 = vld [vmem:[%s21843_s1 + $0xda8] ss:$16 sps:$4 sm:$0xff]  }
 0x17f   :  { %10065 = vmatpush1.bf16.msra.mxu0 %v14814_v21  ;;  %11090 = vmatpush1.bf16.msra.mxu1 %v14817_v39  ;;  %v14906_v21 = vld [vmem:[%s21843_s1 + $0xdc4] ss:$16 sps:$4 sm:$0xff]   ;;  %v14909_v39 = vld [vmem:[%s21843_s1 + $0xdcc] ss:$16 sps:$4 sm:$0xff]  }
 0x180   :  { %10075 = vmatprep.subr.bf16.mxu0 %v14822_v40  ;;  %11100 = vmatprep.subr.bf16.mxu1 %v14825_v41  ;;  %v14904_v40 = vld [vmem:[%s21843_s1 + $0xdc0] ss:$16 sps:$4 sm:$0xff]   ;;  %v14907_v41 = vld [vmem:[%s21843_s1 + $0xdc8] ss:$16 sps:$4 sm:$0xff]  }
 0x182   :  { %10067 = vmatmul.mubr.bf16.vlgmr.msra.gmra.mrb[0].mxu0 %v1726_v43  ;;  %11092 = vmatmul.mubr.bf16.vlgmr.msra.gmra.mrb[0].mxu1 %v1726_v43  ;;  %v14915_v43 = vld [vmem:[%s21843_s1 + $0xdec] ss:$16 sps:$4 sm:$0xff]  }
 0x183   :  { %10076 = vmatpush1.bf16.msra.mxu0 %v14820_v44  ;;  %11101 = vmatpush1.bf16.msra.mxu1 %v14823_v45  ;;  %v14910_v44 = vld [vmem:[%s21843_s1 + $0xde0] ss:$16 sps:$4 sm:$0xff]   ;;  %v14913_v45 = vld [vmem:[%s21843_s1 + $0xde8] ss:$16 sps:$4 sm:$0xff]  }
 0x184   :  { %10077 = vmatprep.subr.bf16.mxu0 %v14828_v46  ;;  %11102 = vmatprep.subr.bf16.mxu1 %v14831_v35  ;;  %v14919_v46 = vld [vmem:[%s21843_s1 + $0xe04] ss:$16 sps:$4 sm:$0xff]   ;;  %v14922_v35 = vld [vmem:[%s21843_s1 + $0xe0c] ss:$16 sps:$4 sm:$0xff]  }
 0x185   :  { %10107 = vmatprep.mubr.bf16.mxu0 %v17959_v47  ;;  %11132 = vmatprep.mubr.bf16.mxu1 %v17959_v47 }
 0x187   :  { %10078 = vmatpush1.bf16.msra.mxu0 %v14826_v48  ;;  %11103 = vmatpush1.bf16.msra.mxu1 %v14829_v50  ;;  %v18145_v48 = vrot.slane %v17928_v38, %v16851_v49  ;;  %v14917_v50 = vld [vmem:[%s21843_s1 + $0xe00] ss:$16 sps:$4 sm:$0xff]   ;;  %v14928_v38 = vld [vmem:[%s21843_s1 + $0xe2c] ss:$16 sps:$4 sm:$0xff]  }
 0x188   :  { %10079 = vmatprep.subr.bf16.mxu0 %v14834_v51  ;;  %11104 = vmatprep.subr.bf16.mxu1 %v14837_v53  ;;  %v14920_v51 = vld [vmem:[%s21843_s1 + $0xe08] ss:$16 sps:$4 sm:$0xff]   ;;  %v14925_v53 = vld [vmem:[%s21843_s1 + $0xe24] ss:$16 sps:$4 sm:$0xff]  }
 0x18b   :  { %10080 = vmatpush1.bf16.msra.mxu0 %v14832_v54  ;;  %11105 = vmatpush1.bf16.msra.mxu1 %v14835_v55  ;;  %v1729_v54 = vcombine.high %v17959_v47, %v17959_v47  ;;  %v14923_v55 = vld [vmem:[%s21843_s1 + $0xe20] ss:$16 sps:$4 sm:$0xff]   ;;  %v14931_v47 = vld [vmem:[%s21843_s1 + $0xe44] ss:$16 sps:$4 sm:$0xff]  }
 0x18c   :  { %10081 = vmatprep.subr.bf16.mxu0 %v14840_v56  ;;  %11106 = vmatprep.subr.bf16.mxu1 %v14843_v57  ;;  %v14926_v56 = vld [vmem:[%s21843_s1 + $0xe28] ss:$16 sps:$4 sm:$0xff]   ;;  %v14934_v57 = vld [vmem:[%s21843_s1 + $0xe4c] ss:$16 sps:$4 sm:$0xff]  }
 0x18f   :  { %10082 = vmatpush1.bf16.msra.mxu0 %v14838_v58  ;;  %11107 = vmatpush1.bf16.msra.mxu1 %v14841_v59  ;;  %v14929_v58 = vld [vmem:[%s21843_s1 + $0xe40] ss:$16 sps:$4 sm:$0xff]   ;;  %v14932_v59 = vld [vmem:[%s21843_s1 + $0xe48] ss:$16 sps:$4 sm:$0xff]  }
 0x190   :  { %10083 = vmatprep.subr.bf16.mxu0 %v14846_v60  ;;  %11108 = vmatprep.subr.bf16.mxu1 %v14849_v61  ;;  %v14937_v60 = vld [vmem:[%s21843_s1 + $0xe64] ss:$16 sps:$4 sm:$0xff]   ;;  %v14940_v61 = vld [vmem:[%s21843_s1 + $0xe6c] ss:$16 sps:$4 sm:$0xff]  }
 0x193   :  { %10084 = vmatpush1.bf16.msra.mxu0 %v14844_v62  ;;  %11109 = vmatpush1.bf16.msra.mxu1 %v14847_v63  ;;  %v14935_v62 = vld [vmem:[%s21843_s1 + $0xe60] ss:$16 sps:$4 sm:$0xff]   ;;  %v14938_v63 = vld [vmem:[%s21843_s1 + $0xe68] ss:$16 sps:$4 sm:$0xff]  }
 0x194   :  { %10085 = vmatprep.subr.bf16.mxu0 %v14852_v0  ;;  %11110 = vmatprep.subr.bf16.mxu1 %v14855_v1  ;;  %v14943_v0 = vld [vmem:[%s21843_s1 + $0xe84] ss:$16 sps:$4 sm:$0xff]   ;;  %v14946_v1 = vld [vmem:[%s21843_s1 + $0xe8c] ss:$16 sps:$4 sm:$0xff]  }
 0x197   :  { %10086 = vmatpush1.bf16.msra.mxu0 %v14850_v2  ;;  %11111 = vmatpush1.bf16.msra.mxu1 %v14853_v3  ;;  %v14941_v2 = vld [vmem:[%s21843_s1 + $0xe80] ss:$16 sps:$4 sm:$0xff]   ;;  %v14944_v3 = vld [vmem:[%s21843_s1 + $0xe88] ss:$16 sps:$4 sm:$0xff]  }
 0x198   :  { %10087 = vmatprep.subr.bf16.mxu0 %v14858_v4  ;;  %11112 = vmatprep.subr.bf16.mxu1 %v14861_v5  ;;  %v14949_v4 = vld [vmem:[%s21843_s1 + $0xea4] ss:$16 sps:$4 sm:$0xff]   ;;  %v14952_v5 = vld [vmem:[%s21843_s1 + $0xeac] ss:$16 sps:$4 sm:$0xff]  }
 0x19b   :  { %10088 = vmatpush1.bf16.msra.mxu0 %v14856_v6  ;;  %11113 = vmatpush1.bf16.msra.mxu1 %v14859_v7  ;;  %v14947_v6 = vld [vmem:[%s21843_s1 + $0xea0] ss:$16 sps:$4 sm:$0xff]   ;;  %v14950_v7 = vld [vmem:[%s21843_s1 + $0xea8] ss:$16 sps:$4 sm:$0xff]  }
 0x19c   :  { %10089 = vmatprep.subr.bf16.mxu0 %v14864_v8  ;;  %11114 = vmatprep.subr.bf16.mxu1 %v14867_v9  ;;  %v14955_v8 = vld [vmem:[%s21843_s1 + $0xec4] ss:$16 sps:$4 sm:$0xff]   ;;  %v14958_v9 = vld [vmem:[%s21843_s1 + $0xecc] ss:$16 sps:$4 sm:$0xff]  }
 0x19f   :  { %10090 = vmatpush1.bf16.msra.mxu0 %v14862_v10  ;;  %11115 = vmatpush1.bf16.msra.mxu1 %v14865_v11  ;;  %v14953_v10 = vld [vmem:[%s21843_s1 + $0xec0] ss:$16 sps:$4 sm:$0xff]   ;;  %v14956_v11 = vld [vmem:[%s21843_s1 + $0xec8] ss:$16 sps:$4 sm:$0xff]  }
 0x1a0   :  { %10091 = vmatprep.subr.bf16.mxu0 %v14870_v12  ;;  %11116 = vmatprep.subr.bf16.mxu1 %v14873_v52  ;;  %v14961_v12 = vld [vmem:[%s21843_s1 + $0xee4] ss:$16 sps:$4 sm:$0xff]   ;;  %v14964_v52 = vld [vmem:[%s21843_s1 + $0xeec] ss:$16 sps:$4 sm:$0xff]  }
 0x1a3   :  { %10092 = vmatpush1.bf16.msra.mxu0 %v14868_v15  ;;  %11117 = vmatpush1.bf16.msra.mxu1 %v14871_v16  ;;  %v14959_v15 = vld [vmem:[%s21843_s1 + $0xee0] ss:$16 sps:$4 sm:$0xff]   ;;  %v14962_v16 = vld [vmem:[%s21843_s1 + $0xee8] ss:$16 sps:$4 sm:$0xff]  }
 0x1a4   :  { %10093 = vmatprep.subr.bf16.mxu0 %v14876_v17  ;;  %11118 = vmatprep.subr.bf16.mxu1 %v14879_v18  ;;  %v14967_v17 = vld [vmem:[%s21843_s1 + $0xf04] ss:$16 sps:$4 sm:$0xff]   ;;  %v14970_v18 = vld [vmem:[%s21843_s1 + $0xf0c] ss:$16 sps:$4 sm:$0xff]  }
 0x1a7   :  { %10094 = vmatpush1.bf16.msra.mxu0 %v14874_v19  ;;  %11119 = vmatpush1.bf16.msra.mxu1 %v14877_v20  ;;  %v14965_v19 = vld [vmem:[%s21843_s1 + $0xf00] ss:$16 sps:$4 sm:$0xff]   ;;  %v14968_v20 = vld [vmem:[%s21843_s1 + $0xf08] ss:$16 sps:$4 sm:$0xff]  }
 0x1a8   :  { %10095 = vmatprep.subr.bf16.mxu0 %v14882_v22  ;;  %11120 = vmatprep.subr.bf16.mxu1 %v14885_v23  ;;  %v14973_v22 = vld [vmem:[%s21843_s1 + $0xf24] ss:$16 sps:$4 sm:$0xff]   ;;  %v14976_v23 = vld [vmem:[%s21843_s1 + $0xf2c] ss:$16 sps:$4 sm:$0xff]  }
 0x1ab   :  { %10096 = vmatpush1.bf16.msra.mxu0 %v14880_v24  ;;  %11121 = vmatpush1.bf16.msra.mxu1 %v14883_v13  ;;  %v14971_v24 = vld [vmem:[%s21843_s1 + $0xf20] ss:$16 sps:$4 sm:$0xff]   ;;  %v14974_v13 = vld [vmem:[%s21843_s1 + $0xf28] ss:$16 sps:$4 sm:$0xff]  }
 0x1ac   :  { %10097 = vmatprep.subr.bf16.mxu0 %v14888_v27  ;;  %11122 = vmatprep.subr.bf16.mxu1 %v14891_v28  ;;  %v14979_v27 = vld [vmem:[%s21843_s1 + $0xf44] ss:$16 sps:$4 sm:$0xff]   ;;  %v14982_v28 = vld [vmem:[%s21843_s1 + $0xf4c] ss:$16 sps:$4 sm:$0xff]  }
 0x1af   :  { %10098 = vmatpush1.bf16.msra.mxu0 %v14886_v29  ;;  %11123 = vmatpush1.bf16.msra.mxu1 %v14889_v14  ;;  %v14977_v29 = vld [vmem:[%s21843_s1 + $0xf40] ss:$16 sps:$4 sm:$0xff]   ;;  %v14980_v14 = vld [vmem:[%s21843_s1 + $0xf48] ss:$16 sps:$4 sm:$0xff]  }
 0x1b0   :  { %10099 = vmatprep.subr.bf16.mxu0 %v14894_v30  ;;  %11124 = vmatprep.subr.bf16.mxu1 %v14897_v31  ;;  %v14985_v30 = vld [vmem:[%s21843_s1 + $0xf64] ss:$16 sps:$4 sm:$0xff]   ;;  %v14988_v31 = vld [vmem:[%s21843_s1 + $0xf6c] ss:$16 sps:$4 sm:$0xff]  }
 0x1b3   :  { %10100 = vmatpush1.bf16.msra.mxu0 %v14892_v25  ;;  %11125 = vmatpush1.bf16.msra.mxu1 %v14895_v32  ;;  %v14983_v25 = vld [vmem:[%s21843_s1 + $0xf60] ss:$16 sps:$4 sm:$0xff]   ;;  %v14986_v32 = vld [vmem:[%s21843_s1 + $0xf68] ss:$16 sps:$4 sm:$0xff]  }
 0x1b4   :  { %10101 = vmatprep.subr.bf16.mxu0 %v14900_v33  ;;  %11126 = vmatprep.subr.bf16.mxu1 %v14903_v26  ;;  %v14991_v33 = vld [vmem:[%s21843_s1 + $0xf84] ss:$16 sps:$4 sm:$0xff]   ;;  %v14994_v26 = vld [vmem:[%s21843_s1 + $0xf8c] ss:$16 sps:$4 sm:$0xff]  }
 0x1b7   :  { %10102 = vmatpush1.bf16.msra.mxu0 %v14898_v36  ;;  %11127 = vmatpush1.bf16.msra.mxu1 %v14901_v37  ;;  %v14989_v36 = vld [vmem:[%s21843_s1 + $0xf80] ss:$16 sps:$4 sm:$0xff]   ;;  %v14992_v37 = vld [vmem:[%s21843_s1 + $0xf88] ss:$16 sps:$4 sm:$0xff]  }
 0x1b8   :  { %10103 = vmatprep.subr.bf16.mxu0 %v14906_v21  ;;  %11128 = vmatprep.subr.bf16.mxu1 %v14909_v39  ;;  %v14997_v21 = vld [vmem:[%s21843_s1 + $0xfa4] ss:$16 sps:$4 sm:$0xff]   ;;  %v15000_v39 = vld [vmem:[%s21843_s1 + $0xfac] ss:$16 sps:$4 sm:$0xff]  }
 0x1bb   :  { %10104 = vmatpush1.bf16.msra.mxu0 %v14904_v40  ;;  %11129 = vmatpush1.bf16.msra.mxu1 %v14907_v41  ;;  %v14995_v40 = vld [vmem:[%s21843_s1 + $0xfa0] ss:$16 sps:$4 sm:$0xff]   ;;  %v14998_v41 = vld [vmem:[%s21843_s1 + $0xfa8] ss:$16 sps:$4 sm:$0xff]  }
 0x1bc   :  { %10105 = vmatprep.subr.bf16.mxu0 %v14912_v34  ;;  %11130 = vmatprep.subr.bf16.mxu1 %v14915_v43  ;;  %v15003_v34 = vld [vmem:[%s21843_s1 + $0xfc4] ss:$16 sps:$4 sm:$0xff]   ;;  %v15006_v43 = vld [vmem:[%s21843_s1 + $0xfcc] ss:$16 sps:$4 sm:$0xff]  }
 0x1bf   :  { %10106 = vmatpush1.bf16.msra.mxu0 %v14910_v44  ;;  %11131 = vmatpush1.bf16.msra.mxu1 %v14913_v45  ;;  %v18322_v44 = vld.sshfl [vmem:[%s21842_s0 + $0x10] sm:$0xff pattern:$0x75316420] }
 0x1c0   :  { %10116 = vmatprep.subr.bf16.mxu0 %v14919_v46  ;;  %11141 = vmatprep.subr.bf16.mxu1 %v14922_v35  ;;  %v15001_v45 = vld [vmem:[%s21843_s1 + $0xfc0] ss:$16 sps:$4 sm:$0xff]   ;;  %v15004_v46 = vld [vmem:[%s21843_s1 + $0xfc8] ss:$16 sps:$4 sm:$0xff]   ;;  %v15009_v35 = vld [vmem:[%s21843_s1 + $0xfe4] ss:$16 sps:$4 sm:$0xff]  }
 0x1c2   :  { %10108 = vmatmul.mubr.bf16.vlgmr.msra.gmra.mrb[0].mxu0 %v18145_v48  ;;  %11133 = vmatmul.mubr.bf16.vlgmr.msra.gmra.mrb[0].mxu1 %v18145_v48 }
 0x1c3   :  { %10117 = vmatpush1.bf16.msra.mxu0 %v14917_v50  ;;  %11142 = vmatpush1.bf16.msra.mxu1 %v14920_v51  ;;  %v15012_v50 = vld [vmem:[%s21843_s1 + $0xfec] ss:$16 sps:$4 sm:$0xff]   ;;  %v15007_v51 = vld [vmem:[%s21843_s1 + $0xfe0] ss:$16 sps:$4 sm:$0xff]  }
 0x1c4   :  { %10118 = vmatprep.subr.bf16.mxu0 %v14925_v53  ;;  %11143 = vmatprep.subr.bf16.mxu1 %v14928_v38  ;;  %v15010_v53 = vld [vmem:[%s21843_s1 + $0xfe8] ss:$16 sps:$4 sm:$0xff]   ;;  %v15015_v38 = vld [vmem:[%s21843_s1 + $0x1004] ss:$16 sps:$4 sm:$0xff]  }
 0x1c5   :  { %10148 = vmatprep.mubr.bf16.mxu0 %v1729_v54  ;;  %11173 = vmatprep.mubr.bf16.mxu1 %v1729_v54  ;;  %v15018_v54 = vld [vmem:[%s21843_s1 + $0x100c] ss:$16 sps:$4 sm:$0xff]  }
 0x1c7   :  { %10119 = vmatpush1.bf16.msra.mxu0 %v14923_v55  ;;  %11144 = vmatpush1.bf16.msra.mxu1 %v14926_v56  ;;  %v1745_v55 = vcombine.high %v18322_v44, %v18322_v44  ;;  %v1727_v56 = vcombine.high %v18145_v48, %v18145_v48  ;;  %v15024_v48 = vld [vmem:[%s21843_s1 + $0x102c] ss:$16 sps:$4 sm:$0xff]  }
 0x1c8   :  { %10120 = vmatprep.subr.bf16.mxu0 %v14931_v47  ;;  %11145 = vmatprep.subr.bf16.mxu1 %v14934_v57  ;;  %v15013_v47 = vld [vmem:[%s21843_s1 + $0x1000] ss:$16 sps:$4 sm:$0xff]   ;;  %v15016_v57 = vld [vmem:[%s21843_s1 + $0x1008] ss:$16 sps:$4 sm:$0xff]  }
 0x1cb   :  { %10121 = vmatpush1.bf16.msra.mxu0 %v14929_v58  ;;  %11146 = vmatpush1.bf16.msra.mxu1 %v14932_v59  ;;  %v15021_v58 = vld [vmem:[%s21843_s1 + $0x1024] ss:$16 sps:$4 sm:$0xff]   ;;  %v18365_v59 = vrot.slane %v1745_v55, %v16851_v49 }
 0x1cc   :  { %10122 = vmatprep.subr.bf16.mxu0 %v14937_v60  ;;  %11147 = vmatprep.subr.bf16.mxu1 %v14940_v61  ;;  %v15019_v60 = vld [vmem:[%s21843_s1 + $0x1020] ss:$16 sps:$4 sm:$0xff]   ;;  %v15022_v61 = vld [vmem:[%s21843_s1 + $0x1028] ss:$16 sps:$4 sm:$0xff]   ;;  %v15105_v55 = vld [vmem:[%s21843_s1 + $0x11e4] ss:$16 sps:$4 sm:$0xff]  }
 0x1cf   :  { %10123 = vmatpush1.bf16.msra.mxu0 %v14935_v62  ;;  %11148 = vmatpush1.bf16.msra.mxu1 %v14938_v63  ;;  %v15027_v62 = vld [vmem:[%s21843_s1 + $0x1044] ss:$16 sps:$4 sm:$0xff]   ;;  %v15030_v63 = vld [vmem:[%s21843_s1 + $0x104c] ss:$16 sps:$4 sm:$0xff]  }
 0x1d0   :  { %10124 = vmatprep.subr.bf16.mxu0 %v14943_v0  ;;  %11149 = vmatprep.subr.bf16.mxu1 %v14946_v1  ;;  %v15025_v0 = vld [vmem:[%s21843_s1 + $0x1040] ss:$16 sps:$4 sm:$0xff]   ;;  %v15028_v1 = vld [vmem:[%s21843_s1 + $0x1048] ss:$16 sps:$4 sm:$0xff]  }
 0x1d3   :  { %10125 = vmatpush1.bf16.msra.mxu0 %v14941_v2  ;;  %11150 = vmatpush1.bf16.msra.mxu1 %v14944_v3  ;;  %v15033_v2 = vld [vmem:[%s21843_s1 + $0x1064] ss:$16 sps:$4 sm:$0xff]   ;;  %v15036_v3 = vld [vmem:[%s21843_s1 + $0x106c] ss:$16 sps:$4 sm:$0xff]  }
 0x1d4   :  { %10126 = vmatprep.subr.bf16.mxu0 %v14949_v4  ;;  %11151 = vmatprep.subr.bf16.mxu1 %v14952_v5  ;;  %v15031_v4 = vld [vmem:[%s21843_s1 + $0x1060] ss:$16 sps:$4 sm:$0xff]   ;;  %v15034_v5 = vld [vmem:[%s21843_s1 + $0x1068] ss:$16 sps:$4 sm:$0xff]  }
 0x1d7   :  { %10127 = vmatpush1.bf16.msra.mxu0 %v14947_v6  ;;  %11152 = vmatpush1.bf16.msra.mxu1 %v14950_v7  ;;  %v15039_v6 = vld [vmem:[%s21843_s1 + $0x1084] ss:$16 sps:$4 sm:$0xff]   ;;  %v15042_v7 = vld [vmem:[%s21843_s1 + $0x108c] ss:$16 sps:$4 sm:$0xff]  }
 0x1d8   :  { %10128 = vmatprep.subr.bf16.mxu0 %v14955_v8  ;;  %11153 = vmatprep.subr.bf16.mxu1 %v14958_v9  ;;  %v15037_v8 = vld [vmem:[%s21843_s1 + $0x1080] ss:$16 sps:$4 sm:$0xff]   ;;  %v15040_v9 = vld [vmem:[%s21843_s1 + $0x1088] ss:$16 sps:$4 sm:$0xff]  }
 0x1db   :  { %10129 = vmatpush1.bf16.msra.mxu0 %v14953_v10  ;;  %11154 = vmatpush1.bf16.msra.mxu1 %v14956_v11  ;;  %v15045_v10 = vld [vmem:[%s21843_s1 + $0x10a4] ss:$16 sps:$4 sm:$0xff]   ;;  %v15048_v11 = vld [vmem:[%s21843_s1 + $0x10ac] ss:$16 sps:$4 sm:$0xff]  }
 0x1dc   :  { %10130 = vmatprep.subr.bf16.mxu0 %v14961_v12  ;;  %11155 = vmatprep.subr.bf16.mxu1 %v14964_v52  ;;  %v15043_v12 = vld [vmem:[%s21843_s1 + $0x10a0] ss:$16 sps:$4 sm:$0xff]   ;;  %v15046_v52 = vld [vmem:[%s21843_s1 + $0x10a8] ss:$16 sps:$4 sm:$0xff]  }
 0x1df   :  { %10131 = vmatpush1.bf16.msra.mxu0 %v14959_v15  ;;  %11156 = vmatpush1.bf16.msra.mxu1 %v14962_v16  ;;  %v15051_v15 = vld [vmem:[%s21843_s1 + $0x10c4] ss:$16 sps:$4 sm:$0xff]   ;;  %v15054_v16 = vld [vmem:[%s21843_s1 + $0x10cc] ss:$16 sps:$4 sm:$0xff]  }
 0x1e0   :  { %10132 = vmatprep.subr.bf16.mxu0 %v14967_v17  ;;  %11157 = vmatprep.subr.bf16.mxu1 %v14970_v18  ;;  %v15049_v17 = vld [vmem:[%s21843_s1 + $0x10c0] ss:$16 sps:$4 sm:$0xff]   ;;  %v15052_v18 = vld [vmem:[%s21843_s1 + $0x10c8] ss:$16 sps:$4 sm:$0xff]  }
 0x1e3   :  { %10133 = vmatpush1.bf16.msra.mxu0 %v14965_v19  ;;  %11158 = vmatpush1.bf16.msra.mxu1 %v14968_v20  ;;  %v15057_v19 = vld [vmem:[%s21843_s1 + $0x10e4] ss:$16 sps:$4 sm:$0xff]   ;;  %v15060_v20 = vld [vmem:[%s21843_s1 + $0x10ec] ss:$16 sps:$4 sm:$0xff]  }
 0x1e4   :  { %10134 = vmatprep.subr.bf16.mxu0 %v14973_v22  ;;  %11159 = vmatprep.subr.bf16.mxu1 %v14976_v23  ;;  %v15055_v22 = vld [vmem:[%s21843_s1 + $0x10e0] ss:$16 sps:$4 sm:$0xff]   ;;  %v15058_v23 = vld [vmem:[%s21843_s1 + $0x10e8] ss:$16 sps:$4 sm:$0xff]  }
 0x1e7   :  { %10135 = vmatpush1.bf16.msra.mxu0 %v14971_v24  ;;  %11160 = vmatpush1.bf16.msra.mxu1 %v14974_v13  ;;  %v15063_v24 = vld [vmem:[%s21843_s1 + $0x1104] ss:$16 sps:$4 sm:$0xff]   ;;  %v15066_v13 = vld [vmem:[%s21843_s1 + $0x110c] ss:$16 sps:$4 sm:$0xff]  }
 0x1e8   :  { %10136 = vmatprep.subr.bf16.mxu0 %v14979_v27  ;;  %11161 = vmatprep.subr.bf16.mxu1 %v14982_v28  ;;  %v15061_v27 = vld [vmem:[%s21843_s1 + $0x1100] ss:$16 sps:$4 sm:$0xff]   ;;  %v15064_v28 = vld [vmem:[%s21843_s1 + $0x1108] ss:$16 sps:$4 sm:$0xff]  }
 0x1eb   :  { %10137 = vmatpush1.bf16.msra.mxu0 %v14977_v29  ;;  %11162 = vmatpush1.bf16.msra.mxu1 %v14980_v14  ;;  %v15069_v29 = vld [vmem:[%s21843_s1 + $0x1124] ss:$16 sps:$4 sm:$0xff]   ;;  %v15072_v14 = vld [vmem:[%s21843_s1 + $0x112c] ss:$16 sps:$4 sm:$0xff]  }
 0x1ec   :  { %10138 = vmatprep.subr.bf16.mxu0 %v14985_v30  ;;  %11163 = vmatprep.subr.bf16.mxu1 %v14988_v31  ;;  %v15067_v30 = vld [vmem:[%s21843_s1 + $0x1120] ss:$16 sps:$4 sm:$0xff]   ;;  %v15070_v31 = vld [vmem:[%s21843_s1 + $0x1128] ss:$16 sps:$4 sm:$0xff]  }
 0x1ef   :  { %10139 = vmatpush1.bf16.msra.mxu0 %v14983_v25  ;;  %11164 = vmatpush1.bf16.msra.mxu1 %v14986_v32  ;;  %v15075_v25 = vld [vmem:[%s21843_s1 + $0x1144] ss:$16 sps:$4 sm:$0xff]   ;;  %v15078_v32 = vld [vmem:[%s21843_s1 + $0x114c] ss:$16 sps:$4 sm:$0xff]  }
 0x1f0   :  { %10140 = vmatprep.subr.bf16.mxu0 %v14991_v33  ;;  %11165 = vmatprep.subr.bf16.mxu1 %v14994_v26  ;;  %v15073_v33 = vld [vmem:[%s21843_s1 + $0x1140] ss:$16 sps:$4 sm:$0xff]   ;;  %v15076_v26 = vld [vmem:[%s21843_s1 + $0x1148] ss:$16 sps:$4 sm:$0xff]  }
 0x1f3   :  { %10141 = vmatpush1.bf16.msra.mxu0 %v14989_v36  ;;  %11166 = vmatpush1.bf16.msra.mxu1 %v14992_v37  ;;  %v15081_v36 = vld [vmem:[%s21843_s1 + $0x1164] ss:$16 sps:$4 sm:$0xff]   ;;  %v15084_v37 = vld [vmem:[%s21843_s1 + $0x116c] ss:$16 sps:$4 sm:$0xff]  }
 0x1f4   :  { %10142 = vmatprep.subr.bf16.mxu0 %v14997_v21  ;;  %11167 = vmatprep.subr.bf16.mxu1 %v15000_v39  ;;  %v15079_v21 = vld [vmem:[%s21843_s1 + $0x1160] ss:$16 sps:$4 sm:$0xff]   ;;  %v15082_v39 = vld [vmem:[%s21843_s1 + $0x1168] ss:$16 sps:$4 sm:$0xff]  }
 0x1f7   :  { %10143 = vmatpush1.bf16.msra.mxu0 %v14995_v40  ;;  %11168 = vmatpush1.bf16.msra.mxu1 %v14998_v41  ;;  %v15087_v40 = vld [vmem:[%s21843_s1 + $0x1184] ss:$16 sps:$4 sm:$0xff]   ;;  %v15090_v41 = vld [vmem:[%s21843_s1 + $0x118c] ss:$16 sps:$4 sm:$0xff]  }
 0x1f8   :  { %10144 = vmatprep.subr.bf16.mxu0 %v15003_v34  ;;  %11169 = vmatprep.subr.bf16.mxu1 %v15006_v43  ;;  %v15085_v34 = vld [vmem:[%s21843_s1 + $0x1180] ss:$16 sps:$4 sm:$0xff]   ;;  %v15088_v43 = vld [vmem:[%s21843_s1 + $0x1188] ss:$16 sps:$4 sm:$0xff]  }
 0x1fb   :  { %10145 = vmatpush1.bf16.msra.mxu0 %v15001_v45  ;;  %11170 = vmatpush1.bf16.msra.mxu1 %v15004_v46  ;;  %v15093_v45 = vld [vmem:[%s21843_s1 + $0x11a4] ss:$16 sps:$4 sm:$0xff]   ;;  %v15096_v46 = vld [vmem:[%s21843_s1 + $0x11ac] ss:$16 sps:$4 sm:$0xff]  }
 0x1fc   :  { %10146 = vmatprep.subr.bf16.mxu0 %v15009_v35  ;;  %11171 = vmatprep.subr.bf16.mxu1 %v15012_v50  ;;  %v15091_v35 = vld [vmem:[%s21843_s1 + $0x11a0] ss:$16 sps:$4 sm:$0xff]   ;;  %v15094_v50 = vld [vmem:[%s21843_s1 + $0x11a8] ss:$16 sps:$4 sm:$0xff]  }
 0x1ff   :  { %10147 = vmatpush1.bf16.msra.mxu0 %v15007_v51  ;;  %11172 = vmatpush1.bf16.msra.mxu1 %v15010_v53  ;;  %v15099_v51 = vld [vmem:[%s21843_s1 + $0x11c4] ss:$16 sps:$4 sm:$0xff]   ;;  %v15102_v53 = vld [vmem:[%s21843_s1 + $0x11cc] ss:$16 sps:$4 sm:$0xff]  }
 0x200   :  { %10157 = vmatprep.subr.bf16.mxu0 %v15015_v38  ;;  %11182 = vmatprep.subr.bf16.mxu1 %v15018_v54  ;;  %v15097_v38 = vld [vmem:[%s21843_s1 + $0x11c0] ss:$16 sps:$4 sm:$0xff]   ;;  %v15100_v54 = vld [vmem:[%s21843_s1 + $0x11c8] ss:$16 sps:$4 sm:$0xff]  }
 0x202   :  { %10149 = vmatmul.mubr.bf16.vlgmr.msra.gmra.mrb[0].mxu0 %v1727_v56  ;;  %11174 = vmatmul.mubr.bf16.vlgmr.msra.gmra.mrb[0].mxu1 %v1727_v56  ;;  %v15108_v56 = vld [vmem:[%s21843_s1 + $0x11ec] ss:$16 sps:$4 sm:$0xff]  }
 0x203   :  { %10158 = vmatpush1.bf16.msra.mxu0 %v15013_v47  ;;  %11183 = vmatpush1.bf16.msra.mxu1 %v15016_v57  ;;  %v15103_v47 = vld [vmem:[%s21843_s1 + $0x11e0] ss:$16 sps:$4 sm:$0xff]   ;;  %v15106_v57 = vld [vmem:[%s21843_s1 + $0x11e8] ss:$16 sps:$4 sm:$0xff]  }
 0x204   :  { %10159 = vmatprep.subr.bf16.mxu0 %v15021_v58  ;;  %11184 = vmatprep.subr.bf16.mxu1 %v15024_v48  ;;  %v15111_v58 = vld [vmem:[%s21843_s1 + $0x1204] ss:$16 sps:$4 sm:$0xff]   ;;  %v15114_v48 = vld [vmem:[%s21843_s1 + $0x120c] ss:$16 sps:$4 sm:$0xff]  }
 0x205   :  { %10189 = vmatprep.mubr.bf16.mxu0 %v18365_v59  ;;  %11214 = vmatprep.mubr.bf16.mxu1 %v18365_v59 }
 0x207   :  { %10160 = vmatpush1.bf16.msra.mxu0 %v15019_v60  ;;  %11185 = vmatpush1.bf16.msra.mxu1 %v15022_v61  ;;  %v18551_v60 = vrot.slane %v18322_v44, %v16851_v49  ;;  %v15109_v61 = vld [vmem:[%s21843_s1 + $0x1200] ss:$16 sps:$4 sm:$0xff]   ;;  %v15120_v44 = vld [vmem:[%s21843_s1 + $0x122c] ss:$16 sps:$4 sm:$0xff]  }
 0x208   :  { %10161 = vmatprep.subr.bf16.mxu0 %v15027_v62  ;;  %11186 = vmatprep.subr.bf16.mxu1 %v15030_v63  ;;  %v15112_v62 = vld [vmem:[%s21843_s1 + $0x1208] ss:$16 sps:$4 sm:$0xff]   ;;  %v15117_v63 = vld [vmem:[%s21843_s1 + $0x1224] ss:$16 sps:$4 sm:$0xff]  }
 0x20b   :  { %10162 = vmatpush1.bf16.msra.mxu0 %v15025_v0  ;;  %11187 = vmatpush1.bf16.msra.mxu1 %v15028_v1  ;;  %v1777_v0 = vcombine.high %v18365_v59, %v18365_v59  ;;  %v15115_v1 = vld [vmem:[%s21843_s1 + $0x1220] ss:$16 sps:$4 sm:$0xff]   ;;  %v15123_v59 = vld [vmem:[%s21843_s1 + $0x1244] ss:$16 sps:$4 sm:$0xff]  }
 0x20c   :  { %10163 = vmatprep.subr.bf16.mxu0 %v15033_v2  ;;  %11188 = vmatprep.subr.bf16.mxu1 %v15036_v3  ;;  %v15118_v2 = vld [vmem:[%s21843_s1 + $0x1228] ss:$16 sps:$4 sm:$0xff]   ;;  %v15126_v3 = vld [vmem:[%s21843_s1 + $0x124c] ss:$16 sps:$4 sm:$0xff]  }
 0x20f   :  { %10164 = vmatpush1.bf16.msra.mxu0 %v15031_v4  ;;  %11189 = vmatpush1.bf16.msra.mxu1 %v15034_v5  ;;  %v15121_v4 = vld [vmem:[%s21843_s1 + $0x1240] ss:$16 sps:$4 sm:$0xff]   ;;  %v15124_v5 = vld [vmem:[%s21843_s1 + $0x1248] ss:$16 sps:$4 sm:$0xff]  }
 0x210   :  { %10165 = vmatprep.subr.bf16.mxu0 %v15039_v6  ;;  %11190 = vmatprep.subr.bf16.mxu1 %v15042_v7  ;;  %v15129_v6 = vld [vmem:[%s21843_s1 + $0x1264] ss:$16 sps:$4 sm:$0xff]   ;;  %v15132_v7 = vld [vmem:[%s21843_s1 + $0x126c] ss:$16 sps:$4 sm:$0xff]  }
 0x213   :  { %10166 = vmatpush1.bf16.msra.mxu0 %v15037_v8  ;;  %11191 = vmatpush1.bf16.msra.mxu1 %v15040_v9  ;;  %v15127_v8 = vld [vmem:[%s21843_s1 + $0x1260] ss:$16 sps:$4 sm:$0xff]   ;;  %v15130_v9 = vld [vmem:[%s21843_s1 + $0x1268] ss:$16 sps:$4 sm:$0xff]  }
 0x214   :  { %10167 = vmatprep.subr.bf16.mxu0 %v15045_v10  ;;  %11192 = vmatprep.subr.bf16.mxu1 %v15048_v11  ;;  %v15135_v10 = vld [vmem:[%s21843_s1 + $0x1284] ss:$16 sps:$4 sm:$0xff]   ;;  %v15138_v11 = vld [vmem:[%s21843_s1 + $0x128c] ss:$16 sps:$4 sm:$0xff]  }
 0x217   :  { %10168 = vmatpush1.bf16.msra.mxu0 %v15043_v12  ;;  %11193 = vmatpush1.bf16.msra.mxu1 %v15046_v52  ;;  %v15133_v12 = vld [vmem:[%s21843_s1 + $0x1280] ss:$16 sps:$4 sm:$0xff]   ;;  %v15136_v52 = vld [vmem:[%s21843_s1 + $0x1288] ss:$16 sps:$4 sm:$0xff]  }
 0x218   :  { %10169 = vmatprep.subr.bf16.mxu0 %v15051_v15  ;;  %11194 = vmatprep.subr.bf16.mxu1 %v15054_v16  ;;  %v15141_v15 = vld [vmem:[%s21843_s1 + $0x12a4] ss:$16 sps:$4 sm:$0xff]   ;;  %v15144_v16 = vld [vmem:[%s21843_s1 + $0x12ac] ss:$16 sps:$4 sm:$0xff]  }
 0x21b   :  { %10170 = vmatpush1.bf16.msra.mxu0 %v15049_v17  ;;  %11195 = vmatpush1.bf16.msra.mxu1 %v15052_v18  ;;  %v15139_v17 = vld [vmem:[%s21843_s1 + $0x12a0] ss:$16 sps:$4 sm:$0xff]   ;;  %v15142_v18 = vld [vmem:[%s21843_s1 + $0x12a8] ss:$16 sps:$4 sm:$0xff]  }
 0x21c   :  { %10171 = vmatprep.subr.bf16.mxu0 %v15057_v19  ;;  %11196 = vmatprep.subr.bf16.mxu1 %v15060_v20  ;;  %v15147_v19 = vld [vmem:[%s21843_s1 + $0x12c4] ss:$16 sps:$4 sm:$0xff]   ;;  %v15150_v20 = vld [vmem:[%s21843_s1 + $0x12cc] ss:$16 sps:$4 sm:$0xff]  }
 0x21f   :  { %10172 = vmatpush1.bf16.msra.mxu0 %v15055_v22  ;;  %11197 = vmatpush1.bf16.msra.mxu1 %v15058_v23  ;;  %v15145_v22 = vld [vmem:[%s21843_s1 + $0x12c0] ss:$16 sps:$4 sm:$0xff]   ;;  %v15148_v23 = vld [vmem:[%s21843_s1 + $0x12c8] ss:$16 sps:$4 sm:$0xff]  }
 0x220   :  { %10173 = vmatprep.subr.bf16.mxu0 %v15063_v24  ;;  %11198 = vmatprep.subr.bf16.mxu1 %v15066_v13  ;;  %v15153_v24 = vld [vmem:[%s21843_s1 + $0x12e4] ss:$16 sps:$4 sm:$0xff]   ;;  %v15156_v13 = vld [vmem:[%s21843_s1 + $0x12ec] ss:$16 sps:$4 sm:$0xff]  }
 0x223   :  { %10174 = vmatpush1.bf16.msra.mxu0 %v15061_v27  ;;  %11199 = vmatpush1.bf16.msra.mxu1 %v15064_v28  ;;  %v15151_v27 = vld [vmem:[%s21843_s1 + $0x12e0] ss:$16 sps:$4 sm:$0xff]   ;;  %v15154_v28 = vld [vmem:[%s21843_s1 + $0x12e8] ss:$16 sps:$4 sm:$0xff]  }
 0x224   :  { %10175 = vmatprep.subr.bf16.mxu0 %v15069_v29  ;;  %11200 = vmatprep.subr.bf16.mxu1 %v15072_v14  ;;  %v15159_v29 = vld [vmem:[%s21843_s1 + $0x1304] ss:$16 sps:$4 sm:$0xff]   ;;  %v15162_v14 = vld [vmem:[%s21843_s1 + $0x130c] ss:$16 sps:$4 sm:$0xff]  }
 0x227   :  { %10176 = vmatpush1.bf16.msra.mxu0 %v15067_v30  ;;  %11201 = vmatpush1.bf16.msra.mxu1 %v15070_v31  ;;  %v15157_v30 = vld [vmem:[%s21843_s1 + $0x1300] ss:$16 sps:$4 sm:$0xff]   ;;  %v15160_v31 = vld [vmem:[%s21843_s1 + $0x1308] ss:$16 sps:$4 sm:$0xff]  }
 0x228   :  { %10177 = vmatprep.subr.bf16.mxu0 %v15075_v25  ;;  %11202 = vmatprep.subr.bf16.mxu1 %v15078_v32  ;;  %v15165_v25 = vld [vmem:[%s21843_s1 + $0x1324] ss:$16 sps:$4 sm:$0xff]   ;;  %v15168_v32 = vld [vmem:[%s21843_s1 + $0x132c] ss:$16 sps:$4 sm:$0xff]  }
 0x22b   :  { %10178 = vmatpush1.bf16.msra.mxu0 %v15073_v33  ;;  %11203 = vmatpush1.bf16.msra.mxu1 %v15076_v26  ;;  %v15163_v33 = vld [vmem:[%s21843_s1 + $0x1320] ss:$16 sps:$4 sm:$0xff]   ;;  %v15166_v26 = vld [vmem:[%s21843_s1 + $0x1328] ss:$16 sps:$4 sm:$0xff]  }
 0x22c   :  { %10179 = vmatprep.subr.bf16.mxu0 %v15081_v36  ;;  %11204 = vmatprep.subr.bf16.mxu1 %v15084_v37  ;;  %v15171_v36 = vld [vmem:[%s21843_s1 + $0x1344] ss:$16 sps:$4 sm:$0xff]   ;;  %v15174_v37 = vld [vmem:[%s21843_s1 + $0x134c] ss:$16 sps:$4 sm:$0xff]  }
 0x22f   :  { %10180 = vmatpush1.bf16.msra.mxu0 %v15079_v21  ;;  %11205 = vmatpush1.bf16.msra.mxu1 %v15082_v39  ;;  %v15169_v21 = vld [vmem:[%s21843_s1 + $0x1340] ss:$16 sps:$4 sm:$0xff]   ;;  %v15172_v39 = vld [vmem:[%s21843_s1 + $0x1348] ss:$16 sps:$4 sm:$0xff]  }
 0x230   :  { %10181 = vmatprep.subr.bf16.mxu0 %v15087_v40  ;;  %11206 = vmatprep.subr.bf16.mxu1 %v15090_v41  ;;  %v15177_v40 = vld [vmem:[%s21843_s1 + $0x1364] ss:$16 sps:$4 sm:$0xff]   ;;  %v15180_v41 = vld [vmem:[%s21843_s1 + $0x136c] ss:$16 sps:$4 sm:$0xff]  }
 0x233   :  { %10182 = vmatpush1.bf16.msra.mxu0 %v15085_v34  ;;  %11207 = vmatpush1.bf16.msra.mxu1 %v15088_v43  ;;  %v15175_v34 = vld [vmem:[%s21843_s1 + $0x1360] ss:$16 sps:$4 sm:$0xff]   ;;  %v15178_v43 = vld [vmem:[%s21843_s1 + $0x1368] ss:$16 sps:$4 sm:$0xff]  }
 0x234   :  { %10183 = vmatprep.subr.bf16.mxu0 %v15093_v45  ;;  %11208 = vmatprep.subr.bf16.mxu1 %v15096_v46  ;;  %v15183_v45 = vld [vmem:[%s21843_s1 + $0x1384] ss:$16 sps:$4 sm:$0xff]   ;;  %v15186_v46 = vld [vmem:[%s21843_s1 + $0x138c] ss:$16 sps:$4 sm:$0xff]  }
 0x237   :  { %10184 = vmatpush1.bf16.msra.mxu0 %v15091_v35  ;;  %11209 = vmatpush1.bf16.msra.mxu1 %v15094_v50  ;;  %v15181_v35 = vld [vmem:[%s21843_s1 + $0x1380] ss:$16 sps:$4 sm:$0xff]   ;;  %v15184_v50 = vld [vmem:[%s21843_s1 + $0x1388] ss:$16 sps:$4 sm:$0xff]  }
 0x238   :  { %10185 = vmatprep.subr.bf16.mxu0 %v15099_v51  ;;  %11210 = vmatprep.subr.bf16.mxu1 %v15102_v53  ;;  %v15189_v51 = vld [vmem:[%s21843_s1 + $0x13a4] ss:$16 sps:$4 sm:$0xff]   ;;  %v15192_v53 = vld [vmem:[%s21843_s1 + $0x13ac] ss:$16 sps:$4 sm:$0xff]  }
 0x23b   :  { %10186 = vmatpush1.bf16.msra.mxu0 %v15097_v38  ;;  %11211 = vmatpush1.bf16.msra.mxu1 %v15100_v54  ;;  %v15187_v38 = vld [vmem:[%s21843_s1 + $0x13a0] ss:$16 sps:$4 sm:$0xff]   ;;  %v15190_v54 = vld [vmem:[%s21843_s1 + $0x13a8] ss:$16 sps:$4 sm:$0xff]  }
 0x23c   :  { %10187 = vmatprep.subr.bf16.mxu0 %v15105_v55  ;;  %11212 = vmatprep.subr.bf16.mxu1 %v15108_v56  ;;  %v15195_v55 = vld [vmem:[%s21843_s1 + $0x13c4] ss:$16 sps:$4 sm:$0xff]   ;;  %v15198_v56 = vld [vmem:[%s21843_s1 + $0x13cc] ss:$16 sps:$4 sm:$0xff]  }
 0x23f   :  { %10188 = vmatpush1.bf16.msra.mxu0 %v15103_v47  ;;  %11213 = vmatpush1.bf16.msra.mxu1 %v15106_v57  ;;  %v16642_v47 = vld [vmem:[%s21842_s0 + $0x10] sm:$0xff] }
 0x240   :  { %10198 = vmatprep.subr.bf16.mxu0 %v15111_v58  ;;  %11223 = vmatprep.subr.bf16.mxu1 %v15114_v48  ;;  %v1730_v57 = vcombine.high %v16642_v47, %v16642_v47  ;;  %v15193_v58 = vld [vmem:[%s21843_s1 + $0x13c0] ss:$16 sps:$4 sm:$0xff]   ;;  %v15196_v48 = vld [vmem:[%s21843_s1 + $0x13c8] ss:$16 sps:$4 sm:$0xff]  }
 0x241   :  { %v15277_v47 = vld [vmem:[%s21843_s1 + $0x1580] ss:$16 sps:$4 sm:$0xff]  }
 0x242   :  { %10190 = vmatmul.mubr.bf16.vlgmr.msra.gmra.mrb[0].mxu0 %v18551_v60  ;;  %11215 = vmatmul.mubr.bf16.vlgmr.msra.gmra.mrb[0].mxu1 %v18551_v60 }
 0x243   :  { %10199 = vmatpush1.bf16.msra.mxu0 %v15109_v61  ;;  %11224 = vmatpush1.bf16.msra.mxu1 %v15112_v62  ;;  %v15201_v61 = vld [vmem:[%s21843_s1 + $0x13e4] ss:$16 sps:$4 sm:$0xff]   ;;  %v15204_v62 = vld [vmem:[%s21843_s1 + $0x13ec] ss:$16 sps:$4 sm:$0xff]  }
 0x244   :  { %10200 = vmatprep.subr.bf16.mxu0 %v15117_v63  ;;  %11225 = vmatprep.subr.bf16.mxu1 %v15120_v44  ;;  %v18741_v63 = vrot.slane %v1730_v57, %v16851_v49  ;;  %v15199_v44 = vld [vmem:[%s21843_s1 + $0x13e0] ss:$16 sps:$4 sm:$0xff]   ;;  %v15280_v57 = vld [vmem:[%s21843_s1 + $0x1588] ss:$16 sps:$4 sm:$0xff]  }
 0x245   :  { %10230 = vmatprep.mubr.bf16.mxu0 %v1777_v0  ;;  %11255 = vmatprep.mubr.bf16.mxu1 %v1777_v0  ;;  %v15202_v0 = vld [vmem:[%s21843_s1 + $0x13e8] ss:$16 sps:$4 sm:$0xff]  }
 0x247   :  { %10201 = vmatpush1.bf16.msra.mxu0 %v15115_v1  ;;  %11226 = vmatpush1.bf16.msra.mxu1 %v15118_v2  ;;  %v15207_v1 = vld [vmem:[%s21843_s1 + $0x1404] ss:$16 sps:$4 sm:$0xff]   ;;  %v15210_v2 = vld [vmem:[%s21843_s1 + $0x140c] ss:$16 sps:$4 sm:$0xff]  }
 0x248   :  { %10202 = vmatprep.subr.bf16.mxu0 %v15123_v59  ;;  %11227 = vmatprep.subr.bf16.mxu1 %v15126_v3  ;;  %v1746_v59 = vcombine.high %v18741_v63, %v18741_v63  ;;  %v1775_v3 = vcombine.high %v18551_v60, %v18551_v60  ;;  %v15216_v60 = vld [vmem:[%s21843_s1 + $0x142c] ss:$16 sps:$4 sm:$0xff]  }
 0x24b   :  { %10203 = vmatpush1.bf16.msra.mxu0 %v15121_v4  ;;  %11228 = vmatpush1.bf16.msra.mxu1 %v15124_v5  ;;  %v15205_v4 = vld [vmem:[%s21843_s1 + $0x1400] ss:$16 sps:$4 sm:$0xff]   ;;  %v15208_v5 = vld [vmem:[%s21843_s1 + $0x1408] ss:$16 sps:$4 sm:$0xff]  }
 0x24c   :  { %10204 = vmatprep.subr.bf16.mxu0 %v15129_v6  ;;  %11229 = vmatprep.subr.bf16.mxu1 %v15132_v7  ;;  %v15213_v6 = vld [vmem:[%s21843_s1 + $0x1424] ss:$16 sps:$4 sm:$0xff]   ;;  %v18772_v7 = vrot.slane %v1746_v59, %v16851_v49 }
 0x24d   :  { %v15297_v59 = vld [vmem:[%s21843_s1 + $0x15e4] ss:$16 sps:$4 sm:$0xff]  }
 0x24f   :  { %10205 = vmatpush1.bf16.msra.mxu0 %v15127_v8  ;;  %11230 = vmatpush1.bf16.msra.mxu1 %v15130_v9  ;;  %v15211_v8 = vld [vmem:[%s21843_s1 + $0x1420] ss:$16 sps:$4 sm:$0xff]   ;;  %v15214_v9 = vld [vmem:[%s21843_s1 + $0x1428] ss:$16 sps:$4 sm:$0xff]  }
 0x250   :  { %10206 = vmatprep.subr.bf16.mxu0 %v15135_v10  ;;  %11231 = vmatprep.subr.bf16.mxu1 %v15138_v11  ;;  %v15219_v10 = vld [vmem:[%s21843_s1 + $0x1444] ss:$16 sps:$4 sm:$0xff]   ;;  %v15222_v11 = vld [vmem:[%s21843_s1 + $0x144c] ss:$16 sps:$4 sm:$0xff]  }
 0x253   :  { %10207 = vmatpush1.bf16.msra.mxu0 %v15133_v12  ;;  %11232 = vmatpush1.bf16.msra.mxu1 %v15136_v52  ;;  %v15217_v12 = vld [vmem:[%s21843_s1 + $0x1440] ss:$16 sps:$4 sm:$0xff]   ;;  %v15220_v52 = vld [vmem:[%s21843_s1 + $0x1448] ss:$16 sps:$4 sm:$0xff]  }
 0x254   :  { %10208 = vmatprep.subr.bf16.mxu0 %v15141_v15  ;;  %11233 = vmatprep.subr.bf16.mxu1 %v15144_v16  ;;  %v15225_v15 = vld [vmem:[%s21843_s1 + $0x1464] ss:$16 sps:$4 sm:$0xff]   ;;  %v15228_v16 = vld [vmem:[%s21843_s1 + $0x146c] ss:$16 sps:$4 sm:$0xff]  }
 0x257   :  { %10209 = vmatpush1.bf16.msra.mxu0 %v15139_v17  ;;  %11234 = vmatpush1.bf16.msra.mxu1 %v15142_v18  ;;  %v15223_v17 = vld [vmem:[%s21843_s1 + $0x1460] ss:$16 sps:$4 sm:$0xff]   ;;  %v15226_v18 = vld [vmem:[%s21843_s1 + $0x1468] ss:$16 sps:$4 sm:$0xff]  }
 0x258   :  { %10210 = vmatprep.subr.bf16.mxu0 %v15147_v19  ;;  %11235 = vmatprep.subr.bf16.mxu1 %v15150_v20  ;;  %v15231_v19 = vld [vmem:[%s21843_s1 + $0x1484] ss:$16 sps:$4 sm:$0xff]   ;;  %v15234_v20 = vld [vmem:[%s21843_s1 + $0x148c] ss:$16 sps:$4 sm:$0xff]  }
 0x25b   :  { %10211 = vmatpush1.bf16.msra.mxu0 %v15145_v22  ;;  %11236 = vmatpush1.bf16.msra.mxu1 %v15148_v23  ;;  %v15229_v22 = vld [vmem:[%s21843_s1 + $0x1480] ss:$16 sps:$4 sm:$0xff]   ;;  %v15232_v23 = vld [vmem:[%s21843_s1 + $0x1488] ss:$16 sps:$4 sm:$0xff]  }
 0x25c   :  { %10212 = vmatprep.subr.bf16.mxu0 %v15153_v24  ;;  %11237 = vmatprep.subr.bf16.mxu1 %v15156_v13  ;;  %v15237_v24 = vld [vmem:[%s21843_s1 + $0x14a4] ss:$16 sps:$4 sm:$0xff]   ;;  %v15240_v13 = vld [vmem:[%s21843_s1 + $0x14ac] ss:$16 sps:$4 sm:$0xff]  }
 0x25f   :  { %10213 = vmatpush1.bf16.msra.mxu0 %v15151_v27  ;;  %11238 = vmatpush1.bf16.msra.mxu1 %v15154_v28  ;;  %v15235_v27 = vld [vmem:[%s21843_s1 + $0x14a0] ss:$16 sps:$4 sm:$0xff]   ;;  %v15238_v28 = vld [vmem:[%s21843_s1 + $0x14a8] ss:$16 sps:$4 sm:$0xff]  }
 0x260   :  { %10214 = vmatprep.subr.bf16.mxu0 %v15159_v29  ;;  %11239 = vmatprep.subr.bf16.mxu1 %v15162_v14  ;;  %v15243_v29 = vld [vmem:[%s21843_s1 + $0x14c4] ss:$16 sps:$4 sm:$0xff]   ;;  %v15246_v14 = vld [vmem:[%s21843_s1 + $0x14cc] ss:$16 sps:$4 sm:$0xff]  }
 0x263   :  { %10215 = vmatpush1.bf16.msra.mxu0 %v15157_v30  ;;  %11240 = vmatpush1.bf16.msra.mxu1 %v15160_v31  ;;  %v15241_v30 = vld [vmem:[%s21843_s1 + $0x14c0] ss:$16 sps:$4 sm:$0xff]   ;;  %v15244_v31 = vld [vmem:[%s21843_s1 + $0x14c8] ss:$16 sps:$4 sm:$0xff]  }
 0x264   :  { %10216 = vmatprep.subr.bf16.mxu0 %v15165_v25  ;;  %11241 = vmatprep.subr.bf16.mxu1 %v15168_v32  ;;  %v15249_v25 = vld [vmem:[%s21843_s1 + $0x14e4] ss:$16 sps:$4 sm:$0xff]   ;;  %v15252_v32 = vld [vmem:[%s21843_s1 + $0x14ec] ss:$16 sps:$4 sm:$0xff]  }
 0x267   :  { %10217 = vmatpush1.bf16.msra.mxu0 %v15163_v33  ;;  %11242 = vmatpush1.bf16.msra.mxu1 %v15166_v26  ;;  %v15247_v33 = vld [vmem:[%s21843_s1 + $0x14e0] ss:$16 sps:$4 sm:$0xff]   ;;  %v15250_v26 = vld [vmem:[%s21843_s1 + $0x14e8] ss:$16 sps:$4 sm:$0xff]  }
 0x268   :  { %10218 = vmatprep.subr.bf16.mxu0 %v15171_v36  ;;  %11243 = vmatprep.subr.bf16.mxu1 %v15174_v37  ;;  %v15255_v36 = vld [vmem:[%s21843_s1 + $0x1504] ss:$16 sps:$4 sm:$0xff]   ;;  %v15258_v37 = vld [vmem:[%s21843_s1 + $0x150c] ss:$16 sps:$4 sm:$0xff]  }
 0x26b   :  { %10219 = vmatpush1.bf16.msra.mxu0 %v15169_v21  ;;  %11244 = vmatpush1.bf16.msra.mxu1 %v15172_v39  ;;  %v15253_v21 = vld [vmem:[%s21843_s1 + $0x1500] ss:$16 sps:$4 sm:$0xff]   ;;  %v15256_v39 = vld [vmem:[%s21843_s1 + $0x1508] ss:$16 sps:$4 sm:$0xff]  }
 0x26c   :  { %10220 = vmatprep.subr.bf16.mxu0 %v15177_v40  ;;  %11245 = vmatprep.subr.bf16.mxu1 %v15180_v41  ;;  %v15261_v40 = vld [vmem:[%s21843_s1 + $0x1524] ss:$16 sps:$4 sm:$0xff]   ;;  %v15264_v41 = vld [vmem:[%s21843_s1 + $0x152c] ss:$16 sps:$4 sm:$0xff]  }
 0x26f   :  { %10221 = vmatpush1.bf16.msra.mxu0 %v15175_v34  ;;  %11246 = vmatpush1.bf16.msra.mxu1 %v15178_v43  ;;  %v15259_v34 = vld [vmem:[%s21843_s1 + $0x1520] ss:$16 sps:$4 sm:$0xff]   ;;  %v15262_v43 = vld [vmem:[%s21843_s1 + $0x1528] ss:$16 sps:$4 sm:$0xff]  }
 0x270   :  { %10222 = vmatprep.subr.bf16.mxu0 %v15183_v45  ;;  %11247 = vmatprep.subr.bf16.mxu1 %v15186_v46  ;;  %v15267_v45 = vld [vmem:[%s21843_s1 + $0x1544] ss:$16 sps:$4 sm:$0xff]   ;;  %v15270_v46 = vld [vmem:[%s21843_s1 + $0x154c] ss:$16 sps:$4 sm:$0xff]  }
 0x273   :  { %10223 = vmatpush1.bf16.msra.mxu0 %v15181_v35  ;;  %11248 = vmatpush1.bf16.msra.mxu1 %v15184_v50  ;;  %v15265_v35 = vld [vmem:[%s21843_s1 + $0x1540] ss:$16 sps:$4 sm:$0xff]   ;;  %v15268_v50 = vld [vmem:[%s21843_s1 + $0x1548] ss:$16 sps:$4 sm:$0xff]  }
 0x274   :  { %10224 = vmatprep.subr.bf16.mxu0 %v15189_v51  ;;  %11249 = vmatprep.subr.bf16.mxu1 %v15192_v53  ;;  %v15273_v51 = vld [vmem:[%s21843_s1 + $0x1564] ss:$16 sps:$4 sm:$0xff]   ;;  %v15276_v53 = vld [vmem:[%s21843_s1 + $0x156c] ss:$16 sps:$4 sm:$0xff]  }
 0x277   :  { %10225 = vmatpush1.bf16.msra.mxu0 %v15187_v38  ;;  %11250 = vmatpush1.bf16.msra.mxu1 %v15190_v54  ;;  %v15271_v38 = vld [vmem:[%s21843_s1 + $0x1560] ss:$16 sps:$4 sm:$0xff]   ;;  %v15274_v54 = vld [vmem:[%s21843_s1 + $0x1568] ss:$16 sps:$4 sm:$0xff]  }
 0x278   :  { %10226 = vmatprep.subr.bf16.mxu0 %v15195_v55  ;;  %11251 = vmatprep.subr.bf16.mxu1 %v15198_v56  ;;  %v15279_v55 = vld [vmem:[%s21843_s1 + $0x1584] ss:$16 sps:$4 sm:$0xff]   ;;  %v15282_v56 = vld [vmem:[%s21843_s1 + $0x158c] ss:$16 sps:$4 sm:$0xff]  }
 0x27b   :  { %10227 = vmatpush1.bf16.msra.mxu0 %v15193_v58  ;;  %11252 = vmatpush1.bf16.msra.mxu1 %v15196_v48  ;;  %v15285_v58 = vld [vmem:[%s21843_s1 + $0x15a4] ss:$16 sps:$4 sm:$0xff]   ;;  %v15288_v48 = vld [vmem:[%s21843_s1 + $0x15ac] ss:$16 sps:$4 sm:$0xff]  }
 0x27c   :  { %10228 = vmatprep.subr.bf16.mxu0 %v15201_v61  ;;  %11253 = vmatprep.subr.bf16.mxu1 %v15204_v62  ;;  %v15283_v61 = vld [vmem:[%s21843_s1 + $0x15a0] ss:$16 sps:$4 sm:$0xff]   ;;  %v15286_v62 = vld [vmem:[%s21843_s1 + $0x15a8] ss:$16 sps:$4 sm:$0xff]  }
 0x27f   :  { %10229 = vmatpush1.bf16.msra.mxu0 %v15199_v44  ;;  %11254 = vmatpush1.bf16.msra.mxu1 %v15202_v0  ;;  %v15291_v44 = vld [vmem:[%s21843_s1 + $0x15c4] ss:$16 sps:$4 sm:$0xff]   ;;  %v15294_v0 = vld [vmem:[%s21843_s1 + $0x15cc] ss:$16 sps:$4 sm:$0xff]  }
 0x280   :  { %10239 = vmatprep.subr.bf16.mxu0 %v15207_v1  ;;  %11264 = vmatprep.subr.bf16.mxu1 %v15210_v2  ;;  %v15289_v1 = vld [vmem:[%s21843_s1 + $0x15c0] ss:$16 sps:$4 sm:$0xff]   ;;  %v15292_v2 = vld [vmem:[%s21843_s1 + $0x15c8] ss:$16 sps:$4 sm:$0xff]  }
 0x282   :  { %10231 = vmatmul.mubr.bf16.vlgmr.msra.gmra.mrb[0].mxu0 %v1775_v3  ;;  %11256 = vmatmul.mubr.bf16.vlgmr.msra.gmra.mrb[0].mxu1 %v1775_v3  ;;  %v15300_v3 = vld [vmem:[%s21843_s1 + $0x15ec] ss:$16 sps:$4 sm:$0xff]  }
 0x283   :  { %10240 = vmatpush1.bf16.msra.mxu0 %v15205_v4  ;;  %11265 = vmatpush1.bf16.msra.mxu1 %v15208_v5  ;;  %v15295_v4 = vld [vmem:[%s21843_s1 + $0x15e0] ss:$16 sps:$4 sm:$0xff]   ;;  %v15298_v5 = vld [vmem:[%s21843_s1 + $0x15e8] ss:$16 sps:$4 sm:$0xff]  }
 0x284   :  { %10241 = vmatprep.subr.bf16.mxu0 %v15213_v6  ;;  %11266 = vmatprep.subr.bf16.mxu1 %v15216_v60  ;;  %v15304_v6 = vld [vmem:[%s21843_s1 + $0x1604] ss:$16 sps:$4 sm:$0xff]   ;;  %v15307_v60 = vld [vmem:[%s21843_s1 + $0x160c] ss:$16 sps:$4 sm:$0xff]  }
 0x285   :  { %10271 = vmatprep.mubr.bf16.mxu0 %v18772_v7  ;;  %11296 = vmatprep.mubr.bf16.mxu1 %v18772_v7 }
 0x287   :  { %10242 = vmatpush1.bf16.msra.mxu0 %v15211_v8  ;;  %11267 = vmatpush1.bf16.msra.mxu1 %v15214_v9  ;;  %v18958_v8 = vrot.slane %v18741_v63, %v16851_v49  ;;  %v15302_v9 = vld [vmem:[%s21843_s1 + $0x1600] ss:$16 sps:$4 sm:$0xff]   ;;  %v15313_v63 = vld [vmem:[%s21843_s1 + $0x162c] ss:$16 sps:$4 sm:$0xff]  }
 0x288   :  { %10243 = vmatprep.subr.bf16.mxu0 %v15219_v10  ;;  %11268 = vmatprep.subr.bf16.mxu1 %v15222_v11  ;;  %v15305_v10 = vld [vmem:[%s21843_s1 + $0x1608] ss:$16 sps:$4 sm:$0xff]   ;;  %v15310_v11 = vld [vmem:[%s21843_s1 + $0x1624] ss:$16 sps:$4 sm:$0xff]  }
 0x28b   :  { %10244 = vmatpush1.bf16.msra.mxu0 %v15217_v12  ;;  %11269 = vmatpush1.bf16.msra.mxu1 %v15220_v52  ;;  %v1778_v12 = vcombine.high %v18772_v7, %v18772_v7  ;;  %v15308_v52 = vld [vmem:[%s21843_s1 + $0x1620] ss:$16 sps:$4 sm:$0xff]   ;;  %v15316_v7 = vld [vmem:[%s21843_s1 + $0x1644] ss:$16 sps:$4 sm:$0xff]  }
 0x28c   :  { %10245 = vmatprep.subr.bf16.mxu0 %v15225_v15  ;;  %11270 = vmatprep.subr.bf16.mxu1 %v15228_v16  ;;  %v15311_v15 = vld [vmem:[%s21843_s1 + $0x1628] ss:$16 sps:$4 sm:$0xff]   ;;  %v15319_v16 = vld [vmem:[%s21843_s1 + $0x164c] ss:$16 sps:$4 sm:$0xff]  }
 0x28f   :  { %10246 = vmatpush1.bf16.msra.mxu0 %v15223_v17  ;;  %11271 = vmatpush1.bf16.msra.mxu1 %v15226_v18  ;;  %v15314_v17 = vld [vmem:[%s21843_s1 + $0x1640] ss:$16 sps:$4 sm:$0xff]   ;;  %v15317_v18 = vld [vmem:[%s21843_s1 + $0x1648] ss:$16 sps:$4 sm:$0xff]  }
 0x290   :  { %10247 = vmatprep.subr.bf16.mxu0 %v15231_v19  ;;  %11272 = vmatprep.subr.bf16.mxu1 %v15234_v20  ;;  %v15322_v19 = vld [vmem:[%s21843_s1 + $0x1664] ss:$16 sps:$4 sm:$0xff]   ;;  %v15325_v20 = vld [vmem:[%s21843_s1 + $0x166c] ss:$16 sps:$4 sm:$0xff]  }
 0x293   :  { %10248 = vmatpush1.bf16.msra.mxu0 %v15229_v22  ;;  %11273 = vmatpush1.bf16.msra.mxu1 %v15232_v23  ;;  %v15320_v22 = vld [vmem:[%s21843_s1 + $0x1660] ss:$16 sps:$4 sm:$0xff]   ;;  %v15323_v23 = vld [vmem:[%s21843_s1 + $0x1668] ss:$16 sps:$4 sm:$0xff]  }
 0x294   :  { %10249 = vmatprep.subr.bf16.mxu0 %v15237_v24  ;;  %11274 = vmatprep.subr.bf16.mxu1 %v15240_v13  ;;  %v15328_v24 = vld [vmem:[%s21843_s1 + $0x1684] ss:$16 sps:$4 sm:$0xff]   ;;  %v15331_v13 = vld [vmem:[%s21843_s1 + $0x168c] ss:$16 sps:$4 sm:$0xff]  }
 0x297   :  { %10250 = vmatpush1.bf16.msra.mxu0 %v15235_v27  ;;  %11275 = vmatpush1.bf16.msra.mxu1 %v15238_v28  ;;  %v15326_v27 = vld [vmem:[%s21843_s1 + $0x1680] ss:$16 sps:$4 sm:$0xff]   ;;  %v15329_v28 = vld [vmem:[%s21843_s1 + $0x1688] ss:$16 sps:$4 sm:$0xff]  }
 0x298   :  { %10251 = vmatprep.subr.bf16.mxu0 %v15243_v29  ;;  %11276 = vmatprep.subr.bf16.mxu1 %v15246_v14  ;;  %v15334_v29 = vld [vmem:[%s21843_s1 + $0x16a4] ss:$16 sps:$4 sm:$0xff]   ;;  %v15337_v14 = vld [vmem:[%s21843_s1 + $0x16ac] ss:$16 sps:$4 sm:$0xff]  }
 0x29b   :  { %10252 = vmatpush1.bf16.msra.mxu0 %v15241_v30  ;;  %11277 = vmatpush1.bf16.msra.mxu1 %v15244_v31  ;;  %v15332_v30 = vld [vmem:[%s21843_s1 + $0x16a0] ss:$16 sps:$4 sm:$0xff]   ;;  %v15335_v31 = vld [vmem:[%s21843_s1 + $0x16a8] ss:$16 sps:$4 sm:$0xff]  }
 0x29c   :  { %10253 = vmatprep.subr.bf16.mxu0 %v15249_v25  ;;  %11278 = vmatprep.subr.bf16.mxu1 %v15252_v32  ;;  %v15340_v25 = vld [vmem:[%s21843_s1 + $0x16c4] ss:$16 sps:$4 sm:$0xff]   ;;  %v15343_v32 = vld [vmem:[%s21843_s1 + $0x16cc] ss:$16 sps:$4 sm:$0xff]  }
 0x29f   :  { %10254 = vmatpush1.bf16.msra.mxu0 %v15247_v33  ;;  %11279 = vmatpush1.bf16.msra.mxu1 %v15250_v26  ;;  %v15338_v33 = vld [vmem:[%s21843_s1 + $0x16c0] ss:$16 sps:$4 sm:$0xff]   ;;  %v15341_v26 = vld [vmem:[%s21843_s1 + $0x16c8] ss:$16 sps:$4 sm:$0xff]  }
 0x2a0   :  { %10255 = vmatprep.subr.bf16.mxu0 %v15255_v36  ;;  %11280 = vmatprep.subr.bf16.mxu1 %v15258_v37  ;;  %v15346_v36 = vld [vmem:[%s21843_s1 + $0x16e4] ss:$16 sps:$4 sm:$0xff]   ;;  %v15349_v37 = vld [vmem:[%s21843_s1 + $0x16ec] ss:$16 sps:$4 sm:$0xff]  }
 0x2a3   :  { %10256 = vmatpush1.bf16.msra.mxu0 %v15253_v21  ;;  %11281 = vmatpush1.bf16.msra.mxu1 %v15256_v39  ;;  %v15344_v21 = vld [vmem:[%s21843_s1 + $0x16e0] ss:$16 sps:$4 sm:$0xff]   ;;  %v15347_v39 = vld [vmem:[%s21843_s1 + $0x16e8] ss:$16 sps:$4 sm:$0xff]  }
 0x2a4   :  { %10257 = vmatprep.subr.bf16.mxu0 %v15261_v40  ;;  %11282 = vmatprep.subr.bf16.mxu1 %v15264_v41  ;;  %v15352_v40 = vld [vmem:[%s21843_s1 + $0x1704] ss:$16 sps:$4 sm:$0xff]   ;;  %v15355_v41 = vld [vmem:[%s21843_s1 + $0x170c] ss:$16 sps:$4 sm:$0xff]  }
 0x2a7   :  { %10258 = vmatpush1.bf16.msra.mxu0 %v15259_v34  ;;  %11283 = vmatpush1.bf16.msra.mxu1 %v15262_v43  ;;  %v15350_v34 = vld [vmem:[%s21843_s1 + $0x1700] ss:$16 sps:$4 sm:$0xff]   ;;  %v15353_v43 = vld [vmem:[%s21843_s1 + $0x1708] ss:$16 sps:$4 sm:$0xff]  }
 0x2a8   :  { %10259 = vmatprep.subr.bf16.mxu0 %v15267_v45  ;;  %11284 = vmatprep.subr.bf16.mxu1 %v15270_v46  ;;  %v15358_v45 = vld [vmem:[%s21843_s1 + $0x1724] ss:$16 sps:$4 sm:$0xff]   ;;  %v15361_v46 = vld [vmem:[%s21843_s1 + $0x172c] ss:$16 sps:$4 sm:$0xff]  }
 0x2ab   :  { %10260 = vmatpush1.bf16.msra.mxu0 %v15265_v35  ;;  %11285 = vmatpush1.bf16.msra.mxu1 %v15268_v50  ;;  %v15356_v35 = vld [vmem:[%s21843_s1 + $0x1720] ss:$16 sps:$4 sm:$0xff]   ;;  %v15359_v50 = vld [vmem:[%s21843_s1 + $0x1728] ss:$16 sps:$4 sm:$0xff]  }
 0x2ac   :  { %10261 = vmatprep.subr.bf16.mxu0 %v15273_v51  ;;  %11286 = vmatprep.subr.bf16.mxu1 %v15276_v53  ;;  %v15364_v51 = vld [vmem:[%s21843_s1 + $0x1744] ss:$16 sps:$4 sm:$0xff]   ;;  %v15367_v53 = vld [vmem:[%s21843_s1 + $0x174c] ss:$16 sps:$4 sm:$0xff]  }
 0x2af   :  { %10262 = vmatpush1.bf16.msra.mxu0 %v15271_v38  ;;  %11287 = vmatpush1.bf16.msra.mxu1 %v15274_v54  ;;  %v15362_v38 = vld [vmem:[%s21843_s1 + $0x1740] ss:$16 sps:$4 sm:$0xff]   ;;  %v15365_v54 = vld [vmem:[%s21843_s1 + $0x1748] ss:$16 sps:$4 sm:$0xff]  }
 0x2b0   :  { %10263 = vmatprep.subr.bf16.mxu0 %v15279_v55  ;;  %11288 = vmatprep.subr.bf16.mxu1 %v15282_v56  ;;  %v15370_v55 = vld [vmem:[%s21843_s1 + $0x1764] ss:$16 sps:$4 sm:$0xff]   ;;  %v15373_v56 = vld [vmem:[%s21843_s1 + $0x176c] ss:$16 sps:$4 sm:$0xff]  }
 0x2b3   :  { %10264 = vmatpush1.bf16.msra.mxu0 %v15277_v47  ;;  %11289 = vmatpush1.bf16.msra.mxu1 %v15280_v57  ;;  %v15368_v47 = vld [vmem:[%s21843_s1 + $0x1760] ss:$16 sps:$4 sm:$0xff]   ;;  %v15371_v57 = vld [vmem:[%s21843_s1 + $0x1768] ss:$16 sps:$4 sm:$0xff]  }
 0x2b4   :  { %10265 = vmatprep.subr.bf16.mxu0 %v15285_v58  ;;  %11290 = vmatprep.subr.bf16.mxu1 %v15288_v48  ;;  %v15376_v58 = vld [vmem:[%s21843_s1 + $0x1784] ss:$16 sps:$4 sm:$0xff]   ;;  %v15379_v48 = vld [vmem:[%s21843_s1 + $0x178c] ss:$16 sps:$4 sm:$0xff]  }
 0x2b7   :  { %10266 = vmatpush1.bf16.msra.mxu0 %v15283_v61  ;;  %11291 = vmatpush1.bf16.msra.mxu1 %v15286_v62  ;;  %v15374_v61 = vld [vmem:[%s21843_s1 + $0x1780] ss:$16 sps:$4 sm:$0xff]   ;;  %v15377_v62 = vld [vmem:[%s21843_s1 + $0x1788] ss:$16 sps:$4 sm:$0xff]  }
 0x2b8   :  { %10267 = vmatprep.subr.bf16.mxu0 %v15291_v44  ;;  %11292 = vmatprep.subr.bf16.mxu1 %v15294_v0  ;;  %v15382_v44 = vld [vmem:[%s21843_s1 + $0x17a4] ss:$16 sps:$4 sm:$0xff]   ;;  %v15385_v0 = vld [vmem:[%s21843_s1 + $0x17ac] ss:$16 sps:$4 sm:$0xff]  }
 0x2bb   :  { %10268 = vmatpush1.bf16.msra.mxu0 %v15289_v1  ;;  %11293 = vmatpush1.bf16.msra.mxu1 %v15292_v2  ;;  %v15380_v1 = vld [vmem:[%s21843_s1 + $0x17a0] ss:$16 sps:$4 sm:$0xff]   ;;  %v15383_v2 = vld [vmem:[%s21843_s1 + $0x17a8] ss:$16 sps:$4 sm:$0xff]  }
 0x2bc   :  { %10269 = vmatprep.subr.bf16.mxu0 %v15297_v59  ;;  %11294 = vmatprep.subr.bf16.mxu1 %v15300_v3  ;;  %v15388_v59 = vld [vmem:[%s21843_s1 + $0x17c4] ss:$16 sps:$4 sm:$0xff]   ;;  %v15391_v3 = vld [vmem:[%s21843_s1 + $0x17cc] ss:$16 sps:$4 sm:$0xff]  }
 0x2bf   :  { %10270 = vmatpush1.bf16.msra.mxu0 %v15295_v4  ;;  %11295 = vmatpush1.bf16.msra.mxu1 %v15298_v5  ;;  %v19135_v4 = vld.sshfl [vmem:[%s21842_s0 + $0x18] sm:$0xff pattern:$0x75316420]  ;;  %v15386_v5 = vld [vmem:[%s21843_s1 + $0x17c0] ss:$16 sps:$4 sm:$0xff]  }
 0x2c0   :  { %10280 = vmatprep.subr.bf16.mxu0 %v15304_v6  ;;  %11305 = vmatprep.subr.bf16.mxu1 %v15307_v60  ;;  %v15389_v6 = vld [vmem:[%s21843_s1 + $0x17c8] ss:$16 sps:$4 sm:$0xff]   ;;  %v15394_v60 = vld [vmem:[%s21843_s1 + $0x17e4] ss:$16 sps:$4 sm:$0xff]  }
 0x2c2   :  { %10272 = vmatmul.mubr.bf16.vlgmr.msra.gmra.mrb[0].mxu0 %v18958_v8  ;;  %11297 = vmatmul.mubr.bf16.vlgmr.msra.gmra.mrb[0].mxu1 %v18958_v8 }
 0x2c3   :  { %10281 = vmatpush1.bf16.msra.mxu0 %v15302_v9  ;;  %11306 = vmatpush1.bf16.msra.mxu1 %v15305_v10  ;;  %v15397_v9 = vld [vmem:[%s21843_s1 + $0x17ec] ss:$16 sps:$4 sm:$0xff]   ;;  %v15392_v10 = vld [vmem:[%s21843_s1 + $0x17e0] ss:$16 sps:$4 sm:$0xff]  }
 0x2c4   :  { %10282 = vmatprep.subr.bf16.mxu0 %v15310_v11  ;;  %11307 = vmatprep.subr.bf16.mxu1 %v15313_v63  ;;  %v15395_v11 = vld [vmem:[%s21843_s1 + $0x17e8] ss:$16 sps:$4 sm:$0xff]   ;;  %v15400_v63 = vld [vmem:[%s21843_s1 + $0x1804] ss:$16 sps:$4 sm:$0xff]  }
 0x2c5   :  { %10312 = vmatprep.mubr.bf16.mxu0 %v1778_v12  ;;  %11337 = vmatprep.mubr.bf16.mxu1 %v1778_v12  ;;  %v15403_v12 = vld [vmem:[%s21843_s1 + $0x180c] ss:$16 sps:$4 sm:$0xff]  }
 0x2c7   :  { %10283 = vmatpush1.bf16.msra.mxu0 %v15308_v52  ;;  %11308 = vmatpush1.bf16.msra.mxu1 %v15311_v15  ;;  %v1794_v52 = vcombine.high %v19135_v4, %v19135_v4  ;;  %v1776_v15 = vcombine.high %v18958_v8, %v18958_v8  ;;  %v15409_v8 = vld [vmem:[%s21843_s1 + $0x182c] ss:$16 sps:$4 sm:$0xff]  }
 0x2c8   :  { %10284 = vmatprep.subr.bf16.mxu0 %v15316_v7  ;;  %11309 = vmatprep.subr.bf16.mxu1 %v15319_v16  ;;  %v15398_v7 = vld [vmem:[%s21843_s1 + $0x1800] ss:$16 sps:$4 sm:$0xff]   ;;  %v15401_v16 = vld [vmem:[%s21843_s1 + $0x1808] ss:$16 sps:$4 sm:$0xff]  }
 0x2cb   :  { %10285 = vmatpush1.bf16.msra.mxu0 %v15314_v17  ;;  %11310 = vmatpush1.bf16.msra.mxu1 %v15317_v18  ;;  %v15406_v17 = vld [vmem:[%s21843_s1 + $0x1824] ss:$16 sps:$4 sm:$0xff]   ;;  %v19178_v18 = vrot.slane %v1794_v52, %v16851_v49 }
 0x2cc   :  { %10286 = vmatprep.subr.bf16.mxu0 %v15322_v19  ;;  %11311 = vmatprep.subr.bf16.mxu1 %v15325_v20  ;;  %v15404_v19 = vld [vmem:[%s21843_s1 + $0x1820] ss:$16 sps:$4 sm:$0xff]   ;;  %v15407_v20 = vld [vmem:[%s21843_s1 + $0x1828] ss:$16 sps:$4 sm:$0xff]   ;;  %v15490_v52 = vld [vmem:[%s21843_s1 + $0x19e4] ss:$16 sps:$4 sm:$0xff]  }
 0x2cf   :  { %10287 = vmatpush1.bf16.msra.mxu0 %v15320_v22  ;;  %11312 = vmatpush1.bf16.msra.mxu1 %v15323_v23  ;;  %v15412_v22 = vld [vmem:[%s21843_s1 + $0x1844] ss:$16 sps:$4 sm:$0xff]   ;;  %v15415_v23 = vld [vmem:[%s21843_s1 + $0x184c] ss:$16 sps:$4 sm:$0xff]  }
 0x2d0   :  { %10288 = vmatprep.subr.bf16.mxu0 %v15328_v24  ;;  %11313 = vmatprep.subr.bf16.mxu1 %v15331_v13  ;;  %v15410_v24 = vld [vmem:[%s21843_s1 + $0x1840] ss:$16 sps:$4 sm:$0xff]   ;;  %v15413_v13 = vld [vmem:[%s21843_s1 + $0x1848] ss:$16 sps:$4 sm:$0xff]  }
 0x2d3   :  { %10289 = vmatpush1.bf16.msra.mxu0 %v15326_v27  ;;  %11314 = vmatpush1.bf16.msra.mxu1 %v15329_v28  ;;  %v15418_v27 = vld [vmem:[%s21843_s1 + $0x1864] ss:$16 sps:$4 sm:$0xff]   ;;  %v15421_v28 = vld [vmem:[%s21843_s1 + $0x186c] ss:$16 sps:$4 sm:$0xff]  }
 0x2d4   :  { %10290 = vmatprep.subr.bf16.mxu0 %v15334_v29  ;;  %11315 = vmatprep.subr.bf16.mxu1 %v15337_v14  ;;  %v15416_v29 = vld [vmem:[%s21843_s1 + $0x1860] ss:$16 sps:$4 sm:$0xff]   ;;  %v15419_v14 = vld [vmem:[%s21843_s1 + $0x1868] ss:$16 sps:$4 sm:$0xff]  }
 0x2d7   :  { %10291 = vmatpush1.bf16.msra.mxu0 %v15332_v30  ;;  %11316 = vmatpush1.bf16.msra.mxu1 %v15335_v31  ;;  %v15424_v30 = vld [vmem:[%s21843_s1 + $0x1884] ss:$16 sps:$4 sm:$0xff]   ;;  %v15427_v31 = vld [vmem:[%s21843_s1 + $0x188c] ss:$16 sps:$4 sm:$0xff]  }
 0x2d8   :  { %10292 = vmatprep.subr.bf16.mxu0 %v15340_v25  ;;  %11317 = vmatprep.subr.bf16.mxu1 %v15343_v32  ;;  %v15422_v25 = vld [vmem:[%s21843_s1 + $0x1880] ss:$16 sps:$4 sm:$0xff]   ;;  %v15425_v32 = vld [vmem:[%s21843_s1 + $0x1888] ss:$16 sps:$4 sm:$0xff]  }
 0x2db   :  { %10293 = vmatpush1.bf16.msra.mxu0 %v15338_v33  ;;  %11318 = vmatpush1.bf16.msra.mxu1 %v15341_v26  ;;  %v15430_v33 = vld [vmem:[%s21843_s1 + $0x18a4] ss:$16 sps:$4 sm:$0xff]   ;;  %v15433_v26 = vld [vmem:[%s21843_s1 + $0x18ac] ss:$16 sps:$4 sm:$0xff]  }
 0x2dc   :  { %10294 = vmatprep.subr.bf16.mxu0 %v15346_v36  ;;  %11319 = vmatprep.subr.bf16.mxu1 %v15349_v37  ;;  %v15428_v36 = vld [vmem:[%s21843_s1 + $0x18a0] ss:$16 sps:$4 sm:$0xff]   ;;  %v15431_v37 = vld [vmem:[%s21843_s1 + $0x18a8] ss:$16 sps:$4 sm:$0xff]  }
 0x2df   :  { %10295 = vmatpush1.bf16.msra.mxu0 %v15344_v21  ;;  %11320 = vmatpush1.bf16.msra.mxu1 %v15347_v39  ;;  %v15436_v21 = vld [vmem:[%s21843_s1 + $0x18c4] ss:$16 sps:$4 sm:$0xff]   ;;  %v15439_v39 = vld [vmem:[%s21843_s1 + $0x18cc] ss:$16 sps:$4 sm:$0xff]  }
 0x2e0   :  { %10296 = vmatprep.subr.bf16.mxu0 %v15352_v40  ;;  %11321 = vmatprep.subr.bf16.mxu1 %v15355_v41  ;;  %v15434_v40 = vld [vmem:[%s21843_s1 + $0x18c0] ss:$16 sps:$4 sm:$0xff]   ;;  %v15437_v41 = vld [vmem:[%s21843_s1 + $0x18c8] ss:$16 sps:$4 sm:$0xff]  }
 0x2e3   :  { %10297 = vmatpush1.bf16.msra.mxu0 %v15350_v34  ;;  %11322 = vmatpush1.bf16.msra.mxu1 %v15353_v43  ;;  %v15442_v34 = vld [vmem:[%s21843_s1 + $0x18e4] ss:$16 sps:$4 sm:$0xff]   ;;  %v15445_v43 = vld [vmem:[%s21843_s1 + $0x18ec] ss:$16 sps:$4 sm:$0xff]  }
 0x2e4   :  { %10298 = vmatprep.subr.bf16.mxu0 %v15358_v45  ;;  %11323 = vmatprep.subr.bf16.mxu1 %v15361_v46  ;;  %v15440_v45 = vld [vmem:[%s21843_s1 + $0x18e0] ss:$16 sps:$4 sm:$0xff]   ;;  %v15443_v46 = vld [vmem:[%s21843_s1 + $0x18e8] ss:$16 sps:$4 sm:$0xff]  }
 0x2e7   :  { %10299 = vmatpush1.bf16.msra.mxu0 %v15356_v35  ;;  %11324 = vmatpush1.bf16.msra.mxu1 %v15359_v50  ;;  %v15448_v35 = vld [vmem:[%s21843_s1 + $0x1904] ss:$16 sps:$4 sm:$0xff]   ;;  %v15451_v50 = vld [vmem:[%s21843_s1 + $0x190c] ss:$16 sps:$4 sm:$0xff]  }
 0x2e8   :  { %10300 = vmatprep.subr.bf16.mxu0 %v15364_v51  ;;  %11325 = vmatprep.subr.bf16.mxu1 %v15367_v53  ;;  %v15446_v51 = vld [vmem:[%s21843_s1 + $0x1900] ss:$16 sps:$4 sm:$0xff]   ;;  %v15449_v53 = vld [vmem:[%s21843_s1 + $0x1908] ss:$16 sps:$4 sm:$0xff]  }
 0x2eb   :  { %10301 = vmatpush1.bf16.msra.mxu0 %v15362_v38  ;;  %11326 = vmatpush1.bf16.msra.mxu1 %v15365_v54  ;;  %v15454_v38 = vld [vmem:[%s21843_s1 + $0x1924] ss:$16 sps:$4 sm:$0xff]   ;;  %v15457_v54 = vld [vmem:[%s21843_s1 + $0x192c] ss:$16 sps:$4 sm:$0xff]  }
 0x2ec   :  { %10302 = vmatprep.subr.bf16.mxu0 %v15370_v55  ;;  %11327 = vmatprep.subr.bf16.mxu1 %v15373_v56  ;;  %v15452_v55 = vld [vmem:[%s21843_s1 + $0x1920] ss:$16 sps:$4 sm:$0xff]   ;;  %v15455_v56 = vld [vmem:[%s21843_s1 + $0x1928] ss:$16 sps:$4 sm:$0xff]  }
 0x2ef   :  { %10303 = vmatpush1.bf16.msra.mxu0 %v15368_v47  ;;  %11328 = vmatpush1.bf16.msra.mxu1 %v15371_v57  ;;  %v15460_v47 = vld [vmem:[%s21843_s1 + $0x1944] ss:$16 sps:$4 sm:$0xff]   ;;  %v15463_v57 = vld [vmem:[%s21843_s1 + $0x194c] ss:$16 sps:$4 sm:$0xff]  }
 0x2f0   :  { %10304 = vmatprep.subr.bf16.mxu0 %v15376_v58  ;;  %11329 = vmatprep.subr.bf16.mxu1 %v15379_v48  ;;  %v15458_v58 = vld [vmem:[%s21843_s1 + $0x1940] ss:$16 sps:$4 sm:$0xff]   ;;  %v15461_v48 = vld [vmem:[%s21843_s1 + $0x1948] ss:$16 sps:$4 sm:$0xff]  }
 0x2f3   :  { %10305 = vmatpush1.bf16.msra.mxu0 %v15374_v61  ;;  %11330 = vmatpush1.bf16.msra.mxu1 %v15377_v62  ;;  %v15466_v61 = vld [vmem:[%s21843_s1 + $0x1964] ss:$16 sps:$4 sm:$0xff]   ;;  %v15469_v62 = vld [vmem:[%s21843_s1 + $0x196c] ss:$16 sps:$4 sm:$0xff]  }
 0x2f4   :  { %10306 = vmatprep.subr.bf16.mxu0 %v15382_v44  ;;  %11331 = vmatprep.subr.bf16.mxu1 %v15385_v0  ;;  %v15464_v44 = vld [vmem:[%s21843_s1 + $0x1960] ss:$16 sps:$4 sm:$0xff]   ;;  %v15467_v0 = vld [vmem:[%s21843_s1 + $0x1968] ss:$16 sps:$4 sm:$0xff]  }
 0x2f7   :  { %10307 = vmatpush1.bf16.msra.mxu0 %v15380_v1  ;;  %11332 = vmatpush1.bf16.msra.mxu1 %v15383_v2  ;;  %v15472_v1 = vld [vmem:[%s21843_s1 + $0x1984] ss:$16 sps:$4 sm:$0xff]   ;;  %v15475_v2 = vld [vmem:[%s21843_s1 + $0x198c] ss:$16 sps:$4 sm:$0xff]  }
 0x2f8   :  { %10308 = vmatprep.subr.bf16.mxu0 %v15388_v59  ;;  %11333 = vmatprep.subr.bf16.mxu1 %v15391_v3  ;;  %v15470_v59 = vld [vmem:[%s21843_s1 + $0x1980] ss:$16 sps:$4 sm:$0xff]   ;;  %v15473_v3 = vld [vmem:[%s21843_s1 + $0x1988] ss:$16 sps:$4 sm:$0xff]  }
 0x2fb   :  { %10309 = vmatpush1.bf16.msra.mxu0 %v15386_v5  ;;  %11334 = vmatpush1.bf16.msra.mxu1 %v15389_v6  ;;  %v15478_v5 = vld [vmem:[%s21843_s1 + $0x19a4] ss:$16 sps:$4 sm:$0xff]   ;;  %v15481_v6 = vld [vmem:[%s21843_s1 + $0x19ac] ss:$16 sps:$4 sm:$0xff]  }
 0x2fc   :  { %10310 = vmatprep.subr.bf16.mxu0 %v15394_v60  ;;  %11335 = vmatprep.subr.bf16.mxu1 %v15397_v9  ;;  %v15476_v60 = vld [vmem:[%s21843_s1 + $0x19a0] ss:$16 sps:$4 sm:$0xff]   ;;  %v15479_v9 = vld [vmem:[%s21843_s1 + $0x19a8] ss:$16 sps:$4 sm:$0xff]  }
 0x2ff   :  { %10311 = vmatpush1.bf16.msra.mxu0 %v15392_v10  ;;  %11336 = vmatpush1.bf16.msra.mxu1 %v15395_v11  ;;  %v15484_v10 = vld [vmem:[%s21843_s1 + $0x19c4] ss:$16 sps:$4 sm:$0xff]   ;;  %v15487_v11 = vld [vmem:[%s21843_s1 + $0x19cc] ss:$16 sps:$4 sm:$0xff]  }
 0x300   :  { %10321 = vmatprep.subr.bf16.mxu0 %v15400_v63  ;;  %11346 = vmatprep.subr.bf16.mxu1 %v15403_v12  ;;  %v15482_v63 = vld [vmem:[%s21843_s1 + $0x19c0] ss:$16 sps:$4 sm:$0xff]   ;;  %v15485_v12 = vld [vmem:[%s21843_s1 + $0x19c8] ss:$16 sps:$4 sm:$0xff]  }
 0x302   :  { %10313 = vmatmul.mubr.bf16.vlgmr.msra.gmra.mrb[0].mxu0 %v1776_v15  ;;  %11338 = vmatmul.mubr.bf16.vlgmr.msra.gmra.mrb[0].mxu1 %v1776_v15  ;;  %v15493_v15 = vld [vmem:[%s21843_s1 + $0x19ec] ss:$16 sps:$4 sm:$0xff]  }
 0x303   :  { %10322 = vmatpush1.bf16.msra.mxu0 %v15398_v7  ;;  %11347 = vmatpush1.bf16.msra.mxu1 %v15401_v16  ;;  %v15488_v7 = vld [vmem:[%s21843_s1 + $0x19e0] ss:$16 sps:$4 sm:$0xff]   ;;  %v15491_v16 = vld [vmem:[%s21843_s1 + $0x19e8] ss:$16 sps:$4 sm:$0xff]  }
 0x304   :  { %10323 = vmatprep.subr.bf16.mxu0 %v15406_v17  ;;  %11348 = vmatprep.subr.bf16.mxu1 %v15409_v8  ;;  %v15496_v17 = vld [vmem:[%s21843_s1 + $0x1a04] ss:$16 sps:$4 sm:$0xff]   ;;  %v15499_v8 = vld [vmem:[%s21843_s1 + $0x1a0c] ss:$16 sps:$4 sm:$0xff]  }
 0x305   :  { %10353 = vmatprep.mubr.bf16.mxu0 %v19178_v18  ;;  %11378 = vmatprep.mubr.bf16.mxu1 %v19178_v18 }
 0x307   :  { %10324 = vmatpush1.bf16.msra.mxu0 %v15404_v19  ;;  %11349 = vmatpush1.bf16.msra.mxu1 %v15407_v20  ;;  %v19364_v19 = vrot.slane %v19135_v4, %v16851_v49  ;;  %v15494_v20 = vld [vmem:[%s21843_s1 + $0x1a00] ss:$16 sps:$4 sm:$0xff]   ;;  %v15505_v4 = vld [vmem:[%s21843_s1 + $0x1a2c] ss:$16 sps:$4 sm:$0xff]  }
 0x308   :  { %10325 = vmatprep.subr.bf16.mxu0 %v15412_v22  ;;  %11350 = vmatprep.subr.bf16.mxu1 %v15415_v23  ;;  %v15497_v22 = vld [vmem:[%s21843_s1 + $0x1a08] ss:$16 sps:$4 sm:$0xff]   ;;  %v15502_v23 = vld [vmem:[%s21843_s1 + $0x1a24] ss:$16 sps:$4 sm:$0xff]  }
 0x30b   :  { %10326 = vmatpush1.bf16.msra.mxu0 %v15410_v24  ;;  %11351 = vmatpush1.bf16.msra.mxu1 %v15413_v13  ;;  %v1826_v24 = vcombine.high %v19178_v18, %v19178_v18  ;;  %v15500_v13 = vld [vmem:[%s21843_s1 + $0x1a20] ss:$16 sps:$4 sm:$0xff]   ;;  %v15508_v18 = vld [vmem:[%s21843_s1 + $0x1a44] ss:$16 sps:$4 sm:$0xff]  }
 0x30c   :  { %10327 = vmatprep.subr.bf16.mxu0 %v15418_v27  ;;  %11352 = vmatprep.subr.bf16.mxu1 %v15421_v28  ;;  %v15503_v27 = vld [vmem:[%s21843_s1 + $0x1a28] ss:$16 sps:$4 sm:$0xff]   ;;  %v15511_v28 = vld [vmem:[%s21843_s1 + $0x1a4c] ss:$16 sps:$4 sm:$0xff]  }
 0x30f   :  { %10328 = vmatpush1.bf16.msra.mxu0 %v15416_v29  ;;  %11353 = vmatpush1.bf16.msra.mxu1 %v15419_v14  ;;  %v15506_v29 = vld [vmem:[%s21843_s1 + $0x1a40] ss:$16 sps:$4 sm:$0xff]   ;;  %v15509_v14 = vld [vmem:[%s21843_s1 + $0x1a48] ss:$16 sps:$4 sm:$0xff]  }
 0x310   :  { %10329 = vmatprep.subr.bf16.mxu0 %v15424_v30  ;;  %11354 = vmatprep.subr.bf16.mxu1 %v15427_v31  ;;  %v15514_v30 = vld [vmem:[%s21843_s1 + $0x1a64] ss:$16 sps:$4 sm:$0xff]   ;;  %v15517_v31 = vld [vmem:[%s21843_s1 + $0x1a6c] ss:$16 sps:$4 sm:$0xff]  }
 0x313   :  { %10330 = vmatpush1.bf16.msra.mxu0 %v15422_v25  ;;  %11355 = vmatpush1.bf16.msra.mxu1 %v15425_v32  ;;  %v15512_v25 = vld [vmem:[%s21843_s1 + $0x1a60] ss:$16 sps:$4 sm:$0xff]   ;;  %v15515_v32 = vld [vmem:[%s21843_s1 + $0x1a68] ss:$16 sps:$4 sm:$0xff]  }
 0x314   :  { %10331 = vmatprep.subr.bf16.mxu0 %v15430_v33  ;;  %11356 = vmatprep.subr.bf16.mxu1 %v15433_v26  ;;  %v15520_v33 = vld [vmem:[%s21843_s1 + $0x1a84] ss:$16 sps:$4 sm:$0xff]   ;;  %v15523_v26 = vld [vmem:[%s21843_s1 + $0x1a8c] ss:$16 sps:$4 sm:$0xff]  }
 0x317   :  { %10332 = vmatpush1.bf16.msra.mxu0 %v15428_v36  ;;  %11357 = vmatpush1.bf16.msra.mxu1 %v15431_v37  ;;  %v15518_v36 = vld [vmem:[%s21843_s1 + $0x1a80] ss:$16 sps:$4 sm:$0xff]   ;;  %v15521_v37 = vld [vmem:[%s21843_s1 + $0x1a88] ss:$16 sps:$4 sm:$0xff]  }
 0x318   :  { %10333 = vmatprep.subr.bf16.mxu0 %v15436_v21  ;;  %11358 = vmatprep.subr.bf16.mxu1 %v15439_v39  ;;  %v15526_v21 = vld [vmem:[%s21843_s1 + $0x1aa4] ss:$16 sps:$4 sm:$0xff]   ;;  %v15529_v39 = vld [vmem:[%s21843_s1 + $0x1aac] ss:$16 sps:$4 sm:$0xff]  }
 0x31b   :  { %10334 = vmatpush1.bf16.msra.mxu0 %v15434_v40  ;;  %11359 = vmatpush1.bf16.msra.mxu1 %v15437_v41  ;;  %v15524_v40 = vld [vmem:[%s21843_s1 + $0x1aa0] ss:$16 sps:$4 sm:$0xff]   ;;  %v15527_v41 = vld [vmem:[%s21843_s1 + $0x1aa8] ss:$16 sps:$4 sm:$0xff]  }
 0x31c   :  { %10335 = vmatprep.subr.bf16.mxu0 %v15442_v34  ;;  %11360 = vmatprep.subr.bf16.mxu1 %v15445_v43  ;;  %v15532_v34 = vld [vmem:[%s21843_s1 + $0x1ac4] ss:$16 sps:$4 sm:$0xff]   ;;  %v15535_v43 = vld [vmem:[%s21843_s1 + $0x1acc] ss:$16 sps:$4 sm:$0xff]  }
 0x31f   :  { %10336 = vmatpush1.bf16.msra.mxu0 %v15440_v45  ;;  %11361 = vmatpush1.bf16.msra.mxu1 %v15443_v46  ;;  %v15530_v45 = vld [vmem:[%s21843_s1 + $0x1ac0] ss:$16 sps:$4 sm:$0xff]   ;;  %v15533_v46 = vld [vmem:[%s21843_s1 + $0x1ac8] ss:$16 sps:$4 sm:$0xff]  }
 0x320   :  { %10337 = vmatprep.subr.bf16.mxu0 %v15448_v35  ;;  %11362 = vmatprep.subr.bf16.mxu1 %v15451_v50  ;;  %v15538_v35 = vld [vmem:[%s21843_s1 + $0x1ae4] ss:$16 sps:$4 sm:$0xff]   ;;  %v15541_v50 = vld [vmem:[%s21843_s1 + $0x1aec] ss:$16 sps:$4 sm:$0xff]  }
 0x323   :  { %10338 = vmatpush1.bf16.msra.mxu0 %v15446_v51  ;;  %11363 = vmatpush1.bf16.msra.mxu1 %v15449_v53  ;;  %v15536_v51 = vld [vmem:[%s21843_s1 + $0x1ae0] ss:$16 sps:$4 sm:$0xff]   ;;  %v15539_v53 = vld [vmem:[%s21843_s1 + $0x1ae8] ss:$16 sps:$4 sm:$0xff]  }
 0x324   :  { %10339 = vmatprep.subr.bf16.mxu0 %v15454_v38  ;;  %11364 = vmatprep.subr.bf16.mxu1 %v15457_v54  ;;  %v15544_v38 = vld [vmem:[%s21843_s1 + $0x1b04] ss:$16 sps:$4 sm:$0xff]   ;;  %v15547_v54 = vld [vmem:[%s21843_s1 + $0x1b0c] ss:$16 sps:$4 sm:$0xff]  }
 0x327   :  { %10340 = vmatpush1.bf16.msra.mxu0 %v15452_v55  ;;  %11365 = vmatpush1.bf16.msra.mxu1 %v15455_v56  ;;  %v15542_v55 = vld [vmem:[%s21843_s1 + $0x1b00] ss:$16 sps:$4 sm:$0xff]   ;;  %v15545_v56 = vld [vmem:[%s21843_s1 + $0x1b08] ss:$16 sps:$4 sm:$0xff]  }
 0x328   :  { %10341 = vmatprep.subr.bf16.mxu0 %v15460_v47  ;;  %11366 = vmatprep.subr.bf16.mxu1 %v15463_v57  ;;  %v15550_v47 = vld [vmem:[%s21843_s1 + $0x1b24] ss:$16 sps:$4 sm:$0xff]   ;;  %v15553_v57 = vld [vmem:[%s21843_s1 + $0x1b2c] ss:$16 sps:$4 sm:$0xff]  }
 0x32b   :  { %10342 = vmatpush1.bf16.msra.mxu0 %v15458_v58  ;;  %11367 = vmatpush1.bf16.msra.mxu1 %v15461_v48  ;;  %v15548_v58 = vld [vmem:[%s21843_s1 + $0x1b20] ss:$16 sps:$4 sm:$0xff]   ;;  %v15551_v48 = vld [vmem:[%s21843_s1 + $0x1b28] ss:$16 sps:$4 sm:$0xff]  }
 0x32c   :  { %10343 = vmatprep.subr.bf16.mxu0 %v15466_v61  ;;  %11368 = vmatprep.subr.bf16.mxu1 %v15469_v62  ;;  %v15556_v61 = vld [vmem:[%s21843_s1 + $0x1b44] ss:$16 sps:$4 sm:$0xff]   ;;  %v15559_v62 = vld [vmem:[%s21843_s1 + $0x1b4c] ss:$16 sps:$4 sm:$0xff]  }
 0x32f   :  { %10344 = vmatpush1.bf16.msra.mxu0 %v15464_v44  ;;  %11369 = vmatpush1.bf16.msra.mxu1 %v15467_v0  ;;  %v15554_v44 = vld [vmem:[%s21843_s1 + $0x1b40] ss:$16 sps:$4 sm:$0xff]   ;;  %v15557_v0 = vld [vmem:[%s21843_s1 + $0x1b48] ss:$16 sps:$4 sm:$0xff]  }
 0x330   :  { %10345 = vmatprep.subr.bf16.mxu0 %v15472_v1  ;;  %11370 = vmatprep.subr.bf16.mxu1 %v15475_v2  ;;  %v15562_v1 = vld [vmem:[%s21843_s1 + $0x1b64] ss:$16 sps:$4 sm:$0xff]   ;;  %v15565_v2 = vld [vmem:[%s21843_s1 + $0x1b6c] ss:$16 sps:$4 sm:$0xff]  }
 0x333   :  { %10346 = vmatpush1.bf16.msra.mxu0 %v15470_v59  ;;  %11371 = vmatpush1.bf16.msra.mxu1 %v15473_v3  ;;  %v15560_v59 = vld [vmem:[%s21843_s1 + $0x1b60] ss:$16 sps:$4 sm:$0xff]   ;;  %v15563_v3 = vld [vmem:[%s21843_s1 + $0x1b68] ss:$16 sps:$4 sm:$0xff]  }
 0x334   :  { %10347 = vmatprep.subr.bf16.mxu0 %v15478_v5  ;;  %11372 = vmatprep.subr.bf16.mxu1 %v15481_v6  ;;  %v15568_v5 = vld [vmem:[%s21843_s1 + $0x1b84] ss:$16 sps:$4 sm:$0xff]   ;;  %v15571_v6 = vld [vmem:[%s21843_s1 + $0x1b8c] ss:$16 sps:$4 sm:$0xff]  }
 0x337   :  { %10348 = vmatpush1.bf16.msra.mxu0 %v15476_v60  ;;  %11373 = vmatpush1.bf16.msra.mxu1 %v15479_v9  ;;  %v15566_v60 = vld [vmem:[%s21843_s1 + $0x1b80] ss:$16 sps:$4 sm:$0xff]   ;;  %v15569_v9 = vld [vmem:[%s21843_s1 + $0x1b88] ss:$16 sps:$4 sm:$0xff]  }
 0x338   :  { %10349 = vmatprep.subr.bf16.mxu0 %v15484_v10  ;;  %11374 = vmatprep.subr.bf16.mxu1 %v15487_v11  ;;  %v15574_v10 = vld [vmem:[%s21843_s1 + $0x1ba4] ss:$16 sps:$4 sm:$0xff]   ;;  %v15577_v11 = vld [vmem:[%s21843_s1 + $0x1bac] ss:$16 sps:$4 sm:$0xff]  }
 0x33b   :  { %10350 = vmatpush1.bf16.msra.mxu0 %v15482_v63  ;;  %11375 = vmatpush1.bf16.msra.mxu1 %v15485_v12  ;;  %v15572_v63 = vld [vmem:[%s21843_s1 + $0x1ba0] ss:$16 sps:$4 sm:$0xff]   ;;  %v15575_v12 = vld [vmem:[%s21843_s1 + $0x1ba8] ss:$16 sps:$4 sm:$0xff]  }
 0x33c   :  { %10351 = vmatprep.subr.bf16.mxu0 %v15490_v52  ;;  %11376 = vmatprep.subr.bf16.mxu1 %v15493_v15  ;;  %v15580_v52 = vld [vmem:[%s21843_s1 + $0x1bc4] ss:$16 sps:$4 sm:$0xff]   ;;  %v15583_v15 = vld [vmem:[%s21843_s1 + $0x1bcc] ss:$16 sps:$4 sm:$0xff]  }
 0x33f   :  { %10352 = vmatpush1.bf16.msra.mxu0 %v15488_v7  ;;  %11377 = vmatpush1.bf16.msra.mxu1 %v15491_v16  ;;  %v16643_v7 = vld [vmem:[%s21842_s0 + $0x18] sm:$0xff] }
 0x340   :  { %10362 = vmatprep.subr.bf16.mxu0 %v15496_v17  ;;  %11387 = vmatprep.subr.bf16.mxu1 %v15499_v8  ;;  %v1779_v16 = vcombine.high %v16643_v7, %v16643_v7  ;;  %v15578_v17 = vld [vmem:[%s21843_s1 + $0x1bc0] ss:$16 sps:$4 sm:$0xff]   ;;  %v15581_v8 = vld [vmem:[%s21843_s1 + $0x1bc8] ss:$16 sps:$4 sm:$0xff]  }
 0x342   :  { %10354 = vmatmul.mubr.bf16.vlgmr.msra.gmra.mrb[0].mxu0 %v19364_v19  ;;  %11379 = vmatmul.mubr.bf16.vlgmr.msra.gmra.mrb[0].mxu1 %v19364_v19 }
 0x343   :  { %10363 = vmatpush1.bf16.msra.mxu0 %v15494_v20  ;;  %11388 = vmatpush1.bf16.msra.mxu1 %v15497_v22  ;;  %v15586_v20 = vld [vmem:[%s21843_s1 + $0x1be4] ss:$16 sps:$4 sm:$0xff]   ;;  %v15589_v22 = vld [vmem:[%s21843_s1 + $0x1bec] ss:$16 sps:$4 sm:$0xff]  }
 0x344   :  { %10364 = vmatprep.subr.bf16.mxu0 %v15502_v23  ;;  %11389 = vmatprep.subr.bf16.mxu1 %v15505_v4  ;;  %v19554_v23 = vrot.slane %v1779_v16, %v16851_v49 }
 0x345   :  { %10394 = vmatprep.mubr.bf16.mxu0 %v1826_v24  ;;  %11419 = vmatprep.mubr.bf16.mxu1 %v1826_v24 }
 0x347   :  { %10365 = vmatpush1.bf16.msra.mxu0 %v15500_v13  ;;  %11390 = vmatpush1.bf16.msra.mxu1 %v15503_v27 }
 0x348   :  { %10366 = vmatprep.subr.bf16.mxu0 %v15508_v18  ;;  %11391 = vmatprep.subr.bf16.mxu1 %v15511_v28 }
 0x34b   :  { %10367 = vmatpush1.bf16.msra.mxu0 %v15506_v29  ;;  %11392 = vmatpush1.bf16.msra.mxu1 %v15509_v14 }
 0x34c   :  { %10368 = vmatprep.subr.bf16.mxu0 %v15514_v30  ;;  %11393 = vmatprep.subr.bf16.mxu1 %v15517_v31 }
 0x34f   :  { %10369 = vmatpush1.bf16.msra.mxu0 %v15512_v25  ;;  %11394 = vmatpush1.bf16.msra.mxu1 %v15515_v32 }
 0x350   :  { %10370 = vmatprep.subr.bf16.mxu0 %v15520_v33  ;;  %11395 = vmatprep.subr.bf16.mxu1 %v15523_v26 }
 0x353   :  { %10371 = vmatpush1.bf16.msra.mxu0 %v15518_v36  ;;  %11396 = vmatpush1.bf16.msra.mxu1 %v15521_v37 }
 0x354   :  { %10372 = vmatprep.subr.bf16.mxu0 %v15526_v21  ;;  %11397 = vmatprep.subr.bf16.mxu1 %v15529_v39 }
 0x357   :  { %10373 = vmatpush1.bf16.msra.mxu0 %v15524_v40  ;;  %11398 = vmatpush1.bf16.msra.mxu1 %v15527_v41 }
 0x358   :  { %10374 = vmatprep.subr.bf16.mxu0 %v15532_v34  ;;  %11399 = vmatprep.subr.bf16.mxu1 %v15535_v43 }
 0x35b   :  { %10375 = vmatpush1.bf16.msra.mxu0 %v15530_v45  ;;  %11400 = vmatpush1.bf16.msra.mxu1 %v15533_v46 }
 0x35c   :  { %10376 = vmatprep.subr.bf16.mxu0 %v15538_v35  ;;  %11401 = vmatprep.subr.bf16.mxu1 %v15541_v50 }
 0x35f   :  { %10377 = vmatpush1.bf16.msra.mxu0 %v15536_v51  ;;  %11402 = vmatpush1.bf16.msra.mxu1 %v15539_v53 }
 0x360   :  { %10378 = vmatprep.subr.bf16.mxu0 %v15544_v38  ;;  %11403 = vmatprep.subr.bf16.mxu1 %v15547_v54 }
 0x363   :  { %10379 = vmatpush1.bf16.msra.mxu0 %v15542_v55  ;;  %11404 = vmatpush1.bf16.msra.mxu1 %v15545_v56 }
 0x364   :  { %10380 = vmatprep.subr.bf16.mxu0 %v15550_v47  ;;  %11405 = vmatprep.subr.bf16.mxu1 %v15553_v57 }
 0x367   :  { %10381 = vmatpush1.bf16.msra.mxu0 %v15548_v58  ;;  %11406 = vmatpush1.bf16.msra.mxu1 %v15551_v48 }
 0x368   :  { %10382 = vmatprep.subr.bf16.mxu0 %v15556_v61  ;;  %11407 = vmatprep.subr.bf16.mxu1 %v15559_v62 }
 0x36b   :  { %10383 = vmatpush1.bf16.msra.mxu0 %v15554_v44  ;;  %11408 = vmatpush1.bf16.msra.mxu1 %v15557_v0 }
 0x36c   :  { %10384 = vmatprep.subr.bf16.mxu0 %v15562_v1  ;;  %11409 = vmatprep.subr.bf16.mxu1 %v15565_v2 }
 0x36f   :  { %10385 = vmatpush1.bf16.msra.mxu0 %v15560_v59  ;;  %11410 = vmatpush1.bf16.msra.mxu1 %v15563_v3 }
 0x370   :  { %10386 = vmatprep.subr.bf16.mxu0 %v15568_v5  ;;  %11411 = vmatprep.subr.bf16.mxu1 %v15571_v6 }
 0x373   :  { %10387 = vmatpush1.bf16.msra.mxu0 %v15566_v60  ;;  %11412 = vmatpush1.bf16.msra.mxu1 %v15569_v9 }
 0x374   :  { %10388 = vmatprep.subr.bf16.mxu0 %v15574_v10  ;;  %11413 = vmatprep.subr.bf16.mxu1 %v15577_v11 }
 0x377   :  { %10389 = vmatpush1.bf16.msra.mxu0 %v15572_v63  ;;  %11414 = vmatpush1.bf16.msra.mxu1 %v15575_v12 }
 0x378   :  { %10390 = vmatprep.subr.bf16.mxu0 %v15580_v52  ;;  %11415 = vmatprep.subr.bf16.mxu1 %v15583_v15 }
 0x379   :  { %12 = vsyncpa [#allocation3], 0  ;;  %v15584_v4 = vld [vmem:[%s21843_s1 + $0x1be0] ss:$16 sps:$4 sm:$0xff]   ;;  %v15587_v24 = vld [vmem:[%s21843_s1 + $0x1be8] ss:$16 sps:$4 sm:$0xff]   ;;  %v1795_v18 = vcombine.high %v19554_v23, %v19554_v23  ;;  %v1824_v28 = vcombine.high %v19364_v19, %v19364_v19 }
 0x37a   :  { %v15592_v13 = vld [vmem:[%s21843_s1 + $0x1c04] ss:$16 sps:$4 sm:$0xff]   ;;  %v15595_v27 = vld [vmem:[%s21843_s1 + $0x1c0c] ss:$16 sps:$4 sm:$0xff]   ;;  %v15590_v29 = vld [vmem:[%s21843_s1 + $0x1c00] ss:$16 sps:$4 sm:$0xff]  }
 0x37b   :  { %10391 = vmatpush1.bf16.msra.mxu0 %v15578_v17  ;;  %11416 = vmatpush1.bf16.msra.mxu1 %v15581_v8  ;;  %v15593_v14 = vld [vmem:[%s21843_s1 + $0x1c08] ss:$16 sps:$4 sm:$0xff]   ;;  %v15598_v30 = vld [vmem:[%s21843_s1 + $0x1c24] ss:$16 sps:$4 sm:$0xff]   ;;  %v15601_v19 = vld [vmem:[%s21843_s1 + $0x1c2c] ss:$16 sps:$4 sm:$0xff]   ;;  %v19585_v31 = vrot.slane %v1795_v18, %v16851_v49 }
 0x37c   :  { %10392 = vmatprep.subr.bf16.mxu0 %v15586_v20  ;;  %11417 = vmatprep.subr.bf16.mxu1 %v15589_v22  ;;  %v15596_v25 = vld [vmem:[%s21843_s1 + $0x1c20] ss:$16 sps:$4 sm:$0xff]   ;;  %v15599_v32 = vld [vmem:[%s21843_s1 + $0x1c28] ss:$16 sps:$4 sm:$0xff]   ;;  %v15604_v33 = vld [vmem:[%s21843_s1 + $0x1c44] ss:$16 sps:$4 sm:$0xff]  }
 0x37d   :  { %v15607_v26 = vld [vmem:[%s21843_s1 + $0x1c4c] ss:$16 sps:$4 sm:$0xff]   ;;  %v15602_v36 = vld [vmem:[%s21843_s1 + $0x1c40] ss:$16 sps:$4 sm:$0xff]   ;;  %v15605_v37 = vld [vmem:[%s21843_s1 + $0x1c48] ss:$16 sps:$4 sm:$0xff]  }
 0x37e   :  { %v15610_v21 = vld [vmem:[%s21843_s1 + $0x1c64] ss:$16 sps:$4 sm:$0xff]   ;;  %v15613_v39 = vld [vmem:[%s21843_s1 + $0x1c6c] ss:$16 sps:$4 sm:$0xff]   ;;  %v15608_v40 = vld [vmem:[%s21843_s1 + $0x1c60] ss:$16 sps:$4 sm:$0xff]  }
 0x37f   :  { %10393 = vmatpush1.bf16.msra.mxu0 %v15584_v4  ;;  %11418 = vmatpush1.bf16.msra.mxu1 %v15587_v24  ;;  %v15611_v41 = vld [vmem:[%s21843_s1 + $0x1c68] ss:$16 sps:$4 sm:$0xff]   ;;  %v15616_v34 = vld [vmem:[%s21843_s1 + $0x1c84] ss:$16 sps:$4 sm:$0xff]   ;;  %v15619_v43 = vld [vmem:[%s21843_s1 + $0x1c8c] ss:$16 sps:$4 sm:$0xff]  }
 0x380   :  { %10403 = vmatprep.subr.bf16.mxu0 %v15592_v13  ;;  %11428 = vmatprep.subr.bf16.mxu1 %v15595_v27  ;;  %v15614_v45 = vld [vmem:[%s21843_s1 + $0x1c80] ss:$16 sps:$4 sm:$0xff]   ;;  %v15617_v46 = vld [vmem:[%s21843_s1 + $0x1c88] ss:$16 sps:$4 sm:$0xff]   ;;  %v15622_v35 = vld [vmem:[%s21843_s1 + $0x1ca4] ss:$16 sps:$4 sm:$0xff]  }
 0x381   :  { %v15625_v50 = vld [vmem:[%s21843_s1 + $0x1cac] ss:$16 sps:$4 sm:$0xff]   ;;  %v15620_v51 = vld [vmem:[%s21843_s1 + $0x1ca0] ss:$16 sps:$4 sm:$0xff]   ;;  %v15623_v53 = vld [vmem:[%s21843_s1 + $0x1ca8] ss:$16 sps:$4 sm:$0xff]  }
 0x382   :  { %10395 = vmatmul.mubr.bf16.vlgmr.msra.gmra.mrb[0].mxu0 %v1824_v28  ;;  %11420 = vmatmul.mubr.bf16.vlgmr.msra.gmra.mrb[0].mxu1 %v1824_v28  ;;  %v15628_v38 = vld [vmem:[%s21843_s1 + $0x1cc4] ss:$16 sps:$4 sm:$0xff]   ;;  %v15631_v54 = vld [vmem:[%s21843_s1 + $0x1ccc] ss:$16 sps:$4 sm:$0xff]   ;;  %v15626_v55 = vld [vmem:[%s21843_s1 + $0x1cc0] ss:$16 sps:$4 sm:$0xff]  }
 0x383   :  { %10404 = vmatpush1.bf16.msra.mxu0 %v15590_v29  ;;  %11429 = vmatpush1.bf16.msra.mxu1 %v15593_v14  ;;  %v15629_v56 = vld [vmem:[%s21843_s1 + $0x1cc8] ss:$16 sps:$4 sm:$0xff]   ;;  %v15634_v47 = vld [vmem:[%s21843_s1 + $0x1ce4] ss:$16 sps:$4 sm:$0xff]   ;;  %v15637_v57 = vld [vmem:[%s21843_s1 + $0x1cec] ss:$16 sps:$4 sm:$0xff]  }
 0x384   :  { %10405 = vmatprep.subr.bf16.mxu0 %v15598_v30  ;;  %11430 = vmatprep.subr.bf16.mxu1 %v15601_v19  ;;  %v15632_v58 = vld [vmem:[%s21843_s1 + $0x1ce0] ss:$16 sps:$4 sm:$0xff]   ;;  %v15635_v48 = vld [vmem:[%s21843_s1 + $0x1ce8] ss:$16 sps:$4 sm:$0xff]   ;;  %v15640_v61 = vld [vmem:[%s21843_s1 + $0x1d04] ss:$16 sps:$4 sm:$0xff]  }
 0x385   :  { %10435 = vmatprep.mubr.bf16.mxu0 %v19585_v31  ;;  %11460 = vmatprep.mubr.bf16.mxu1 %v19585_v31  ;;  %v15643_v62 = vld [vmem:[%s21843_s1 + $0x1d0c] ss:$16 sps:$4 sm:$0xff]   ;;  %v15638_v44 = vld [vmem:[%s21843_s1 + $0x1d00] ss:$16 sps:$4 sm:$0xff]   ;;  %v15641_v0 = vld [vmem:[%s21843_s1 + $0x1d08] ss:$16 sps:$4 sm:$0xff]  }
 0x386   :  { %v15646_v1 = vld [vmem:[%s21843_s1 + $0x1d24] ss:$16 sps:$4 sm:$0xff]   ;;  %v15649_v2 = vld [vmem:[%s21843_s1 + $0x1d2c] ss:$16 sps:$4 sm:$0xff]   ;;  %v15644_v59 = vld [vmem:[%s21843_s1 + $0x1d20] ss:$16 sps:$4 sm:$0xff]  }
 0x387   :  { %10406 = vmatpush1.bf16.msra.mxu0 %v15596_v25  ;;  %11431 = vmatpush1.bf16.msra.mxu1 %v15599_v32  ;;  %v15647_v3 = vld [vmem:[%s21843_s1 + $0x1d28] ss:$16 sps:$4 sm:$0xff]   ;;  %v15652_v5 = vld [vmem:[%s21843_s1 + $0x1d44] ss:$16 sps:$4 sm:$0xff]   ;;  %v15655_v6 = vld [vmem:[%s21843_s1 + $0x1d4c] ss:$16 sps:$4 sm:$0xff]   ;;  %v19771_v25 = vrot.slane %v19554_v23, %v16851_v49 }
 0x388   :  { %10407 = vmatprep.subr.bf16.mxu0 %v15604_v33  ;;  %11432 = vmatprep.subr.bf16.mxu1 %v15607_v26  ;;  %v15650_v60 = vld [vmem:[%s21843_s1 + $0x1d40] ss:$16 sps:$4 sm:$0xff]   ;;  %v15653_v9 = vld [vmem:[%s21843_s1 + $0x1d48] ss:$16 sps:$4 sm:$0xff]   ;;  %v15658_v10 = vld [vmem:[%s21843_s1 + $0x1d64] ss:$16 sps:$4 sm:$0xff]  }
 0x389   :  { %v15661_v11 = vld [vmem:[%s21843_s1 + $0x1d6c] ss:$16 sps:$4 sm:$0xff]   ;;  %v15656_v63 = vld [vmem:[%s21843_s1 + $0x1d60] ss:$16 sps:$4 sm:$0xff]   ;;  %v15659_v12 = vld [vmem:[%s21843_s1 + $0x1d68] ss:$16 sps:$4 sm:$0xff]  }
 0x38a   :  { %v15664_v52 = vld [vmem:[%s21843_s1 + $0x1d84] ss:$16 sps:$4 sm:$0xff]   ;;  %v15667_v15 = vld [vmem:[%s21843_s1 + $0x1d8c] ss:$16 sps:$4 sm:$0xff]   ;;  %v15662_v7 = vld [vmem:[%s21843_s1 + $0x1d80] ss:$16 sps:$4 sm:$0xff]  }
 0x38b   :  { %10408 = vmatpush1.bf16.msra.mxu0 %v15602_v36  ;;  %11433 = vmatpush1.bf16.msra.mxu1 %v15605_v37  ;;  %v15665_v16 = vld [vmem:[%s21843_s1 + $0x1d88] ss:$16 sps:$4 sm:$0xff]   ;;  %v15670_v17 = vld [vmem:[%s21843_s1 + $0x1da4] ss:$16 sps:$4 sm:$0xff]   ;;  %v15673_v8 = vld [vmem:[%s21843_s1 + $0x1dac] ss:$16 sps:$4 sm:$0xff]   ;;  %v1827_v36 = vcombine.high %v19585_v31, %v19585_v31 }
 0x38c   :  { %10409 = vmatprep.subr.bf16.mxu0 %v15610_v21  ;;  %11434 = vmatprep.subr.bf16.mxu1 %v15613_v39  ;;  %v15668_v20 = vld [vmem:[%s21843_s1 + $0x1da0] ss:$16 sps:$4 sm:$0xff]   ;;  %v15671_v22 = vld [vmem:[%s21843_s1 + $0x1da8] ss:$16 sps:$4 sm:$0xff]   ;;  %v15676_v4 = vld [vmem:[%s21843_s1 + $0x1dc4] ss:$16 sps:$4 sm:$0xff]  }
 0x38d   :  { %v15679_v24 = vld [vmem:[%s21843_s1 + $0x1dcc] ss:$16 sps:$4 sm:$0xff]   ;;  %v15674_v13 = vld [vmem:[%s21843_s1 + $0x1dc0] ss:$16 sps:$4 sm:$0xff]   ;;  %v15677_v27 = vld [vmem:[%s21843_s1 + $0x1dc8] ss:$16 sps:$4 sm:$0xff]  }
 0x38e   :  { %v15682_v18 = vld [vmem:[%s21843_s1 + $0x1de4] ss:$16 sps:$4 sm:$0xff]   ;;  %v15685_v28 = vld [vmem:[%s21843_s1 + $0x1dec] ss:$16 sps:$4 sm:$0xff]   ;;  %v15680_v29 = vld [vmem:[%s21843_s1 + $0x1de0] ss:$16 sps:$4 sm:$0xff]  }
 0x38f   :  { %10410 = vmatpush1.bf16.msra.mxu0 %v15608_v40  ;;  %11435 = vmatpush1.bf16.msra.mxu1 %v15611_v41  ;;  %v15683_v14 = vld [vmem:[%s21843_s1 + $0x1de8] ss:$16 sps:$4 sm:$0xff]   ;;  %v15689_v30 = vld [vmem:[%s21843_s1 + $0x1e04] ss:$16 sps:$4 sm:$0xff]   ;;  %v15692_v19 = vld [vmem:[%s21843_s1 + $0x1e0c] ss:$16 sps:$4 sm:$0xff]  }
 0x390   :  { %10411 = vmatprep.subr.bf16.mxu0 %v15616_v34  ;;  %11436 = vmatprep.subr.bf16.mxu1 %v15619_v43  ;;  %v15687_v32 = vld [vmem:[%s21843_s1 + $0x1e00] ss:$16 sps:$4 sm:$0xff]   ;;  %v15690_v33 = vld [vmem:[%s21843_s1 + $0x1e08] ss:$16 sps:$4 sm:$0xff]   ;;  %v15695_v26 = vld [vmem:[%s21843_s1 + $0x1e24] ss:$16 sps:$4 sm:$0xff]  }
 0x391   :  { %v15698_v23 = vld [vmem:[%s21843_s1 + $0x1e2c] ss:$16 sps:$4 sm:$0xff]   ;;  %v15693_v37 = vld [vmem:[%s21843_s1 + $0x1e20] ss:$16 sps:$4 sm:$0xff]   ;;  %v15696_v21 = vld [vmem:[%s21843_s1 + $0x1e28] ss:$16 sps:$4 sm:$0xff]  }
 0x392   :  { %v15701_v31 = vld [vmem:[%s21843_s1 + $0x1e44] ss:$16 sps:$4 sm:$0xff]   ;;  %v15704_v39 = vld [vmem:[%s21843_s1 + $0x1e4c] ss:$16 sps:$4 sm:$0xff]   ;;  %v15699_v40 = vld [vmem:[%s21843_s1 + $0x1e40] ss:$16 sps:$4 sm:$0xff]  }
 0x393   :  { %10412 = vmatpush1.bf16.msra.mxu0 %v15614_v45  ;;  %11437 = vmatpush1.bf16.msra.mxu1 %v15617_v46  ;;  %v15702_v41 = vld [vmem:[%s21843_s1 + $0x1e48] ss:$16 sps:$4 sm:$0xff]   ;;  %v15707_v34 = vld [vmem:[%s21843_s1 + $0x1e64] ss:$16 sps:$4 sm:$0xff]   ;;  %v15710_v43 = vld [vmem:[%s21843_s1 + $0x1e6c] ss:$16 sps:$4 sm:$0xff]  }
 0x394   :  { %10413 = vmatprep.subr.bf16.mxu0 %v15622_v35  ;;  %11438 = vmatprep.subr.bf16.mxu1 %v15625_v50  ;;  %v15705_v45 = vld [vmem:[%s21843_s1 + $0x1e60] ss:$16 sps:$4 sm:$0xff]   ;;  %v15708_v46 = vld [vmem:[%s21843_s1 + $0x1e68] ss:$16 sps:$4 sm:$0xff]   ;;  %v15713_v35 = vld [vmem:[%s21843_s1 + $0x1e84] ss:$16 sps:$4 sm:$0xff]  }
 0x395   :  { %v15716_v50 = vld [vmem:[%s21843_s1 + $0x1e8c] ss:$16 sps:$4 sm:$0xff]   ;;  %vm16674_vm0 = vmmov 0   ;;  %s16675_s12 = smov [#allocation2]  }
 0x396   :  { %s12350_s13 = sshll.u32 %s16675_s12, 4  ;;  %s12351_s13 = int_to_ptr.vmem [resolvable:$true] %s12350_s13 }
 0x397   :  { %10414 = vmatpush1.bf16.msra.mxu0 %v15620_v51  ;;  %11439 = vmatpush1.bf16.msra.mxu1 %v15623_v53  ;;  %v15711_v51 = vld [vmem:[%s21843_s1 + $0x1e80] ss:$16 sps:$4 sm:$0xff]   ;;  %v15714_v53 = vld [vmem:[%s21843_s1 + $0x1e88] ss:$16 sps:$4 sm:$0xff]   ;;  %p16652_p1 = scmp.lt.s32.totalorder %s12351_s13, %s12351_s13 }
 0x398   :  { %10415 = vmatprep.subr.bf16.mxu0 %v15628_v38  ;;  %11440 = vmatprep.subr.bf16.mxu1 %v15631_v54  ;;  %v15719_v38 = vld [vmem:[%s21843_s1 + $0x1ea4] ss:$16 sps:$4 sm:$0xff]   ;;  %v15722_v54 = vld [vmem:[%s21843_s1 + $0x1eac] ss:$16 sps:$4 sm:$0xff]  }
 0x39b   :  { %10416 = vmatpush1.bf16.msra.mxu0 %v15626_v55  ;;  %11441 = vmatpush1.bf16.msra.mxu1 %v15629_v56  ;;  %v15717_v55 = vld [vmem:[%s21843_s1 + $0x1ea0] ss:$16 sps:$4 sm:$0xff]   ;;  %v15720_v56 = vld [vmem:[%s21843_s1 + $0x1ea8] ss:$16 sps:$4 sm:$0xff]  }
 0x39c   :  { %10417 = vmatprep.subr.bf16.mxu0 %v15634_v47  ;;  %11442 = vmatprep.subr.bf16.mxu1 %v15637_v57  ;;  %v15725_v47 = vld [vmem:[%s21843_s1 + $0x1ec4] ss:$16 sps:$4 sm:$0xff]   ;;  %v15728_v57 = vld [vmem:[%s21843_s1 + $0x1ecc] ss:$16 sps:$4 sm:$0xff]  }
 0x39f   :  { %10418 = vmatpush1.bf16.msra.mxu0 %v15632_v58  ;;  %11443 = vmatpush1.bf16.msra.mxu1 %v15635_v48  ;;  %v15723_v58 = vld [vmem:[%s21843_s1 + $0x1ec0] ss:$16 sps:$4 sm:$0xff]   ;;  %v15726_v48 = vld [vmem:[%s21843_s1 + $0x1ec8] ss:$16 sps:$4 sm:$0xff]  }
 0x3a0   :  { %10419 = vmatprep.subr.bf16.mxu0 %v15640_v61  ;;  %11444 = vmatprep.subr.bf16.mxu1 %v15643_v62  ;;  %v15731_v61 = vld [vmem:[%s21843_s1 + $0x1ee4] ss:$16 sps:$4 sm:$0xff]   ;;  %v15734_v62 = vld [vmem:[%s21843_s1 + $0x1eec] ss:$16 sps:$4 sm:$0xff]  }
 0x3a3   :  { %10420 = vmatpush1.bf16.msra.mxu0 %v15638_v44  ;;  %11445 = vmatpush1.bf16.msra.mxu1 %v15641_v0  ;;  %v15729_v44 = vld [vmem:[%s21843_s1 + $0x1ee0] ss:$16 sps:$4 sm:$0xff]   ;;  %v15732_v0 = vld [vmem:[%s21843_s1 + $0x1ee8] ss:$16 sps:$4 sm:$0xff]  }
 0x3a4   :  { %10421 = vmatprep.subr.bf16.mxu0 %v15646_v1  ;;  %11446 = vmatprep.subr.bf16.mxu1 %v15649_v2  ;;  %v15737_v1 = vld [vmem:[%s21843_s1 + $0x1f04] ss:$16 sps:$4 sm:$0xff]   ;;  %v15740_v2 = vld [vmem:[%s21843_s1 + $0x1f0c] ss:$16 sps:$4 sm:$0xff]  }
 0x3a7   :  { %10422 = vmatpush1.bf16.msra.mxu0 %v15644_v59  ;;  %11447 = vmatpush1.bf16.msra.mxu1 %v15647_v3  ;;  %v15735_v59 = vld [vmem:[%s21843_s1 + $0x1f00] ss:$16 sps:$4 sm:$0xff]   ;;  %v15738_v3 = vld [vmem:[%s21843_s1 + $0x1f08] ss:$16 sps:$4 sm:$0xff]  }
 0x3a8   :  { %10423 = vmatprep.subr.bf16.mxu0 %v15652_v5  ;;  %11448 = vmatprep.subr.bf16.mxu1 %v15655_v6  ;;  %v15743_v5 = vld [vmem:[%s21843_s1 + $0x1f24] ss:$16 sps:$4 sm:$0xff]   ;;  %v15746_v6 = vld [vmem:[%s21843_s1 + $0x1f2c] ss:$16 sps:$4 sm:$0xff]  }
 0x3ab   :  { %10424 = vmatpush1.bf16.msra.mxu0 %v15650_v60  ;;  %11449 = vmatpush1.bf16.msra.mxu1 %v15653_v9  ;;  %v15741_v60 = vld [vmem:[%s21843_s1 + $0x1f20] ss:$16 sps:$4 sm:$0xff]   ;;  %v15744_v9 = vld [vmem:[%s21843_s1 + $0x1f28] ss:$16 sps:$4 sm:$0xff]  }
 0x3ac   :  { %10425 = vmatprep.subr.bf16.mxu0 %v15658_v10  ;;  %11450 = vmatprep.subr.bf16.mxu1 %v15661_v11  ;;  %v15749_v10 = vld [vmem:[%s21843_s1 + $0x1f44] ss:$16 sps:$4 sm:$0xff]   ;;  %v15752_v11 = vld [vmem:[%s21843_s1 + $0x1f4c] ss:$16 sps:$4 sm:$0xff]  }
 0x3af   :  { %10426 = vmatpush1.bf16.msra.mxu0 %v15656_v63  ;;  %11451 = vmatpush1.bf16.msra.mxu1 %v15659_v12  ;;  %v15747_v63 = vld [vmem:[%s21843_s1 + $0x1f40] ss:$16 sps:$4 sm:$0xff]   ;;  %v15750_v12 = vld [vmem:[%s21843_s1 + $0x1f48] ss:$16 sps:$4 sm:$0xff]  }
 0x3b0   :  { %10427 = vmatprep.subr.bf16.mxu0 %v15664_v52  ;;  %11452 = vmatprep.subr.bf16.mxu1 %v15667_v15  ;;  %v15755_v52 = vld [vmem:[%s21843_s1 + $0x1f64] ss:$16 sps:$4 sm:$0xff]   ;;  %v15758_v15 = vld [vmem:[%s21843_s1 + $0x1f6c] ss:$16 sps:$4 sm:$0xff]  }
 0x3b3   :  { %10428 = vmatpush1.bf16.msra.mxu0 %v15662_v7  ;;  %11453 = vmatpush1.bf16.msra.mxu1 %v15665_v16  ;;  %v15753_v7 = vld [vmem:[%s21843_s1 + $0x1f60] ss:$16 sps:$4 sm:$0xff]   ;;  %v15756_v16 = vld [vmem:[%s21843_s1 + $0x1f68] ss:$16 sps:$4 sm:$0xff]  }
 0x3b4   :  { %10429 = vmatprep.subr.bf16.mxu0 %v15670_v17  ;;  %11454 = vmatprep.subr.bf16.mxu1 %v15673_v8  ;;  %v15761_v17 = vld [vmem:[%s21843_s1 + $0x1f84] ss:$16 sps:$4 sm:$0xff]   ;;  %v15764_v8 = vld [vmem:[%s21843_s1 + $0x1f8c] ss:$16 sps:$4 sm:$0xff]  }
 0x3b7   :  { %10430 = vmatpush1.bf16.msra.mxu0 %v15668_v20  ;;  %11455 = vmatpush1.bf16.msra.mxu1 %v15671_v22  ;;  %v15759_v20 = vld [vmem:[%s21843_s1 + $0x1f80] ss:$16 sps:$4 sm:$0xff]   ;;  %v15762_v22 = vld [vmem:[%s21843_s1 + $0x1f88] ss:$16 sps:$4 sm:$0xff]  }
 0x3b8   :  { %10431 = vmatprep.subr.bf16.mxu0 %v15676_v4  ;;  %11456 = vmatprep.subr.bf16.mxu1 %v15679_v24  ;;  %v15767_v4 = vld [vmem:[%s21843_s1 + $0x1fa4] ss:$16 sps:$4 sm:$0xff]   ;;  %v15770_v24 = vld [vmem:[%s21843_s1 + $0x1fac] ss:$16 sps:$4 sm:$0xff]  }
 0x3bb   :  { %10432 = vmatpush1.bf16.msra.mxu0 %v15674_v13  ;;  %11457 = vmatpush1.bf16.msra.mxu1 %v15677_v27  ;;  %v15765_v13 = vld [vmem:[%s21843_s1 + $0x1fa0] ss:$16 sps:$4 sm:$0xff]   ;;  %v15768_v27 = vld [vmem:[%s21843_s1 + $0x1fa8] ss:$16 sps:$4 sm:$0xff]  }
 0x3bc   :  { %10433 = vmatprep.subr.bf16.mxu0 %v15682_v18  ;;  %11458 = vmatprep.subr.bf16.mxu1 %v15685_v28  ;;  %v15773_v18 = vld [vmem:[%s21843_s1 + $0x1fc4] ss:$16 sps:$4 sm:$0xff]   ;;  %v15776_v28 = vld [vmem:[%s21843_s1 + $0x1fcc] ss:$16 sps:$4 sm:$0xff]  }
 0x3bf   :  { %10434 = vmatpush1.bf16.msra.mxu0 %v15680_v29  ;;  %11459 = vmatpush1.bf16.msra.mxu1 %v15683_v14  ;;  %v19948_v29 = vld [vmem:[%s21842_s0 + $0x20] sm:$0xff] }
 0x3c0   :  { %10444 = vmatprep.subr.bf16.mxu0 %v15689_v30  ;;  %11469 = vmatprep.subr.bf16.mxu1 %v15692_v19  ;;  %v15771_v14 = vld [vmem:[%s21843_s1 + $0x1fc0] ss:$16 sps:$4 sm:$0xff]   ;;  %v15774_v30 = vld [vmem:[%s21843_s1 + $0x1fc8] ss:$16 sps:$4 sm:$0xff]   ;;  %v15779_v19 = vld [vmem:[%s21843_s1 + $0x1fe4] ss:$16 sps:$4 sm:$0xff]  }
 0x3c2   :  { %10436 = vmatmul.mubr.bf16.vlgmr.msra.gmra.mrb[0].mxu0 %v19771_v25  ;;  %11461 = vmatmul.mubr.bf16.vlgmr.msra.gmra.mrb[0].mxu1 %v19771_v25 }
 0x3c3   :  { %10445 = vmatpush1.bf16.msra.mxu0 %v15687_v32  ;;  %11470 = vmatpush1.bf16.msra.mxu1 %v15690_v33  ;;  %v15782_v32 = vld [vmem:[%s21843_s1 + $0x1fec] ss:$16 sps:$4 sm:$0xff]   ;;  %v19964_v33 = vrot.slane %v19948_v29, %v16851_v49 }
 0x3c4   :  { %10446 = vmatprep.subr.bf16.mxu0 %v15695_v26  ;;  %11471 = vmatprep.subr.bf16.mxu1 %v15698_v23  ;;  %v15777_v26 = vld [vmem:[%s21843_s1 + $0x1fe0] ss:$16 sps:$4 sm:$0xff]   ;;  %v15780_v23 = vld [vmem:[%s21843_s1 + $0x1fe8] ss:$16 sps:$4 sm:$0xff]  }
 0x3c5   :  { %10476 = vmatprep.mubr.bf16.mxu0 %v1827_v36  ;;  %11501 = vmatprep.mubr.bf16.mxu1 %v1827_v36  ;;  %v15785_v36 = vld [vmem:[%s21843_s1 + $0x2004] ss:$16 sps:$4 sm:$0xff]  }
 0x3c7   :  { %10447 = vmatpush1.bf16.msra.mxu0 %v15693_v37  ;;  %11472 = vmatpush1.bf16.msra.mxu1 %v15696_v21  ;;  %v15788_v37 = vld [vmem:[%s21843_s1 + $0x200c] ss:$16 sps:$4 sm:$0xff]   ;;  %v1843_v21 = vcombine.high %v19964_v33, %v19964_v33 }
 0x3c8   :  { %10448 = vmatprep.subr.bf16.mxu0 %v15701_v31  ;;  %11473 = vmatprep.subr.bf16.mxu1 %v15704_v39  ;;  %v1825_v31 = vcombine.high %v19771_v25, %v19771_v25  ;;  %v15783_v39 = vld [vmem:[%s21843_s1 + $0x2000] ss:$16 sps:$4 sm:$0xff]   ;;  %v15794_v25 = vld [vmem:[%s21843_s1 + $0x202c] ss:$16 sps:$4 sm:$0xff]  }
 0x3cb   :  { %10449 = vmatpush1.bf16.msra.mxu0 %v15699_v40  ;;  %11474 = vmatpush1.bf16.msra.mxu1 %v15702_v41  ;;  %v15786_v40 = vld [vmem:[%s21843_s1 + $0x2008] ss:$16 sps:$4 sm:$0xff]   ;;  %v15791_v41 = vld [vmem:[%s21843_s1 + $0x2024] ss:$16 sps:$4 sm:$0xff]  }
 0x3cc   :  { %10450 = vmatprep.subr.bf16.mxu0 %v15707_v34  ;;  %11475 = vmatprep.subr.bf16.mxu1 %v15710_v43  ;;  %v19995_v34 = vrot.slane %v1843_v21, %v16851_v49  ;;  %v15789_v43 = vld [vmem:[%s21843_s1 + $0x2020] ss:$16 sps:$4 sm:$0xff]   ;;  %v15870_v21 = vld [vmem:[%s21843_s1 + $0x21c8] ss:$16 sps:$4 sm:$0xff]  }
 0x3cf   :  { %10451 = vmatpush1.bf16.msra.mxu0 %v15705_v45  ;;  %11476 = vmatpush1.bf16.msra.mxu1 %v15708_v46  ;;  %v15792_v45 = vld [vmem:[%s21843_s1 + $0x2028] ss:$16 sps:$4 sm:$0xff]   ;;  %v15797_v46 = vld [vmem:[%s21843_s1 + $0x2044] ss:$16 sps:$4 sm:$0xff]  }
 0x3d0   :  { %10452 = vmatprep.subr.bf16.mxu0 %v15713_v35  ;;  %11477 = vmatprep.subr.bf16.mxu1 %v15716_v50  ;;  %v15800_v35 = vld [vmem:[%s21843_s1 + $0x204c] ss:$16 sps:$4 sm:$0xff]   ;;  %v15795_v50 = vld [vmem:[%s21843_s1 + $0x2040] ss:$16 sps:$4 sm:$0xff]  }
 0x3d3   :  { %10453 = vmatpush1.bf16.msra.mxu0 %v15711_v51  ;;  %11478 = vmatpush1.bf16.msra.mxu1 %v15714_v53  ;;  %v15798_v51 = vld [vmem:[%s21843_s1 + $0x2048] ss:$16 sps:$4 sm:$0xff]   ;;  %v15803_v53 = vld [vmem:[%s21843_s1 + $0x2064] ss:$16 sps:$4 sm:$0xff]  }
 0x3d4   :  { %10454 = vmatprep.subr.bf16.mxu0 %v15719_v38  ;;  %11479 = vmatprep.subr.bf16.mxu1 %v15722_v54  ;;  %v15806_v38 = vld [vmem:[%s21843_s1 + $0x206c] ss:$16 sps:$4 sm:$0xff]   ;;  %v15801_v54 = vld [vmem:[%s21843_s1 + $0x2060] ss:$16 sps:$4 sm:$0xff]  }
 0x3d7   :  { %10455 = vmatpush1.bf16.msra.mxu0 %v15717_v55  ;;  %11480 = vmatpush1.bf16.msra.mxu1 %v15720_v56  ;;  %v15804_v55 = vld [vmem:[%s21843_s1 + $0x2068] ss:$16 sps:$4 sm:$0xff]   ;;  %v15809_v56 = vld [vmem:[%s21843_s1 + $0x2084] ss:$16 sps:$4 sm:$0xff]  }
 0x3d8   :  { %10456 = vmatprep.subr.bf16.mxu0 %v15725_v47  ;;  %11481 = vmatprep.subr.bf16.mxu1 %v15728_v57  ;;  %v15812_v47 = vld [vmem:[%s21843_s1 + $0x208c] ss:$16 sps:$4 sm:$0xff]   ;;  %v15807_v57 = vld [vmem:[%s21843_s1 + $0x2080] ss:$16 sps:$4 sm:$0xff]  }
 0x3db   :  { %10457 = vmatpush1.bf16.msra.mxu0 %v15723_v58  ;;  %11482 = vmatpush1.bf16.msra.mxu1 %v15726_v48  ;;  %v15810_v58 = vld [vmem:[%s21843_s1 + $0x2088] ss:$16 sps:$4 sm:$0xff]   ;;  %v15815_v48 = vld [vmem:[%s21843_s1 + $0x20a4] ss:$16 sps:$4 sm:$0xff]  }
 0x3dc   :  { %10458 = vmatprep.subr.bf16.mxu0 %v15731_v61  ;;  %11483 = vmatprep.subr.bf16.mxu1 %v15734_v62  ;;  %v15818_v61 = vld [vmem:[%s21843_s1 + $0x20ac] ss:$16 sps:$4 sm:$0xff]   ;;  %v15813_v62 = vld [vmem:[%s21843_s1 + $0x20a0] ss:$16 sps:$4 sm:$0xff]  }
 0x3df   :  { %10459 = vmatpush1.bf16.msra.mxu0 %v15729_v44  ;;  %11484 = vmatpush1.bf16.msra.mxu1 %v15732_v0  ;;  %v15816_v44 = vld [vmem:[%s21843_s1 + $0x20a8] ss:$16 sps:$4 sm:$0xff]   ;;  %v15821_v0 = vld [vmem:[%s21843_s1 + $0x20c4] ss:$16 sps:$4 sm:$0xff]  }
 0x3e0   :  { %10460 = vmatprep.subr.bf16.mxu0 %v15737_v1  ;;  %11485 = vmatprep.subr.bf16.mxu1 %v15740_v2  ;;  %v15824_v1 = vld [vmem:[%s21843_s1 + $0x20cc] ss:$16 sps:$4 sm:$0xff]   ;;  %v15819_v2 = vld [vmem:[%s21843_s1 + $0x20c0] ss:$16 sps:$4 sm:$0xff]  }
 0x3e3   :  { %10461 = vmatpush1.bf16.msra.mxu0 %v15735_v59  ;;  %11486 = vmatpush1.bf16.msra.mxu1 %v15738_v3  ;;  %v15822_v59 = vld [vmem:[%s21843_s1 + $0x20c8] ss:$16 sps:$4 sm:$0xff]   ;;  %v15827_v3 = vld [vmem:[%s21843_s1 + $0x20e4] ss:$16 sps:$4 sm:$0xff]  }
 0x3e4   :  { %10462 = vmatprep.subr.bf16.mxu0 %v15743_v5  ;;  %11487 = vmatprep.subr.bf16.mxu1 %v15746_v6  ;;  %v15830_v5 = vld [vmem:[%s21843_s1 + $0x20ec] ss:$16 sps:$4 sm:$0xff]   ;;  %v15825_v6 = vld [vmem:[%s21843_s1 + $0x20e0] ss:$16 sps:$4 sm:$0xff]  }
 0x3e7   :  { %10463 = vmatpush1.bf16.msra.mxu0 %v15741_v60  ;;  %11488 = vmatpush1.bf16.msra.mxu1 %v15744_v9  ;;  %v15828_v60 = vld [vmem:[%s21843_s1 + $0x20e8] ss:$16 sps:$4 sm:$0xff]   ;;  %v15833_v9 = vld [vmem:[%s21843_s1 + $0x2104] ss:$16 sps:$4 sm:$0xff]  }
 0x3e8   :  { %10464 = vmatprep.subr.bf16.mxu0 %v15749_v10  ;;  %11489 = vmatprep.subr.bf16.mxu1 %v15752_v11  ;;  %v15836_v10 = vld [vmem:[%s21843_s1 + $0x210c] ss:$16 sps:$4 sm:$0xff]   ;;  %v15831_v11 = vld [vmem:[%s21843_s1 + $0x2100] ss:$16 sps:$4 sm:$0xff]  }
 0x3eb   :  { %10465 = vmatpush1.bf16.msra.mxu0 %v15747_v63  ;;  %11490 = vmatpush1.bf16.msra.mxu1 %v15750_v12  ;;  %v15834_v63 = vld [vmem:[%s21843_s1 + $0x2108] ss:$16 sps:$4 sm:$0xff]   ;;  %v15839_v12 = vld [vmem:[%s21843_s1 + $0x2124] ss:$16 sps:$4 sm:$0xff]  }
 0x3ec   :  { %10466 = vmatprep.subr.bf16.mxu0 %v15755_v52  ;;  %11491 = vmatprep.subr.bf16.mxu1 %v15758_v15  ;;  %v15842_v52 = vld [vmem:[%s21843_s1 + $0x212c] ss:$16 sps:$4 sm:$0xff]   ;;  %v15837_v15 = vld [vmem:[%s21843_s1 + $0x2120] ss:$16 sps:$4 sm:$0xff]  }
 0x3ef   :  { %10467 = vmatpush1.bf16.msra.mxu0 %v15753_v7  ;;  %11492 = vmatpush1.bf16.msra.mxu1 %v15756_v16  ;;  %v15840_v7 = vld [vmem:[%s21843_s1 + $0x2128] ss:$16 sps:$4 sm:$0xff]   ;;  %v15845_v16 = vld [vmem:[%s21843_s1 + $0x2144] ss:$16 sps:$4 sm:$0xff]  }
 0x3f0   :  { %10468 = vmatprep.subr.bf16.mxu0 %v15761_v17  ;;  %11493 = vmatprep.subr.bf16.mxu1 %v15764_v8  ;;  %v15848_v17 = vld [vmem:[%s21843_s1 + $0x214c] ss:$16 sps:$4 sm:$0xff]   ;;  %v15843_v8 = vld [vmem:[%s21843_s1 + $0x2140] ss:$16 sps:$4 sm:$0xff]  }
 0x3f3   :  { %10469 = vmatpush1.bf16.msra.mxu0 %v15759_v20  ;;  %11494 = vmatpush1.bf16.msra.mxu1 %v15762_v22  ;;  %v15846_v20 = vld [vmem:[%s21843_s1 + $0x2148] ss:$16 sps:$4 sm:$0xff]   ;;  %v15851_v22 = vld [vmem:[%s21843_s1 + $0x2164] ss:$16 sps:$4 sm:$0xff]  }
 0x3f4   :  { %10470 = vmatprep.subr.bf16.mxu0 %v15767_v4  ;;  %11495 = vmatprep.subr.bf16.mxu1 %v15770_v24  ;;  %v15854_v4 = vld [vmem:[%s21843_s1 + $0x216c] ss:$16 sps:$4 sm:$0xff]   ;;  %v15849_v24 = vld [vmem:[%s21843_s1 + $0x2160] ss:$16 sps:$4 sm:$0xff]  }
 0x3f7   :  { %10471 = vmatpush1.bf16.msra.mxu0 %v15765_v13  ;;  %11496 = vmatpush1.bf16.msra.mxu1 %v15768_v27  ;;  %v15852_v13 = vld [vmem:[%s21843_s1 + $0x2168] ss:$16 sps:$4 sm:$0xff]   ;;  %v15857_v27 = vld [vmem:[%s21843_s1 + $0x2184] ss:$16 sps:$4 sm:$0xff]  }
 0x3f8   :  { %10472 = vmatprep.subr.bf16.mxu0 %v15773_v18  ;;  %11497 = vmatprep.subr.bf16.mxu1 %v15776_v28  ;;  %v15860_v18 = vld [vmem:[%s21843_s1 + $0x218c] ss:$16 sps:$4 sm:$0xff]   ;;  %v15855_v28 = vld [vmem:[%s21843_s1 + $0x2180] ss:$16 sps:$4 sm:$0xff]  }
 0x3fb   :  { %10473 = vmatpush1.bf16.msra.mxu0 %v15771_v14  ;;  %11498 = vmatpush1.bf16.msra.mxu1 %v15774_v30  ;;  %v15858_v14 = vld [vmem:[%s21843_s1 + $0x2188] ss:$16 sps:$4 sm:$0xff]   ;;  %v15863_v30 = vld [vmem:[%s21843_s1 + $0x21a4] ss:$16 sps:$4 sm:$0xff]  }
 0x3fc   :  { %10474 = vmatprep.subr.bf16.mxu0 %v15779_v19  ;;  %11499 = vmatprep.subr.bf16.mxu1 %v15782_v32  ;;  %v15866_v19 = vld [vmem:[%s21843_s1 + $0x21ac] ss:$16 sps:$4 sm:$0xff]   ;;  %v15861_v32 = vld [vmem:[%s21843_s1 + $0x21a0] ss:$16 sps:$4 sm:$0xff]  }
 0x3ff   :  { %10475 = vmatpush1.bf16.msra.mxu0 %v15777_v26  ;;  %11500 = vmatpush1.bf16.msra.mxu1 %v15780_v23  ;;  %v15864_v26 = vld [vmem:[%s21843_s1 + $0x21a8] ss:$16 sps:$4 sm:$0xff]   ;;  %v15869_v23 = vld [vmem:[%s21843_s1 + $0x21c4] ss:$16 sps:$4 sm:$0xff]  }
 0x400   :  { %10485 = vmatprep.subr.bf16.mxu0 %v15785_v36  ;;  %11510 = vmatprep.subr.bf16.mxu1 %v15788_v37  ;;  %v15872_v36 = vld [vmem:[%s21843_s1 + $0x21cc] ss:$16 sps:$4 sm:$0xff]   ;;  %v15867_v37 = vld [vmem:[%s21843_s1 + $0x21c0] ss:$16 sps:$4 sm:$0xff]  }
 0x402   :  { %10477 = vmatmul.mubr.bf16.vlgmr.msra.gmra.mrb[0].mxu0 %v1825_v31  ;;  %11502 = vmatmul.mubr.bf16.vlgmr.msra.gmra.mrb[0].mxu1 %v1825_v31  ;;  %v15875_v31 = vld [vmem:[%s21843_s1 + $0x21e4] ss:$16 sps:$4 sm:$0xff]  }
 0x403   :  { %10486 = vmatpush1.bf16.msra.mxu0 %v15783_v39  ;;  %11511 = vmatpush1.bf16.msra.mxu1 %v15786_v40  ;;  %v15878_v39 = vld [vmem:[%s21843_s1 + $0x21ec] ss:$16 sps:$4 sm:$0xff]   ;;  %v15873_v40 = vld [vmem:[%s21843_s1 + $0x21e0] ss:$16 sps:$4 sm:$0xff]  }
 0x404   :  { %10487 = vmatprep.subr.bf16.mxu0 %v15791_v41  ;;  %11512 = vmatprep.subr.bf16.mxu1 %v15794_v25  ;;  %v15876_v41 = vld [vmem:[%s21843_s1 + $0x21e8] ss:$16 sps:$4 sm:$0xff]   ;;  %v15881_v25 = vld [vmem:[%s21843_s1 + $0x2204] ss:$16 sps:$4 sm:$0xff]  }
 0x405   :  { %10517 = vmatprep.mubr.bf16.mxu0 %v19995_v34  ;;  %11542 = vmatprep.mubr.bf16.mxu1 %v19995_v34 }
 0x407   :  { %10488 = vmatpush1.bf16.msra.mxu0 %v15789_v43  ;;  %11513 = vmatpush1.bf16.msra.mxu1 %v15792_v45  ;;  %v15884_v43 = vld [vmem:[%s21843_s1 + $0x220c] ss:$16 sps:$4 sm:$0xff]   ;;  %v20181_v45 = vrot.slane %v19964_v33, %v16851_v49 }
 0x408   :  { %10489 = vmatprep.subr.bf16.mxu0 %v15797_v46  ;;  %11514 = vmatprep.subr.bf16.mxu1 %v15800_v35  ;;  %v15879_v46 = vld [vmem:[%s21843_s1 + $0x2200] ss:$16 sps:$4 sm:$0xff]   ;;  %v15882_v35 = vld [vmem:[%s21843_s1 + $0x2208] ss:$16 sps:$4 sm:$0xff]   ;;  %v15890_v33 = vld [vmem:[%s21843_s1 + $0x222c] ss:$16 sps:$4 sm:$0xff]  }
 0x40b   :  { %10490 = vmatpush1.bf16.msra.mxu0 %v15795_v50  ;;  %11515 = vmatpush1.bf16.msra.mxu1 %v15798_v51  ;;  %v15887_v50 = vld [vmem:[%s21843_s1 + $0x2224] ss:$16 sps:$4 sm:$0xff]   ;;  %v1875_v51 = vcombine.high %v19995_v34, %v19995_v34 }
 0x40c   :  { %10491 = vmatprep.subr.bf16.mxu0 %v15803_v53  ;;  %11516 = vmatprep.subr.bf16.mxu1 %v15806_v38  ;;  %v15885_v53 = vld [vmem:[%s21843_s1 + $0x2220] ss:$16 sps:$4 sm:$0xff]   ;;  %v15888_v38 = vld [vmem:[%s21843_s1 + $0x2228] ss:$16 sps:$4 sm:$0xff]   ;;  %v15893_v34 = vld [vmem:[%s21843_s1 + $0x2244] ss:$16 sps:$4 sm:$0xff]  }
 0x40f   :  { %10492 = vmatpush1.bf16.msra.mxu0 %v15801_v54  ;;  %11517 = vmatpush1.bf16.msra.mxu1 %v15804_v55  ;;  %v15896_v54 = vld [vmem:[%s21843_s1 + $0x224c] ss:$16 sps:$4 sm:$0xff]   ;;  %v15891_v55 = vld [vmem:[%s21843_s1 + $0x2240] ss:$16 sps:$4 sm:$0xff]  }
 0x410   :  { %10493 = vmatprep.subr.bf16.mxu0 %v15809_v56  ;;  %11518 = vmatprep.subr.bf16.mxu1 %v15812_v47  ;;  %v15894_v56 = vld [vmem:[%s21843_s1 + $0x2248] ss:$16 sps:$4 sm:$0xff]   ;;  %v15899_v47 = vld [vmem:[%s21843_s1 + $0x2264] ss:$16 sps:$4 sm:$0xff]  }
 0x413   :  { %10494 = vmatpush1.bf16.msra.mxu0 %v15807_v57  ;;  %11519 = vmatpush1.bf16.msra.mxu1 %v15810_v58  ;;  %v15902_v57 = vld [vmem:[%s21843_s1 + $0x226c] ss:$16 sps:$4 sm:$0xff]   ;;  %v15897_v58 = vld [vmem:[%s21843_s1 + $0x2260] ss:$16 sps:$4 sm:$0xff]  }
 0x414   :  { %10495 = vmatprep.subr.bf16.mxu0 %v15815_v48  ;;  %11520 = vmatprep.subr.bf16.mxu1 %v15818_v61  ;;  %v15900_v48 = vld [vmem:[%s21843_s1 + $0x2268] ss:$16 sps:$4 sm:$0xff]   ;;  %v15905_v61 = vld [vmem:[%s21843_s1 + $0x2284] ss:$16 sps:$4 sm:$0xff]  }
 0x417   :  { %10496 = vmatpush1.bf16.msra.mxu0 %v15813_v62  ;;  %11521 = vmatpush1.bf16.msra.mxu1 %v15816_v44  ;;  %v15908_v62 = vld [vmem:[%s21843_s1 + $0x228c] ss:$16 sps:$4 sm:$0xff]   ;;  %v15903_v44 = vld [vmem:[%s21843_s1 + $0x2280] ss:$16 sps:$4 sm:$0xff]  }
 0x418   :  { %10497 = vmatprep.subr.bf16.mxu0 %v15821_v0  ;;  %11522 = vmatprep.subr.bf16.mxu1 %v15824_v1  ;;  %v15906_v0 = vld [vmem:[%s21843_s1 + $0x2288] ss:$16 sps:$4 sm:$0xff]   ;;  %v15911_v1 = vld [vmem:[%s21843_s1 + $0x22a4] ss:$16 sps:$4 sm:$0xff]  }
 0x41b   :  { %10498 = vmatpush1.bf16.msra.mxu0 %v15819_v2  ;;  %11523 = vmatpush1.bf16.msra.mxu1 %v15822_v59  ;;  %v15914_v2 = vld [vmem:[%s21843_s1 + $0x22ac] ss:$16 sps:$4 sm:$0xff]   ;;  %v15909_v59 = vld [vmem:[%s21843_s1 + $0x22a0] ss:$16 sps:$4 sm:$0xff]  }
 0x41c   :  { %10499 = vmatprep.subr.bf16.mxu0 %v15827_v3  ;;  %11524 = vmatprep.subr.bf16.mxu1 %v15830_v5  ;;  %v15912_v3 = vld [vmem:[%s21843_s1 + $0x22a8] ss:$16 sps:$4 sm:$0xff]   ;;  %v15917_v5 = vld [vmem:[%s21843_s1 + $0x22c4] ss:$16 sps:$4 sm:$0xff]  }
 0x41f   :  { %10500 = vmatpush1.bf16.msra.mxu0 %v15825_v6  ;;  %11525 = vmatpush1.bf16.msra.mxu1 %v15828_v60  ;;  %v15920_v6 = vld [vmem:[%s21843_s1 + $0x22cc] ss:$16 sps:$4 sm:$0xff]   ;;  %v15915_v60 = vld [vmem:[%s21843_s1 + $0x22c0] ss:$16 sps:$4 sm:$0xff]  }
 0x420   :  { %10501 = vmatprep.subr.bf16.mxu0 %v15833_v9  ;;  %11526 = vmatprep.subr.bf16.mxu1 %v15836_v10  ;;  %v15918_v9 = vld [vmem:[%s21843_s1 + $0x22c8] ss:$16 sps:$4 sm:$0xff]   ;;  %v15923_v10 = vld [vmem:[%s21843_s1 + $0x22e4] ss:$16 sps:$4 sm:$0xff]  }
 0x423   :  { %10502 = vmatpush1.bf16.msra.mxu0 %v15831_v11  ;;  %11527 = vmatpush1.bf16.msra.mxu1 %v15834_v63  ;;  %v15926_v11 = vld [vmem:[%s21843_s1 + $0x22ec] ss:$16 sps:$4 sm:$0xff]   ;;  %v15921_v63 = vld [vmem:[%s21843_s1 + $0x22e0] ss:$16 sps:$4 sm:$0xff]  }
 0x424   :  { %10503 = vmatprep.subr.bf16.mxu0 %v15839_v12  ;;  %11528 = vmatprep.subr.bf16.mxu1 %v15842_v52  ;;  %v15924_v12 = vld [vmem:[%s21843_s1 + $0x22e8] ss:$16 sps:$4 sm:$0xff]   ;;  %v15929_v52 = vld [vmem:[%s21843_s1 + $0x2304] ss:$16 sps:$4 sm:$0xff]  }
 0x427   :  { %10504 = vmatpush1.bf16.msra.mxu0 %v15837_v15  ;;  %11529 = vmatpush1.bf16.msra.mxu1 %v15840_v7  ;;  %v15932_v15 = vld [vmem:[%s21843_s1 + $0x230c] ss:$16 sps:$4 sm:$0xff]   ;;  %v15927_v7 = vld [vmem:[%s21843_s1 + $0x2300] ss:$16 sps:$4 sm:$0xff]  }
 0x428   :  { %10505 = vmatprep.subr.bf16.mxu0 %v15845_v16  ;;  %11530 = vmatprep.subr.bf16.mxu1 %v15848_v17  ;;  %v15930_v16 = vld [vmem:[%s21843_s1 + $0x2308] ss:$16 sps:$4 sm:$0xff]   ;;  %v15935_v17 = vld [vmem:[%s21843_s1 + $0x2324] ss:$16 sps:$4 sm:$0xff]  }
 0x42b   :  { %10506 = vmatpush1.bf16.msra.mxu0 %v15843_v8  ;;  %11531 = vmatpush1.bf16.msra.mxu1 %v15846_v20  ;;  %v15938_v8 = vld [vmem:[%s21843_s1 + $0x232c] ss:$16 sps:$4 sm:$0xff]   ;;  %v15933_v20 = vld [vmem:[%s21843_s1 + $0x2320] ss:$16 sps:$4 sm:$0xff]  }
 0x42c   :  { %10507 = vmatprep.subr.bf16.mxu0 %v15851_v22  ;;  %11532 = vmatprep.subr.bf16.mxu1 %v15854_v4  ;;  %v15936_v22 = vld [vmem:[%s21843_s1 + $0x2328] ss:$16 sps:$4 sm:$0xff]   ;;  %v15941_v4 = vld [vmem:[%s21843_s1 + $0x2344] ss:$16 sps:$4 sm:$0xff]  }
 0x42f   :  { %10508 = vmatpush1.bf16.msra.mxu0 %v15849_v24  ;;  %11533 = vmatpush1.bf16.msra.mxu1 %v15852_v13  ;;  %v15944_v24 = vld [vmem:[%s21843_s1 + $0x234c] ss:$16 sps:$4 sm:$0xff]   ;;  %v15939_v13 = vld [vmem:[%s21843_s1 + $0x2340] ss:$16 sps:$4 sm:$0xff]  }
 0x430   :  { %10509 = vmatprep.subr.bf16.mxu0 %v15857_v27  ;;  %11534 = vmatprep.subr.bf16.mxu1 %v15860_v18  ;;  %v15942_v27 = vld [vmem:[%s21843_s1 + $0x2348] ss:$16 sps:$4 sm:$0xff]   ;;  %v15947_v18 = vld [vmem:[%s21843_s1 + $0x2364] ss:$16 sps:$4 sm:$0xff]  }
 0x433   :  { %10510 = vmatpush1.bf16.msra.mxu0 %v15855_v28  ;;  %11535 = vmatpush1.bf16.msra.mxu1 %v15858_v14  ;;  %v15950_v28 = vld [vmem:[%s21843_s1 + $0x236c] ss:$16 sps:$4 sm:$0xff]   ;;  %v15945_v14 = vld [vmem:[%s21843_s1 + $0x2360] ss:$16 sps:$4 sm:$0xff]  }
 0x434   :  { %10511 = vmatprep.subr.bf16.mxu0 %v15863_v30  ;;  %11536 = vmatprep.subr.bf16.mxu1 %v15866_v19  ;;  %v15948_v30 = vld [vmem:[%s21843_s1 + $0x2368] ss:$16 sps:$4 sm:$0xff]   ;;  %v15953_v19 = vld [vmem:[%s21843_s1 + $0x2384] ss:$16 sps:$4 sm:$0xff]  }
 0x437   :  { %10512 = vmatpush1.bf16.msra.mxu0 %v15861_v32  ;;  %11537 = vmatpush1.bf16.msra.mxu1 %v15864_v26  ;;  %v15956_v32 = vld [vmem:[%s21843_s1 + $0x238c] ss:$16 sps:$4 sm:$0xff]   ;;  %v15951_v26 = vld [vmem:[%s21843_s1 + $0x2380] ss:$16 sps:$4 sm:$0xff]  }
 0x438   :  { %10513 = vmatprep.subr.bf16.mxu0 %v15869_v23  ;;  %11538 = vmatprep.subr.bf16.mxu1 %v15872_v36  ;;  %v15954_v23 = vld [vmem:[%s21843_s1 + $0x2388] ss:$16 sps:$4 sm:$0xff]   ;;  %v15959_v36 = vld [vmem:[%s21843_s1 + $0x23a4] ss:$16 sps:$4 sm:$0xff]  }
 0x43b   :  { %10514 = vmatpush1.bf16.msra.mxu0 %v15867_v37  ;;  %11539 = vmatpush1.bf16.msra.mxu1 %v15870_v21  ;;  %v15962_v37 = vld [vmem:[%s21843_s1 + $0x23ac] ss:$16 sps:$4 sm:$0xff]   ;;  %v15957_v21 = vld [vmem:[%s21843_s1 + $0x23a0] ss:$16 sps:$4 sm:$0xff]  }
 0x43c   :  { %10515 = vmatprep.subr.bf16.mxu0 %v15875_v31  ;;  %11540 = vmatprep.subr.bf16.mxu1 %v15878_v39  ;;  %v15960_v31 = vld [vmem:[%s21843_s1 + $0x23a8] ss:$16 sps:$4 sm:$0xff]   ;;  %v15965_v39 = vld [vmem:[%s21843_s1 + $0x23c4] ss:$16 sps:$4 sm:$0xff]  }
 0x43f   :  { %10516 = vmatpush1.bf16.msra.mxu0 %v15873_v40  ;;  %11541 = vmatpush1.bf16.msra.mxu1 %v15876_v41  ;;  %v15968_v40 = vld [vmem:[%s21843_s1 + $0x23cc] ss:$16 sps:$4 sm:$0xff]   ;;  %v1828_v41 = vcombine.high %v19948_v29, %v19948_v29 }
 0x440   :  { %10526 = vmatprep.subr.bf16.mxu0 %v15881_v25  ;;  %11551 = vmatprep.subr.bf16.mxu1 %v15884_v43  ;;  %v15963_v25 = vld [vmem:[%s21843_s1 + $0x23c0] ss:$16 sps:$4 sm:$0xff]   ;;  %v15966_v43 = vld [vmem:[%s21843_s1 + $0x23c8] ss:$16 sps:$4 sm:$0xff]   ;;  %v15974_v29 = vld [vmem:[%s21843_s1 + $0x23ec] ss:$16 sps:$4 sm:$0xff]  }
 0x442   :  { %10518 = vmatmul.mubr.bf16.vlgmr.msra.gmra.mrb[0].mxu0 %v20181_v45  ;;  %11543 = vmatmul.mubr.bf16.vlgmr.msra.gmra.mrb[0].mxu1 %v20181_v45 }
 0x443   :  { %10527 = vmatpush1.bf16.msra.mxu0 %v15879_v46  ;;  %11552 = vmatpush1.bf16.msra.mxu1 %v15882_v35  ;;  %v15971_v46 = vld [vmem:[%s21843_s1 + $0x23e4] ss:$16 sps:$4 sm:$0xff]   ;;  %v20370_v35 = vrot.slane %v1828_v41, %v16851_v49  ;;  %v16050_v41 = vld [vmem:[%s21843_s1 + $0x2588] ss:$16 sps:$4 sm:$0xff]  }
 0x444   :  { %10528 = vmatprep.subr.bf16.mxu0 %v15887_v50  ;;  %11553 = vmatprep.subr.bf16.mxu1 %v15890_v33  ;;  %v15969_v50 = vld [vmem:[%s21843_s1 + $0x23e0] ss:$16 sps:$4 sm:$0xff]   ;;  %v15972_v33 = vld [vmem:[%s21843_s1 + $0x23e8] ss:$16 sps:$4 sm:$0xff]  }
 0x445   :  { %10558 = vmatprep.mubr.bf16.mxu0 %v1875_v51  ;;  %11583 = vmatprep.mubr.bf16.mxu1 %v1875_v51  ;;  %v15977_v51 = vld [vmem:[%s21843_s1 + $0x2404] ss:$16 sps:$4 sm:$0xff]  }
 0x447   :  { %10529 = vmatpush1.bf16.msra.mxu0 %v15885_v53  ;;  %11554 = vmatpush1.bf16.msra.mxu1 %v15888_v38  ;;  %v15980_v53 = vld [vmem:[%s21843_s1 + $0x240c] ss:$16 sps:$4 sm:$0xff]   ;;  %v1844_v38 = vcombine.high %v20370_v35, %v20370_v35 }
 0x448   :  { %10530 = vmatprep.subr.bf16.mxu0 %v15893_v34  ;;  %11555 = vmatprep.subr.bf16.mxu1 %v15896_v54  ;;  %v1873_v34 = vcombine.high %v20181_v45, %v20181_v45  ;;  %v15975_v54 = vld [vmem:[%s21843_s1 + $0x2400] ss:$16 sps:$4 sm:$0xff]   ;;  %v15986_v45 = vld [vmem:[%s21843_s1 + $0x242c] ss:$16 sps:$4 sm:$0xff]  }
 0x44b   :  { %10531 = vmatpush1.bf16.msra.mxu0 %v15891_v55  ;;  %11556 = vmatpush1.bf16.msra.mxu1 %v15894_v56  ;;  %v15978_v55 = vld [vmem:[%s21843_s1 + $0x2408] ss:$16 sps:$4 sm:$0xff]   ;;  %v15983_v56 = vld [vmem:[%s21843_s1 + $0x2424] ss:$16 sps:$4 sm:$0xff]  }
 0x44c   :  { %10532 = vmatprep.subr.bf16.mxu0 %v15899_v47  ;;  %11557 = vmatprep.subr.bf16.mxu1 %v15902_v57  ;;  %v20401_v47 = vrot.slane %v1844_v38, %v16851_v49  ;;  %v15981_v57 = vld [vmem:[%s21843_s1 + $0x2420] ss:$16 sps:$4 sm:$0xff]   ;;  %v16067_v38 = vld [vmem:[%s21843_s1 + $0x25e4] ss:$16 sps:$4 sm:$0xff]  }
 0x44f   :  { %10533 = vmatpush1.bf16.msra.mxu0 %v15897_v58  ;;  %11558 = vmatpush1.bf16.msra.mxu1 %v15900_v48  ;;  %v15984_v58 = vld [vmem:[%s21843_s1 + $0x2428] ss:$16 sps:$4 sm:$0xff]   ;;  %v15989_v48 = vld [vmem:[%s21843_s1 + $0x2444] ss:$16 sps:$4 sm:$0xff]  }
 0x450   :  { %10534 = vmatprep.subr.bf16.mxu0 %v15905_v61  ;;  %11559 = vmatprep.subr.bf16.mxu1 %v15908_v62  ;;  %v15992_v61 = vld [vmem:[%s21843_s1 + $0x244c] ss:$16 sps:$4 sm:$0xff]   ;;  %v15987_v62 = vld [vmem:[%s21843_s1 + $0x2440] ss:$16 sps:$4 sm:$0xff]  }
 0x453   :  { %10535 = vmatpush1.bf16.msra.mxu0 %v15903_v44  ;;  %11560 = vmatpush1.bf16.msra.mxu1 %v15906_v0  ;;  %v15990_v44 = vld [vmem:[%s21843_s1 + $0x2448] ss:$16 sps:$4 sm:$0xff]   ;;  %v15995_v0 = vld [vmem:[%s21843_s1 + $0x2464] ss:$16 sps:$4 sm:$0xff]  }
 0x454   :  { %10536 = vmatprep.subr.bf16.mxu0 %v15911_v1  ;;  %11561 = vmatprep.subr.bf16.mxu1 %v15914_v2  ;;  %v15998_v1 = vld [vmem:[%s21843_s1 + $0x246c] ss:$16 sps:$4 sm:$0xff]   ;;  %v15993_v2 = vld [vmem:[%s21843_s1 + $0x2460] ss:$16 sps:$4 sm:$0xff]  }
 0x457   :  { %10537 = vmatpush1.bf16.msra.mxu0 %v15909_v59  ;;  %11562 = vmatpush1.bf16.msra.mxu1 %v15912_v3  ;;  %v15996_v59 = vld [vmem:[%s21843_s1 + $0x2468] ss:$16 sps:$4 sm:$0xff]   ;;  %v16001_v3 = vld [vmem:[%s21843_s1 + $0x2484] ss:$16 sps:$4 sm:$0xff]  }
 0x458   :  { %10538 = vmatprep.subr.bf16.mxu0 %v15917_v5  ;;  %11563 = vmatprep.subr.bf16.mxu1 %v15920_v6  ;;  %v16004_v5 = vld [vmem:[%s21843_s1 + $0x248c] ss:$16 sps:$4 sm:$0xff]   ;;  %v15999_v6 = vld [vmem:[%s21843_s1 + $0x2480] ss:$16 sps:$4 sm:$0xff]  }
 0x45b   :  { %10539 = vmatpush1.bf16.msra.mxu0 %v15915_v60  ;;  %11564 = vmatpush1.bf16.msra.mxu1 %v15918_v9  ;;  %v16002_v60 = vld [vmem:[%s21843_s1 + $0x2488] ss:$16 sps:$4 sm:$0xff]   ;;  %v16007_v9 = vld [vmem:[%s21843_s1 + $0x24a4] ss:$16 sps:$4 sm:$0xff]  }
 0x45c   :  { %10540 = vmatprep.subr.bf16.mxu0 %v15923_v10  ;;  %11565 = vmatprep.subr.bf16.mxu1 %v15926_v11  ;;  %v16010_v10 = vld [vmem:[%s21843_s1 + $0x24ac] ss:$16 sps:$4 sm:$0xff]   ;;  %v16005_v11 = vld [vmem:[%s21843_s1 + $0x24a0] ss:$16 sps:$4 sm:$0xff]  }
 0x45f   :  { %10541 = vmatpush1.bf16.msra.mxu0 %v15921_v63  ;;  %11566 = vmatpush1.bf16.msra.mxu1 %v15924_v12  ;;  %v16008_v63 = vld [vmem:[%s21843_s1 + $0x24a8] ss:$16 sps:$4 sm:$0xff]   ;;  %v16013_v12 = vld [vmem:[%s21843_s1 + $0x24c4] ss:$16 sps:$4 sm:$0xff]  }
 0x460   :  { %10542 = vmatprep.subr.bf16.mxu0 %v15929_v52  ;;  %11567 = vmatprep.subr.bf16.mxu1 %v15932_v15  ;;  %v16016_v52 = vld [vmem:[%s21843_s1 + $0x24cc] ss:$16 sps:$4 sm:$0xff]   ;;  %v16011_v15 = vld [vmem:[%s21843_s1 + $0x24c0] ss:$16 sps:$4 sm:$0xff]  }
 0x463   :  { %10543 = vmatpush1.bf16.msra.mxu0 %v15927_v7  ;;  %11568 = vmatpush1.bf16.msra.mxu1 %v15930_v16  ;;  %v16014_v7 = vld [vmem:[%s21843_s1 + $0x24c8] ss:$16 sps:$4 sm:$0xff]   ;;  %v16019_v16 = vld [vmem:[%s21843_s1 + $0x24e4] ss:$16 sps:$4 sm:$0xff]  }
 0x464   :  { %10544 = vmatprep.subr.bf16.mxu0 %v15935_v17  ;;  %11569 = vmatprep.subr.bf16.mxu1 %v15938_v8  ;;  %v16022_v17 = vld [vmem:[%s21843_s1 + $0x24ec] ss:$16 sps:$4 sm:$0xff]   ;;  %v16017_v8 = vld [vmem:[%s21843_s1 + $0x24e0] ss:$16 sps:$4 sm:$0xff]  }
 0x467   :  { %10545 = vmatpush1.bf16.msra.mxu0 %v15933_v20  ;;  %11570 = vmatpush1.bf16.msra.mxu1 %v15936_v22  ;;  %v16020_v20 = vld [vmem:[%s21843_s1 + $0x24e8] ss:$16 sps:$4 sm:$0xff]   ;;  %v16025_v22 = vld [vmem:[%s21843_s1 + $0x2504] ss:$16 sps:$4 sm:$0xff]  }
 0x468   :  { %10546 = vmatprep.subr.bf16.mxu0 %v15941_v4  ;;  %11571 = vmatprep.subr.bf16.mxu1 %v15944_v24  ;;  %v16028_v4 = vld [vmem:[%s21843_s1 + $0x250c] ss:$16 sps:$4 sm:$0xff]   ;;  %v16023_v24 = vld [vmem:[%s21843_s1 + $0x2500] ss:$16 sps:$4 sm:$0xff]  }
 0x46b   :  { %10547 = vmatpush1.bf16.msra.mxu0 %v15939_v13  ;;  %11572 = vmatpush1.bf16.msra.mxu1 %v15942_v27  ;;  %v16026_v13 = vld [vmem:[%s21843_s1 + $0x2508] ss:$16 sps:$4 sm:$0xff]   ;;  %v16031_v27 = vld [vmem:[%s21843_s1 + $0x2524] ss:$16 sps:$4 sm:$0xff]  }
 0x46c   :  { %10548 = vmatprep.subr.bf16.mxu0 %v15947_v18  ;;  %11573 = vmatprep.subr.bf16.mxu1 %v15950_v28  ;;  %v16034_v18 = vld [vmem:[%s21843_s1 + $0x252c] ss:$16 sps:$4 sm:$0xff]   ;;  %v16029_v28 = vld [vmem:[%s21843_s1 + $0x2520] ss:$16 sps:$4 sm:$0xff]  }
 0x46f   :  { %10549 = vmatpush1.bf16.msra.mxu0 %v15945_v14  ;;  %11574 = vmatpush1.bf16.msra.mxu1 %v15948_v30  ;;  %v16032_v14 = vld [vmem:[%s21843_s1 + $0x2528] ss:$16 sps:$4 sm:$0xff]   ;;  %v16037_v30 = vld [vmem:[%s21843_s1 + $0x2544] ss:$16 sps:$4 sm:$0xff]  }
 0x470   :  { %10550 = vmatprep.subr.bf16.mxu0 %v15953_v19  ;;  %11575 = vmatprep.subr.bf16.mxu1 %v15956_v32  ;;  %v16040_v19 = vld [vmem:[%s21843_s1 + $0x254c] ss:$16 sps:$4 sm:$0xff]   ;;  %v16035_v32 = vld [vmem:[%s21843_s1 + $0x2540] ss:$16 sps:$4 sm:$0xff]  }
 0x473   :  { %10551 = vmatpush1.bf16.msra.mxu0 %v15951_v26  ;;  %11576 = vmatpush1.bf16.msra.mxu1 %v15954_v23  ;;  %v16038_v26 = vld [vmem:[%s21843_s1 + $0x2548] ss:$16 sps:$4 sm:$0xff]   ;;  %v16043_v23 = vld [vmem:[%s21843_s1 + $0x2564] ss:$16 sps:$4 sm:$0xff]  }
 0x474   :  { %10552 = vmatprep.subr.bf16.mxu0 %v15959_v36  ;;  %11577 = vmatprep.subr.bf16.mxu1 %v15962_v37  ;;  %v16046_v36 = vld [vmem:[%s21843_s1 + $0x256c] ss:$16 sps:$4 sm:$0xff]   ;;  %v16041_v37 = vld [vmem:[%s21843_s1 + $0x2560] ss:$16 sps:$4 sm:$0xff]  }
 0x477   :  { %10553 = vmatpush1.bf16.msra.mxu0 %v15957_v21  ;;  %11578 = vmatpush1.bf16.msra.mxu1 %v15960_v31  ;;  %v16044_v21 = vld [vmem:[%s21843_s1 + $0x2568] ss:$16 sps:$4 sm:$0xff]   ;;  %v16049_v31 = vld [vmem:[%s21843_s1 + $0x2584] ss:$16 sps:$4 sm:$0xff]  }
 0x478   :  { %10554 = vmatprep.subr.bf16.mxu0 %v15965_v39  ;;  %11579 = vmatprep.subr.bf16.mxu1 %v15968_v40  ;;  %v16052_v39 = vld [vmem:[%s21843_s1 + $0x258c] ss:$16 sps:$4 sm:$0xff]   ;;  %v16047_v40 = vld [vmem:[%s21843_s1 + $0x2580] ss:$16 sps:$4 sm:$0xff]  }
 0x47b   :  { %10555 = vmatpush1.bf16.msra.mxu0 %v15963_v25  ;;  %11580 = vmatpush1.bf16.msra.mxu1 %v15966_v43  ;;  %v16055_v25 = vld [vmem:[%s21843_s1 + $0x25a4] ss:$16 sps:$4 sm:$0xff]   ;;  %v16058_v43 = vld [vmem:[%s21843_s1 + $0x25ac] ss:$16 sps:$4 sm:$0xff]  }
 0x47c   :  { %10556 = vmatprep.subr.bf16.mxu0 %v15971_v46  ;;  %11581 = vmatprep.subr.bf16.mxu1 %v15974_v29  ;;  %v16053_v46 = vld [vmem:[%s21843_s1 + $0x25a0] ss:$16 sps:$4 sm:$0xff]   ;;  %v16056_v29 = vld [vmem:[%s21843_s1 + $0x25a8] ss:$16 sps:$4 sm:$0xff]  }
 0x47f   :  { %10557 = vmatpush1.bf16.msra.mxu0 %v15969_v50  ;;  %11582 = vmatpush1.bf16.msra.mxu1 %v15972_v33  ;;  %v16061_v50 = vld [vmem:[%s21843_s1 + $0x25c4] ss:$16 sps:$4 sm:$0xff]   ;;  %v16064_v33 = vld [vmem:[%s21843_s1 + $0x25cc] ss:$16 sps:$4 sm:$0xff]  }
 0x480   :  { %10567 = vmatprep.subr.bf16.mxu0 %v15977_v51  ;;  %11592 = vmatprep.subr.bf16.mxu1 %v15980_v53  ;;  %v16059_v51 = vld [vmem:[%s21843_s1 + $0x25c0] ss:$16 sps:$4 sm:$0xff]   ;;  %v16062_v53 = vld [vmem:[%s21843_s1 + $0x25c8] ss:$16 sps:$4 sm:$0xff]  }
 0x482   :  { %10559 = vmatmul.mubr.bf16.vlgmr.msra.gmra.mrb[0].mxu0 %v1873_v34  ;;  %11584 = vmatmul.mubr.bf16.vlgmr.msra.gmra.mrb[0].mxu1 %v1873_v34  ;;  %v16070_v34 = vld [vmem:[%s21843_s1 + $0x25ec] ss:$16 sps:$4 sm:$0xff]  }
 0x483   :  { %10568 = vmatpush1.bf16.msra.mxu0 %v15975_v54  ;;  %11593 = vmatpush1.bf16.msra.mxu1 %v15978_v55  ;;  %v16065_v54 = vld [vmem:[%s21843_s1 + $0x25e0] ss:$16 sps:$4 sm:$0xff]   ;;  %v16068_v55 = vld [vmem:[%s21843_s1 + $0x25e8] ss:$16 sps:$4 sm:$0xff]  }
 0x484   :  { %10569 = vmatprep.subr.bf16.mxu0 %v15983_v56  ;;  %11594 = vmatprep.subr.bf16.mxu1 %v15986_v45  ;;  %v16074_v56 = vld [vmem:[%s21843_s1 + $0x2604] ss:$16 sps:$4 sm:$0xff]   ;;  %v16077_v45 = vld [vmem:[%s21843_s1 + $0x260c] ss:$16 sps:$4 sm:$0xff]  }
 0x485   :  { %10599 = vmatprep.mubr.bf16.mxu0 %v20401_v47  ;;  %11624 = vmatprep.mubr.bf16.mxu1 %v20401_v47 }
 0x487   :  { %10570 = vmatpush1.bf16.msra.mxu0 %v15981_v57  ;;  %11595 = vmatpush1.bf16.msra.mxu1 %v15984_v58  ;;  %v20587_v57 = vrot.slane %v20370_v35, %v16851_v49  ;;  %v16072_v58 = vld [vmem:[%s21843_s1 + $0x2600] ss:$16 sps:$4 sm:$0xff]   ;;  %v16083_v35 = vld [vmem:[%s21843_s1 + $0x262c] ss:$16 sps:$4 sm:$0xff]  }
 0x488   :  { %10571 = vmatprep.subr.bf16.mxu0 %v15989_v48  ;;  %11596 = vmatprep.subr.bf16.mxu1 %v15992_v61  ;;  %v16075_v48 = vld [vmem:[%s21843_s1 + $0x2608] ss:$16 sps:$4 sm:$0xff]   ;;  %v16080_v61 = vld [vmem:[%s21843_s1 + $0x2624] ss:$16 sps:$4 sm:$0xff]  }
 0x48b   :  { %10572 = vmatpush1.bf16.msra.mxu0 %v15987_v62  ;;  %11597 = vmatpush1.bf16.msra.mxu1 %v15990_v44  ;;  %v1876_v62 = vcombine.high %v20401_v47, %v20401_v47  ;;  %v16078_v44 = vld [vmem:[%s21843_s1 + $0x2620] ss:$16 sps:$4 sm:$0xff]   ;;  %v16086_v47 = vld [vmem:[%s21843_s1 + $0x2644] ss:$16 sps:$4 sm:$0xff]  }
 0x48c   :  { %10573 = vmatprep.subr.bf16.mxu0 %v15995_v0  ;;  %11598 = vmatprep.subr.bf16.mxu1 %v15998_v1  ;;  %v16081_v0 = vld [vmem:[%s21843_s1 + $0x2628] ss:$16 sps:$4 sm:$0xff]   ;;  %v16089_v1 = vld [vmem:[%s21843_s1 + $0x264c] ss:$16 sps:$4 sm:$0xff]  }
 0x48f   :  { %10574 = vmatpush1.bf16.msra.mxu0 %v15993_v2  ;;  %11599 = vmatpush1.bf16.msra.mxu1 %v15996_v59  ;;  %v16084_v2 = vld [vmem:[%s21843_s1 + $0x2640] ss:$16 sps:$4 sm:$0xff]   ;;  %v16087_v59 = vld [vmem:[%s21843_s1 + $0x2648] ss:$16 sps:$4 sm:$0xff]  }
 0x490   :  { %10575 = vmatprep.subr.bf16.mxu0 %v16001_v3  ;;  %11600 = vmatprep.subr.bf16.mxu1 %v16004_v5  ;;  %v16092_v3 = vld [vmem:[%s21843_s1 + $0x2664] ss:$16 sps:$4 sm:$0xff]   ;;  %v16095_v5 = vld [vmem:[%s21843_s1 + $0x266c] ss:$16 sps:$4 sm:$0xff]  }
 0x493   :  { %10576 = vmatpush1.bf16.msra.mxu0 %v15999_v6  ;;  %11601 = vmatpush1.bf16.msra.mxu1 %v16002_v60  ;;  %v16090_v6 = vld [vmem:[%s21843_s1 + $0x2660] ss:$16 sps:$4 sm:$0xff]   ;;  %v16093_v60 = vld [vmem:[%s21843_s1 + $0x2668] ss:$16 sps:$4 sm:$0xff]  }
 0x494   :  { %10577 = vmatprep.subr.bf16.mxu0 %v16007_v9  ;;  %11602 = vmatprep.subr.bf16.mxu1 %v16010_v10  ;;  %v16098_v9 = vld [vmem:[%s21843_s1 + $0x2684] ss:$16 sps:$4 sm:$0xff]   ;;  %v16101_v10 = vld [vmem:[%s21843_s1 + $0x268c] ss:$16 sps:$4 sm:$0xff]  }
 0x497   :  { %10578 = vmatpush1.bf16.msra.mxu0 %v16005_v11  ;;  %11603 = vmatpush1.bf16.msra.mxu1 %v16008_v63  ;;  %v16096_v11 = vld [vmem:[%s21843_s1 + $0x2680] ss:$16 sps:$4 sm:$0xff]   ;;  %v16099_v63 = vld [vmem:[%s21843_s1 + $0x2688] ss:$16 sps:$4 sm:$0xff]  }
 0x498   :  { %10579 = vmatprep.subr.bf16.mxu0 %v16013_v12  ;;  %11604 = vmatprep.subr.bf16.mxu1 %v16016_v52  ;;  %v16104_v12 = vld [vmem:[%s21843_s1 + $0x26a4] ss:$16 sps:$4 sm:$0xff]   ;;  %v16107_v52 = vld [vmem:[%s21843_s1 + $0x26ac] ss:$16 sps:$4 sm:$0xff]  }
 0x49b   :  { %10580 = vmatpush1.bf16.msra.mxu0 %v16011_v15  ;;  %11605 = vmatpush1.bf16.msra.mxu1 %v16014_v7  ;;  %v16102_v15 = vld [vmem:[%s21843_s1 + $0x26a0] ss:$16 sps:$4 sm:$0xff]   ;;  %v16105_v7 = vld [vmem:[%s21843_s1 + $0x26a8] ss:$16 sps:$4 sm:$0xff]  }
 0x49c   :  { %10581 = vmatprep.subr.bf16.mxu0 %v16019_v16  ;;  %11606 = vmatprep.subr.bf16.mxu1 %v16022_v17  ;;  %v16110_v16 = vld [vmem:[%s21843_s1 + $0x26c4] ss:$16 sps:$4 sm:$0xff]   ;;  %v16113_v17 = vld [vmem:[%s21843_s1 + $0x26cc] ss:$16 sps:$4 sm:$0xff]  }
 0x49f   :  { %10582 = vmatpush1.bf16.msra.mxu0 %v16017_v8  ;;  %11607 = vmatpush1.bf16.msra.mxu1 %v16020_v20  ;;  %v16108_v8 = vld [vmem:[%s21843_s1 + $0x26c0] ss:$16 sps:$4 sm:$0xff]   ;;  %v16111_v20 = vld [vmem:[%s21843_s1 + $0x26c8] ss:$16 sps:$4 sm:$0xff]  }
 0x4a0   :  { %10583 = vmatprep.subr.bf16.mxu0 %v16025_v22  ;;  %11608 = vmatprep.subr.bf16.mxu1 %v16028_v4  ;;  %v16116_v22 = vld [vmem:[%s21843_s1 + $0x26e4] ss:$16 sps:$4 sm:$0xff]   ;;  %v16119_v4 = vld [vmem:[%s21843_s1 + $0x26ec] ss:$16 sps:$4 sm:$0xff]  }
 0x4a3   :  { %10584 = vmatpush1.bf16.msra.mxu0 %v16023_v24  ;;  %11609 = vmatpush1.bf16.msra.mxu1 %v16026_v13  ;;  %v16114_v24 = vld [vmem:[%s21843_s1 + $0x26e0] ss:$16 sps:$4 sm:$0xff]   ;;  %v16117_v13 = vld [vmem:[%s21843_s1 + $0x26e8] ss:$16 sps:$4 sm:$0xff]  }
 0x4a4   :  { %10585 = vmatprep.subr.bf16.mxu0 %v16031_v27  ;;  %11610 = vmatprep.subr.bf16.mxu1 %v16034_v18  ;;  %v16122_v27 = vld [vmem:[%s21843_s1 + $0x2704] ss:$16 sps:$4 sm:$0xff]   ;;  %v16125_v18 = vld [vmem:[%s21843_s1 + $0x270c] ss:$16 sps:$4 sm:$0xff]  }
 0x4a7   :  { %10586 = vmatpush1.bf16.msra.mxu0 %v16029_v28  ;;  %11611 = vmatpush1.bf16.msra.mxu1 %v16032_v14  ;;  %v16120_v28 = vld [vmem:[%s21843_s1 + $0x2700] ss:$16 sps:$4 sm:$0xff]   ;;  %v16123_v14 = vld [vmem:[%s21843_s1 + $0x2708] ss:$16 sps:$4 sm:$0xff]  }
 0x4a8   :  { %10587 = vmatprep.subr.bf16.mxu0 %v16037_v30  ;;  %11612 = vmatprep.subr.bf16.mxu1 %v16040_v19  ;;  %v16128_v30 = vld [vmem:[%s21843_s1 + $0x2724] ss:$16 sps:$4 sm:$0xff]   ;;  %v16131_v19 = vld [vmem:[%s21843_s1 + $0x272c] ss:$16 sps:$4 sm:$0xff]  }
 0x4ab   :  { %10588 = vmatpush1.bf16.msra.mxu0 %v16035_v32  ;;  %11613 = vmatpush1.bf16.msra.mxu1 %v16038_v26  ;;  %v16126_v32 = vld [vmem:[%s21843_s1 + $0x2720] ss:$16 sps:$4 sm:$0xff]   ;;  %v16129_v26 = vld [vmem:[%s21843_s1 + $0x2728] ss:$16 sps:$4 sm:$0xff]  }
 0x4ac   :  { %10589 = vmatprep.subr.bf16.mxu0 %v16043_v23  ;;  %11614 = vmatprep.subr.bf16.mxu1 %v16046_v36  ;;  %v16134_v23 = vld [vmem:[%s21843_s1 + $0x2744] ss:$16 sps:$4 sm:$0xff]   ;;  %v16137_v36 = vld [vmem:[%s21843_s1 + $0x274c] ss:$16 sps:$4 sm:$0xff]  }
 0x4af   :  { %10590 = vmatpush1.bf16.msra.mxu0 %v16041_v37  ;;  %11615 = vmatpush1.bf16.msra.mxu1 %v16044_v21  ;;  %v16132_v37 = vld [vmem:[%s21843_s1 + $0x2740] ss:$16 sps:$4 sm:$0xff]   ;;  %v16135_v21 = vld [vmem:[%s21843_s1 + $0x2748] ss:$16 sps:$4 sm:$0xff]  }
 0x4b0   :  { %10591 = vmatprep.subr.bf16.mxu0 %v16049_v31  ;;  %11616 = vmatprep.subr.bf16.mxu1 %v16052_v39  ;;  %v16140_v31 = vld [vmem:[%s21843_s1 + $0x2764] ss:$16 sps:$4 sm:$0xff]   ;;  %v16143_v39 = vld [vmem:[%s21843_s1 + $0x276c] ss:$16 sps:$4 sm:$0xff]  }
 0x4b3   :  { %10592 = vmatpush1.bf16.msra.mxu0 %v16047_v40  ;;  %11617 = vmatpush1.bf16.msra.mxu1 %v16050_v41  ;;  %v16138_v40 = vld [vmem:[%s21843_s1 + $0x2760] ss:$16 sps:$4 sm:$0xff]   ;;  %v16141_v41 = vld [vmem:[%s21843_s1 + $0x2768] ss:$16 sps:$4 sm:$0xff]  }
 0x4b4   :  { %10593 = vmatprep.subr.bf16.mxu0 %v16055_v25  ;;  %11618 = vmatprep.subr.bf16.mxu1 %v16058_v43  ;;  %v16146_v25 = vld [vmem:[%s21843_s1 + $0x2784] ss:$16 sps:$4 sm:$0xff]   ;;  %v16149_v43 = vld [vmem:[%s21843_s1 + $0x278c] ss:$16 sps:$4 sm:$0xff]  }
 0x4b7   :  { %10594 = vmatpush1.bf16.msra.mxu0 %v16053_v46  ;;  %11619 = vmatpush1.bf16.msra.mxu1 %v16056_v29  ;;  %v16144_v46 = vld [vmem:[%s21843_s1 + $0x2780] ss:$16 sps:$4 sm:$0xff]   ;;  %v16147_v29 = vld [vmem:[%s21843_s1 + $0x2788] ss:$16 sps:$4 sm:$0xff]  }
 0x4b8   :  { %10595 = vmatprep.subr.bf16.mxu0 %v16061_v50  ;;  %11620 = vmatprep.subr.bf16.mxu1 %v16064_v33  ;;  %v16152_v50 = vld [vmem:[%s21843_s1 + $0x27a4] ss:$16 sps:$4 sm:$0xff]   ;;  %v16155_v33 = vld [vmem:[%s21843_s1 + $0x27ac] ss:$16 sps:$4 sm:$0xff]  }
 0x4bb   :  { %10596 = vmatpush1.bf16.msra.mxu0 %v16059_v51  ;;  %11621 = vmatpush1.bf16.msra.mxu1 %v16062_v53  ;;  %v16150_v51 = vld [vmem:[%s21843_s1 + $0x27a0] ss:$16 sps:$4 sm:$0xff]   ;;  %v16153_v53 = vld [vmem:[%s21843_s1 + $0x27a8] ss:$16 sps:$4 sm:$0xff]  }
 0x4bc   :  { %10597 = vmatprep.subr.bf16.mxu0 %v16067_v38  ;;  %11622 = vmatprep.subr.bf16.mxu1 %v16070_v34  ;;  %v16158_v38 = vld [vmem:[%s21843_s1 + $0x27c4] ss:$16 sps:$4 sm:$0xff]   ;;  %v16161_v34 = vld [vmem:[%s21843_s1 + $0x27cc] ss:$16 sps:$4 sm:$0xff]  }
 0x4bf   :  { %10598 = vmatpush1.bf16.msra.mxu0 %v16065_v54  ;;  %11623 = vmatpush1.bf16.msra.mxu1 %v16068_v55  ;;  %v20764_v54 = vld [vmem:[%s21842_s0 + $0x28] sm:$0xff]  ;;  %v16156_v55 = vld [vmem:[%s21843_s1 + $0x27c0] ss:$16 sps:$4 sm:$0xff]  }
 0x4c0   :  { %10608 = vmatprep.subr.bf16.mxu0 %v16074_v56  ;;  %11633 = vmatprep.subr.bf16.mxu1 %v16077_v45  ;;  %v16159_v56 = vld [vmem:[%s21843_s1 + $0x27c8] ss:$16 sps:$4 sm:$0xff]   ;;  %v16164_v45 = vld [vmem:[%s21843_s1 + $0x27e4] ss:$16 sps:$4 sm:$0xff]  }
 0x4c2   :  { %10600 = vmatmul.mubr.bf16.vlgmr.msra.gmra.mrb[0].mxu0 %v20587_v57  ;;  %11625 = vmatmul.mubr.bf16.vlgmr.msra.gmra.mrb[0].mxu1 %v20587_v57 }
 0x4c3   :  { %10609 = vmatpush1.bf16.msra.mxu0 %v16072_v58  ;;  %11634 = vmatpush1.bf16.msra.mxu1 %v16075_v48  ;;  %v16167_v58 = vld [vmem:[%s21843_s1 + $0x27ec] ss:$16 sps:$4 sm:$0xff]   ;;  %v20780_v48 = vrot.slane %v20764_v54, %v16851_v49 }
 0x4c4   :  { %10610 = vmatprep.subr.bf16.mxu0 %v16080_v61  ;;  %11635 = vmatprep.subr.bf16.mxu1 %v16083_v35  ;;  %v16162_v61 = vld [vmem:[%s21843_s1 + $0x27e0] ss:$16 sps:$4 sm:$0xff]   ;;  %v16165_v35 = vld [vmem:[%s21843_s1 + $0x27e8] ss:$16 sps:$4 sm:$0xff]  }
 0x4c5   :  { %10640 = vmatprep.mubr.bf16.mxu0 %v1876_v62  ;;  %11665 = vmatprep.mubr.bf16.mxu1 %v1876_v62  ;;  %v16170_v62 = vld [vmem:[%s21843_s1 + $0x2804] ss:$16 sps:$4 sm:$0xff]  }
 0x4c7   :  { %10611 = vmatpush1.bf16.msra.mxu0 %v16078_v44  ;;  %11636 = vmatpush1.bf16.msra.mxu1 %v16081_v0  ;;  %v16173_v44 = vld [vmem:[%s21843_s1 + $0x280c] ss:$16 sps:$4 sm:$0xff]   ;;  %v1892_v0 = vcombine.high %v20780_v48, %v20780_v48 }
 0x4c8   :  { %10612 = vmatprep.subr.bf16.mxu0 %v16086_v47  ;;  %11637 = vmatprep.subr.bf16.mxu1 %v16089_v1  ;;  %v1874_v47 = vcombine.high %v20587_v57, %v20587_v57  ;;  %v16168_v1 = vld [vmem:[%s21843_s1 + $0x2800] ss:$16 sps:$4 sm:$0xff]   ;;  %v16179_v57 = vld [vmem:[%s21843_s1 + $0x282c] ss:$16 sps:$4 sm:$0xff]  }
 0x4cb   :  { %10613 = vmatpush1.bf16.msra.mxu0 %v16084_v2  ;;  %11638 = vmatpush1.bf16.msra.mxu1 %v16087_v59  ;;  %v16171_v2 = vld [vmem:[%s21843_s1 + $0x2808] ss:$16 sps:$4 sm:$0xff]   ;;  %v16176_v59 = vld [vmem:[%s21843_s1 + $0x2824] ss:$16 sps:$4 sm:$0xff]  }
 0x4cc   :  { %10614 = vmatprep.subr.bf16.mxu0 %v16092_v3  ;;  %11639 = vmatprep.subr.bf16.mxu1 %v16095_v5  ;;  %v20811_v3 = vrot.slane %v1892_v0, %v16851_v49  ;;  %v16174_v5 = vld [vmem:[%s21843_s1 + $0x2820] ss:$16 sps:$4 sm:$0xff]   ;;  %v16255_v0 = vld [vmem:[%s21843_s1 + $0x29c8] ss:$16 sps:$4 sm:$0xff]  }
 0x4cf   :  { %10615 = vmatpush1.bf16.msra.mxu0 %v16090_v6  ;;  %11640 = vmatpush1.bf16.msra.mxu1 %v16093_v60  ;;  %v16177_v6 = vld [vmem:[%s21843_s1 + $0x2828] ss:$16 sps:$4 sm:$0xff]   ;;  %v16182_v60 = vld [vmem:[%s21843_s1 + $0x2844] ss:$16 sps:$4 sm:$0xff]  }
 0x4d0   :  { %10616 = vmatprep.subr.bf16.mxu0 %v16098_v9  ;;  %11641 = vmatprep.subr.bf16.mxu1 %v16101_v10  ;;  %v16185_v9 = vld [vmem:[%s21843_s1 + $0x284c] ss:$16 sps:$4 sm:$0xff]   ;;  %v16180_v10 = vld [vmem:[%s21843_s1 + $0x2840] ss:$16 sps:$4 sm:$0xff]  }
 0x4d3   :  { %10617 = vmatpush1.bf16.msra.mxu0 %v16096_v11  ;;  %11642 = vmatpush1.bf16.msra.mxu1 %v16099_v63  ;;  %v16183_v11 = vld [vmem:[%s21843_s1 + $0x2848] ss:$16 sps:$4 sm:$0xff]   ;;  %v16188_v63 = vld [vmem:[%s21843_s1 + $0x2864] ss:$16 sps:$4 sm:$0xff]  }
 0x4d4   :  { %10618 = vmatprep.subr.bf16.mxu0 %v16104_v12  ;;  %11643 = vmatprep.subr.bf16.mxu1 %v16107_v52  ;;  %v16191_v12 = vld [vmem:[%s21843_s1 + $0x286c] ss:$16 sps:$4 sm:$0xff]   ;;  %v16186_v52 = vld [vmem:[%s21843_s1 + $0x2860] ss:$16 sps:$4 sm:$0xff]  }
 0x4d7   :  { %10619 = vmatpush1.bf16.msra.mxu0 %v16102_v15  ;;  %11644 = vmatpush1.bf16.msra.mxu1 %v16105_v7  ;;  %v16189_v15 = vld [vmem:[%s21843_s1 + $0x2868] ss:$16 sps:$4 sm:$0xff]   ;;  %v16194_v7 = vld [vmem:[%s21843_s1 + $0x2884] ss:$16 sps:$4 sm:$0xff]  }
 0x4d8   :  { %10620 = vmatprep.subr.bf16.mxu0 %v16110_v16  ;;  %11645 = vmatprep.subr.bf16.mxu1 %v16113_v17  ;;  %v16197_v16 = vld [vmem:[%s21843_s1 + $0x288c] ss:$16 sps:$4 sm:$0xff]   ;;  %v16192_v17 = vld [vmem:[%s21843_s1 + $0x2880] ss:$16 sps:$4 sm:$0xff]  }
 0x4db   :  { %10621 = vmatpush1.bf16.msra.mxu0 %v16108_v8  ;;  %11646 = vmatpush1.bf16.msra.mxu1 %v16111_v20  ;;  %v16195_v8 = vld [vmem:[%s21843_s1 + $0x2888] ss:$16 sps:$4 sm:$0xff]   ;;  %v16200_v20 = vld [vmem:[%s21843_s1 + $0x28a4] ss:$16 sps:$4 sm:$0xff]  }
 0x4dc   :  { %10622 = vmatprep.subr.bf16.mxu0 %v16116_v22  ;;  %11647 = vmatprep.subr.bf16.mxu1 %v16119_v4  ;;  %v16203_v22 = vld [vmem:[%s21843_s1 + $0x28ac] ss:$16 sps:$4 sm:$0xff]   ;;  %v16198_v4 = vld [vmem:[%s21843_s1 + $0x28a0] ss:$16 sps:$4 sm:$0xff]  }
 0x4df   :  { %10623 = vmatpush1.bf16.msra.mxu0 %v16114_v24  ;;  %11648 = vmatpush1.bf16.msra.mxu1 %v16117_v13  ;;  %v16201_v24 = vld [vmem:[%s21843_s1 + $0x28a8] ss:$16 sps:$4 sm:$0xff]   ;;  %v16206_v13 = vld [vmem:[%s21843_s1 + $0x28c4] ss:$16 sps:$4 sm:$0xff]  }
 0x4e0   :  { %10624 = vmatprep.subr.bf16.mxu0 %v16122_v27  ;;  %11649 = vmatprep.subr.bf16.mxu1 %v16125_v18  ;;  %v16209_v27 = vld [vmem:[%s21843_s1 + $0x28cc] ss:$16 sps:$4 sm:$0xff]   ;;  %v16204_v18 = vld [vmem:[%s21843_s1 + $0x28c0] ss:$16 sps:$4 sm:$0xff]  }
 0x4e3   :  { %10625 = vmatpush1.bf16.msra.mxu0 %v16120_v28  ;;  %11650 = vmatpush1.bf16.msra.mxu1 %v16123_v14  ;;  %v16207_v28 = vld [vmem:[%s21843_s1 + $0x28c8] ss:$16 sps:$4 sm:$0xff]   ;;  %v16212_v14 = vld [vmem:[%s21843_s1 + $0x28e4] ss:$16 sps:$4 sm:$0xff]  }
 0x4e4   :  { %10626 = vmatprep.subr.bf16.mxu0 %v16128_v30  ;;  %11651 = vmatprep.subr.bf16.mxu1 %v16131_v19  ;;  %v16215_v30 = vld [vmem:[%s21843_s1 + $0x28ec] ss:$16 sps:$4 sm:$0xff]   ;;  %v16210_v19 = vld [vmem:[%s21843_s1 + $0x28e0] ss:$16 sps:$4 sm:$0xff]  }
 0x4e7   :  { %10627 = vmatpush1.bf16.msra.mxu0 %v16126_v32  ;;  %11652 = vmatpush1.bf16.msra.mxu1 %v16129_v26  ;;  %v16213_v32 = vld [vmem:[%s21843_s1 + $0x28e8] ss:$16 sps:$4 sm:$0xff]   ;;  %v16218_v26 = vld [vmem:[%s21843_s1 + $0x2904] ss:$16 sps:$4 sm:$0xff]  }
 0x4e8   :  { %10628 = vmatprep.subr.bf16.mxu0 %v16134_v23  ;;  %11653 = vmatprep.subr.bf16.mxu1 %v16137_v36  ;;  %v16221_v23 = vld [vmem:[%s21843_s1 + $0x290c] ss:$16 sps:$4 sm:$0xff]   ;;  %v16216_v36 = vld [vmem:[%s21843_s1 + $0x2900] ss:$16 sps:$4 sm:$0xff]  }
 0x4eb   :  { %10629 = vmatpush1.bf16.msra.mxu0 %v16132_v37  ;;  %11654 = vmatpush1.bf16.msra.mxu1 %v16135_v21  ;;  %v16219_v37 = vld [vmem:[%s21843_s1 + $0x2908] ss:$16 sps:$4 sm:$0xff]   ;;  %v16224_v21 = vld [vmem:[%s21843_s1 + $0x2924] ss:$16 sps:$4 sm:$0xff]  }
 0x4ec   :  { %10630 = vmatprep.subr.bf16.mxu0 %v16140_v31  ;;  %11655 = vmatprep.subr.bf16.mxu1 %v16143_v39  ;;  %v16227_v31 = vld [vmem:[%s21843_s1 + $0x292c] ss:$16 sps:$4 sm:$0xff]   ;;  %v16222_v39 = vld [vmem:[%s21843_s1 + $0x2920] ss:$16 sps:$4 sm:$0xff]  }
 0x4ef   :  { %10631 = vmatpush1.bf16.msra.mxu0 %v16138_v40  ;;  %11656 = vmatpush1.bf16.msra.mxu1 %v16141_v41  ;;  %v16225_v40 = vld [vmem:[%s21843_s1 + $0x2928] ss:$16 sps:$4 sm:$0xff]   ;;  %v16230_v41 = vld [vmem:[%s21843_s1 + $0x2944] ss:$16 sps:$4 sm:$0xff]  }
 0x4f0   :  { %10632 = vmatprep.subr.bf16.mxu0 %v16146_v25  ;;  %11657 = vmatprep.subr.bf16.mxu1 %v16149_v43  ;;  %v16233_v25 = vld [vmem:[%s21843_s1 + $0x294c] ss:$16 sps:$4 sm:$0xff]   ;;  %v16228_v43 = vld [vmem:[%s21843_s1 + $0x2940] ss:$16 sps:$4 sm:$0xff]  }
 0x4f3   :  { %10633 = vmatpush1.bf16.msra.mxu0 %v16144_v46  ;;  %11658 = vmatpush1.bf16.msra.mxu1 %v16147_v29  ;;  %v16231_v46 = vld [vmem:[%s21843_s1 + $0x2948] ss:$16 sps:$4 sm:$0xff]   ;;  %v16236_v29 = vld [vmem:[%s21843_s1 + $0x2964] ss:$16 sps:$4 sm:$0xff]  }
 0x4f4   :  { %10634 = vmatprep.subr.bf16.mxu0 %v16152_v50  ;;  %11659 = vmatprep.subr.bf16.mxu1 %v16155_v33  ;;  %v16239_v50 = vld [vmem:[%s21843_s1 + $0x296c] ss:$16 sps:$4 sm:$0xff]   ;;  %v16234_v33 = vld [vmem:[%s21843_s1 + $0x2960] ss:$16 sps:$4 sm:$0xff]  }
 0x4f7   :  { %10635 = vmatpush1.bf16.msra.mxu0 %v16150_v51  ;;  %11660 = vmatpush1.bf16.msra.mxu1 %v16153_v53  ;;  %v16237_v51 = vld [vmem:[%s21843_s1 + $0x2968] ss:$16 sps:$4 sm:$0xff]   ;;  %v16242_v53 = vld [vmem:[%s21843_s1 + $0x2984] ss:$16 sps:$4 sm:$0xff]  }
 0x4f8   :  { %10636 = vmatprep.subr.bf16.mxu0 %v16158_v38  ;;  %11661 = vmatprep.subr.bf16.mxu1 %v16161_v34  ;;  %v16245_v38 = vld [vmem:[%s21843_s1 + $0x298c] ss:$16 sps:$4 sm:$0xff]   ;;  %v16240_v34 = vld [vmem:[%s21843_s1 + $0x2980] ss:$16 sps:$4 sm:$0xff]  }
 0x4fb   :  { %10637 = vmatpush1.bf16.msra.mxu0 %v16156_v55  ;;  %11662 = vmatpush1.bf16.msra.mxu1 %v16159_v56  ;;  %v16243_v55 = vld [vmem:[%s21843_s1 + $0x2988] ss:$16 sps:$4 sm:$0xff]   ;;  %v16248_v56 = vld [vmem:[%s21843_s1 + $0x29a4] ss:$16 sps:$4 sm:$0xff]  }
 0x4fc   :  { %10638 = vmatprep.subr.bf16.mxu0 %v16164_v45  ;;  %11663 = vmatprep.subr.bf16.mxu1 %v16167_v58  ;;  %v16251_v45 = vld [vmem:[%s21843_s1 + $0x29ac] ss:$16 sps:$4 sm:$0xff]   ;;  %v16246_v58 = vld [vmem:[%s21843_s1 + $0x29a0] ss:$16 sps:$4 sm:$0xff]  }
 0x4ff   :  { %10639 = vmatpush1.bf16.msra.mxu0 %v16162_v61  ;;  %11664 = vmatpush1.bf16.msra.mxu1 %v16165_v35  ;;  %v16249_v61 = vld [vmem:[%s21843_s1 + $0x29a8] ss:$16 sps:$4 sm:$0xff]   ;;  %v16254_v35 = vld [vmem:[%s21843_s1 + $0x29c4] ss:$16 sps:$4 sm:$0xff]  }
 0x500   :  { %10649 = vmatprep.subr.bf16.mxu0 %v16170_v62  ;;  %11674 = vmatprep.subr.bf16.mxu1 %v16173_v44  ;;  %v16257_v62 = vld [vmem:[%s21843_s1 + $0x29cc] ss:$16 sps:$4 sm:$0xff]   ;;  %v16252_v44 = vld [vmem:[%s21843_s1 + $0x29c0] ss:$16 sps:$4 sm:$0xff]  }
 0x502   :  { %10641 = vmatmul.mubr.bf16.vlgmr.msra.gmra.mrb[0].mxu0 %v1874_v47  ;;  %11666 = vmatmul.mubr.bf16.vlgmr.msra.gmra.mrb[0].mxu1 %v1874_v47  ;;  %v16260_v47 = vld [vmem:[%s21843_s1 + $0x29e4] ss:$16 sps:$4 sm:$0xff]  }
 0x503   :  { %10650 = vmatpush1.bf16.msra.mxu0 %v16168_v1  ;;  %11675 = vmatpush1.bf16.msra.mxu1 %v16171_v2  ;;  %v16263_v1 = vld [vmem:[%s21843_s1 + $0x29ec] ss:$16 sps:$4 sm:$0xff]   ;;  %v16258_v2 = vld [vmem:[%s21843_s1 + $0x29e0] ss:$16 sps:$4 sm:$0xff]  }
 0x504   :  { %10651 = vmatprep.subr.bf16.mxu0 %v16176_v59  ;;  %11676 = vmatprep.subr.bf16.mxu1 %v16179_v57  ;;  %v16261_v59 = vld [vmem:[%s21843_s1 + $0x29e8] ss:$16 sps:$4 sm:$0xff]   ;;  %v16266_v57 = vld [vmem:[%s21843_s1 + $0x2a04] ss:$16 sps:$4 sm:$0xff]  }
 0x505   :  { %10681 = vmatprep.mubr.bf16.mxu0 %v20811_v3  ;;  %11706 = vmatprep.mubr.bf16.mxu1 %v20811_v3 }
 0x507   :  { %10652 = vmatpush1.bf16.msra.mxu0 %v16174_v5  ;;  %11677 = vmatpush1.bf16.msra.mxu1 %v16177_v6  ;;  %v16269_v5 = vld [vmem:[%s21843_s1 + $0x2a0c] ss:$16 sps:$4 sm:$0xff]   ;;  %v20997_v6 = vrot.slane %v20780_v48, %v16851_v49 }
 0x508   :  { %10653 = vmatprep.subr.bf16.mxu0 %v16182_v60  ;;  %11678 = vmatprep.subr.bf16.mxu1 %v16185_v9  ;;  %v16264_v60 = vld [vmem:[%s21843_s1 + $0x2a00] ss:$16 sps:$4 sm:$0xff]   ;;  %v16267_v9 = vld [vmem:[%s21843_s1 + $0x2a08] ss:$16 sps:$4 sm:$0xff]   ;;  %v16275_v48 = vld [vmem:[%s21843_s1 + $0x2a2c] ss:$16 sps:$4 sm:$0xff]  }
 0x50b   :  { %10654 = vmatpush1.bf16.msra.mxu0 %v16180_v10  ;;  %11679 = vmatpush1.bf16.msra.mxu1 %v16183_v11  ;;  %v16272_v10 = vld [vmem:[%s21843_s1 + $0x2a24] ss:$16 sps:$4 sm:$0xff]   ;;  %v1924_v11 = vcombine.high %v20811_v3, %v20811_v3 }
 0x50c   :  { %10655 = vmatprep.subr.bf16.mxu0 %v16188_v63  ;;  %11680 = vmatprep.subr.bf16.mxu1 %v16191_v12  ;;  %v16270_v63 = vld [vmem:[%s21843_s1 + $0x2a20] ss:$16 sps:$4 sm:$0xff]   ;;  %v16273_v12 = vld [vmem:[%s21843_s1 + $0x2a28] ss:$16 sps:$4 sm:$0xff]   ;;  %v16278_v3 = vld [vmem:[%s21843_s1 + $0x2a44] ss:$16 sps:$4 sm:$0xff]  }
 0x50f   :  { %10656 = vmatpush1.bf16.msra.mxu0 %v16186_v52  ;;  %11681 = vmatpush1.bf16.msra.mxu1 %v16189_v15  ;;  %v16281_v52 = vld [vmem:[%s21843_s1 + $0x2a4c] ss:$16 sps:$4 sm:$0xff]   ;;  %v16276_v15 = vld [vmem:[%s21843_s1 + $0x2a40] ss:$16 sps:$4 sm:$0xff]  }
 0x510   :  { %10657 = vmatprep.subr.bf16.mxu0 %v16194_v7  ;;  %11682 = vmatprep.subr.bf16.mxu1 %v16197_v16  ;;  %v16279_v7 = vld [vmem:[%s21843_s1 + $0x2a48] ss:$16 sps:$4 sm:$0xff]   ;;  %v16284_v16 = vld [vmem:[%s21843_s1 + $0x2a64] ss:$16 sps:$4 sm:$0xff]  }
 0x513   :  { %10658 = vmatpush1.bf16.msra.mxu0 %v16192_v17  ;;  %11683 = vmatpush1.bf16.msra.mxu1 %v16195_v8  ;;  %v16287_v17 = vld [vmem:[%s21843_s1 + $0x2a6c] ss:$16 sps:$4 sm:$0xff]   ;;  %v16282_v8 = vld [vmem:[%s21843_s1 + $0x2a60] ss:$16 sps:$4 sm:$0xff]  }
 0x514   :  { %10659 = vmatprep.subr.bf16.mxu0 %v16200_v20  ;;  %11684 = vmatprep.subr.bf16.mxu1 %v16203_v22  ;;  %v16285_v20 = vld [vmem:[%s21843_s1 + $0x2a68] ss:$16 sps:$4 sm:$0xff]   ;;  %v16290_v22 = vld [vmem:[%s21843_s1 + $0x2a84] ss:$16 sps:$4 sm:$0xff]  }
 0x517   :  { %10660 = vmatpush1.bf16.msra.mxu0 %v16198_v4  ;;  %11685 = vmatpush1.bf16.msra.mxu1 %v16201_v24  ;;  %v16293_v4 = vld [vmem:[%s21843_s1 + $0x2a8c] ss:$16 sps:$4 sm:$0xff]   ;;  %v16288_v24 = vld [vmem:[%s21843_s1 + $0x2a80] ss:$16 sps:$4 sm:$0xff]  }
 0x518   :  { %10661 = vmatprep.subr.bf16.mxu0 %v16206_v13  ;;  %11686 = vmatprep.subr.bf16.mxu1 %v16209_v27  ;;  %v16291_v13 = vld [vmem:[%s21843_s1 + $0x2a88] ss:$16 sps:$4 sm:$0xff]   ;;  %v16296_v27 = vld [vmem:[%s21843_s1 + $0x2aa4] ss:$16 sps:$4 sm:$0xff]  }
 0x51b   :  { %10662 = vmatpush1.bf16.msra.mxu0 %v16204_v18  ;;  %11687 = vmatpush1.bf16.msra.mxu1 %v16207_v28  ;;  %v16299_v18 = vld [vmem:[%s21843_s1 + $0x2aac] ss:$16 sps:$4 sm:$0xff]   ;;  %v16294_v28 = vld [vmem:[%s21843_s1 + $0x2aa0] ss:$16 sps:$4 sm:$0xff]  }
 0x51c   :  { %10663 = vmatprep.subr.bf16.mxu0 %v16212_v14  ;;  %11688 = vmatprep.subr.bf16.mxu1 %v16215_v30  ;;  %v16297_v14 = vld [vmem:[%s21843_s1 + $0x2aa8] ss:$16 sps:$4 sm:$0xff]   ;;  %v16302_v30 = vld [vmem:[%s21843_s1 + $0x2ac4] ss:$16 sps:$4 sm:$0xff]  }
 0x51f   :  { %10664 = vmatpush1.bf16.msra.mxu0 %v16210_v19  ;;  %11689 = vmatpush1.bf16.msra.mxu1 %v16213_v32  ;;  %v16305_v19 = vld [vmem:[%s21843_s1 + $0x2acc] ss:$16 sps:$4 sm:$0xff]   ;;  %v16300_v32 = vld [vmem:[%s21843_s1 + $0x2ac0] ss:$16 sps:$4 sm:$0xff]  }
 0x520   :  { %10665 = vmatprep.subr.bf16.mxu0 %v16218_v26  ;;  %11690 = vmatprep.subr.bf16.mxu1 %v16221_v23  ;;  %v16303_v26 = vld [vmem:[%s21843_s1 + $0x2ac8] ss:$16 sps:$4 sm:$0xff]   ;;  %v16308_v23 = vld [vmem:[%s21843_s1 + $0x2ae4] ss:$16 sps:$4 sm:$0xff]  }
 0x523   :  { %10666 = vmatpush1.bf16.msra.mxu0 %v16216_v36  ;;  %11691 = vmatpush1.bf16.msra.mxu1 %v16219_v37  ;;  %v16311_v36 = vld [vmem:[%s21843_s1 + $0x2aec] ss:$16 sps:$4 sm:$0xff]   ;;  %v16306_v37 = vld [vmem:[%s21843_s1 + $0x2ae0] ss:$16 sps:$4 sm:$0xff]  }
 0x524   :  { %10667 = vmatprep.subr.bf16.mxu0 %v16224_v21  ;;  %11692 = vmatprep.subr.bf16.mxu1 %v16227_v31  ;;  %v16309_v21 = vld [vmem:[%s21843_s1 + $0x2ae8] ss:$16 sps:$4 sm:$0xff]   ;;  %v16314_v31 = vld [vmem:[%s21843_s1 + $0x2b04] ss:$16 sps:$4 sm:$0xff]  }
 0x527   :  { %10668 = vmatpush1.bf16.msra.mxu0 %v16222_v39  ;;  %11693 = vmatpush1.bf16.msra.mxu1 %v16225_v40  ;;  %v16317_v39 = vld [vmem:[%s21843_s1 + $0x2b0c] ss:$16 sps:$4 sm:$0xff]   ;;  %v16312_v40 = vld [vmem:[%s21843_s1 + $0x2b00] ss:$16 sps:$4 sm:$0xff]  }
 0x528   :  { %10669 = vmatprep.subr.bf16.mxu0 %v16230_v41  ;;  %11694 = vmatprep.subr.bf16.mxu1 %v16233_v25  ;;  %v16315_v41 = vld [vmem:[%s21843_s1 + $0x2b08] ss:$16 sps:$4 sm:$0xff]   ;;  %v16320_v25 = vld [vmem:[%s21843_s1 + $0x2b24] ss:$16 sps:$4 sm:$0xff]  }
 0x52b   :  { %10670 = vmatpush1.bf16.msra.mxu0 %v16228_v43  ;;  %11695 = vmatpush1.bf16.msra.mxu1 %v16231_v46  ;;  %v16323_v43 = vld [vmem:[%s21843_s1 + $0x2b2c] ss:$16 sps:$4 sm:$0xff]   ;;  %v16318_v46 = vld [vmem:[%s21843_s1 + $0x2b20] ss:$16 sps:$4 sm:$0xff]  }
 0x52c   :  { %10671 = vmatprep.subr.bf16.mxu0 %v16236_v29  ;;  %11696 = vmatprep.subr.bf16.mxu1 %v16239_v50  ;;  %v16321_v29 = vld [vmem:[%s21843_s1 + $0x2b28] ss:$16 sps:$4 sm:$0xff]   ;;  %v16326_v50 = vld [vmem:[%s21843_s1 + $0x2b44] ss:$16 sps:$4 sm:$0xff]  }
 0x52f   :  { %10672 = vmatpush1.bf16.msra.mxu0 %v16234_v33  ;;  %11697 = vmatpush1.bf16.msra.mxu1 %v16237_v51  ;;  %v16329_v33 = vld [vmem:[%s21843_s1 + $0x2b4c] ss:$16 sps:$4 sm:$0xff]   ;;  %v16324_v51 = vld [vmem:[%s21843_s1 + $0x2b40] ss:$16 sps:$4 sm:$0xff]  }
 0x530   :  { %10673 = vmatprep.subr.bf16.mxu0 %v16242_v53  ;;  %11698 = vmatprep.subr.bf16.mxu1 %v16245_v38  ;;  %v16327_v53 = vld [vmem:[%s21843_s1 + $0x2b48] ss:$16 sps:$4 sm:$0xff]   ;;  %v16332_v38 = vld [vmem:[%s21843_s1 + $0x2b64] ss:$16 sps:$4 sm:$0xff]  }
 0x533   :  { %10674 = vmatpush1.bf16.msra.mxu0 %v16240_v34  ;;  %11699 = vmatpush1.bf16.msra.mxu1 %v16243_v55  ;;  %v16335_v34 = vld [vmem:[%s21843_s1 + $0x2b6c] ss:$16 sps:$4 sm:$0xff]   ;;  %v16330_v55 = vld [vmem:[%s21843_s1 + $0x2b60] ss:$16 sps:$4 sm:$0xff]  }
 0x534   :  { %10675 = vmatprep.subr.bf16.mxu0 %v16248_v56  ;;  %11700 = vmatprep.subr.bf16.mxu1 %v16251_v45  ;;  %v16333_v56 = vld [vmem:[%s21843_s1 + $0x2b68] ss:$16 sps:$4 sm:$0xff]   ;;  %v16338_v45 = vld [vmem:[%s21843_s1 + $0x2b84] ss:$16 sps:$4 sm:$0xff]  }
 0x537   :  { %10676 = vmatpush1.bf16.msra.mxu0 %v16246_v58  ;;  %11701 = vmatpush1.bf16.msra.mxu1 %v16249_v61  ;;  %v16341_v58 = vld [vmem:[%s21843_s1 + $0x2b8c] ss:$16 sps:$4 sm:$0xff]   ;;  %v16336_v61 = vld [vmem:[%s21843_s1 + $0x2b80] ss:$16 sps:$4 sm:$0xff]  }
 0x538   :  { %10677 = vmatprep.subr.bf16.mxu0 %v16254_v35  ;;  %11702 = vmatprep.subr.bf16.mxu1 %v16257_v62  ;;  %v16339_v35 = vld [vmem:[%s21843_s1 + $0x2b88] ss:$16 sps:$4 sm:$0xff]   ;;  %v16344_v62 = vld [vmem:[%s21843_s1 + $0x2ba4] ss:$16 sps:$4 sm:$0xff]  }
 0x53b   :  { %10678 = vmatpush1.bf16.msra.mxu0 %v16252_v44  ;;  %11703 = vmatpush1.bf16.msra.mxu1 %v16255_v0  ;;  %v16347_v44 = vld [vmem:[%s21843_s1 + $0x2bac] ss:$16 sps:$4 sm:$0xff]   ;;  %v16342_v0 = vld [vmem:[%s21843_s1 + $0x2ba0] ss:$16 sps:$4 sm:$0xff]  }
 0x53c   :  { %10679 = vmatprep.subr.bf16.mxu0 %v16260_v47  ;;  %11704 = vmatprep.subr.bf16.mxu1 %v16263_v1  ;;  %v16345_v47 = vld [vmem:[%s21843_s1 + $0x2ba8] ss:$16 sps:$4 sm:$0xff]   ;;  %v16350_v1 = vld [vmem:[%s21843_s1 + $0x2bc4] ss:$16 sps:$4 sm:$0xff]  }
 0x53f   :  { %10680 = vmatpush1.bf16.msra.mxu0 %v16258_v2  ;;  %11705 = vmatpush1.bf16.msra.mxu1 %v16261_v59  ;;  %v16353_v2 = vld [vmem:[%s21843_s1 + $0x2bcc] ss:$16 sps:$4 sm:$0xff]   ;;  %v1877_v59 = vcombine.high %v20764_v54, %v20764_v54 }
 0x540   :  { %10690 = vmatprep.subr.bf16.mxu0 %v16266_v57  ;;  %11715 = vmatprep.subr.bf16.mxu1 %v16269_v5  ;;  %v16348_v57 = vld [vmem:[%s21843_s1 + $0x2bc0] ss:$16 sps:$4 sm:$0xff]   ;;  %v16351_v5 = vld [vmem:[%s21843_s1 + $0x2bc8] ss:$16 sps:$4 sm:$0xff]   ;;  %v16359_v54 = vld [vmem:[%s21843_s1 + $0x2bec] ss:$16 sps:$4 sm:$0xff]  }
 0x542   :  { %10682 = vmatmul.mubr.bf16.vlgmr.msra.gmra.mrb[0].mxu0 %v20997_v6  ;;  %11707 = vmatmul.mubr.bf16.vlgmr.msra.gmra.mrb[0].mxu1 %v20997_v6 }
 0x543   :  { %10691 = vmatpush1.bf16.msra.mxu0 %v16264_v60  ;;  %11716 = vmatpush1.bf16.msra.mxu1 %v16267_v9  ;;  %v16356_v60 = vld [vmem:[%s21843_s1 + $0x2be4] ss:$16 sps:$4 sm:$0xff]   ;;  %v21186_v9 = vrot.slane %v1877_v59, %v16851_v49  ;;  %v16435_v59 = vld [vmem:[%s21843_s1 + $0x2d88] ss:$16 sps:$4 sm:$0xff]  }
 0x544   :  { %10692 = vmatprep.subr.bf16.mxu0 %v16272_v10  ;;  %11717 = vmatprep.subr.bf16.mxu1 %v16275_v48  ;;  %v16354_v10 = vld [vmem:[%s21843_s1 + $0x2be0] ss:$16 sps:$4 sm:$0xff]   ;;  %v16357_v48 = vld [vmem:[%s21843_s1 + $0x2be8] ss:$16 sps:$4 sm:$0xff]  }
 0x545   :  { %10722 = vmatprep.mubr.bf16.mxu0 %v1924_v11  ;;  %11747 = vmatprep.mubr.bf16.mxu1 %v1924_v11  ;;  %v16362_v11 = vld [vmem:[%s21843_s1 + $0x2c04] ss:$16 sps:$4 sm:$0xff]  }
 0x547   :  { %10693 = vmatpush1.bf16.msra.mxu0 %v16270_v63  ;;  %11718 = vmatpush1.bf16.msra.mxu1 %v16273_v12  ;;  %v16365_v63 = vld [vmem:[%s21843_s1 + $0x2c0c] ss:$16 sps:$4 sm:$0xff]   ;;  %v1893_v12 = vcombine.high %v21186_v9, %v21186_v9 }
 0x548   :  { %10694 = vmatprep.subr.bf16.mxu0 %v16278_v3  ;;  %11719 = vmatprep.subr.bf16.mxu1 %v16281_v52  ;;  %v1922_v3 = vcombine.high %v20997_v6, %v20997_v6  ;;  %v16360_v52 = vld [vmem:[%s21843_s1 + $0x2c00] ss:$16 sps:$4 sm:$0xff]   ;;  %v16371_v6 = vld [vmem:[%s21843_s1 + $0x2c2c] ss:$16 sps:$4 sm:$0xff]  }
 0x54b   :  { %10695 = vmatpush1.bf16.msra.mxu0 %v16276_v15  ;;  %11720 = vmatpush1.bf16.msra.mxu1 %v16279_v7  ;;  %v16363_v15 = vld [vmem:[%s21843_s1 + $0x2c08] ss:$16 sps:$4 sm:$0xff]   ;;  %v16368_v7 = vld [vmem:[%s21843_s1 + $0x2c24] ss:$16 sps:$4 sm:$0xff]  }
 0x54c   :  { %10696 = vmatprep.subr.bf16.mxu0 %v16284_v16  ;;  %11721 = vmatprep.subr.bf16.mxu1 %v16287_v17  ;;  %v21217_v16 = vrot.slane %v1893_v12, %v16851_v49  ;;  %v16366_v17 = vld [vmem:[%s21843_s1 + $0x2c20] ss:$16 sps:$4 sm:$0xff]   ;;  %v16452_v12 = vld [vmem:[%s21843_s1 + $0x2de4] ss:$16 sps:$4 sm:$0xff]  }
 0x54f   :  { %10697 = vmatpush1.bf16.msra.mxu0 %v16282_v8  ;;  %11722 = vmatpush1.bf16.msra.mxu1 %v16285_v20  ;;  %v16369_v8 = vld [vmem:[%s21843_s1 + $0x2c28] ss:$16 sps:$4 sm:$0xff]   ;;  %v16374_v20 = vld [vmem:[%s21843_s1 + $0x2c44] ss:$16 sps:$4 sm:$0xff]  }
 0x550   :  { %10698 = vmatprep.subr.bf16.mxu0 %v16290_v22  ;;  %11723 = vmatprep.subr.bf16.mxu1 %v16293_v4  ;;  %v16377_v22 = vld [vmem:[%s21843_s1 + $0x2c4c] ss:$16 sps:$4 sm:$0xff]   ;;  %v16372_v4 = vld [vmem:[%s21843_s1 + $0x2c40] ss:$16 sps:$4 sm:$0xff]  }
 0x553   :  { %10699 = vmatpush1.bf16.msra.mxu0 %v16288_v24  ;;  %11724 = vmatpush1.bf16.msra.mxu1 %v16291_v13  ;;  %v16375_v24 = vld [vmem:[%s21843_s1 + $0x2c48] ss:$16 sps:$4 sm:$0xff]   ;;  %v16380_v13 = vld [vmem:[%s21843_s1 + $0x2c64] ss:$16 sps:$4 sm:$0xff]  }
 0x554   :  { %10700 = vmatprep.subr.bf16.mxu0 %v16296_v27  ;;  %11725 = vmatprep.subr.bf16.mxu1 %v16299_v18  ;;  %v16383_v27 = vld [vmem:[%s21843_s1 + $0x2c6c] ss:$16 sps:$4 sm:$0xff]   ;;  %v16378_v18 = vld [vmem:[%s21843_s1 + $0x2c60] ss:$16 sps:$4 sm:$0xff]  }
 0x557   :  { %10701 = vmatpush1.bf16.msra.mxu0 %v16294_v28  ;;  %11726 = vmatpush1.bf16.msra.mxu1 %v16297_v14  ;;  %v16381_v28 = vld [vmem:[%s21843_s1 + $0x2c68] ss:$16 sps:$4 sm:$0xff]   ;;  %v16386_v14 = vld [vmem:[%s21843_s1 + $0x2c84] ss:$16 sps:$4 sm:$0xff]  }
 0x558   :  { %10702 = vmatprep.subr.bf16.mxu0 %v16302_v30  ;;  %11727 = vmatprep.subr.bf16.mxu1 %v16305_v19  ;;  %v16389_v30 = vld [vmem:[%s21843_s1 + $0x2c8c] ss:$16 sps:$4 sm:$0xff]   ;;  %v16384_v19 = vld [vmem:[%s21843_s1 + $0x2c80] ss:$16 sps:$4 sm:$0xff]  }
 0x55b   :  { %10703 = vmatpush1.bf16.msra.mxu0 %v16300_v32  ;;  %11728 = vmatpush1.bf16.msra.mxu1 %v16303_v26  ;;  %v16387_v32 = vld [vmem:[%s21843_s1 + $0x2c88] ss:$16 sps:$4 sm:$0xff]   ;;  %v16392_v26 = vld [vmem:[%s21843_s1 + $0x2ca4] ss:$16 sps:$4 sm:$0xff]  }
 0x55c   :  { %10704 = vmatprep.subr.bf16.mxu0 %v16308_v23  ;;  %11729 = vmatprep.subr.bf16.mxu1 %v16311_v36  ;;  %v16395_v23 = vld [vmem:[%s21843_s1 + $0x2cac] ss:$16 sps:$4 sm:$0xff]   ;;  %v16390_v36 = vld [vmem:[%s21843_s1 + $0x2ca0] ss:$16 sps:$4 sm:$0xff]  }
 0x55f   :  { %10705 = vmatpush1.bf16.msra.mxu0 %v16306_v37  ;;  %11730 = vmatpush1.bf16.msra.mxu1 %v16309_v21  ;;  %v16393_v37 = vld [vmem:[%s21843_s1 + $0x2ca8] ss:$16 sps:$4 sm:$0xff]   ;;  %v16398_v21 = vld [vmem:[%s21843_s1 + $0x2cc4] ss:$16 sps:$4 sm:$0xff]  }
 0x560   :  { %10706 = vmatprep.subr.bf16.mxu0 %v16314_v31  ;;  %11731 = vmatprep.subr.bf16.mxu1 %v16317_v39  ;;  %v16401_v31 = vld [vmem:[%s21843_s1 + $0x2ccc] ss:$16 sps:$4 sm:$0xff]   ;;  %v16396_v39 = vld [vmem:[%s21843_s1 + $0x2cc0] ss:$16 sps:$4 sm:$0xff]  }
 0x563   :  { %10707 = vmatpush1.bf16.msra.mxu0 %v16312_v40  ;;  %11732 = vmatpush1.bf16.msra.mxu1 %v16315_v41  ;;  %v16399_v40 = vld [vmem:[%s21843_s1 + $0x2cc8] ss:$16 sps:$4 sm:$0xff]   ;;  %v16404_v41 = vld [vmem:[%s21843_s1 + $0x2ce4] ss:$16 sps:$4 sm:$0xff]  }
 0x564   :  { %10708 = vmatprep.subr.bf16.mxu0 %v16320_v25  ;;  %11733 = vmatprep.subr.bf16.mxu1 %v16323_v43  ;;  %v16407_v25 = vld [vmem:[%s21843_s1 + $0x2cec] ss:$16 sps:$4 sm:$0xff]   ;;  %v16402_v43 = vld [vmem:[%s21843_s1 + $0x2ce0] ss:$16 sps:$4 sm:$0xff]  }
 0x567   :  { %10709 = vmatpush1.bf16.msra.mxu0 %v16318_v46  ;;  %11734 = vmatpush1.bf16.msra.mxu1 %v16321_v29  ;;  %v16405_v46 = vld [vmem:[%s21843_s1 + $0x2ce8] ss:$16 sps:$4 sm:$0xff]   ;;  %v16410_v29 = vld [vmem:[%s21843_s1 + $0x2d04] ss:$16 sps:$4 sm:$0xff]  }
 0x568   :  { %10710 = vmatprep.subr.bf16.mxu0 %v16326_v50  ;;  %11735 = vmatprep.subr.bf16.mxu1 %v16329_v33  ;;  %v16413_v50 = vld [vmem:[%s21843_s1 + $0x2d0c] ss:$16 sps:$4 sm:$0xff]   ;;  %v16408_v33 = vld [vmem:[%s21843_s1 + $0x2d00] ss:$16 sps:$4 sm:$0xff]  }
 0x56b   :  { %10711 = vmatpush1.bf16.msra.mxu0 %v16324_v51  ;;  %11736 = vmatpush1.bf16.msra.mxu1 %v16327_v53  ;;  %v16411_v51 = vld [vmem:[%s21843_s1 + $0x2d08] ss:$16 sps:$4 sm:$0xff]   ;;  %v16416_v53 = vld [vmem:[%s21843_s1 + $0x2d24] ss:$16 sps:$4 sm:$0xff]  }
 0x56c   :  { %10712 = vmatprep.subr.bf16.mxu0 %v16332_v38  ;;  %11737 = vmatprep.subr.bf16.mxu1 %v16335_v34  ;;  %v16419_v38 = vld [vmem:[%s21843_s1 + $0x2d2c] ss:$16 sps:$4 sm:$0xff]   ;;  %v16414_v34 = vld [vmem:[%s21843_s1 + $0x2d20] ss:$16 sps:$4 sm:$0xff]  }
 0x56f   :  { %10713 = vmatpush1.bf16.msra.mxu0 %v16330_v55  ;;  %11738 = vmatpush1.bf16.msra.mxu1 %v16333_v56  ;;  %v16417_v55 = vld [vmem:[%s21843_s1 + $0x2d28] ss:$16 sps:$4 sm:$0xff]   ;;  %v16422_v56 = vld [vmem:[%s21843_s1 + $0x2d44] ss:$16 sps:$4 sm:$0xff]  }
 0x570   :  { %10714 = vmatprep.subr.bf16.mxu0 %v16338_v45  ;;  %11739 = vmatprep.subr.bf16.mxu1 %v16341_v58  ;;  %v16425_v45 = vld [vmem:[%s21843_s1 + $0x2d4c] ss:$16 sps:$4 sm:$0xff]   ;;  %v16420_v58 = vld [vmem:[%s21843_s1 + $0x2d40] ss:$16 sps:$4 sm:$0xff]  }
 0x573   :  { %10715 = vmatpush1.bf16.msra.mxu0 %v16336_v61  ;;  %11740 = vmatpush1.bf16.msra.mxu1 %v16339_v35  ;;  %v16423_v61 = vld [vmem:[%s21843_s1 + $0x2d48] ss:$16 sps:$4 sm:$0xff]   ;;  %v16428_v35 = vld [vmem:[%s21843_s1 + $0x2d64] ss:$16 sps:$4 sm:$0xff]  }
 0x574   :  { %10716 = vmatprep.subr.bf16.mxu0 %v16344_v62  ;;  %11741 = vmatprep.subr.bf16.mxu1 %v16347_v44  ;;  %v16431_v62 = vld [vmem:[%s21843_s1 + $0x2d6c] ss:$16 sps:$4 sm:$0xff]   ;;  %v16426_v44 = vld [vmem:[%s21843_s1 + $0x2d60] ss:$16 sps:$4 sm:$0xff]  }
 0x577   :  { %10717 = vmatpush1.bf16.msra.mxu0 %v16342_v0  ;;  %11742 = vmatpush1.bf16.msra.mxu1 %v16345_v47  ;;  %v16429_v0 = vld [vmem:[%s21843_s1 + $0x2d68] ss:$16 sps:$4 sm:$0xff]   ;;  %v16434_v47 = vld [vmem:[%s21843_s1 + $0x2d84] ss:$16 sps:$4 sm:$0xff]  }
 0x578   :  { %10718 = vmatprep.subr.bf16.mxu0 %v16350_v1  ;;  %11743 = vmatprep.subr.bf16.mxu1 %v16353_v2  ;;  %v16437_v1 = vld [vmem:[%s21843_s1 + $0x2d8c] ss:$16 sps:$4 sm:$0xff]   ;;  %v16432_v2 = vld [vmem:[%s21843_s1 + $0x2d80] ss:$16 sps:$4 sm:$0xff]  }
 0x57b   :  { %10719 = vmatpush1.bf16.msra.mxu0 %v16348_v57  ;;  %11744 = vmatpush1.bf16.msra.mxu1 %v16351_v5  ;;  %v16440_v57 = vld [vmem:[%s21843_s1 + $0x2da4] ss:$16 sps:$4 sm:$0xff]   ;;  %v16443_v5 = vld [vmem:[%s21843_s1 + $0x2dac] ss:$16 sps:$4 sm:$0xff]  }
 0x57c   :  { %10720 = vmatprep.subr.bf16.mxu0 %v16356_v60  ;;  %11745 = vmatprep.subr.bf16.mxu1 %v16359_v54  ;;  %v16438_v60 = vld [vmem:[%s21843_s1 + $0x2da0] ss:$16 sps:$4 sm:$0xff]   ;;  %v16441_v54 = vld [vmem:[%s21843_s1 + $0x2da8] ss:$16 sps:$4 sm:$0xff]  }
 0x57f   :  { %10721 = vmatpush1.bf16.msra.mxu0 %v16354_v10  ;;  %11746 = vmatpush1.bf16.msra.mxu1 %v16357_v48  ;;  %v16446_v10 = vld [vmem:[%s21843_s1 + $0x2dc4] ss:$16 sps:$4 sm:$0xff]   ;;  %v16449_v48 = vld [vmem:[%s21843_s1 + $0x2dcc] ss:$16 sps:$4 sm:$0xff]  }
 0x580   :  { %10731 = vmatprep.subr.bf16.mxu0 %v16362_v11  ;;  %11756 = vmatprep.subr.bf16.mxu1 %v16365_v63  ;;  %v16444_v11 = vld [vmem:[%s21843_s1 + $0x2dc0] ss:$16 sps:$4 sm:$0xff]   ;;  %v16447_v63 = vld [vmem:[%s21843_s1 + $0x2dc8] ss:$16 sps:$4 sm:$0xff]  }
 0x582   :  { %10723 = vmatmul.mubr.bf16.vlgmr.msra.gmra.mrb[0].mxu0 %v1922_v3  ;;  %11748 = vmatmul.mubr.bf16.vlgmr.msra.gmra.mrb[0].mxu1 %v1922_v3  ;;  %v16455_v3 = vld [vmem:[%s21843_s1 + $0x2dec] ss:$16 sps:$4 sm:$0xff]  }
 0x583   :  { %10732 = vmatpush1.bf16.msra.mxu0 %v16360_v52  ;;  %11757 = vmatpush1.bf16.msra.mxu1 %v16363_v15  ;;  %v16450_v52 = vld [vmem:[%s21843_s1 + $0x2de0] ss:$16 sps:$4 sm:$0xff]   ;;  %v16453_v15 = vld [vmem:[%s21843_s1 + $0x2de8] ss:$16 sps:$4 sm:$0xff]  }
 0x584   :  { %10733 = vmatprep.subr.bf16.mxu0 %v16368_v7  ;;  %11758 = vmatprep.subr.bf16.mxu1 %v16371_v6  ;;  %v16459_v7 = vld [vmem:[%s21843_s1 + $0x2e04] ss:$16 sps:$4 sm:$0xff]   ;;  %v16462_v6 = vld [vmem:[%s21843_s1 + $0x2e0c] ss:$16 sps:$4 sm:$0xff]  }
 0x585   :  { %10763 = vmatprep.mubr.bf16.mxu0 %v21217_v16  ;;  %11788 = vmatprep.mubr.bf16.mxu1 %v21217_v16 }
 0x587   :  { %10734 = vmatpush1.bf16.msra.mxu0 %v16366_v17  ;;  %11759 = vmatpush1.bf16.msra.mxu1 %v16369_v8  ;;  %v21403_v17 = vrot.slane %v21186_v9, %v16851_v49  ;;  %v16457_v8 = vld [vmem:[%s21843_s1 + $0x2e00] ss:$16 sps:$4 sm:$0xff]   ;;  %v16468_v9 = vld [vmem:[%s21843_s1 + $0x2e2c] ss:$16 sps:$4 sm:$0xff]  }
 0x588   :  { %10735 = vmatprep.subr.bf16.mxu0 %v16374_v20  ;;  %11760 = vmatprep.subr.bf16.mxu1 %v16377_v22  ;;  %v16460_v20 = vld [vmem:[%s21843_s1 + $0x2e08] ss:$16 sps:$4 sm:$0xff]   ;;  %v16465_v22 = vld [vmem:[%s21843_s1 + $0x2e24] ss:$16 sps:$4 sm:$0xff]  }
 0x58b   :  { %10736 = vmatpush1.bf16.msra.mxu0 %v16372_v4  ;;  %11761 = vmatpush1.bf16.msra.mxu1 %v16375_v24  ;;  %v1925_v4 = vcombine.high %v21217_v16, %v21217_v16  ;;  %v16463_v24 = vld [vmem:[%s21843_s1 + $0x2e20] ss:$16 sps:$4 sm:$0xff]   ;;  %v16471_v16 = vld [vmem:[%s21843_s1 + $0x2e44] ss:$16 sps:$4 sm:$0xff]  }
 0x58c   :  { %10737 = vmatprep.subr.bf16.mxu0 %v16380_v13  ;;  %11762 = vmatprep.subr.bf16.mxu1 %v16383_v27  ;;  %v16466_v13 = vld [vmem:[%s21843_s1 + $0x2e28] ss:$16 sps:$4 sm:$0xff]   ;;  %v16474_v27 = vld [vmem:[%s21843_s1 + $0x2e4c] ss:$16 sps:$4 sm:$0xff]  }
 0x58f   :  { %10738 = vmatpush1.bf16.msra.mxu0 %v16378_v18  ;;  %11763 = vmatpush1.bf16.msra.mxu1 %v16381_v28  ;;  %v16469_v18 = vld [vmem:[%s21843_s1 + $0x2e40] ss:$16 sps:$4 sm:$0xff]   ;;  %v16472_v28 = vld [vmem:[%s21843_s1 + $0x2e48] ss:$16 sps:$4 sm:$0xff]  }
 0x590   :  { %10739 = vmatprep.subr.bf16.mxu0 %v16386_v14  ;;  %11764 = vmatprep.subr.bf16.mxu1 %v16389_v30  ;;  %v16477_v14 = vld [vmem:[%s21843_s1 + $0x2e64] ss:$16 sps:$4 sm:$0xff]   ;;  %v16480_v30 = vld [vmem:[%s21843_s1 + $0x2e6c] ss:$16 sps:$4 sm:$0xff]  }
 0x593   :  { %10740 = vmatpush1.bf16.msra.mxu0 %v16384_v19  ;;  %11765 = vmatpush1.bf16.msra.mxu1 %v16387_v32  ;;  %v16475_v19 = vld [vmem:[%s21843_s1 + $0x2e60] ss:$16 sps:$4 sm:$0xff]   ;;  %v16478_v32 = vld [vmem:[%s21843_s1 + $0x2e68] ss:$16 sps:$4 sm:$0xff]  }
 0x594   :  { %10741 = vmatprep.subr.bf16.mxu0 %v16392_v26  ;;  %11766 = vmatprep.subr.bf16.mxu1 %v16395_v23  ;;  %v16483_v26 = vld [vmem:[%s21843_s1 + $0x2e84] ss:$16 sps:$4 sm:$0xff]   ;;  %v16486_v23 = vld [vmem:[%s21843_s1 + $0x2e8c] ss:$16 sps:$4 sm:$0xff]  }
 0x597   :  { %10742 = vmatpush1.bf16.msra.mxu0 %v16390_v36  ;;  %11767 = vmatpush1.bf16.msra.mxu1 %v16393_v37  ;;  %v16481_v36 = vld [vmem:[%s21843_s1 + $0x2e80] ss:$16 sps:$4 sm:$0xff]   ;;  %v16484_v37 = vld [vmem:[%s21843_s1 + $0x2e88] ss:$16 sps:$4 sm:$0xff]  }
 0x598   :  { %10743 = vmatprep.subr.bf16.mxu0 %v16398_v21  ;;  %11768 = vmatprep.subr.bf16.mxu1 %v16401_v31  ;;  %v16489_v21 = vld [vmem:[%s21843_s1 + $0x2ea4] ss:$16 sps:$4 sm:$0xff]   ;;  %v16492_v31 = vld [vmem:[%s21843_s1 + $0x2eac] ss:$16 sps:$4 sm:$0xff]  }
 0x59b   :  { %10744 = vmatpush1.bf16.msra.mxu0 %v16396_v39  ;;  %11769 = vmatpush1.bf16.msra.mxu1 %v16399_v40  ;;  %v16487_v39 = vld [vmem:[%s21843_s1 + $0x2ea0] ss:$16 sps:$4 sm:$0xff]   ;;  %v16490_v40 = vld [vmem:[%s21843_s1 + $0x2ea8] ss:$16 sps:$4 sm:$0xff]  }
 0x59c   :  { %10745 = vmatprep.subr.bf16.mxu0 %v16404_v41  ;;  %11770 = vmatprep.subr.bf16.mxu1 %v16407_v25  ;;  %v16495_v41 = vld [vmem:[%s21843_s1 + $0x2ec4] ss:$16 sps:$4 sm:$0xff]   ;;  %v16498_v25 = vld [vmem:[%s21843_s1 + $0x2ecc] ss:$16 sps:$4 sm:$0xff]  }
 0x59f   :  { %10746 = vmatpush1.bf16.msra.mxu0 %v16402_v43  ;;  %11771 = vmatpush1.bf16.msra.mxu1 %v16405_v46  ;;  %v16493_v43 = vld [vmem:[%s21843_s1 + $0x2ec0] ss:$16 sps:$4 sm:$0xff]   ;;  %v16496_v46 = vld [vmem:[%s21843_s1 + $0x2ec8] ss:$16 sps:$4 sm:$0xff]  }
 0x5a0   :  { %10747 = vmatprep.subr.bf16.mxu0 %v16410_v29  ;;  %11772 = vmatprep.subr.bf16.mxu1 %v16413_v50  ;;  %v16501_v29 = vld [vmem:[%s21843_s1 + $0x2ee4] ss:$16 sps:$4 sm:$0xff]   ;;  %v16504_v50 = vld [vmem:[%s21843_s1 + $0x2eec] ss:$16 sps:$4 sm:$0xff]  }
 0x5a3   :  { %10748 = vmatpush1.bf16.msra.mxu0 %v16408_v33  ;;  %11773 = vmatpush1.bf16.msra.mxu1 %v16411_v51  ;;  %v16499_v33 = vld [vmem:[%s21843_s1 + $0x2ee0] ss:$16 sps:$4 sm:$0xff]   ;;  %v16502_v51 = vld [vmem:[%s21843_s1 + $0x2ee8] ss:$16 sps:$4 sm:$0xff]  }
 0x5a4   :  { %10749 = vmatprep.subr.bf16.mxu0 %v16416_v53  ;;  %11774 = vmatprep.subr.bf16.mxu1 %v16419_v38  ;;  %v16507_v53 = vld [vmem:[%s21843_s1 + $0x2f04] ss:$16 sps:$4 sm:$0xff]   ;;  %v16510_v38 = vld [vmem:[%s21843_s1 + $0x2f0c] ss:$16 sps:$4 sm:$0xff]  }
 0x5a7   :  { %10750 = vmatpush1.bf16.msra.mxu0 %v16414_v34  ;;  %11775 = vmatpush1.bf16.msra.mxu1 %v16417_v55  ;;  %v16505_v34 = vld [vmem:[%s21843_s1 + $0x2f00] ss:$16 sps:$4 sm:$0xff]   ;;  %v16508_v55 = vld [vmem:[%s21843_s1 + $0x2f08] ss:$16 sps:$4 sm:$0xff]  }
 0x5a8   :  { %10751 = vmatprep.subr.bf16.mxu0 %v16422_v56  ;;  %11776 = vmatprep.subr.bf16.mxu1 %v16425_v45  ;;  %v16513_v56 = vld [vmem:[%s21843_s1 + $0x2f24] ss:$16 sps:$4 sm:$0xff]   ;;  %v16516_v45 = vld [vmem:[%s21843_s1 + $0x2f2c] ss:$16 sps:$4 sm:$0xff]  }
 0x5ab   :  { %10752 = vmatpush1.bf16.msra.mxu0 %v16420_v58  ;;  %11777 = vmatpush1.bf16.msra.mxu1 %v16423_v61  ;;  %v16511_v58 = vld [vmem:[%s21843_s1 + $0x2f20] ss:$16 sps:$4 sm:$0xff]   ;;  %v16514_v61 = vld [vmem:[%s21843_s1 + $0x2f28] ss:$16 sps:$4 sm:$0xff]  }
 0x5ac   :  { %10753 = vmatprep.subr.bf16.mxu0 %v16428_v35  ;;  %11778 = vmatprep.subr.bf16.mxu1 %v16431_v62  ;;  %v16519_v35 = vld [vmem:[%s21843_s1 + $0x2f44] ss:$16 sps:$4 sm:$0xff]   ;;  %v16522_v62 = vld [vmem:[%s21843_s1 + $0x2f4c] ss:$16 sps:$4 sm:$0xff]  }
 0x5af   :  { %10754 = vmatpush1.bf16.msra.mxu0 %v16426_v44  ;;  %11779 = vmatpush1.bf16.msra.mxu1 %v16429_v0  ;;  %v16517_v44 = vld [vmem:[%s21843_s1 + $0x2f40] ss:$16 sps:$4 sm:$0xff]   ;;  %v16520_v0 = vld [vmem:[%s21843_s1 + $0x2f48] ss:$16 sps:$4 sm:$0xff]  }
 0x5b0   :  { %10755 = vmatprep.subr.bf16.mxu0 %v16434_v47  ;;  %11780 = vmatprep.subr.bf16.mxu1 %v16437_v1  ;;  %v16525_v47 = vld [vmem:[%s21843_s1 + $0x2f64] ss:$16 sps:$4 sm:$0xff]   ;;  %v16528_v1 = vld [vmem:[%s21843_s1 + $0x2f6c] ss:$16 sps:$4 sm:$0xff]  }
 0x5b3   :  { %10756 = vmatpush1.bf16.msra.mxu0 %v16432_v2  ;;  %11781 = vmatpush1.bf16.msra.mxu1 %v16435_v59  ;;  %v16523_v2 = vld [vmem:[%s21843_s1 + $0x2f60] ss:$16 sps:$4 sm:$0xff]   ;;  %v16526_v59 = vld [vmem:[%s21843_s1 + $0x2f68] ss:$16 sps:$4 sm:$0xff]  }
 0x5b4   :  { %10757 = vmatprep.subr.bf16.mxu0 %v16440_v57  ;;  %11782 = vmatprep.subr.bf16.mxu1 %v16443_v5  ;;  %v16531_v57 = vld [vmem:[%s21843_s1 + $0x2f84] ss:$16 sps:$4 sm:$0xff]   ;;  %v16534_v5 = vld [vmem:[%s21843_s1 + $0x2f8c] ss:$16 sps:$4 sm:$0xff]  }
 0x5b7   :  { %10758 = vmatpush1.bf16.msra.mxu0 %v16438_v60  ;;  %11783 = vmatpush1.bf16.msra.mxu1 %v16441_v54  ;;  %v16529_v60 = vld [vmem:[%s21843_s1 + $0x2f80] ss:$16 sps:$4 sm:$0xff]   ;;  %v16532_v54 = vld [vmem:[%s21843_s1 + $0x2f88] ss:$16 sps:$4 sm:$0xff]  }
 0x5b8   :  { %10759 = vmatprep.subr.bf16.mxu0 %v16446_v10  ;;  %11784 = vmatprep.subr.bf16.mxu1 %v16449_v48  ;;  %v16537_v10 = vld [vmem:[%s21843_s1 + $0x2fa4] ss:$16 sps:$4 sm:$0xff]   ;;  %v16540_v48 = vld [vmem:[%s21843_s1 + $0x2fac] ss:$16 sps:$4 sm:$0xff]  }
 0x5bb   :  { %10760 = vmatpush1.bf16.msra.mxu0 %v16444_v11  ;;  %11785 = vmatpush1.bf16.msra.mxu1 %v16447_v63  ;;  %v16535_v11 = vld [vmem:[%s21843_s1 + $0x2fa0] ss:$16 sps:$4 sm:$0xff]   ;;  %v16538_v63 = vld [vmem:[%s21843_s1 + $0x2fa8] ss:$16 sps:$4 sm:$0xff]  }
 0x5bc   :  { %10761 = vmatprep.subr.bf16.mxu0 %v16452_v12  ;;  %11786 = vmatprep.subr.bf16.mxu1 %v16455_v3  ;;  %v16543_v12 = vld [vmem:[%s21843_s1 + $0x2fc4] ss:$16 sps:$4 sm:$0xff]   ;;  %v16546_v3 = vld [vmem:[%s21843_s1 + $0x2fcc] ss:$16 sps:$4 sm:$0xff]  }
 0x5bf   :  { %10762 = vmatpush1.bf16.msra.mxu0 %v16450_v52  ;;  %11787 = vmatpush1.bf16.msra.mxu1 %v16453_v15  ;;  %v16541_v52 = vld [vmem:[%s21843_s1 + $0x2fc0] ss:$16 sps:$4 sm:$0xff]   ;;  %v16544_v15 = vld [vmem:[%s21843_s1 + $0x2fc8] ss:$16 sps:$4 sm:$0xff]  }
 0x5c0   :  { %10772 = vmatprep.subr.bf16.mxu0 %v16459_v7  ;;  %11797 = vmatprep.subr.bf16.mxu1 %v16462_v6  ;;  %v16549_v7 = vld [vmem:[%s21843_s1 + $0x2fe4] ss:$16 sps:$4 sm:$0xff]   ;;  %v16552_v6 = vld [vmem:[%s21843_s1 + $0x2fec] ss:$16 sps:$4 sm:$0xff]  }
 0x5c2   :  { %10764 = vmatmul.mubr.bf16.vlgmr.msra.gmra.mrb[0].mxu0 %v21403_v17  ;;  %11789 = vmatmul.mubr.bf16.vlgmr.msra.gmra.mrb[0].mxu1 %v21403_v17 }
 0x5c3   :  { %10773 = vmatpush1.bf16.msra.mxu0 %v16457_v8  ;;  %11798 = vmatpush1.bf16.msra.mxu1 %v16460_v20  ;;  %v16547_v8 = vld [vmem:[%s21843_s1 + $0x2fe0] ss:$16 sps:$4 sm:$0xff]   ;;  %v16550_v20 = vld [vmem:[%s21843_s1 + $0x2fe8] ss:$16 sps:$4 sm:$0xff]  }
 0x5c4   :  { %10774 = vmatprep.subr.bf16.mxu0 %v16465_v22  ;;  %11799 = vmatprep.subr.bf16.mxu1 %v16468_v9  ;;  %v16555_v22 = vld [vmem:[%s21843_s1 + $0x3004] ss:$16 sps:$4 sm:$0xff]   ;;  %v16558_v9 = vld [vmem:[%s21843_s1 + $0x300c] ss:$16 sps:$4 sm:$0xff]  }
 0x5c5   :  { %10804 = vmatprep.mubr.bf16.mxu0 %v1925_v4  ;;  %11829 = vmatprep.mubr.bf16.mxu1 %v1925_v4  ;;  %v1923_v4 = vcombine.high %v21403_v17, %v21403_v17  ;;  %v16564_v17 = vld [vmem:[%s21843_s1 + $0x302c] ss:$16 sps:$4 sm:$0xff]  }
 0x5c7   :  { %10775 = vmatpush1.bf16.msra.mxu0 %v16463_v24  ;;  %11800 = vmatpush1.bf16.msra.mxu1 %v16466_v13  ;;  %v16553_v24 = vld [vmem:[%s21843_s1 + $0x3000] ss:$16 sps:$4 sm:$0xff]   ;;  %v16556_v13 = vld [vmem:[%s21843_s1 + $0x3008] ss:$16 sps:$4 sm:$0xff]  }
 0x5c8   :  { %10776 = vmatprep.subr.bf16.mxu0 %v16471_v16  ;;  %11801 = vmatprep.subr.bf16.mxu1 %v16474_v27  ;;  %v16561_v16 = vld [vmem:[%s21843_s1 + $0x3024] ss:$16 sps:$4 sm:$0xff]   ;;  %v16559_v27 = vld [vmem:[%s21843_s1 + $0x3020] ss:$16 sps:$4 sm:$0xff]  }
 0x5cb   :  { %10777 = vmatpush1.bf16.msra.mxu0 %v16469_v18  ;;  %11802 = vmatpush1.bf16.msra.mxu1 %v16472_v28  ;;  %v16562_v18 = vld [vmem:[%s21843_s1 + $0x3028] ss:$16 sps:$4 sm:$0xff]   ;;  %v16567_v28 = vld [vmem:[%s21843_s1 + $0x3044] ss:$16 sps:$4 sm:$0xff]  }
 0x5cc   :  { %10778 = vmatprep.subr.bf16.mxu0 %v16477_v14  ;;  %11803 = vmatprep.subr.bf16.mxu1 %v16480_v30  ;;  %v16570_v14 = vld [vmem:[%s21843_s1 + $0x304c] ss:$16 sps:$4 sm:$0xff]   ;;  %v16672_v30 = vmov 0  }
 0x5cf   :  { %10779 = vmatpush1.bf16.msra.mxu0 %v16475_v19  ;;  %11804 = vmatpush1.bf16.msra.mxu1 %v16478_v32  ;;  %v16565_v19 = vld [vmem:[%s21843_s1 + $0x3040] ss:$16 sps:$4 sm:$0xff]   ;;  %v16568_v32 = vld [vmem:[%s21843_s1 + $0x3048] ss:$16 sps:$4 sm:$0xff]  }
 0x5d0   :  { %10780 = vmatprep.subr.bf16.mxu0 %v16483_v26  ;;  %11805 = vmatprep.subr.bf16.mxu1 %v16486_v23  ;;  %v16573_v26 = vld [vmem:[%s21843_s1 + $0x3064] ss:$16 sps:$4 sm:$0xff]   ;;  %v16576_v23 = vld [vmem:[%s21843_s1 + $0x306c] ss:$16 sps:$4 sm:$0xff]  }
 0x5d3   :  { %10781 = vmatpush1.bf16.msra.mxu0 %v16481_v36  ;;  %11806 = vmatpush1.bf16.msra.mxu1 %v16484_v37  ;;  %v16571_v36 = vld [vmem:[%s21843_s1 + $0x3060] ss:$16 sps:$4 sm:$0xff]   ;;  %v16574_v37 = vld [vmem:[%s21843_s1 + $0x3068] ss:$16 sps:$4 sm:$0xff]  }
 0x5d4   :  { %10782 = vmatprep.subr.bf16.mxu0 %v16489_v21  ;;  %11807 = vmatprep.subr.bf16.mxu1 %v16492_v31  ;;  %v16579_v21 = vld [vmem:[%s21843_s1 + $0x3084] ss:$16 sps:$4 sm:$0xff]   ;;  %v16582_v31 = vld [vmem:[%s21843_s1 + $0x308c] ss:$16 sps:$4 sm:$0xff]  }
 0x5d7   :  { %10783 = vmatpush1.bf16.msra.mxu0 %v16487_v39  ;;  %11808 = vmatpush1.bf16.msra.mxu1 %v16490_v40  ;;  %v16577_v39 = vld [vmem:[%s21843_s1 + $0x3080] ss:$16 sps:$4 sm:$0xff]   ;;  %v16580_v40 = vld [vmem:[%s21843_s1 + $0x3088] ss:$16 sps:$4 sm:$0xff]  }
 0x5d8   :  { %10784 = vmatprep.subr.bf16.mxu0 %v16495_v41  ;;  %11809 = vmatprep.subr.bf16.mxu1 %v16498_v25  ;;  %v16585_v41 = vld [vmem:[%s21843_s1 + $0x30a4] ss:$16 sps:$4 sm:$0xff]   ;;  %v16588_v25 = vld [vmem:[%s21843_s1 + $0x30ac] ss:$16 sps:$4 sm:$0xff]  }
 0x5db   :  { %10785 = vmatpush1.bf16.msra.mxu0 %v16493_v43  ;;  %11810 = vmatpush1.bf16.msra.mxu1 %v16496_v46  ;;  %v16583_v43 = vld [vmem:[%s21843_s1 + $0x30a0] ss:$16 sps:$4 sm:$0xff]   ;;  %v16586_v46 = vld [vmem:[%s21843_s1 + $0x30a8] ss:$16 sps:$4 sm:$0xff]  }
 0x5dc   :  { %10786 = vmatprep.subr.bf16.mxu0 %v16501_v29  ;;  %11811 = vmatprep.subr.bf16.mxu1 %v16504_v50  ;;  %v16591_v29 = vld [vmem:[%s21843_s1 + $0x30c4] ss:$16 sps:$4 sm:$0xff]   ;;  %v16594_v50 = vld [vmem:[%s21843_s1 + $0x30cc] ss:$16 sps:$4 sm:$0xff]  }
 0x5df   :  { %10787 = vmatpush1.bf16.msra.mxu0 %v16499_v33  ;;  %11812 = vmatpush1.bf16.msra.mxu1 %v16502_v51  ;;  %v16589_v33 = vld [vmem:[%s21843_s1 + $0x30c0] ss:$16 sps:$4 sm:$0xff]   ;;  %v16592_v51 = vld [vmem:[%s21843_s1 + $0x30c8] ss:$16 sps:$4 sm:$0xff]  }
 0x5e0   :  { %10788 = vmatprep.subr.bf16.mxu0 %v16507_v53  ;;  %11813 = vmatprep.subr.bf16.mxu1 %v16510_v38  ;;  %v16597_v53 = vld [vmem:[%s21843_s1 + $0x30e4] ss:$16 sps:$4 sm:$0xff]   ;;  %v16600_v38 = vld [vmem:[%s21843_s1 + $0x30ec] ss:$16 sps:$4 sm:$0xff]  }
 0x5e3   :  { %10789 = vmatpush1.bf16.msra.mxu0 %v16505_v34  ;;  %11814 = vmatpush1.bf16.msra.mxu1 %v16508_v55  ;;  %v16595_v34 = vld [vmem:[%s21843_s1 + $0x30e0] ss:$16 sps:$4 sm:$0xff]   ;;  %v16598_v55 = vld [vmem:[%s21843_s1 + $0x30e8] ss:$16 sps:$4 sm:$0xff]  }
 0x5e4   :  { %10790 = vmatprep.subr.bf16.mxu0 %v16513_v56  ;;  %11815 = vmatprep.subr.bf16.mxu1 %v16516_v45  ;;  %v12358_v56 = vld.sshfl [vmem:[%s21842_s0 + $0x30] sm:$0x1 pattern:$0x75316420]  ;;  %v16601_v45 = vld [vmem:[%s21845_s3 + $0x40] sm:$0xff]  }
 0x5e7   :  { %10791 = vmatpush1.bf16.msra.mxu0 %v16511_v58  ;;  %11816 = vmatpush1.bf16.msra.mxu1 %v16514_v61  ;;  %v16602_v58 = vld [vmem:[%s21845_s3 + $0xc0] sm:$0xff]   ;;  %v1939_v61 = vrot.slane %v12358_v56, %v16851_v49  ;;  %v16606_v49 = vld [vmem:[%s21845_s3 + $0xc8] sm:$0xff]  }
 0x5e8   :  { %10792 = vmatprep.subr.bf16.mxu0 %v16519_v35  ;;  %11817 = vmatprep.subr.bf16.mxu1 %v16522_v62  ;;  %v16603_v35 = vld [vmem:[%s21845_s3] sm:$0xff]  }
 0x5e9   :  { %v16604_v62 = vld [vmem:[%s21845_s3 + $0x80] sm:$0xff]  }
 0x5eb   :  { %10793 = vmatpush1.bf16.msra.mxu0 %v16517_v44  ;;  %11818 = vmatpush1.bf16.msra.mxu1 %v16520_v0  ;;  %v16605_v44 = vld [vmem:[%s21845_s3 + $0x48] sm:$0xff]  }
 0x5ec   :  { %10794 = vmatprep.subr.bf16.mxu0 %v16525_v47  ;;  %11819 = vmatprep.subr.bf16.mxu1 %v16528_v1  ;;  %v16607_v0 = vld [vmem:[%s21845_s3 + $0x8] sm:$0xff]   ;;  %v16609_v1 = vld [vmem:[%s21845_s3 + $0x50] sm:$0xff]  }
 0x5ed   :  { %v16608_v47 = vld [vmem:[%s21845_s3 + $0x88] sm:$0xff]  }
 0x5ef   :  { %10795 = vmatpush1.bf16.msra.mxu0 %v16523_v2  ;;  %11820 = vmatpush1.bf16.msra.mxu1 %v16526_v59  ;;  %v16610_v2 = vld [vmem:[%s21845_s3 + $0xd0] sm:$0xff]  }
 0x5f0   :  { %10796 = vmatprep.subr.bf16.mxu0 %v16531_v57  ;;  %11821 = vmatprep.subr.bf16.mxu1 %v16534_v5  ;;  %v16611_v59 = vld [vmem:[%s21845_s3 + $0x10] sm:$0xff]   ;;  %v16613_v5 = vld [vmem:[%s21845_s3 + $0x58] sm:$0xff]  }
 0x5f1   :  { %v16612_v57 = vld [vmem:[%s21845_s3 + $0x90] sm:$0xff]  }
 0x5f3   :  { %10797 = vmatpush1.bf16.msra.mxu0 %v16529_v60  ;;  %11822 = vmatpush1.bf16.msra.mxu1 %v16532_v54  ;;  %v16614_v60 = vld [vmem:[%s21845_s3 + $0xd8] sm:$0xff]  }
 0x5f4   :  { %10798 = vmatprep.subr.bf16.mxu0 %v16537_v10  ;;  %11823 = vmatprep.subr.bf16.mxu1 %v16540_v48  ;;  %v16615_v54 = vld [vmem:[%s21845_s3 + $0x18] sm:$0xff]   ;;  %v16617_v48 = vld [vmem:[%s21845_s3 + $0x60] sm:$0xff]  }
 0x5f5   :  { %v16616_v10 = vld [vmem:[%s21845_s3 + $0x98] sm:$0xff]  }
 0x5f7   :  { %10799 = vmatpush1.bf16.msra.mxu0 %v16535_v11  ;;  %11824 = vmatpush1.bf16.msra.mxu1 %v16538_v63  ;;  %v16618_v11 = vld [vmem:[%s21845_s3 + $0xe0] sm:$0xff]  }
 0x5f8   :  { %10800 = vmatprep.subr.bf16.mxu0 %v16543_v12  ;;  %11825 = vmatprep.subr.bf16.mxu1 %v16546_v3  ;;  %v16619_v63 = vld [vmem:[%s21845_s3 + $0x20] sm:$0xff]   ;;  %v16621_v3 = vld [vmem:[%s21845_s3 + $0x68] sm:$0xff]  }
 0x5f9   :  { %v16620_v12 = vld [vmem:[%s21845_s3 + $0xa0] sm:$0xff]  }
 0x5fb   :  { %10801 = vmatpush1.bf16.msra.mxu0 %v16541_v52  ;;  %11826 = vmatpush1.bf16.msra.mxu1 %v16544_v15  ;;  %v16622_v52 = vld [vmem:[%s21845_s3 + $0xe8] sm:$0xff]  }
 0x5fc   :  { %10802 = vmatprep.subr.bf16.mxu0 %v16549_v7  ;;  %11827 = vmatprep.subr.bf16.mxu1 %v16552_v6  ;;  %v16623_v15 = vld [vmem:[%s21845_s3 + $0x28] sm:$0xff]   ;;  %v16625_v6 = vld [vmem:[%s21845_s3 + $0x70] sm:$0xff]  }
 0x5fd   :  { %v16624_v7 = vld [vmem:[%s21845_s3 + $0xa8] sm:$0xff]  }
 0x5ff   :  { %10803 = vmatpush1.bf16.msra.mxu0 %v16547_v8  ;;  %11828 = vmatpush1.bf16.msra.mxu1 %v16550_v20  ;;  %v16626_v8 = vld [vmem:[%s21845_s3 + $0xf0] sm:$0xff]  }
 0x600   :  { %10813 = vmatprep.subr.bf16.mxu0 %v16555_v22  ;;  %11838 = vmatprep.subr.bf16.mxu1 %v16558_v9  ;;  %v16627_v20 = vld [vmem:[%s21845_s3 + $0x30] sm:$0xff]   ;;  %v16629_v9 = vld [vmem:[%s21845_s3 + $0x78] sm:$0xff]  }
 0x601   :  { %v16628_v22 = vld [vmem:[%s21845_s3 + $0xb0] sm:$0xff]  }
 0x602   :  { %10805 = vmatmul.mubr.bf16.vlgmr.msra.gmra.mrb[0].mxu0 %v1923_v4  ;;  %11830 = vmatmul.mubr.bf16.vlgmr.msra.gmra.mrb[0].mxu1 %v1923_v4  ;;  %v16630_v4 = vld [vmem:[%s21845_s3 + $0xf8] sm:$0xff]  }
 0x603   :  { %10814 = vmatpush1.bf16.msra.mxu0 %v16553_v24  ;;  %11839 = vmatpush1.bf16.msra.mxu1 %v16556_v13  ;;  %v16631_v24 = vld [vmem:[%s21845_s3 + $0x38] sm:$0xff]  }
 0x604   :  { %10815 = vmatprep.subr.bf16.mxu0 %v16561_v16  ;;  %11840 = vmatprep.subr.bf16.mxu1 %v16564_v17  ;;  %v16632_v13 = vld [vmem:[%s21845_s3 + $0xb8] sm:$0xff]   ;;  %v16673_v16 = vmov 0.0   ;;  %v1607_v17 = vsub.s32 0, %v16833_v42 }
 0x605   :  { %10845 = vmatprep.mubr.bf16.mxu0 %v16672_v30  ;;  %11870 = vmatprep.mubr.bf16.mxu1 %v16672_v30 }
 0x607   :  { %10816 = vmatpush1.bf16.msra.mxu0 %v16559_v27  ;;  %11841 = vmatpush1.bf16.msra.mxu1 %v16562_v18  ;;  %v1615_v27 = vsub.s32 2, %v16833_v42  ;;  %v1603_v18 = vld [vmem:[%s21844_s2] sm:$0xf] }
 0x608   :  { %10817 = vmatprep.subr.bf16.mxu0 %v16567_v28  ;;  %11842 = vmatprep.subr.bf16.mxu1 %v16570_v14  ;;  %v1611_v28 = vsub.s32 1, %v16833_v42  ;;  %v1619_v14 = vsub.s32 3, %v16833_v42  ;;  %v1608_v30 = vrot.slane %v1603_v18, %v1607_v17 }
 0x60b   :  { %10818 = vmatpush1.bf16.msra.mxu0 %v16565_v19  ;;  %11843 = vmatpush1.bf16.msra.mxu1 %v16568_v32  ;;  %v1616_v19 = vrot.slane %v1603_v18, %v1615_v27  ;;  %v1612_v32 = vrot.slane %v1603_v18, %v1611_v28 }
 0x60c   :  { %10819 = vmatprep.subr.bf16.mxu0 %v16573_v26  ;;  %11844 = vmatprep.subr.bf16.mxu1 %v16576_v23  ;;  %v1620_v26 = vrot.slane %v1603_v18, %v1619_v14 }
 0x60f   :  { %10820 = vmatpush1.bf16.msra.mxu0 %v16571_v36  ;;  %11845 = vmatpush1.bf16.msra.mxu1 %v16574_v37 }
 0x610   :  { %10821 = vmatprep.subr.bf16.mxu0 %v16579_v21  ;;  %11846 = vmatprep.subr.bf16.mxu1 %v16582_v31 }
 0x613   :  { %10822 = vmatpush1.bf16.msra.mxu0 %v16577_v39  ;;  %11847 = vmatpush1.bf16.msra.mxu1 %v16580_v40 }
 0x614   :  { %10823 = vmatprep.subr.bf16.mxu0 %v16585_v41  ;;  %11848 = vmatprep.subr.bf16.mxu1 %v16588_v25 }
 0x617   :  { %10824 = vmatpush1.bf16.msra.mxu0 %v16583_v43  ;;  %11849 = vmatpush1.bf16.msra.mxu1 %v16586_v46 }
 0x618   :  { %10825 = vmatprep.subr.bf16.mxu0 %v16591_v29  ;;  %11850 = vmatprep.subr.bf16.mxu1 %v16594_v50 }
 0x61b   :  { %10826 = vmatpush1.bf16.msra.mxu0 %v16589_v33  ;;  %11851 = vmatpush1.bf16.msra.mxu1 %v16592_v51 }
 0x61c   :  { %10827 = vmatprep.subr.bf16.mxu0 %v16597_v53  ;;  %11852 = vmatprep.subr.bf16.mxu1 %v16600_v38 }
 0x61f   :  { %10828 = vmatpush1.bf16.msra.mxu0 %v16595_v34  ;;  %11853 = vmatpush1.bf16.msra.mxu1 %v16598_v55  ;;  %v16633_v34 = vld [vmem:[%s21847_s5] sm:$0xff]  }
 0x620   :  { %13969 = vmatprep.subr.bf16.mxu0 %v16601_v45  ;;  %13991 = vmatprep.subr.bf16.mxu1 %v16602_v58  ;;  %v16634_v45 = vld [vmem:[%s21847_s5 + $0x8] sm:$0xff]   ;;  %v16635_v58 = vld [vmem:[%s21847_s5 + $0x10] sm:$0xff]  }
 0x622   :  { %10846 = vmatmul.mubr.bf16.vlgmr.msra.gmra.mrb[0].mxu0 %v1939_v61  ;;  %11871 = vmatmul.mubr.bf16.vlgmr.msra.gmra.mrb[0].mxu1 %v1939_v61  ;;  %v16636_v61 = vld [vmem:[%s21847_s5 + $0x18] sm:$0xff]  }
 0x623   :  { %13970 = vmatpush3.bf16.msra.mxu0 %v16603_v35  ;;  %13992 = vmatpush3.bf16.msra.mxu1 %v16604_v62  ;;  %v16637_v35 = vld [vmem:[%s21847_s5 + $0x20] sm:$0xff]   ;;  %v16638_v62 = vld [vmem:[%s21847_s5 + $0x28] sm:$0xff]  }
 0x624   :  { %13971 = vmatprep.subr.bf16.mxu0 %v16605_v44  ;;  %13993 = vmatprep.subr.bf16.mxu1 %v16606_v49  ;;  %v16639_v44 = vld [vmem:[%s21847_s5 + $0x30] sm:$0xff]   ;;  %v16640_v49 = vld [vmem:[%s21847_s5 + $0x38] sm:$0xff]  }
 0x627   :  { %13972 = vmatpush3.bf16.msra.mxu0 %v16607_v0  ;;  %13994 = vmatpush3.bf16.msra.mxu1 %v16608_v47 }
 0x628   :  { %13973 = vmatprep.subr.bf16.mxu0 %v16609_v1  ;;  %13995 = vmatprep.subr.bf16.mxu1 %v16610_v2  ;;  %v13927_v1 = vld [vmem:[%s21846_s4] ss:$0 sm:$0xff]  ;;  %s16647_s4 = scalar_lea.vmem %s12351_s13, 32 }
 0x629   :  { %p16648_p0 = scmp.ne.s32.totalorder %s12351_s13, %s16647_s4  ;;  %p16653_p2 = scmp.lt.s32.totalorder %s16647_s4, %s16647_s4 }
 0x62b   :  { %13974 = vmatpush3.bf16.msra.mxu0 %v16611_v59  ;;  %13996 = vmatpush3.bf16.msra.mxu1 %v16612_v57  ;;  %p16654_p3 = por %p16653_p2, %p16652_p1 }
 0x62c   :  { %13975 = vmatprep.subr.bf16.mxu0 %v16613_v5  ;;  %13997 = vmatprep.subr.bf16.mxu1 %v16614_v60 }
 0x62d   :  { %p16655_p4 = pnand %p16654_p3, %p16648_p0 }
 0x62f   :  { %13976 = vmatpush3.bf16.msra.mxu0 %v16615_v54  ;;  %13998 = vmatpush3.bf16.msra.mxu1 %v16616_v10 }
 0x630   :  { %13977 = vmatprep.subr.bf16.mxu0 %v16617_v48  ;;  %13999 = vmatprep.subr.bf16.mxu1 %v16618_v11 }
 0x633   :  { %13978 = vmatpush3.bf16.msra.mxu0 %v16619_v63  ;;  %14000 = vmatpush3.bf16.msra.mxu1 %v16620_v12 }
 0x634   :  { %13979 = vmatprep.subr.bf16.mxu0 %v16621_v3  ;;  %14001 = vmatprep.subr.bf16.mxu1 %v16622_v52  ;;  %v13960_v52 = vld [vmem:[%s21848_s6] ss:$0 sm:$0xff] }
 0x637   :  { %13980 = vmatpush3.bf16.msra.mxu0 %v16623_v15  ;;  %14002 = vmatpush3.bf16.msra.mxu1 %v16624_v7 }
 0x638   :  { %13981 = vmatprep.subr.bf16.mxu0 %v16625_v6  ;;  %14003 = vmatprep.subr.bf16.mxu1 %v16626_v8 }
 0x63b   :  { %13982 = vmatpush3.bf16.msra.mxu0 %v16627_v20  ;;  %14004 = vmatpush3.bf16.msra.mxu1 %v16628_v22 }
 0x63c   :  { %13983 = vmatprep.subr.bf16.mxu0 %v16629_v9  ;;  %14005 = vmatprep.subr.bf16.mxu1 %v16630_v4 }
 0x63f   :  { %13984 = vmatpush3.bf16.msra.mxu0 %v16631_v24  ;;  %14006 = vmatpush3.bf16.msra.mxu1 %v16632_v13 }
 0x640   :  { %14022 = vmatprep.subr.bf16.mxu0 %v16673_v16 }
 0x6f5   :  { %v10847_v23 = vpop.f32.mrb[0].mxu0  ;;  %v11872_v36 = vpop.f32.mrb[0].mxu1 }
 0x6f6   :  { %v14042_v37 = vadd.f32 %v10847_v23, %v1608_v30  ;;  %v14044_v21 = vadd.f32 %v11872_v36, %v1616_v19  ;;  %v10849_v31 = vpop.f32.mrb[1].mxu0  ;;  %v11874_v39 = vpop.f32.mrb[1].mxu1 }
 0x6f7   :  { %v14043_v40 = vadd.f32 %v10849_v31, %v1612_v32  ;;  %v14045_v41 = vadd.f32 %v11874_v39, %v1620_v26  ;;  %v10851_v25 = vpop.f32.mrb[2].mxu0  ;;  %v11876_v43 = vpop.f32.mrb[2].mxu1 }
 0x6f8   :  { %v11879_v46 = vmax.f32 %v14042_v37, 0.0  ;;  %v11881_v29 = vmax.f32 %v14044_v21, 0.0  ;;  %v10852_v50 = vpop.f32.mrb[3].mxu0  ;;  %v11877_v33 = vpop.f32.mrb[3].mxu1 }
 0x6f9   :  { %v11880_v51 = vmax.f32 %v14043_v40, 0.0  ;;  %v11882_v42 = vmax.f32 %v14045_v41, 0.0 }
 0x6fa   :  { %v11883_v55 = vpack.c.bf16 %v11879_v46, %v11879_v46  ;;  %v11885_v56 = vpack.c.bf16 %v11881_v29, %v11881_v29 }
 0x6fb   :  { %v11884_v53 = vpack.c.bf16 %v11880_v51, %v11880_v51  ;;  %v11886_v38 = vpack.c.bf16 %v11882_v42, %v11882_v42 }
 0x6fd   :  { %12182 = vmatprep.mubr.bf16.mxu0 %v11884_v53  ;;  %12222 = vmatprep.mubr.bf16.mxu1 %v11886_v38 }
 0x6fe   :  { %12183 = vmatmul.mubr.bf16.vlgmr.msra.gmra.mrb[4].mxu0 %v11883_v55  ;;  %12223 = vmatmul.mubr.bf16.vlgmr.msra.gmra.mrb[4].mxu1 %v11885_v56 }
 0x6ff   :  { %14023 = vmatpush3.bf16.msra.mxu0 %v16633_v34  ;;  %14038 = vmatprep.mubr.msk.bf16.mxu0 %vm16674_vm0, %v16673_v16 }
 0x700   :  { %14024 = vmatprep.subr.bf16.mxu0 %v16673_v16 }
 0x703   :  { %14025 = vmatpush3.bf16.msra.mxu0 %v16634_v45 }
 0x704   :  { %14026 = vmatprep.subr.bf16.mxu0 %v16673_v16 }
 0x707   :  { %14027 = vmatpush3.bf16.msra.mxu0 %v16635_v58 }
 0x708   :  { %14028 = vmatprep.subr.bf16.mxu0 %v16673_v16 }
 0x70b   :  { %14029 = vmatpush3.bf16.msra.mxu0 %v16636_v61 }
 0x70c   :  { %14030 = vmatprep.subr.bf16.mxu0 %v16673_v16 }
 0x70f   :  { %14031 = vmatpush3.bf16.msra.mxu0 %v16637_v35 }
 0x710   :  { %14032 = vmatprep.subr.bf16.mxu0 %v16673_v16 }
 0x713   :  { %14033 = vmatpush3.bf16.msra.mxu0 %v16638_v62 }
 0x714   :  { %14034 = vmatprep.subr.bf16.mxu0 %v16673_v16 }
 0x717   :  { %14035 = vmatpush3.bf16.msra.mxu0 %v16639_v44 }
 0x718   :  { %14036 = vmatprep.subr.bf16.mxu0 %v16673_v16 }
 0x71b   :  { %14037 = vmatpush3.bf16.msra.mxu0 %v16640_v49 }
 0x7d1   :  { %v13985_v0 = vpop.f32.mrb[4].mxu0  ;;  %v14007_v47 = vpop.f32.mrb[4].mxu1 }
 0x7d2   :  { %v13986_v2 = vpop.f32.mrb[5].mxu0  ;;  %v14008_v59 = vpop.f32.mrb[5].mxu1 }
 0x7d3   :  { %v13987_v57 = vadd.f32 %v13986_v2, %v13985_v0  ;;  %v14009_v5 = vadd.f32 %v14008_v59, %v14007_v47  ;;  %v13988_v60 = vpop.f32.mrb[6].mxu0  ;;  %v14010_v54 = vpop.f32.mrb[6].mxu1 }
 0x7d4   :  { %v13989_v10 = vpop.f32.mrb[7].mxu0  ;;  %v14011_v48 = vpop.f32.mrb[7].mxu1 }
 0x7d5   :  { %v12185_v11 = vadd.f32 %v13987_v57, %v13927_v1 }
 0x7d7   :  { %v12225_v63 = vadd.f32 %v14009_v5, %v12185_v11 }
 0x7d9   :  { %v12230_v12 = vmax.f32 %v12225_v63, 0.0 }
 0x7db   :  { %v12231_v3 = vpack.c.bf16 %v12230_v12, %v12230_v12 }
 0x7dd   :  { %14039 = vmatmul.mubr.bf16.vlgmr.msra.gmra.mrb[8].mxu0 %v12231_v3 }
 0x8b0   :  { %v12337_v15 = vpop.f32.mrb[8].mxu0 }
 0x8b1   :  { %v12338_v7 = vadd.f32 %v13960_v52, %v12337_v15  ;;  %v14040_v6 = vpop.f32.mrb[9].mxu0 }
 0x8b2   :  { %v12340_v8 = vpop.f32.mrb[10].mxu0 }
 0x8b3   :  { %12343 = vst [vmem:[#allocation2] sm:$0x3] %v12338_v7  ;;  %v14041_v20 = vpop.f32.mrb[11].mxu0 }
 0x8b4   :  { %16658 = shalt.err (!%p16655_p4)
}
 0x8b5   :  { %s16659_s6 = scalar_lea.hbm %s21849_s7, 32 }
 0x8b6   :  { %p16660_p5 = scmp.ne.s32.totalorder %s21849_s7, %s16659_s6  ;;  %p16663_p6 = scmp.lt.u32.totalorder %s16659_s6, %s21849_s7 }
 0x8b8   :  { %p16665_p7 = pnand %p16663_p6, %p16660_p5 }
 0x8ba   :  { %16668 = shalt.err (!%p16665_p7)
}
 0x8bb   :  { %12353 = dma.vmem_to_hbm [thread:$0]  %s12351_s13, 32, %s21849_s7, [#allocation3]  }
 0x8bc   :  { %16669 = dma.done.wait [#allocation3], 32  }
 0x8bd   :  { %16670 = vsyncadd [#allocation3], 4294967264 }
 0x8be   :  { %12357 = vsyncpa [#allocation3], 1 }

</bundles_post_ra>
